<compile_context>
chip_gen: v5e
topology: v5e:2x2
jax: 0.10.0
libtpu: 0.0.40
codegen_flags: <defaults>
</compile_context>

<pallas_src>
import math
import functools

import jax
import jax.numpy as jnp
from jax import lax
from jax.experimental import pallas as pl
from jax.experimental.pallas import tpu as pltpu


# ---------------------------------------------------------------------------
# Kernel 1: conv1(1x1)+BN+ReLU -> multi-head self-attention -> residual -> FFN
# ---------------------------------------------------------------------------

def _transformer_block_kernel(low_ref, w1_ref, b1_ref,
                              wq_ref, wk_ref, wv_ref, bq_ref, bk_ref, bv_ref,
                              wo_ref, bo_ref,
                              wf1_ref, bf1_ref, wf2_ref, bf2_ref,
                              o_ref, *, num_heads):
    """Whole low-level branch for one batch element (grid over batch)."""
    x = low_ref[0]                                                    # (S, Cl) bf16

    # conv1 (1x1, BN scale folded into w1) + shift + ReLU
    llf = jnp.dot(x, w1_ref[...], preferred_element_type=jnp.float32) + b1_ref[...]
    llf = jnp.maximum(llf, 0.0)                                       # (S, 48) f32
    llf_b = llf.astype(jnp.bfloat16)

    # Multi-head self-attention.  Per-head weights stay stacked on a leading dim
    # (static unrolled loop) so no unaligned lane slicing is required in-kernel.
    # 1/sqrt(head_dim) is pre-folded into wq / bq on the host.
    # TODO(synk): at realistic S (thousands) convert to a KV-tiled flash-style loop.
    attn = jnp.zeros_like(llf)                                        # (S, 48) f32
    for h in range(num_heads):
        q = jnp.dot(llf_b, wq_ref[h], preferred_element_type=jnp.float32) + bq_ref[h]
        k = jnp.dot(llf_b, wk_ref[h], preferred_element_type=jnp.float32) + bk_ref[h]
        v = jnp.dot(llf_b, wv_ref[h], preferred_element_type=jnp.float32) + bv_ref[h]
        # scores: (S, hd) @ (S, hd)^T  (nt-form dot_general, bf16 operands)
        s = lax.dot_general(q.astype(jnp.bfloat16), k.astype(jnp.bfloat16),
                            (((1,), (1,)), ((), ())),
                            preferred_element_type=jnp.float32)        # (S, S)
        s = s - jnp.max(s, axis=-1, keepdims=True)
        p = jnp.exp(s)
        p = p * pl.reciprocal(jnp.sum(p, axis=-1, keepdims=True), approx=True)
        oh = jnp.dot(p.astype(jnp.bfloat16), v.astype(jnp.bfloat16),
                     preferred_element_type=jnp.float32)               # (S, hd)
        attn = attn + jnp.dot(oh.astype(jnp.bfloat16), wo_ref[h],
                              preferred_element_type=jnp.float32)
    attn = attn + bo_ref[...] + llf                                    # out-proj bias + residual

    # FFN: Linear(48,192) + ReLU, Linear(192,48)
    h1 = jnp.dot(attn.astype(jnp.bfloat16), wf1_ref[...],
                 preferred_element_type=jnp.float32) + bf1_ref[...]
    h1 = jnp.maximum(h1, 0.0)
    out = jnp.dot(h1.astype(jnp.bfloat16), wf2_ref[...],
                  preferred_element_type=jnp.float32) + bf2_ref[...]
    o_ref[0] = out.astype(o_ref.dtype)


def transformer_block(low_bse, w1, b1, wq, wk, wv, bq, bk, bv, wo, bo,
                      wf1, bf1, wf2, bf2, num_heads):
    B, S, Cl = low_bse.shape
    E = w1.shape[1]
    full = lambda a: pl.BlockSpec(a.shape, lambda b: (0,) * a.ndim)
    kernel = functools.partial(_transformer_block_kernel, num_heads=num_heads)
    weights = (w1, b1, wq, wk, wv, bq, bk, bv, wo, bo, wf1, bf1, wf2, bf2)
    return pl.pallas_call(
        kernel,
        out_shape=jax.ShapeDtypeStruct((B, S, E), jnp.bfloat16),
        grid=(B,),
        in_specs=[pl.BlockSpec((1, S, Cl), lambda b: (b, 0, 0))]
                 + [full(a) for a in weights],
        out_specs=pl.BlockSpec((1, S, E), lambda b: (b, 0, 0)),
        compiler_params=pltpu.CompilerParams(dimension_semantics=("parallel",)),
    )(low_bse, *weights)


# ---------------------------------------------------------------------------
# Kernel 2: fused last_conv stack
#   concat + conv3x3(304->64)+BN+ReLU -> conv3x3(64->64)+BN+ReLU -> conv1x1(->nc)
# ---------------------------------------------------------------------------
# Input layout per batch: zero-padded NHWC image, H padded by (1, 2) and W by
# (1, 1), flattened to ((H+3)*(W+2), C).  For tap (dy, dx) the contribution to
# extended-output row m = r*(W+2) + c is input row m + dy*(W+2) + dx.  Output
# columns c in [W, W+2) are garbage; they are zeroed via `mask` before feeding
# the second conv and cropped from the final result in XLA.
#
# The intermediate 64-ch activation is staged in a VMEM scratch with layout
#   [base zero rows][H*(W+2) content rows (garbage cols zeroed)][zero tail]
# where base = base2 + (W+2) + 1 and base2 = (-(W+3)) % 16 so the content store
# is 16-sublane aligned.  With that layout the second conv reads at offsets
# base2 + dy*(W+2) + dx, identical in form to the first conv.

def _last_conv_kernel(x_ref, f_ref, mask_ref, wx_ref, wf_ref, sh1_ref,
                      w2_ref, sh2_ref, w3_ref, b3_ref,
                      o_ref, scr_ref, *, H, W, C1, base2):
    WP = W + 2
    rows = H * WP
    base = base2 + WP + 1                       # 16-aligned content start

    # ---- conv3x3 over concat(x_up, ffn): 9 shifted matmuls each -------------
    acc = jnp.zeros((rows, C1), jnp.float32)
    for dy in range(3):
        for dx in range(3):
            t = dy * 3 + dx
            off = dy * WP + dx
            acc = acc + jnp.dot(x_ref[0, pl.ds(off, rows), :], wx_ref[t],
                                preferred_element_type=jnp.float32)
            acc = acc + jnp.dot(f_ref[0, pl.ds(off, rows), :], wf_ref[t],
                                preferred_element_type=jnp.float32)
    # BN shift + ReLU; zero the 2 garbage columns so they act as zero padding
    # for the next 3x3 conv.
    y1 = jnp.maximum(acc + sh1_ref[...], 0.0) * mask_ref[...]          # (rows, 64)

    # ---- stage the padded activation in VMEM (never leaves the chip) --------
    scr_ref[pl.ds(0, base), :] = jnp.zeros((base, C1), scr_ref.dtype)
    scr_ref[pl.ds(base, rows), :] = y1.astype(scr_ref.dtype)
    tail = scr_ref.shape[0] - base - rows
    scr_ref[pl.ds(base + rows, tail), :] = jnp.zeros((tail, C1), scr_ref.dtype)

    # ---- conv3x3(64->64) + BN + ReLU on the staged slab ----------------------
    acc2 = jnp.zeros((rows, C1), jnp.float32)
    for dy in range(3):
        for dx in range(3):
            t = dy * 3 + dx
            off = base2 + dy * WP + dx
            acc2 = acc2 + jnp.dot(scr_ref[pl.ds(off, rows), :], w2_ref[t],
                                  preferred_element_type=jnp.float32)
    y2 = jnp.maximum(acc2 + sh2_ref[...], 0.0)

    # ---- final 1x1 classifier (fused epilogue) --------------------------------
    out = jnp.dot(y2.astype(jnp.bfloat16), w3_ref[...],
                  preferred_element_type=jnp.float32) + b3_ref[...]
    o_ref[0] = out.astype(o_ref.dtype)


def last_conv(xp_flat, fp_flat, mask, wx, wf, sh1, w2, sh2, w3, b3, H, W):
    """xp_flat: (B,(H+3)(W+2),Cx) bf16, fp_flat: (B,(H+3)(W+2),Cf) bf16
    -> (B, H*(W+2), num_classes) f32 (extended columns cropped by caller)."""
    B, rows_pad, Cx = xp_flat.shape
    Cf = fp_flat.shape[-1]
    C1 = wx.shape[-1]
    nc = w3.shape[-1]
    WP = W + 2
    rows = H * WP
    base2 = (-(WP + 1)) % 16
    # content end + (WP + 1) slack so every static read stays in bounds, 16-aligned
    scr_rows = -(-(base2 + (H + 2) * WP + 2) // 16) * 16
    full = lambda a: pl.BlockSpec(a.shape, lambda b: (0,) * a.ndim)
    kernel = functools.partial(_last_conv_kernel, H=H, W=W, C1=C1, base2=base2)
    # TODO(synk): at realistic H,W (hundreds) tile spatially instead of whole-image blocks.
    return pl.pallas_call(
        kernel,
        out_shape=jax.ShapeDtypeStruct((B, rows, nc), jnp.float32),
        grid=(B,),
        in_specs=[pl.BlockSpec((1, rows_pad, Cx), lambda b: (b, 0, 0)),
                  pl.BlockSpec((1, rows_pad, Cf), lambda b: (b, 0, 0)),
                  full(mask), full(wx), full(wf), full(sh1),
                  full(w2), full(sh2), full(w3), full(b3)],
        out_specs=pl.BlockSpec((1, rows, nc), lambda b: (b, 0, 0)),
        scratch_shapes=[pltpu.VMEM((scr_rows, C1), jnp.bfloat16)],
        compiler_params=pltpu.CompilerParams(dimension_semantics=("parallel",)),
    )(xp_flat, fp_flat, mask, wx, wf, sh1, w2, sh2, w3, b3)


# ---------------------------------------------------------------------------
# Plain-JAX glue (layout transforms / interpolation only)
# ---------------------------------------------------------------------------

def bilinear_align_corners(x_nhwc, out_hw):
    """F.interpolate(mode='bilinear', align_corners=True) on NHWC."""
    B, H, W, C = x_nhwc.shape
    Ho, Wo = out_hw
    ys = jnp.linspace(0.0, H - 1.0, Ho) if Ho > 1 else jnp.zeros((Ho,), jnp.float32)
    xs = jnp.linspace(0.0, W - 1.0, Wo) if Wo > 1 else jnp.zeros((Wo,), jnp.float32)
    y0 = jnp.clip(jnp.floor(ys).astype(jnp.int32), 0, H - 1)
    y1 = jnp.clip(y0 + 1, 0, H - 1)
    x0 = jnp.clip(jnp.floor(xs).astype(jnp.int32), 0, W - 1)
    x1 = jnp.clip(x0 + 1, 0, W - 1)
    wy = (ys - y0.astype(jnp.float32))[None, :, None, None]
    wx = (xs - x0.astype(jnp.float32))[None, None, :, None]
    gather = lambda yi, xi: x_nhwc[:, yi][:, :, xi]                   # (B, Ho, Wo, C)
    top = gather(y0, x0) * (1.0 - wx) + gather(y0, x1) * wx
    bot = gather(y1, x0) * (1.0 - wx) + gather(y1, x1) * wx
    return top * (1.0 - wy) + bot * wy


def pad_flatten(x_nhwc):
    """Zero-pad H by (1,2), W by (1,1) and flatten spatial: (B,H,W,C)->(B,(H+3)(W+2),C)."""
    B, H, W, C = x_nhwc.shape
    xp = jnp.pad(x_nhwc, ((0, 0), (1, 2), (1, 1), (0, 0)))
    return xp.reshape(B, (H + 3) * (W + 2), C)


def crop_ext(y_ext, H, W):
    """(B, H*(W+2), C) extended conv output -> (B, H, W, C) valid region."""
    B, _, C = y_ext.shape
    return y_ext.reshape(B, H, W + 2, C)[:, :, :W, :]


def conv3x3_taps(w_oihw, scale=None):
    """torch (Co, Ci, 3, 3) -> (9, Ci, Co), tap index t = ky*3+kx, BN scale folded."""
    Co, Ci, _, _ = w_oihw.shape
    w = jnp.transpose(w_oihw, (2, 3, 1, 0)).reshape(9, Ci, Co)
    if scale is not None:
        w = w * scale[None, None, :]
    return w


def bn_fold(gamma, beta, mean, var, eps=1e-5):
    scale = gamma / jnp.sqrt(var + eps)
    shift = beta - mean * scale
    return scale, shift


# ---------------------------------------------------------------------------
# FeedFormerDecoder forward
# ---------------------------------------------------------------------------

def feedformer_decoder_forward(x_nchw, low_nchw, p):
    B, _, H, W = low_nchw.shape
    E, num_heads = 48, 4
    hd = E // num_heads
    S = H * W
    bf16 = jnp.bfloat16

    low = jnp.transpose(low_nchw, (0, 2, 3, 1)).astype(jnp.float32)       # (B,H,W,Cl)
    Cl = low.shape[-1]

    # ---- fused conv1(1x1)+BN+ReLU -> MHA -> residual -> FFN (one kernel) -----
    sc1, sh1 = bn_fold(p["bn1_gamma"], p["bn1_beta"], p["bn1_mean"], p["bn1_var"])
    w1 = (p["conv1_w"].reshape(E, Cl).T * sc1[None, :]).astype(bf16)      # (Cl, 48)
    b1 = sh1.reshape(1, E)

    def split_heads(w_oe):                      # torch (E_out, E_in) -> (heads, E_in, hd)
        return w_oe.T.reshape(E, num_heads, hd).transpose(1, 0, 2)

    inv_sqrt_d = 1.0 / math.sqrt(hd)
    wq = (split_heads(p["attn_in_w"][:E]) * inv_sqrt_d).astype(bf16)      # scale folded
    wk = split_heads(p["attn_in_w"][E:2 * E]).astype(bf16)
    wv = split_heads(p["attn_in_w"][2 * E:]).astype(bf16)
    bq = (p["attn_in_b"][:E] * inv_sqrt_d).reshape(num_heads, 1, hd)
    bk = p["attn_in_b"][E:2 * E].reshape(num_heads, 1, hd)
    bv = p["attn_in_b"][2 * E:].reshape(num_heads, 1, hd)
    wo = p["attn_out_w"].T.reshape(num_heads, hd, E).astype(bf16)
    bo = p["attn_out_b"].reshape(1, E)
    wf1 = p["ffn_w1"].T.astype(bf16)                                      # (48, 192)
    bf1 = p["ffn_b1"].reshape(1, -1)
    wf2 = p["ffn_w2"].T.astype(bf16)                                      # (192, 48)
    bf2 = p["ffn_b2"].reshape(1, E)

    low_bse = low.reshape(B, S, Cl).astype(bf16)
    ffn = transformer_block(low_bse, w1, b1, wq, wk, wv, bq, bk, bv, wo, bo,
                            wf1, bf1, wf2, bf2, num_heads)                # (B,S,48) bf16
    ffn = ffn.reshape(B, H, W, E)

    # ---- upsample high-level features (align_corners bilinear, XLA glue) -----
    x_nhwc = jnp.transpose(x_nchw, (0, 2, 3, 1)).astype(jnp.float32)
    x_up = bilinear_align_corners(x_nhwc, (H, W)).astype(bf16)            # (B,H,W,256)
    Cx = x_up.shape[-1]

    # ---- last_conv (single fused kernel) -------------------------------------
    scc1, shc1 = bn_fold(p["bnc1_gamma"], p["bnc1_beta"], p["bnc1_mean"], p["bnc1_var"])
    wx = conv3x3_taps(p["convc1_w"][:, :Cx], scc1).astype(bf16)           # (9,256,64)
    wfn = conv3x3_taps(p["convc1_w"][:, Cx:], scc1).astype(bf16)          # (9, 48,64)
    scc2, shc2 = bn_fold(p["bnc2_gamma"], p["bnc2_beta"], p["bnc2_mean"], p["bnc2_var"])
    w2 = conv3x3_taps(p["convc2_w"], scc2).astype(bf16)                   # (9,64,64)
    nc = p["convc3_w"].shape[0]
    w3 = p["convc3_w"].reshape(nc, 64).T.astype(bf16)                     # (64,nc)
    b3 = p["convc3_b"].reshape(1, nc)

    # (rows, 1) validity mask for the 2 garbage columns of the extended layout.
    WP = W + 2
    col_valid = (jnp.arange(WP) < W).astype(jnp.float32)
    mask = jnp.tile(col_valid, H).reshape(H * WP, 1)

    out = last_conv(pad_flatten(x_up), pad_flatten(ffn), mask,
                    wx, wfn, shc1.reshape(1, -1),
                    w2, shc2.reshape(1, -1), w3, b3, H, W)                # (B,H*(W+2),nc)
    out = crop_ext(out, H, W)                                             # (B,H,W,nc)
    return jnp.transpose(out, (0, 3, 1, 2))                               # NCHW


# ---------------------------------------------------------------------------
# Deterministic parameter init (synthetic; shapes follow the module's __init__)
# ---------------------------------------------------------------------------

def make_params(key, low_level_inplanes=24, num_classes=6):
    keys = jax.random.split(key, 12)
    n = lambda k, shape, std: (jax.random.normal(k, shape, jnp.float32) * std)
    E = 48
    params = {
        # conv1: 1x1, low_level_inplanes -> 48, no bias
        "conv1_w": n(keys[0], (E, low_level_inplanes, 1, 1), math.sqrt(2.0 / low_level_inplanes)),
        "bn1_gamma": jnp.ones((E,), jnp.float32), "bn1_beta": jnp.zeros((E,), jnp.float32),
        "bn1_mean": jnp.zeros((E,), jnp.float32), "bn1_var": jnp.ones((E,), jnp.float32),
        # MultiheadAttention(embed=48, heads=4)
        "attn_in_w": n(keys[1], (3 * E, E), 0.08),
        "attn_in_b": n(keys[2], (3 * E,), 0.02),
        "attn_out_w": n(keys[3], (E, E), 0.08),
        "attn_out_b": n(keys[4], (E,), 0.02),
        # FFN Linear(48,192), Linear(192,48)
        "ffn_w1": n(keys[5], (192, E), 0.08), "ffn_b1": n(keys[6], (192,), 0.02),
        "ffn_w2": n(keys[7], (E, 192), 0.05), "ffn_b2": n(keys[8], (E,), 0.02),
        # last_conv
        "convc1_w": n(keys[9], (64, 304, 3, 3), math.sqrt(2.0 / (304 * 9))),
        "bnc1_gamma": jnp.ones((64,), jnp.float32), "bnc1_beta": jnp.zeros((64,), jnp.float32),
        "bnc1_mean": jnp.zeros((64,), jnp.float32), "bnc1_var": jnp.ones((64,), jnp.float32),
        "convc2_w": n(keys[10], (64, 64, 3, 3), math.sqrt(2.0 / (64 * 9))),
        "bnc2_gamma": jnp.ones((64,), jnp.float32), "bnc2_beta": jnp.zeros((64,), jnp.float32),
        "bnc2_mean": jnp.zeros((64,), jnp.float32), "bnc2_var": jnp.ones((64,), jnp.float32),
        "convc3_w": n(keys[11], (num_classes, 64, 1, 1), math.sqrt(2.0 / 64)),
        "convc3_b": jnp.zeros((num_classes,), jnp.float32),
    }
    return params


if __name__ == "__main__":
    key = jax.random.PRNGKey(0)
    k_x, k_low, k_p = jax.random.split(key, 3)

    B, num_classes = 2, 6
    H, W = 8, 8                       # low-level spatial size (seq = 64)
    # backbone='mobilenet' -> low_level_inplanes = 24; x has 304 - 48 = 256 channels
    x = jax.random.normal(k_x, (B, 256, 4, 4), jnp.float32)
    low_level_feat = jax.random.normal(k_low, (B, 24, H, W), jnp.float32)

    params = make_params(k_p, low_level_inplanes=24, num_classes=num_classes)

    fwd = jax.jit(feedformer_decoder_forward)
    out = fwd(x, low_level_feat, params)
    out = jax.block_until_ready(out)
    assert out.shape == (B, num_classes, H, W)
    assert bool(jnp.all(jnp.isfinite(out)))
    print("KERNEL_OK")
</pallas_src>

<mosaic_0001>
module attributes {stable_mosaic.version = 11 : i64} {
  func.func @_transformer_block_kernel(%arg0: i32, %arg1: memref<1x64x24xbf16, #tpu.memory_space<vmem>>, %arg2: memref<24x48xbf16, #tpu.memory_space<vmem>>, %arg3: memref<1x48xf32, #tpu.memory_space<vmem>>, %arg4: memref<4x48x12xbf16, #tpu.memory_space<vmem>>, %arg5: memref<4x48x12xbf16, #tpu.memory_space<vmem>>, %arg6: memref<4x48x12xbf16, #tpu.memory_space<vmem>>, %arg7: memref<4x1x12xf32, #tpu.memory_space<vmem>>, %arg8: memref<4x1x12xf32, #tpu.memory_space<vmem>>, %arg9: memref<4x1x12xf32, #tpu.memory_space<vmem>>, %arg10: memref<4x12x48xbf16, #tpu.memory_space<vmem>>, %arg11: memref<1x48xf32, #tpu.memory_space<vmem>>, %arg12: memref<48x192xbf16, #tpu.memory_space<vmem>>, %arg13: memref<1x192xf32, #tpu.memory_space<vmem>>, %arg14: memref<192x48xbf16, #tpu.memory_space<vmem>>, %arg15: memref<1x48xf32, #tpu.memory_space<vmem>>, %arg16: memref<1x64x48xbf16, #tpu.memory_space<vmem>>) attributes {dimension_semantics = [#tpu.dimension_semantics<parallel>], iteration_bounds = array<i64: 2>, scalar_prefetch = 0 : i64, scratch_operands = 0 : i64, tpu.core_type = #tpu.core_type<tc>, window_params = [{transform_indices = @transform_0, window_bounds = array<i64: 1, 64, 24>}, {pipeline_mode = #tpu.pipeline_mode<synchronous>, transform_indices = @transform_1, window_bounds = array<i64: 24, 48>}, {pipeline_mode = #tpu.pipeline_mode<synchronous>, transform_indices = @transform_2, window_bounds = array<i64: 1, 48>}, {pipeline_mode = #tpu.pipeline_mode<synchronous>, transform_indices = @transform_3, window_bounds = array<i64: 4, 48, 12>}, {pipeline_mode = #tpu.pipeline_mode<synchronous>, transform_indices = @transform_4, window_bounds = array<i64: 4, 48, 12>}, {pipeline_mode = #tpu.pipeline_mode<synchronous>, transform_indices = @transform_5, window_bounds = array<i64: 4, 48, 12>}, {pipeline_mode = #tpu.pipeline_mode<synchronous>, transform_indices = @transform_6, window_bounds = array<i64: 4, 1, 12>}, {pipeline_mode = #tpu.pipeline_mode<synchronous>, transform_indices = @transform_7, window_bounds = array<i64: 4, 1, 12>}, {pipeline_mode = #tpu.pipeline_mode<synchronous>, transform_indices = @transform_8, window_bounds = array<i64: 4, 1, 12>}, {pipeline_mode = #tpu.pipeline_mode<synchronous>, transform_indices = @transform_9, window_bounds = array<i64: 4, 12, 48>}, {pipeline_mode = #tpu.pipeline_mode<synchronous>, transform_indices = @transform_10, window_bounds = array<i64: 1, 48>}, {pipeline_mode = #tpu.pipeline_mode<synchronous>, transform_indices = @transform_11, window_bounds = array<i64: 48, 192>}, {pipeline_mode = #tpu.pipeline_mode<synchronous>, transform_indices = @transform_12, window_bounds = array<i64: 1, 192>}, {pipeline_mode = #tpu.pipeline_mode<synchronous>, transform_indices = @transform_13, window_bounds = array<i64: 192, 48>}, {pipeline_mode = #tpu.pipeline_mode<synchronous>, transform_indices = @transform_14, window_bounds = array<i64: 1, 48>}, {transform_indices = @transform_15, window_bounds = array<i64: 1, 64, 48>}]} {
    %c0 = arith.constant 0 : index
    %c0_0 = arith.constant 0 : index
    %c0_1 = arith.constant 0 : index
    %0 = vector.load %arg1[%c0, %c0_0, %c0_1] : memref<1x64x24xbf16, #tpu.memory_space<vmem>>, vector<1x64x24xbf16>
    %1 = vector.shape_cast %0 : vector<1x64x24xbf16> to vector<64x24xbf16>
    %c0_2 = arith.constant 0 : index
    %c0_3 = arith.constant 0 : index
    %2 = vector.load %arg2[%c0_2, %c0_3] : memref<24x48xbf16, #tpu.memory_space<vmem>>, vector<24x48xbf16>
    %cst = arith.constant dense<0.000000e+00> : vector<64x48xf32>
    %3 = tpu.matmul %1, %2, %cst {dimension_numbers = #tpu.dot_dimension_numbers<[1], [0], [0], [1], [0, 0, 1, 1], [], []>} : vector<64x24xbf16>, vector<24x48xbf16>, vector<64x48xf32> -> vector<64x48xf32>
    %c0_4 = arith.constant 0 : index
    %c0_5 = arith.constant 0 : index
    %4 = vector.load %arg3[%c0_4, %c0_5] : memref<1x48xf32, #tpu.memory_space<vmem>>, vector<1x48xf32>
    %5 = vector.broadcast %4 : vector<1x48xf32> to vector<64x48xf32>
    %6 = arith.addf %3, %5 : vector<64x48xf32>
    %cst_6 = arith.constant 0.000000e+00 : f32
    %7 = vector.broadcast %cst_6 : f32 to vector<64x48xf32>
    %8 = arith.maximumf %6, %7 : vector<64x48xf32>
    %9 = arith.truncf %8 : vector<64x48xf32> to vector<64x48xbf16>
    %cst_7 = arith.constant 0.000000e+00 : f32
    %10 = vector.broadcast %cst_7 : f32 to vector<64x48xf32>
    %c0_8 = arith.constant 0 : index
    %c0_9 = arith.constant 0 : index
    %c0_10 = arith.constant 0 : index
    %11 = vector.load %arg4[%c0_8, %c0_9, %c0_10] : memref<4x48x12xbf16, #tpu.memory_space<vmem>>, vector<1x48x12xbf16>
    %12 = vector.shape_cast %11 : vector<1x48x12xbf16> to vector<48x12xbf16>
    %cst_11 = arith.constant dense<0.000000e+00> : vector<64x12xf32>
    %13 = tpu.matmul %9, %12, %cst_11 {dimension_numbers = #tpu.dot_dimension_numbers<[1], [0], [0], [1], [0, 0, 1, 1], [], []>} : vector<64x48xbf16>, vector<48x12xbf16>, vector<64x12xf32> -> vector<64x12xf32>
    %c0_12 = arith.constant 0 : index
    %c0_13 = arith.constant 0 : index
    %c0_14 = arith.constant 0 : index
    %14 = vector.load %arg7[%c0_12, %c0_13, %c0_14] : memref<4x1x12xf32, #tpu.memory_space<vmem>>, vector<1x1x12xf32>
    %15 = vector.shape_cast %14 : vector<1x1x12xf32> to vector<1x12xf32>
    %16 = vector.broadcast %15 : vector<1x12xf32> to vector<64x12xf32>
    %17 = arith.addf %13, %16 : vector<64x12xf32>
    %c0_15 = arith.constant 0 : index
    %c0_16 = arith.constant 0 : index
    %c0_17 = arith.constant 0 : index
    %18 = vector.load %arg5[%c0_15, %c0_16, %c0_17] : memref<4x48x12xbf16, #tpu.memory_space<vmem>>, vector<1x48x12xbf16>
    %19 = vector.shape_cast %18 : vector<1x48x12xbf16> to vector<48x12xbf16>
    %cst_18 = arith.constant dense<0.000000e+00> : vector<64x12xf32>
    %20 = tpu.matmul %9, %19, %cst_18 {dimension_numbers = #tpu.dot_dimension_numbers<[1], [0], [0], [1], [0, 0, 1, 1], [], []>} : vector<64x48xbf16>, vector<48x12xbf16>, vector<64x12xf32> -> vector<64x12xf32>
    %c0_19 = arith.constant 0 : index
    %c0_20 = arith.constant 0 : index
    %c0_21 = arith.constant 0 : index
    %21 = vector.load %arg8[%c0_19, %c0_20, %c0_21] : memref<4x1x12xf32, #tpu.memory_space<vmem>>, vector<1x1x12xf32>
    %22 = vector.shape_cast %21 : vector<1x1x12xf32> to vector<1x12xf32>
    %23 = vector.broadcast %22 : vector<1x12xf32> to vector<64x12xf32>
    %24 = arith.addf %20, %23 : vector<64x12xf32>
    %c0_22 = arith.constant 0 : index
    %c0_23 = arith.constant 0 : index
    %c0_24 = arith.constant 0 : index
    %25 = vector.load %arg6[%c0_22, %c0_23, %c0_24] : memref<4x48x12xbf16, #tpu.memory_space<vmem>>, vector<1x48x12xbf16>
    %26 = vector.shape_cast %25 : vector<1x48x12xbf16> to vector<48x12xbf16>
    %cst_25 = arith.constant dense<0.000000e+00> : vector<64x12xf32>
    %27 = tpu.matmul %9, %26, %cst_25 {dimension_numbers = #tpu.dot_dimension_numbers<[1], [0], [0], [1], [0, 0, 1, 1], [], []>} : vector<64x48xbf16>, vector<48x12xbf16>, vector<64x12xf32> -> vector<64x12xf32>
    %c0_26 = arith.constant 0 : index
    %c0_27 = arith.constant 0 : index
    %c0_28 = arith.constant 0 : index
    %28 = vector.load %arg9[%c0_26, %c0_27, %c0_28] : memref<4x1x12xf32, #tpu.memory_space<vmem>>, vector<1x1x12xf32>
    %29 = vector.shape_cast %28 : vector<1x1x12xf32> to vector<1x12xf32>
    %30 = vector.broadcast %29 : vector<1x12xf32> to vector<64x12xf32>
    %31 = arith.addf %27, %30 : vector<64x12xf32>
    %32 = arith.truncf %17 : vector<64x12xf32> to vector<64x12xbf16>
    %33 = arith.truncf %24 : vector<64x12xf32> to vector<64x12xbf16>
    %cst_29 = arith.constant dense<0.000000e+00> : vector<64x64xf32>
    %34 = tpu.matmul %32, %33, %cst_29 {dimension_numbers = #tpu.dot_dimension_numbers<[1], [1], [0], [0], [0, 0, 1, 0], [], []>} : vector<64x12xbf16>, vector<64x12xbf16>, vector<64x64xf32> -> vector<64x64xf32>
    %cst_30 = arith.constant dense<0xFF800000> : vector<64xf32>
    %35 = vector.multi_reduction <maximumf>, %34, %cst_30 [1] : vector<64x64xf32> to vector<64xf32>
    %36 = vector.shape_cast %35 : vector<64xf32> to vector<64x1xf32>
    %37 = vector.broadcast %36 : vector<64x1xf32> to vector<64x64xf32>
    %38 = arith.subf %34, %37 : vector<64x64xf32>
    %39 = math.exp %38 : vector<64x64xf32>
    %cst_31 = arith.constant dense<0.000000e+00> : vector<64xf32>
    %40 = vector.multi_reduction <add>, %39, %cst_31 [1] : vector<64x64xf32> to vector<64xf32>
    %41 = vector.shape_cast %40 : vector<64xf32> to vector<64x1xf32>
    %42 = tpu.reciprocal %41 {approx = true} : vector<64x1xf32> -> vector<64x1xf32>
    %43 = vector.broadcast %42 : vector<64x1xf32> to vector<64x64xf32>
    %44 = arith.mulf %39, %43 : vector<64x64xf32>
    %45 = arith.truncf %44 : vector<64x64xf32> to vector<64x64xbf16>
    %46 = arith.truncf %31 : vector<64x12xf32> to vector<64x12xbf16>
    %cst_32 = arith.constant dense<0.000000e+00> : vector<64x12xf32>
    %47 = tpu.matmul %45, %46, %cst_32 {dimension_numbers = #tpu.dot_dimension_numbers<[1], [0], [0], [1], [0, 0, 1, 1], [], []>} : vector<64x64xbf16>, vector<64x12xbf16>, vector<64x12xf32> -> vector<64x12xf32>
    %48 = arith.truncf %47 : vector<64x12xf32> to vector<64x12xbf16>
    %c0_33 = arith.constant 0 : index
    %c0_34 = arith.constant 0 : index
    %c0_35 = arith.constant 0 : index
    %49 = vector.load %arg10[%c0_33, %c0_34, %c0_35] : memref<4x12x48xbf16, #tpu.memory_space<vmem>>, vector<1x12x48xbf16>
    %50 = vector.shape_cast %49 : vector<1x12x48xbf16> to vector<12x48xbf16>
    %cst_36 = arith.constant dense<0.000000e+00> : vector<64x48xf32>
    %51 = tpu.matmul %48, %50, %cst_36 {dimension_numbers = #tpu.dot_dimension_numbers<[1], [0], [0], [1], [0, 0, 1, 1], [], []>} : vector<64x12xbf16>, vector<12x48xbf16>, vector<64x48xf32> -> vector<64x48xf32>
    %52 = arith.addf %10, %51 : vector<64x48xf32>
    %c1 = arith.constant 1 : index
    %c0_37 = arith.constant 0 : index
    %c0_38 = arith.constant 0 : index
    %53 = vector.load %arg4[%c1, %c0_37, %c0_38] : memref<4x48x12xbf16, #tpu.memory_space<vmem>>, vector<1x48x12xbf16>
    %54 = vector.shape_cast %53 : vector<1x48x12xbf16> to vector<48x12xbf16>
    %cst_39 = arith.constant dense<0.000000e+00> : vector<64x12xf32>
    %55 = tpu.matmul %9, %54, %cst_39 {dimension_numbers = #tpu.dot_dimension_numbers<[1], [0], [0], [1], [0, 0, 1, 1], [], []>} : vector<64x48xbf16>, vector<48x12xbf16>, vector<64x12xf32> -> vector<64x12xf32>
    %c1_40 = arith.constant 1 : index
    %c0_41 = arith.constant 0 : index
    %c0_42 = arith.constant 0 : index
    %56 = vector.load %arg7[%c1_40, %c0_41, %c0_42] : memref<4x1x12xf32, #tpu.memory_space<vmem>>, vector<1x1x12xf32>
    %57 = vector.shape_cast %56 : vector<1x1x12xf32> to vector<1x12xf32>
    %58 = vector.broadcast %57 : vector<1x12xf32> to vector<64x12xf32>
    %59 = arith.addf %55, %58 : vector<64x12xf32>
    %c1_43 = arith.constant 1 : index
    %c0_44 = arith.constant 0 : index
    %c0_45 = arith.constant 0 : index
    %60 = vector.load %arg5[%c1_43, %c0_44, %c0_45] : memref<4x48x12xbf16, #tpu.memory_space<vmem>>, vector<1x48x12xbf16>
    %61 = vector.shape_cast %60 : vector<1x48x12xbf16> to vector<48x12xbf16>
    %cst_46 = arith.constant dense<0.000000e+00> : vector<64x12xf32>
    %62 = tpu.matmul %9, %61, %cst_46 {dimension_numbers = #tpu.dot_dimension_numbers<[1], [0], [0], [1], [0, 0, 1, 1], [], []>} : vector<64x48xbf16>, vector<48x12xbf16>, vector<64x12xf32> -> vector<64x12xf32>
    %c1_47 = arith.constant 1 : index
    %c0_48 = arith.constant 0 : index
    %c0_49 = arith.constant 0 : index
    %63 = vector.load %arg8[%c1_47, %c0_48, %c0_49] : memref<4x1x12xf32, #tpu.memory_space<vmem>>, vector<1x1x12xf32>
    %64 = vector.shape_cast %63 : vector<1x1x12xf32> to vector<1x12xf32>
    %65 = vector.broadcast %64 : vector<1x12xf32> to vector<64x12xf32>
    %66 = arith.addf %62, %65 : vector<64x12xf32>
    %c1_50 = arith.constant 1 : index
    %c0_51 = arith.constant 0 : index
    %c0_52 = arith.constant 0 : index
    %67 = vector.load %arg6[%c1_50, %c0_51, %c0_52] : memref<4x48x12xbf16, #tpu.memory_space<vmem>>, vector<1x48x12xbf16>
    %68 = vector.shape_cast %67 : vector<1x48x12xbf16> to vector<48x12xbf16>
    %cst_53 = arith.constant dense<0.000000e+00> : vector<64x12xf32>
    %69 = tpu.matmul %9, %68, %cst_53 {dimension_numbers = #tpu.dot_dimension_numbers<[1], [0], [0], [1], [0, 0, 1, 1], [], []>} : vector<64x48xbf16>, vector<48x12xbf16>, vector<64x12xf32> -> vector<64x12xf32>
    %c1_54 = arith.constant 1 : index
    %c0_55 = arith.constant 0 : index
    %c0_56 = arith.constant 0 : index
    %70 = vector.load %arg9[%c1_54, %c0_55, %c0_56] : memref<4x1x12xf32, #tpu.memory_space<vmem>>, vector<1x1x12xf32>
    %71 = vector.shape_cast %70 : vector<1x1x12xf32> to vector<1x12xf32>
    %72 = vector.broadcast %71 : vector<1x12xf32> to vector<64x12xf32>
    %73 = arith.addf %69, %72 : vector<64x12xf32>
    %74 = arith.truncf %59 : vector<64x12xf32> to vector<64x12xbf16>
    %75 = arith.truncf %66 : vector<64x12xf32> to vector<64x12xbf16>
    %cst_57 = arith.constant dense<0.000000e+00> : vector<64x64xf32>
    %76 = tpu.matmul %74, %75, %cst_57 {dimension_numbers = #tpu.dot_dimension_numbers<[1], [1], [0], [0], [0, 0, 1, 0], [], []>} : vector<64x12xbf16>, vector<64x12xbf16>, vector<64x64xf32> -> vector<64x64xf32>
    %cst_58 = arith.constant dense<0xFF800000> : vector<64xf32>
    %77 = vector.multi_reduction <maximumf>, %76, %cst_58 [1] : vector<64x64xf32> to vector<64xf32>
    %78 = vector.shape_cast %77 : vector<64xf32> to vector<64x1xf32>
    %79 = vector.broadcast %78 : vector<64x1xf32> to vector<64x64xf32>
    %80 = arith.subf %76, %79 : vector<64x64xf32>
    %81 = math.exp %80 : vector<64x64xf32>
    %cst_59 = arith.constant dense<0.000000e+00> : vector<64xf32>
    %82 = vector.multi_reduction <add>, %81, %cst_59 [1] : vector<64x64xf32> to vector<64xf32>
    %83 = vector.shape_cast %82 : vector<64xf32> to vector<64x1xf32>
    %84 = tpu.reciprocal %83 {approx = true} : vector<64x1xf32> -> vector<64x1xf32>
    %85 = vector.broadcast %84 : vector<64x1xf32> to vector<64x64xf32>
    %86 = arith.mulf %81, %85 : vector<64x64xf32>
    %87 = arith.truncf %86 : vector<64x64xf32> to vector<64x64xbf16>
    %88 = arith.truncf %73 : vector<64x12xf32> to vector<64x12xbf16>
    %cst_60 = arith.constant dense<0.000000e+00> : vector<64x12xf32>
    %89 = tpu.matmul %87, %88, %cst_60 {dimension_numbers = #tpu.dot_dimension_numbers<[1], [0], [0], [1], [0, 0, 1, 1], [], []>} : vector<64x64xbf16>, vector<64x12xbf16>, vector<64x12xf32> -> vector<64x12xf32>
    %90 = arith.truncf %89 : vector<64x12xf32> to vector<64x12xbf16>
    %c1_61 = arith.constant 1 : index
    %c0_62 = arith.constant 0 : index
    %c0_63 = arith.constant 0 : index
    %91 = vector.load %arg10[%c1_61, %c0_62, %c0_63] : memref<4x12x48xbf16, #tpu.memory_space<vmem>>, vector<1x12x48xbf16>
    %92 = vector.shape_cast %91 : vector<1x12x48xbf16> to vector<12x48xbf16>
    %cst_64 = arith.constant dense<0.000000e+00> : vector<64x48xf32>
    %93 = tpu.matmul %90, %92, %cst_64 {dimension_numbers = #tpu.dot_dimension_numbers<[1], [0], [0], [1], [0, 0, 1, 1], [], []>} : vector<64x12xbf16>, vector<12x48xbf16>, vector<64x48xf32> -> vector<64x48xf32>
    %94 = arith.addf %52, %93 : vector<64x48xf32>
    %c2 = arith.constant 2 : index
    %c0_65 = arith.constant 0 : index
    %c0_66 = arith.constant 0 : index
    %95 = vector.load %arg4[%c2, %c0_65, %c0_66] : memref<4x48x12xbf16, #tpu.memory_space<vmem>>, vector<1x48x12xbf16>
    %96 = vector.shape_cast %95 : vector<1x48x12xbf16> to vector<48x12xbf16>
    %cst_67 = arith.constant dense<0.000000e+00> : vector<64x12xf32>
    %97 = tpu.matmul %9, %96, %cst_67 {dimension_numbers = #tpu.dot_dimension_numbers<[1], [0], [0], [1], [0, 0, 1, 1], [], []>} : vector<64x48xbf16>, vector<48x12xbf16>, vector<64x12xf32> -> vector<64x12xf32>
    %c2_68 = arith.constant 2 : index
    %c0_69 = arith.constant 0 : index
    %c0_70 = arith.constant 0 : index
    %98 = vector.load %arg7[%c2_68, %c0_69, %c0_70] : memref<4x1x12xf32, #tpu.memory_space<vmem>>, vector<1x1x12xf32>
    %99 = vector.shape_cast %98 : vector<1x1x12xf32> to vector<1x12xf32>
    %100 = vector.broadcast %99 : vector<1x12xf32> to vector<64x12xf32>
    %101 = arith.addf %97, %100 : vector<64x12xf32>
    %c2_71 = arith.constant 2 : index
    %c0_72 = arith.constant 0 : index
    %c0_73 = arith.constant 0 : index
    %102 = vector.load %arg5[%c2_71, %c0_72, %c0_73] : memref<4x48x12xbf16, #tpu.memory_space<vmem>>, vector<1x48x12xbf16>
    %103 = vector.shape_cast %102 : vector<1x48x12xbf16> to vector<48x12xbf16>
    %cst_74 = arith.constant dense<0.000000e+00> : vector<64x12xf32>
    %104 = tpu.matmul %9, %103, %cst_74 {dimension_numbers = #tpu.dot_dimension_numbers<[1], [0], [0], [1], [0, 0, 1, 1], [], []>} : vector<64x48xbf16>, vector<48x12xbf16>, vector<64x12xf32> -> vector<64x12xf32>
    %c2_75 = arith.constant 2 : index
    %c0_76 = arith.constant 0 : index
    %c0_77 = arith.constant 0 : index
    %105 = vector.load %arg8[%c2_75, %c0_76, %c0_77] : memref<4x1x12xf32, #tpu.memory_space<vmem>>, vector<1x1x12xf32>
    %106 = vector.shape_cast %105 : vector<1x1x12xf32> to vector<1x12xf32>
    %107 = vector.broadcast %106 : vector<1x12xf32> to vector<64x12xf32>
    %108 = arith.addf %104, %107 : vector<64x12xf32>
    %c2_78 = arith.constant 2 : index
    %c0_79 = arith.constant 0 : index
    %c0_80 = arith.constant 0 : index
    %109 = vector.load %arg6[%c2_78, %c0_79, %c0_80] : memref<4x48x12xbf16, #tpu.memory_space<vmem>>, vector<1x48x12xbf16>
    %110 = vector.shape_cast %109 : vector<1x48x12xbf16> to vector<48x12xbf16>
    %cst_81 = arith.constant dense<0.000000e+00> : vector<64x12xf32>
    %111 = tpu.matmul %9, %110, %cst_81 {dimension_numbers = #tpu.dot_dimension_numbers<[1], [0], [0], [1], [0, 0, 1, 1], [], []>} : vector<64x48xbf16>, vector<48x12xbf16>, vector<64x12xf32> -> vector<64x12xf32>
    %c2_82 = arith.constant 2 : index
    %c0_83 = arith.constant 0 : index
    %c0_84 = arith.constant 0 : index
    %112 = vector.load %arg9[%c2_82, %c0_83, %c0_84] : memref<4x1x12xf32, #tpu.memory_space<vmem>>, vector<1x1x12xf32>
    %113 = vector.shape_cast %112 : vector<1x1x12xf32> to vector<1x12xf32>
    %114 = vector.broadcast %113 : vector<1x12xf32> to vector<64x12xf32>
    %115 = arith.addf %111, %114 : vector<64x12xf32>
    %116 = arith.truncf %101 : vector<64x12xf32> to vector<64x12xbf16>
    %117 = arith.truncf %108 : vector<64x12xf32> to vector<64x12xbf16>
    %cst_85 = arith.constant dense<0.000000e+00> : vector<64x64xf32>
    %118 = tpu.matmul %116, %117, %cst_85 {dimension_numbers = #tpu.dot_dimension_numbers<[1], [1], [0], [0], [0, 0, 1, 0], [], []>} : vector<64x12xbf16>, vector<64x12xbf16>, vector<64x64xf32> -> vector<64x64xf32>
    %cst_86 = arith.constant dense<0xFF800000> : vector<64xf32>
    %119 = vector.multi_reduction <maximumf>, %118, %cst_86 [1] : vector<64x64xf32> to vector<64xf32>
    %120 = vector.shape_cast %119 : vector<64xf32> to vector<64x1xf32>
    %121 = vector.broadcast %120 : vector<64x1xf32> to vector<64x64xf32>
    %122 = arith.subf %118, %121 : vector<64x64xf32>
    %123 = math.exp %122 : vector<64x64xf32>
    %cst_87 = arith.constant dense<0.000000e+00> : vector<64xf32>
    %124 = vector.multi_reduction <add>, %123, %cst_87 [1] : vector<64x64xf32> to vector<64xf32>
    %125 = vector.shape_cast %124 : vector<64xf32> to vector<64x1xf32>
    %126 = tpu.reciprocal %125 {approx = true} : vector<64x1xf32> -> vector<64x1xf32>
    %127 = vector.broadcast %126 : vector<64x1xf32> to vector<64x64xf32>
    %128 = arith.mulf %123, %127 : vector<64x64xf32>
    %129 = arith.truncf %128 : vector<64x64xf32> to vector<64x64xbf16>
    %130 = arith.truncf %115 : vector<64x12xf32> to vector<64x12xbf16>
    %cst_88 = arith.constant dense<0.000000e+00> : vector<64x12xf32>
    %131 = tpu.matmul %129, %130, %cst_88 {dimension_numbers = #tpu.dot_dimension_numbers<[1], [0], [0], [1], [0, 0, 1, 1], [], []>} : vector<64x64xbf16>, vector<64x12xbf16>, vector<64x12xf32> -> vector<64x12xf32>
    %132 = arith.truncf %131 : vector<64x12xf32> to vector<64x12xbf16>
    %c2_89 = arith.constant 2 : index
    %c0_90 = arith.constant 0 : index
    %c0_91 = arith.constant 0 : index
    %133 = vector.load %arg10[%c2_89, %c0_90, %c0_91] : memref<4x12x48xbf16, #tpu.memory_space<vmem>>, vector<1x12x48xbf16>
    %134 = vector.shape_cast %133 : vector<1x12x48xbf16> to vector<12x48xbf16>
    %cst_92 = arith.constant dense<0.000000e+00> : vector<64x48xf32>
    %135 = tpu.matmul %132, %134, %cst_92 {dimension_numbers = #tpu.dot_dimension_numbers<[1], [0], [0], [1], [0, 0, 1, 1], [], []>} : vector<64x12xbf16>, vector<12x48xbf16>, vector<64x48xf32> -> vector<64x48xf32>
    %136 = arith.addf %94, %135 : vector<64x48xf32>
    %c3 = arith.constant 3 : index
    %c0_93 = arith.constant 0 : index
    %c0_94 = arith.constant 0 : index
    %137 = vector.load %arg4[%c3, %c0_93, %c0_94] : memref<4x48x12xbf16, #tpu.memory_space<vmem>>, vector<1x48x12xbf16>
    %138 = vector.shape_cast %137 : vector<1x48x12xbf16> to vector<48x12xbf16>
    %cst_95 = arith.constant dense<0.000000e+00> : vector<64x12xf32>
    %139 = tpu.matmul %9, %138, %cst_95 {dimension_numbers = #tpu.dot_dimension_numbers<[1], [0], [0], [1], [0, 0, 1, 1], [], []>} : vector<64x48xbf16>, vector<48x12xbf16>, vector<64x12xf32> -> vector<64x12xf32>
    %c3_96 = arith.constant 3 : index
    %c0_97 = arith.constant 0 : index
    %c0_98 = arith.constant 0 : index
    %140 = vector.load %arg7[%c3_96, %c0_97, %c0_98] : memref<4x1x12xf32, #tpu.memory_space<vmem>>, vector<1x1x12xf32>
    %141 = vector.shape_cast %140 : vector<1x1x12xf32> to vector<1x12xf32>
    %142 = vector.broadcast %141 : vector<1x12xf32> to vector<64x12xf32>
    %143 = arith.addf %139, %142 : vector<64x12xf32>
    %c3_99 = arith.constant 3 : index
    %c0_100 = arith.constant 0 : index
    %c0_101 = arith.constant 0 : index
    %144 = vector.load %arg5[%c3_99, %c0_100, %c0_101] : memref<4x48x12xbf16, #tpu.memory_space<vmem>>, vector<1x48x12xbf16>
    %145 = vector.shape_cast %144 : vector<1x48x12xbf16> to vector<48x12xbf16>
    %cst_102 = arith.constant dense<0.000000e+00> : vector<64x12xf32>
    %146 = tpu.matmul %9, %145, %cst_102 {dimension_numbers = #tpu.dot_dimension_numbers<[1], [0], [0], [1], [0, 0, 1, 1], [], []>} : vector<64x48xbf16>, vector<48x12xbf16>, vector<64x12xf32> -> vector<64x12xf32>
    %c3_103 = arith.constant 3 : index
    %c0_104 = arith.constant 0 : index
    %c0_105 = arith.constant 0 : index
    %147 = vector.load %arg8[%c3_103, %c0_104, %c0_105] : memref<4x1x12xf32, #tpu.memory_space<vmem>>, vector<1x1x12xf32>
    %148 = vector.shape_cast %147 : vector<1x1x12xf32> to vector<1x12xf32>
    %149 = vector.broadcast %148 : vector<1x12xf32> to vector<64x12xf32>
    %150 = arith.addf %146, %149 : vector<64x12xf32>
    %c3_106 = arith.constant 3 : index
    %c0_107 = arith.constant 0 : index
    %c0_108 = arith.constant 0 : index
    %151 = vector.load %arg6[%c3_106, %c0_107, %c0_108] : memref<4x48x12xbf16, #tpu.memory_space<vmem>>, vector<1x48x12xbf16>
    %152 = vector.shape_cast %151 : vector<1x48x12xbf16> to vector<48x12xbf16>
    %cst_109 = arith.constant dense<0.000000e+00> : vector<64x12xf32>
    %153 = tpu.matmul %9, %152, %cst_109 {dimension_numbers = #tpu.dot_dimension_numbers<[1], [0], [0], [1], [0, 0, 1, 1], [], []>} : vector<64x48xbf16>, vector<48x12xbf16>, vector<64x12xf32> -> vector<64x12xf32>
    %c3_110 = arith.constant 3 : index
    %c0_111 = arith.constant 0 : index
    %c0_112 = arith.constant 0 : index
    %154 = vector.load %arg9[%c3_110, %c0_111, %c0_112] : memref<4x1x12xf32, #tpu.memory_space<vmem>>, vector<1x1x12xf32>
    %155 = vector.shape_cast %154 : vector<1x1x12xf32> to vector<1x12xf32>
    %156 = vector.broadcast %155 : vector<1x12xf32> to vector<64x12xf32>
    %157 = arith.addf %153, %156 : vector<64x12xf32>
    %158 = arith.truncf %143 : vector<64x12xf32> to vector<64x12xbf16>
    %159 = arith.truncf %150 : vector<64x12xf32> to vector<64x12xbf16>
    %cst_113 = arith.constant dense<0.000000e+00> : vector<64x64xf32>
    %160 = tpu.matmul %158, %159, %cst_113 {dimension_numbers = #tpu.dot_dimension_numbers<[1], [1], [0], [0], [0, 0, 1, 0], [], []>} : vector<64x12xbf16>, vector<64x12xbf16>, vector<64x64xf32> -> vector<64x64xf32>
    %cst_114 = arith.constant dense<0xFF800000> : vector<64xf32>
    %161 = vector.multi_reduction <maximumf>, %160, %cst_114 [1] : vector<64x64xf32> to vector<64xf32>
    %162 = vector.shape_cast %161 : vector<64xf32> to vector<64x1xf32>
    %163 = vector.broadcast %162 : vector<64x1xf32> to vector<64x64xf32>
    %164 = arith.subf %160, %163 : vector<64x64xf32>
    %165 = math.exp %164 : vector<64x64xf32>
    %cst_115 = arith.constant dense<0.000000e+00> : vector<64xf32>
    %166 = vector.multi_reduction <add>, %165, %cst_115 [1] : vector<64x64xf32> to vector<64xf32>
    %167 = vector.shape_cast %166 : vector<64xf32> to vector<64x1xf32>
    %168 = tpu.reciprocal %167 {approx = true} : vector<64x1xf32> -> vector<64x1xf32>
    %169 = vector.broadcast %168 : vector<64x1xf32> to vector<64x64xf32>
    %170 = arith.mulf %165, %169 : vector<64x64xf32>
    %171 = arith.truncf %170 : vector<64x64xf32> to vector<64x64xbf16>
    %172 = arith.truncf %157 : vector<64x12xf32> to vector<64x12xbf16>
    %cst_116 = arith.constant dense<0.000000e+00> : vector<64x12xf32>
    %173 = tpu.matmul %171, %172, %cst_116 {dimension_numbers = #tpu.dot_dimension_numbers<[1], [0], [0], [1], [0, 0, 1, 1], [], []>} : vector<64x64xbf16>, vector<64x12xbf16>, vector<64x12xf32> -> vector<64x12xf32>
    %174 = arith.truncf %173 : vector<64x12xf32> to vector<64x12xbf16>
    %c3_117 = arith.constant 3 : index
    %c0_118 = arith.constant 0 : index
    %c0_119 = arith.constant 0 : index
    %175 = vector.load %arg10[%c3_117, %c0_118, %c0_119] : memref<4x12x48xbf16, #tpu.memory_space<vmem>>, vector<1x12x48xbf16>
    %176 = vector.shape_cast %175 : vector<1x12x48xbf16> to vector<12x48xbf16>
    %cst_120 = arith.constant dense<0.000000e+00> : vector<64x48xf32>
    %177 = tpu.matmul %174, %176, %cst_120 {dimension_numbers = #tpu.dot_dimension_numbers<[1], [0], [0], [1], [0, 0, 1, 1], [], []>} : vector<64x12xbf16>, vector<12x48xbf16>, vector<64x48xf32> -> vector<64x48xf32>
    %178 = arith.addf %136, %177 : vector<64x48xf32>
    %c0_121 = arith.constant 0 : index
    %c0_122 = arith.constant 0 : index
    %179 = vector.load %arg11[%c0_121, %c0_122] : memref<1x48xf32, #tpu.memory_space<vmem>>, vector<1x48xf32>
    %180 = vector.broadcast %179 : vector<1x48xf32> to vector<64x48xf32>
    %181 = arith.addf %178, %180 : vector<64x48xf32>
    %182 = arith.addf %181, %8 : vector<64x48xf32>
    %183 = arith.truncf %182 : vector<64x48xf32> to vector<64x48xbf16>
    %c0_123 = arith.constant 0 : index
    %c0_124 = arith.constant 0 : index
    %184 = vector.load %arg12[%c0_123, %c0_124] : memref<48x192xbf16, #tpu.memory_space<vmem>>, vector<48x192xbf16>
    %cst_125 = arith.constant dense<0.000000e+00> : vector<64x192xf32>
    %185 = tpu.matmul %183, %184, %cst_125 {dimension_numbers = #tpu.dot_dimension_numbers<[1], [0], [0], [1], [0, 0, 1, 1], [], []>} : vector<64x48xbf16>, vector<48x192xbf16>, vector<64x192xf32> -> vector<64x192xf32>
    %c0_126 = arith.constant 0 : index
    %c0_127 = arith.constant 0 : index
    %186 = vector.load %arg13[%c0_126, %c0_127] : memref<1x192xf32, #tpu.memory_space<vmem>>, vector<1x192xf32>
    %187 = vector.broadcast %186 : vector<1x192xf32> to vector<64x192xf32>
    %188 = arith.addf %185, %187 : vector<64x192xf32>
    %cst_128 = arith.constant 0.000000e+00 : f32
    %189 = vector.broadcast %cst_128 : f32 to vector<64x192xf32>
    %190 = arith.maximumf %188, %189 : vector<64x192xf32>
    %191 = arith.truncf %190 : vector<64x192xf32> to vector<64x192xbf16>
    %c0_129 = arith.constant 0 : index
    %c0_130 = arith.constant 0 : index
    %192 = vector.load %arg14[%c0_129, %c0_130] : memref<192x48xbf16, #tpu.memory_space<vmem>>, vector<192x48xbf16>
    %cst_131 = arith.constant dense<0.000000e+00> : vector<64x48xf32>
    %193 = tpu.matmul %191, %192, %cst_131 {dimension_numbers = #tpu.dot_dimension_numbers<[1], [0], [0], [1], [0, 0, 1, 1], [], []>} : vector<64x192xbf16>, vector<192x48xbf16>, vector<64x48xf32> -> vector<64x48xf32>
    %c0_132 = arith.constant 0 : index
    %c0_133 = arith.constant 0 : index
    %194 = vector.load %arg15[%c0_132, %c0_133] : memref<1x48xf32, #tpu.memory_space<vmem>>, vector<1x48xf32>
    %195 = vector.broadcast %194 : vector<1x48xf32> to vector<64x48xf32>
    %196 = arith.addf %193, %195 : vector<64x48xf32>
    %197 = arith.truncf %196 : vector<64x48xf32> to vector<64x48xbf16>
    %c0_134 = arith.constant 0 : index
    %c0_135 = arith.constant 0 : index
    %c0_136 = arith.constant 0 : index
    %198 = vector.load %arg16[%c0_134, %c0_135, %c0_136] : memref<1x64x48xbf16, #tpu.memory_space<vmem>>, vector<1x64x48xbf16>
    %199 = vector.shape_cast %198 : vector<1x64x48xbf16> to vector<64x48xbf16>
    %200 = vector.shape_cast %197 : vector<64x48xbf16> to vector<1x64x48xbf16>
    tpu.vector_store %arg16[%c0_134, %c0_135, %c0_136], %200 {strides = array<i32>} : memref<1x64x48xbf16, #tpu.memory_space<vmem>>, vector<1x64x48xbf16>,
    return
  }
  func.func @transform_0(%arg0: i32) -> (i32, i32, i32) {
    %c0_i32 = arith.constant 0 : i32
    %c0_i32_0 = arith.constant 0 : i32
    %c0_i32_1 = arith.constant 0 : i32
    return %arg0, %c0_i32, %c0_i32_0 : i32, i32, i32
  }
  func.func @transform_1(%arg0: i32) -> (i32, i32) {
    %c0_i32 = arith.constant 0 : i32
    %c0_i32_0 = arith.constant 0 : i32
    %c0_i32_1 = arith.constant 0 : i32
    return %c0_i32, %c0_i32_0 : i32, i32
  }
  func.func @transform_2(%arg0: i32) -> (i32, i32) {
    %c0_i32 = arith.constant 0 : i32
    %c0_i32_0 = arith.constant 0 : i32
    %c0_i32_1 = arith.constant 0 : i32
    return %c0_i32, %c0_i32_0 : i32, i32
  }
  func.func @transform_3(%arg0: i32) -> (i32, i32, i32) {
    %c0_i32 = arith.constant 0 : i32
    %c0_i32_0 = arith.constant 0 : i32
    %c0_i32_1 = arith.constant 0 : i32
    %c0_i32_2 = arith.constant 0 : i32
    return %c0_i32, %c0_i32_0, %c0_i32_1 : i32, i32, i32
  }
  func.func @transform_4(%arg0: i32) -> (i32, i32, i32) {
    %c0_i32 = arith.constant 0 : i32
    %c0_i32_0 = arith.constant 0 : i32
    %c0_i32_1 = arith.constant 0 : i32
    %c0_i32_2 = arith.constant 0 : i32
    return %c0_i32, %c0_i32_0, %c0_i32_1 : i32, i32, i32
  }
  func.func @transform_5(%arg0: i32) -> (i32, i32, i32) {
    %c0_i32 = arith.constant 0 : i32
    %c0_i32_0 = arith.constant 0 : i32
    %c0_i32_1 = arith.constant 0 : i32
    %c0_i32_2 = arith.constant 0 : i32
    return %c0_i32, %c0_i32_0, %c0_i32_1 : i32, i32, i32
  }
  func.func @transform_6(%arg0: i32) -> (i32, i32, i32) {
    %c0_i32 = arith.constant 0 : i32
    %c0_i32_0 = arith.constant 0 : i32
    %c0_i32_1 = arith.constant 0 : i32
    %c0_i32_2 = arith.constant 0 : i32
    return %c0_i32, %c0_i32_0, %c0_i32_1 : i32, i32, i32
  }
  func.func @transform_7(%arg0: i32) -> (i32, i32, i32) {
    %c0_i32 = arith.constant 0 : i32
    %c0_i32_0 = arith.constant 0 : i32
    %c0_i32_1 = arith.constant 0 : i32
    %c0_i32_2 = arith.constant 0 : i32
    return %c0_i32, %c0_i32_0, %c0_i32_1 : i32, i32, i32
  }
  func.func @transform_8(%arg0: i32) -> (i32, i32, i32) {
    %c0_i32 = arith.constant 0 : i32
    %c0_i32_0 = arith.constant 0 : i32
    %c0_i32_1 = arith.constant 0 : i32
    %c0_i32_2 = arith.constant 0 : i32
    return %c0_i32, %c0_i32_0, %c0_i32_1 : i32, i32, i32
  }
  func.func @transform_9(%arg0: i32) -> (i32, i32, i32) {
    %c0_i32 = arith.constant 0 : i32
    %c0_i32_0 = arith.constant 0 : i32
    %c0_i32_1 = arith.constant 0 : i32
    %c0_i32_2 = arith.constant 0 : i32
    return %c0_i32, %c0_i32_0, %c0_i32_1 : i32, i32, i32
  }
  func.func @transform_10(%arg0: i32) -> (i32, i32) {
    %c0_i32 = arith.constant 0 : i32
    %c0_i32_0 = arith.constant 0 : i32
    %c0_i32_1 = arith.constant 0 : i32
    return %c0_i32, %c0_i32_0 : i32, i32
  }
  func.func @transform_11(%arg0: i32) -> (i32, i32) {
    %c0_i32 = arith.constant 0 : i32
    %c0_i32_0 = arith.constant 0 : i32
    %c0_i32_1 = arith.constant 0 : i32
    return %c0_i32, %c0_i32_0 : i32, i32
  }
  func.func @transform_12(%arg0: i32) -> (i32, i32) {
    %c0_i32 = arith.constant 0 : i32
    %c0_i32_0 = arith.constant 0 : i32
    %c0_i32_1 = arith.constant 0 : i32
    return %c0_i32, %c0_i32_0 : i32, i32
  }
  func.func @transform_13(%arg0: i32) -> (i32, i32) {
    %c0_i32 = arith.constant 0 : i32
    %c0_i32_0 = arith.constant 0 : i32
    %c0_i32_1 = arith.constant 0 : i32
    return %c0_i32, %c0_i32_0 : i32, i32
  }
  func.func @transform_14(%arg0: i32) -> (i32, i32) {
    %c0_i32 = arith.constant 0 : i32
    %c0_i32_0 = arith.constant 0 : i32
    %c0_i32_1 = arith.constant 0 : i32
    return %c0_i32, %c0_i32_0 : i32, i32
  }
  func.func @transform_15(%arg0: i32) -> (i32, i32, i32) {
    %c0_i32 = arith.constant 0 : i32
    %c0_i32_0 = arith.constant 0 : i32
    %c0_i32_1 = arith.constant 0 : i32
    return %arg0, %c0_i32, %c0_i32_0 : i32, i32, i32
  }
}

module attributes {stable_mosaic.version = 11 : i64} {
  func.func @_last_conv_kernel(%arg0: i32, %arg1: memref<1x110x256xbf16, #tpu.memory_space<vmem>>, %arg2: memref<1x110x48xbf16, #tpu.memory_space<vmem>>, %arg3: memref<80x1xf32, #tpu.memory_space<vmem>>, %arg4: memref<9x256x64xbf16, #tpu.memory_space<vmem>>, %arg5: memref<9x48x64xbf16, #tpu.memory_space<vmem>>, %arg6: memref<1x64xf32, #tpu.memory_space<vmem>>, %arg7: memref<9x64x64xbf16, #tpu.memory_space<vmem>>, %arg8: memref<1x64xf32, #tpu.memory_space<vmem>>, %arg9: memref<64x6xbf16, #tpu.memory_space<vmem>>, %arg10: memref<1x6xf32, #tpu.memory_space<vmem>>, %arg11: memref<1x80x6xf32, #tpu.memory_space<vmem>>, %arg12: memref<112x64xbf16, #tpu.memory_space<vmem>>) attributes {dimension_semantics = [#tpu.dimension_semantics<parallel>], iteration_bounds = array<i64: 2>, scalar_prefetch = 0 : i64, scratch_operands = 1 : i64, tpu.core_type = #tpu.core_type<tc>, window_params = [{transform_indices = @transform_0, window_bounds = array<i64: 1, 110, 256>}, {transform_indices = @transform_1, window_bounds = array<i64: 1, 110, 48>}, {pipeline_mode = #tpu.pipeline_mode<synchronous>, transform_indices = @transform_2, window_bounds = array<i64: 80, 1>}, {pipeline_mode = #tpu.pipeline_mode<synchronous>, transform_indices = @transform_3, window_bounds = array<i64: 9, 256, 64>}, {pipeline_mode = #tpu.pipeline_mode<synchronous>, transform_indices = @transform_4, window_bounds = array<i64: 9, 48, 64>}, {pipeline_mode = #tpu.pipeline_mode<synchronous>, transform_indices = @transform_5, window_bounds = array<i64: 1, 64>}, {pipeline_mode = #tpu.pipeline_mode<synchronous>, transform_indices = @transform_6, window_bounds = array<i64: 9, 64, 64>}, {pipeline_mode = #tpu.pipeline_mode<synchronous>, transform_indices = @transform_7, window_bounds = array<i64: 1, 64>}, {pipeline_mode = #tpu.pipeline_mode<synchronous>, transform_indices = @transform_8, window_bounds = array<i64: 64, 6>}, {pipeline_mode = #tpu.pipeline_mode<synchronous>, transform_indices = @transform_9, window_bounds = array<i64: 1, 6>}, {transform_indices = @transform_10, window_bounds = array<i64: 1, 80, 6>}]} {
    %cst = arith.constant 0.000000e+00 : f32
    %0 = vector.broadcast %cst : f32 to vector<80x64xf32>
    %c0 = arith.constant 0 : index
    %c0_0 = arith.constant 0 : index
    %c0_1 = arith.constant 0 : index
    %1 = vector.load %arg1[%c0, %c0_0, %c0_1] : memref<1x110x256xbf16, #tpu.memory_space<vmem>>, vector<1x80x256xbf16>
    %2 = vector.shape_cast %1 : vector<1x80x256xbf16> to vector<80x256xbf16>
    %c0_2 = arith.constant 0 : index
    %c0_3 = arith.constant 0 : index
    %c0_4 = arith.constant 0 : index
    %3 = vector.load %arg4[%c0_2, %c0_3, %c0_4] : memref<9x256x64xbf16, #tpu.memory_space<vmem>>, vector<1x256x64xbf16>
    %4 = vector.shape_cast %3 : vector<1x256x64xbf16> to vector<256x64xbf16>
    %cst_5 = arith.constant dense<0.000000e+00> : vector<80x64xf32>
    %5 = tpu.matmul %2, %4, %cst_5 {dimension_numbers = #tpu.dot_dimension_numbers<[1], [0], [0], [1], [0, 0, 1, 1], [], []>} : vector<80x256xbf16>, vector<256x64xbf16>, vector<80x64xf32> -> vector<80x64xf32>
    %6 = arith.addf %0, %5 : vector<80x64xf32>
    %c0_6 = arith.constant 0 : index
    %c0_7 = arith.constant 0 : index
    %c0_8 = arith.constant 0 : index
    %7 = vector.load %arg2[%c0_6, %c0_7, %c0_8] : memref<1x110x48xbf16, #tpu.memory_space<vmem>>, vector<1x80x48xbf16>
    %8 = vector.shape_cast %7 : vector<1x80x48xbf16> to vector<80x48xbf16>
    %c0_9 = arith.constant 0 : index
    %c0_10 = arith.constant 0 : index
    %c0_11 = arith.constant 0 : index
    %9 = vector.load %arg5[%c0_9, %c0_10, %c0_11] : memref<9x48x64xbf16, #tpu.memory_space<vmem>>, vector<1x48x64xbf16>
    %10 = vector.shape_cast %9 : vector<1x48x64xbf16> to vector<48x64xbf16>
    %cst_12 = arith.constant dense<0.000000e+00> : vector<80x64xf32>
    %11 = tpu.matmul %8, %10, %cst_12 {dimension_numbers = #tpu.dot_dimension_numbers<[1], [0], [0], [1], [0, 0, 1, 1], [], []>} : vector<80x48xbf16>, vector<48x64xbf16>, vector<80x64xf32> -> vector<80x64xf32>
    %12 = arith.addf %6, %11 : vector<80x64xf32>
    %c0_13 = arith.constant 0 : index
    %c1 = arith.constant 1 : index
    %c0_14 = arith.constant 0 : index
    %13 = vector.load %arg1[%c0_13, %c1, %c0_14] : memref<1x110x256xbf16, #tpu.memory_space<vmem>>, vector<1x80x256xbf16>
    %14 = vector.shape_cast %13 : vector<1x80x256xbf16> to vector<80x256xbf16>
    %c1_15 = arith.constant 1 : index
    %c0_16 = arith.constant 0 : index
    %c0_17 = arith.constant 0 : index
    %15 = vector.load %arg4[%c1_15, %c0_16, %c0_17] : memref<9x256x64xbf16, #tpu.memory_space<vmem>>, vector<1x256x64xbf16>
    %16 = vector.shape_cast %15 : vector<1x256x64xbf16> to vector<256x64xbf16>
    %cst_18 = arith.constant dense<0.000000e+00> : vector<80x64xf32>
    %17 = tpu.matmul %14, %16, %cst_18 {dimension_numbers = #tpu.dot_dimension_numbers<[1], [0], [0], [1], [0, 0, 1, 1], [], []>} : vector<80x256xbf16>, vector<256x64xbf16>, vector<80x64xf32> -> vector<80x64xf32>
    %18 = arith.addf %12, %17 : vector<80x64xf32>
    %c0_19 = arith.constant 0 : index
    %c1_20 = arith.constant 1 : index
    %c0_21 = arith.constant 0 : index
    %19 = vector.load %arg2[%c0_19, %c1_20, %c0_21] : memref<1x110x48xbf16, #tpu.memory_space<vmem>>, vector<1x80x48xbf16>
    %20 = vector.shape_cast %19 : vector<1x80x48xbf16> to vector<80x48xbf16>
    %c1_22 = arith.constant 1 : index
    %c0_23 = arith.constant 0 : index
    %c0_24 = arith.constant 0 : index
    %21 = vector.load %arg5[%c1_22, %c0_23, %c0_24] : memref<9x48x64xbf16, #tpu.memory_space<vmem>>, vector<1x48x64xbf16>
    %22 = vector.shape_cast %21 : vector<1x48x64xbf16> to vector<48x64xbf16>
    %cst_25 = arith.constant dense<0.000000e+00> : vector<80x64xf32>
    %23 = tpu.matmul %20, %22, %cst_25 {dimension_numbers = #tpu.dot_dimension_numbers<[1], [0], [0], [1], [0, 0, 1, 1], [], []>} : vector<80x48xbf16>, vector<48x64xbf16>, vector<80x64xf32> -> vector<80x64xf32>
    %24 = arith.addf %18, %23 : vector<80x64xf32>
    %c0_26 = arith.constant 0 : index
    %c2 = arith.constant 2 : index
    %c0_27 = arith.constant 0 : index
    %25 = vector.load %arg1[%c0_26, %c2, %c0_27] : memref<1x110x256xbf16, #tpu.memory_space<vmem>>, vector<1x80x256xbf16>
    %26 = vector.shape_cast %25 : vector<1x80x256xbf16> to vector<80x256xbf16>
    %c2_28 = arith.constant 2 : index
    %c0_29 = arith.constant 0 : index
    %c0_30 = arith.constant 0 : index
    %27 = vector.load %arg4[%c2_28, %c0_29, %c0_30] : memref<9x256x64xbf16, #tpu.memory_space<vmem>>, vector<1x256x64xbf16>
    %28 = vector.shape_cast %27 : vector<1x256x64xbf16> to vector<256x64xbf16>
    %cst_31 = arith.constant dense<0.000000e+00> : vector<80x64xf32>
    %29 = tpu.matmul %26, %28, %cst_31 {dimension_numbers = #tpu.dot_dimension_numbers<[1], [0], [0], [1], [0, 0, 1, 1], [], []>} : vector<80x256xbf16>, vector<256x64xbf16>, vector<80x64xf32> -> vector<80x64xf32>
    %30 = arith.addf %24, %29 : vector<80x64xf32>
    %c0_32 = arith.constant 0 : index
    %c2_33 = arith.constant 2 : index
    %c0_34 = arith.constant 0 : index
    %31 = vector.load %arg2[%c0_32, %c2_33, %c0_34] : memref<1x110x48xbf16, #tpu.memory_space<vmem>>, vector<1x80x48xbf16>
    %32 = vector.shape_cast %31 : vector<1x80x48xbf16> to vector<80x48xbf16>
    %c2_35 = arith.constant 2 : index
    %c0_36 = arith.constant 0 : index
    %c0_37 = arith.constant 0 : index
    %33 = vector.load %arg5[%c2_35, %c0_36, %c0_37] : memref<9x48x64xbf16, #tpu.memory_space<vmem>>, vector<1x48x64xbf16>
    %34 = vector.shape_cast %33 : vector<1x48x64xbf16> to vector<48x64xbf16>
    %cst_38 = arith.constant dense<0.000000e+00> : vector<80x64xf32>
    %35 = tpu.matmul %32, %34, %cst_38 {dimension_numbers = #tpu.dot_dimension_numbers<[1], [0], [0], [1], [0, 0, 1, 1], [], []>} : vector<80x48xbf16>, vector<48x64xbf16>, vector<80x64xf32> -> vector<80x64xf32>
    %36 = arith.addf %30, %35 : vector<80x64xf32>
    %c0_39 = arith.constant 0 : index
    %c10 = arith.constant 10 : index
    %c0_40 = arith.constant 0 : index
    %37 = vector.load %arg1[%c0_39, %c10, %c0_40] : memref<1x110x256xbf16, #tpu.memory_space<vmem>>, vector<1x80x256xbf16>
    %38 = vector.shape_cast %37 : vector<1x80x256xbf16> to vector<80x256xbf16>
    %c3 = arith.constant 3 : index
    %c0_41 = arith.constant 0 : index
    %c0_42 = arith.constant 0 : index
    %39 = vector.load %arg4[%c3, %c0_41, %c0_42] : memref<9x256x64xbf16, #tpu.memory_space<vmem>>, vector<1x256x64xbf16>
    %40 = vector.shape_cast %39 : vector<1x256x64xbf16> to vector<256x64xbf16>
    %cst_43 = arith.constant dense<0.000000e+00> : vector<80x64xf32>
    %41 = tpu.matmul %38, %40, %cst_43 {dimension_numbers = #tpu.dot_dimension_numbers<[1], [0], [0], [1], [0, 0, 1, 1], [], []>} : vector<80x256xbf16>, vector<256x64xbf16>, vector<80x64xf32> -> vector<80x64xf32>
    %42 = arith.addf %36, %41 : vector<80x64xf32>
    %c0_44 = arith.constant 0 : index
    %c10_45 = arith.constant 10 : index
    %c0_46 = arith.constant 0 : index
    %43 = vector.load %arg2[%c0_44, %c10_45, %c0_46] : memref<1x110x48xbf16, #tpu.memory_space<vmem>>, vector<1x80x48xbf16>
    %44 = vector.shape_cast %43 : vector<1x80x48xbf16> to vector<80x48xbf16>
    %c3_47 = arith.constant 3 : index
    %c0_48 = arith.constant 0 : index
    %c0_49 = arith.constant 0 : index
    %45 = vector.load %arg5[%c3_47, %c0_48, %c0_49] : memref<9x48x64xbf16, #tpu.memory_space<vmem>>, vector<1x48x64xbf16>
    %46 = vector.shape_cast %45 : vector<1x48x64xbf16> to vector<48x64xbf16>
    %cst_50 = arith.constant dense<0.000000e+00> : vector<80x64xf32>
    %47 = tpu.matmul %44, %46, %cst_50 {dimension_numbers = #tpu.dot_dimension_numbers<[1], [0], [0], [1], [0, 0, 1, 1], [], []>} : vector<80x48xbf16>, vector<48x64xbf16>, vector<80x64xf32> -> vector<80x64xf32>
    %48 = arith.addf %42, %47 : vector<80x64xf32>
    %c0_51 = arith.constant 0 : index
    %c11 = arith.constant 11 : index
    %c0_52 = arith.constant 0 : index
    %49 = vector.load %arg1[%c0_51, %c11, %c0_52] : memref<1x110x256xbf16, #tpu.memory_space<vmem>>, vector<1x80x256xbf16>
    %50 = vector.shape_cast %49 : vector<1x80x256xbf16> to vector<80x256xbf16>
    %c4 = arith.constant 4 : index
    %c0_53 = arith.constant 0 : index
    %c0_54 = arith.constant 0 : index
    %51 = vector.load %arg4[%c4, %c0_53, %c0_54] : memref<9x256x64xbf16, #tpu.memory_space<vmem>>, vector<1x256x64xbf16>
    %52 = vector.shape_cast %51 : vector<1x256x64xbf16> to vector<256x64xbf16>
    %cst_55 = arith.constant dense<0.000000e+00> : vector<80x64xf32>
    %53 = tpu.matmul %50, %52, %cst_55 {dimension_numbers = #tpu.dot_dimension_numbers<[1], [0], [0], [1], [0, 0, 1, 1], [], []>} : vector<80x256xbf16>, vector<256x64xbf16>, vector<80x64xf32> -> vector<80x64xf32>
    %54 = arith.addf %48, %53 : vector<80x64xf32>
    %c0_56 = arith.constant 0 : index
    %c11_57 = arith.constant 11 : index
    %c0_58 = arith.constant 0 : index
    %55 = vector.load %arg2[%c0_56, %c11_57, %c0_58] : memref<1x110x48xbf16, #tpu.memory_space<vmem>>, vector<1x80x48xbf16>
    %56 = vector.shape_cast %55 : vector<1x80x48xbf16> to vector<80x48xbf16>
    %c4_59 = arith.constant 4 : index
    %c0_60 = arith.constant 0 : index
    %c0_61 = arith.constant 0 : index
    %57 = vector.load %arg5[%c4_59, %c0_60, %c0_61] : memref<9x48x64xbf16, #tpu.memory_space<vmem>>, vector<1x48x64xbf16>
    %58 = vector.shape_cast %57 : vector<1x48x64xbf16> to vector<48x64xbf16>
    %cst_62 = arith.constant dense<0.000000e+00> : vector<80x64xf32>
    %59 = tpu.matmul %56, %58, %cst_62 {dimension_numbers = #tpu.dot_dimension_numbers<[1], [0], [0], [1], [0, 0, 1, 1], [], []>} : vector<80x48xbf16>, vector<48x64xbf16>, vector<80x64xf32> -> vector<80x64xf32>
    %60 = arith.addf %54, %59 : vector<80x64xf32>
    %c0_63 = arith.constant 0 : index
    %c12 = arith.constant 12 : index
    %c0_64 = arith.constant 0 : index
    %61 = vector.load %arg1[%c0_63, %c12, %c0_64] : memref<1x110x256xbf16, #tpu.memory_space<vmem>>, vector<1x80x256xbf16>
    %62 = vector.shape_cast %61 : vector<1x80x256xbf16> to vector<80x256xbf16>
    %c5 = arith.constant 5 : index
    %c0_65 = arith.constant 0 : index
    %c0_66 = arith.constant 0 : index
    %63 = vector.load %arg4[%c5, %c0_65, %c0_66] : memref<9x256x64xbf16, #tpu.memory_space<vmem>>, vector<1x256x64xbf16>
    %64 = vector.shape_cast %63 : vector<1x256x64xbf16> to vector<256x64xbf16>
    %cst_67 = arith.constant dense<0.000000e+00> : vector<80x64xf32>
    %65 = tpu.matmul %62, %64, %cst_67 {dimension_numbers = #tpu.dot_dimension_numbers<[1], [0], [0], [1], [0, 0, 1, 1], [], []>} : vector<80x256xbf16>, vector<256x64xbf16>, vector<80x64xf32> -> vector<80x64xf32>
    %66 = arith.addf %60, %65 : vector<80x64xf32>
    %c0_68 = arith.constant 0 : index
    %c12_69 = arith.constant 12 : index
    %c0_70 = arith.constant 0 : index
    %67 = vector.load %arg2[%c0_68, %c12_69, %c0_70] : memref<1x110x48xbf16, #tpu.memory_space<vmem>>, vector<1x80x48xbf16>
    %68 = vector.shape_cast %67 : vector<1x80x48xbf16> to vector<80x48xbf16>
    %c5_71 = arith.constant 5 : index
    %c0_72 = arith.constant 0 : index
    %c0_73 = arith.constant 0 : index
    %69 = vector.load %arg5[%c5_71, %c0_72, %c0_73] : memref<9x48x64xbf16, #tpu.memory_space<vmem>>, vector<1x48x64xbf16>
    %70 = vector.shape_cast %69 : vector<1x48x64xbf16> to vector<48x64xbf16>
    %cst_74 = arith.constant dense<0.000000e+00> : vector<80x64xf32>
    %71 = tpu.matmul %68, %70, %cst_74 {dimension_numbers = #tpu.dot_dimension_numbers<[1], [0], [0], [1], [0, 0, 1, 1], [], []>} : vector<80x48xbf16>, vector<48x64xbf16>, vector<80x64xf32> -> vector<80x64xf32>
    %72 = arith.addf %66, %71 : vector<80x64xf32>
    %c0_75 = arith.constant 0 : index
    %c20 = arith.constant 20 : index
    %c0_76 = arith.constant 0 : index
    %73 = vector.load %arg1[%c0_75, %c20, %c0_76] : memref<1x110x256xbf16, #tpu.memory_space<vmem>>, vector<1x80x256xbf16>
    %74 = vector.shape_cast %73 : vector<1x80x256xbf16> to vector<80x256xbf16>
    %c6 = arith.constant 6 : index
    %c0_77 = arith.constant 0 : index
    %c0_78 = arith.constant 0 : index
    %75 = vector.load %arg4[%c6, %c0_77, %c0_78] : memref<9x256x64xbf16, #tpu.memory_space<vmem>>, vector<1x256x64xbf16>
    %76 = vector.shape_cast %75 : vector<1x256x64xbf16> to vector<256x64xbf16>
    %cst_79 = arith.constant dense<0.000000e+00> : vector<80x64xf32>
    %77 = tpu.matmul %74, %76, %cst_79 {dimension_numbers = #tpu.dot_dimension_numbers<[1], [0], [0], [1], [0, 0, 1, 1], [], []>} : vector<80x256xbf16>, vector<256x64xbf16>, vector<80x64xf32> -> vector<80x64xf32>
    %78 = arith.addf %72, %77 : vector<80x64xf32>
    %c0_80 = arith.constant 0 : index
    %c20_81 = arith.constant 20 : index
    %c0_82 = arith.constant 0 : index
    %79 = vector.load %arg2[%c0_80, %c20_81, %c0_82] : memref<1x110x48xbf16, #tpu.memory_space<vmem>>, vector<1x80x48xbf16>
    %80 = vector.shape_cast %79 : vector<1x80x48xbf16> to vector<80x48xbf16>
    %c6_83 = arith.constant 6 : index
    %c0_84 = arith.constant 0 : index
    %c0_85 = arith.constant 0 : index
    %81 = vector.load %arg5[%c6_83, %c0_84, %c0_85] : memref<9x48x64xbf16, #tpu.memory_space<vmem>>, vector<1x48x64xbf16>
    %82 = vector.shape_cast %81 : vector<1x48x64xbf16> to vector<48x64xbf16>
    %cst_86 = arith.constant dense<0.000000e+00> : vector<80x64xf32>
    %83 = tpu.matmul %80, %82, %cst_86 {dimension_numbers = #tpu.dot_dimension_numbers<[1], [0], [0], [1], [0, 0, 1, 1], [], []>} : vector<80x48xbf16>, vector<48x64xbf16>, vector<80x64xf32> -> vector<80x64xf32>
    %84 = arith.addf %78, %83 : vector<80x64xf32>
    %c0_87 = arith.constant 0 : index
    %c21 = arith.constant 21 : index
    %c0_88 = arith.constant 0 : index
    %85 = vector.load %arg1[%c0_87, %c21, %c0_88] : memref<1x110x256xbf16, #tpu.memory_space<vmem>>, vector<1x80x256xbf16>
    %86 = vector.shape_cast %85 : vector<1x80x256xbf16> to vector<80x256xbf16>
    %c7 = arith.constant 7 : index
    %c0_89 = arith.constant 0 : index
    %c0_90 = arith.constant 0 : index
    %87 = vector.load %arg4[%c7, %c0_89, %c0_90] : memref<9x256x64xbf16, #tpu.memory_space<vmem>>, vector<1x256x64xbf16>
    %88 = vector.shape_cast %87 : vector<1x256x64xbf16> to vector<256x64xbf16>
    %cst_91 = arith.constant dense<0.000000e+00> : vector<80x64xf32>
    %89 = tpu.matmul %86, %88, %cst_91 {dimension_numbers = #tpu.dot_dimension_numbers<[1], [0], [0], [1], [0, 0, 1, 1], [], []>} : vector<80x256xbf16>, vector<256x64xbf16>, vector<80x64xf32> -> vector<80x64xf32>
    %90 = arith.addf %84, %89 : vector<80x64xf32>
    %c0_92 = arith.constant 0 : index
    %c21_93 = arith.constant 21 : index
    %c0_94 = arith.constant 0 : index
    %91 = vector.load %arg2[%c0_92, %c21_93, %c0_94] : memref<1x110x48xbf16, #tpu.memory_space<vmem>>, vector<1x80x48xbf16>
    %92 = vector.shape_cast %91 : vector<1x80x48xbf16> to vector<80x48xbf16>
    %c7_95 = arith.constant 7 : index
    %c0_96 = arith.constant 0 : index
    %c0_97 = arith.constant 0 : index
    %93 = vector.load %arg5[%c7_95, %c0_96, %c0_97] : memref<9x48x64xbf16, #tpu.memory_space<vmem>>, vector<1x48x64xbf16>
    %94 = vector.shape_cast %93 : vector<1x48x64xbf16> to vector<48x64xbf16>
    %cst_98 = arith.constant dense<0.000000e+00> : vector<80x64xf32>
    %95 = tpu.matmul %92, %94, %cst_98 {dimension_numbers = #tpu.dot_dimension_numbers<[1], [0], [0], [1], [0, 0, 1, 1], [], []>} : vector<80x48xbf16>, vector<48x64xbf16>, vector<80x64xf32> -> vector<80x64xf32>
    %96 = arith.addf %90, %95 : vector<80x64xf32>
    %c0_99 = arith.constant 0 : index
    %c22 = arith.constant 22 : index
    %c0_100 = arith.constant 0 : index
    %97 = vector.load %arg1[%c0_99, %c22, %c0_100] : memref<1x110x256xbf16, #tpu.memory_space<vmem>>, vector<1x80x256xbf16>
    %98 = vector.shape_cast %97 : vector<1x80x256xbf16> to vector<80x256xbf16>
    %c8 = arith.constant 8 : index
    %c0_101 = arith.constant 0 : index
    %c0_102 = arith.constant 0 : index
    %99 = vector.load %arg4[%c8, %c0_101, %c0_102] : memref<9x256x64xbf16, #tpu.memory_space<vmem>>, vector<1x256x64xbf16>
    %100 = vector.shape_cast %99 : vector<1x256x64xbf16> to vector<256x64xbf16>
    %cst_103 = arith.constant dense<0.000000e+00> : vector<80x64xf32>
    %101 = tpu.matmul %98, %100, %cst_103 {dimension_numbers = #tpu.dot_dimension_numbers<[1], [0], [0], [1], [0, 0, 1, 1], [], []>} : vector<80x256xbf16>, vector<256x64xbf16>, vector<80x64xf32> -> vector<80x64xf32>
    %102 = arith.addf %96, %101 : vector<80x64xf32>
    %c0_104 = arith.constant 0 : index
    %c22_105 = arith.constant 22 : index
    %c0_106 = arith.constant 0 : index
    %103 = vector.load %arg2[%c0_104, %c22_105, %c0_106] : memref<1x110x48xbf16, #tpu.memory_space<vmem>>, vector<1x80x48xbf16>
    %104 = vector.shape_cast %103 : vector<1x80x48xbf16> to vector<80x48xbf16>
    %c8_107 = arith.constant 8 : index
    %c0_108 = arith.constant 0 : index
    %c0_109 = arith.constant 0 : index
    %105 = vector.load %arg5[%c8_107, %c0_108, %c0_109] : memref<9x48x64xbf16, #tpu.memory_space<vmem>>, vector<1x48x64xbf16>
    %106 = vector.shape_cast %105 : vector<1x48x64xbf16> to vector<48x64xbf16>
    %cst_110 = arith.constant dense<0.000000e+00> : vector<80x64xf32>
    %107 = tpu.matmul %104, %106, %cst_110 {dimension_numbers = #tpu.dot_dimension_numbers<[1], [0], [0], [1], [0, 0, 1, 1], [], []>} : vector<80x48xbf16>, vector<48x64xbf16>, vector<80x64xf32> -> vector<80x64xf32>
    %108 = arith.addf %102, %107 : vector<80x64xf32>
    %c0_111 = arith.constant 0 : index
    %c0_112 = arith.constant 0 : index
    %109 = vector.load %arg6[%c0_111, %c0_112] : memref<1x64xf32, #tpu.memory_space<vmem>>, vector<1x64xf32>
    %110 = vector.broadcast %109 : vector<1x64xf32> to vector<80x64xf32>
    %111 = arith.addf %108, %110 : vector<80x64xf32>
    %cst_113 = arith.constant 0.000000e+00 : f32
    %112 = vector.broadcast %cst_113 : f32 to vector<80x64xf32>
    %113 = arith.maximumf %111, %112 : vector<80x64xf32>
    %c0_114 = arith.constant 0 : index
    %c0_115 = arith.constant 0 : index
    %114 = vector.load %arg3[%c0_114, %c0_115] : memref<80x1xf32, #tpu.memory_space<vmem>>, vector<80x1xf32>
    %115 = vector.broadcast %114 : vector<80x1xf32> to vector<80x64xf32>
    %116 = arith.mulf %113, %115 : vector<80x64xf32>
    %cst_116 = arith.constant 0.000000e+00 : bf16
    %117 = vector.broadcast %cst_116 : bf16 to vector<16x64xbf16>
    %c0_117 = arith.constant 0 : index
    %c0_118 = arith.constant 0 : index
    %118 = vector.load %arg12[%c0_117, %c0_118] : memref<112x64xbf16, #tpu.memory_space<vmem>>, vector<16x64xbf16>
    tpu.vector_store %arg12[%c0_117, %c0_118], %117 {strides = array<i32>} : memref<112x64xbf16, #tpu.memory_space<vmem>>, vector<16x64xbf16>,
    %119 = arith.truncf %116 : vector<80x64xf32> to vector<80x64xbf16>
    %c16 = arith.constant 16 : index
    %c0_119 = arith.constant 0 : index
    %120 = vector.load %arg12[%c16, %c0_119] : memref<112x64xbf16, #tpu.memory_space<vmem>>, vector<80x64xbf16>
    tpu.vector_store %arg12[%c16, %c0_119], %119 {strides = array<i32>} : memref<112x64xbf16, #tpu.memory_space<vmem>>, vector<80x64xbf16>,
    %cst_120 = arith.constant 0.000000e+00 : bf16
    %121 = vector.broadcast %cst_120 : bf16 to vector<16x64xbf16>
    %c96 = arith.constant 96 : index
    %c0_121 = arith.constant 0 : index
    %122 = vector.load %arg12[%c96, %c0_121] : memref<112x64xbf16, #tpu.memory_space<vmem>>, vector<16x64xbf16>
    tpu.vector_store %arg12[%c96, %c0_121], %121 {strides = array<i32>} : memref<112x64xbf16, #tpu.memory_space<vmem>>, vector<16x64xbf16>,
    %cst_122 = arith.constant 0.000000e+00 : f32
    %123 = vector.broadcast %cst_122 : f32 to vector<80x64xf32>
    %c5_123 = arith.constant 5 : index
    %c0_124 = arith.constant 0 : index
    %124 = vector.load %arg12[%c5_123, %c0_124] : memref<112x64xbf16, #tpu.memory_space<vmem>>, vector<80x64xbf16>
    %c0_125 = arith.constant 0 : index
    %c0_126 = arith.constant 0 : index
    %c0_127 = arith.constant 0 : index
    %125 = vector.load %arg7[%c0_125, %c0_126, %c0_127] : memref<9x64x64xbf16, #tpu.memory_space<vmem>>, vector<1x64x64xbf16>
    %126 = vector.shape_cast %125 : vector<1x64x64xbf16> to vector<64x64xbf16>
    %cst_128 = arith.constant dense<0.000000e+00> : vector<80x64xf32>
    %127 = tpu.matmul %124, %126, %cst_128 {dimension_numbers = #tpu.dot_dimension_numbers<[1], [0], [0], [1], [0, 0, 1, 1], [], []>} : vector<80x64xbf16>, vector<64x64xbf16>, vector<80x64xf32> -> vector<80x64xf32>
    %128 = arith.addf %123, %127 : vector<80x64xf32>
    %c6_129 = arith.constant 6 : index
    %c0_130 = arith.constant 0 : index
    %129 = vector.load %arg12[%c6_129, %c0_130] : memref<112x64xbf16, #tpu.memory_space<vmem>>, vector<80x64xbf16>
    %c1_131 = arith.constant 1 : index
    %c0_132 = arith.constant 0 : index
    %c0_133 = arith.constant 0 : index
    %130 = vector.load %arg7[%c1_131, %c0_132, %c0_133] : memref<9x64x64xbf16, #tpu.memory_space<vmem>>, vector<1x64x64xbf16>
    %131 = vector.shape_cast %130 : vector<1x64x64xbf16> to vector<64x64xbf16>
    %cst_134 = arith.constant dense<0.000000e+00> : vector<80x64xf32>
    %132 = tpu.matmul %129, %131, %cst_134 {dimension_numbers = #tpu.dot_dimension_numbers<[1], [0], [0], [1], [0, 0, 1, 1], [], []>} : vector<80x64xbf16>, vector<64x64xbf16>, vector<80x64xf32> -> vector<80x64xf32>
    %133 = arith.addf %128, %132 : vector<80x64xf32>
    %c7_135 = arith.constant 7 : index
    %c0_136 = arith.constant 0 : index
    %134 = vector.load %arg12[%c7_135, %c0_136] : memref<112x64xbf16, #tpu.memory_space<vmem>>, vector<80x64xbf16>
    %c2_137 = arith.constant 2 : index
    %c0_138 = arith.constant 0 : index
    %c0_139 = arith.constant 0 : index
    %135 = vector.load %arg7[%c2_137, %c0_138, %c0_139] : memref<9x64x64xbf16, #tpu.memory_space<vmem>>, vector<1x64x64xbf16>
    %136 = vector.shape_cast %135 : vector<1x64x64xbf16> to vector<64x64xbf16>
    %cst_140 = arith.constant dense<0.000000e+00> : vector<80x64xf32>
    %137 = tpu.matmul %134, %136, %cst_140 {dimension_numbers = #tpu.dot_dimension_numbers<[1], [0], [0], [1], [0, 0, 1, 1], [], []>} : vector<80x64xbf16>, vector<64x64xbf16>, vector<80x64xf32> -> vector<80x64xf32>
    %138 = arith.addf %133, %137 : vector<80x64xf32>
    %c15 = arith.constant 15 : index
    %c0_141 = arith.constant 0 : index
    %139 = vector.load %arg12[%c15, %c0_141] : memref<112x64xbf16, #tpu.memory_space<vmem>>, vector<80x64xbf16>
    %c3_142 = arith.constant 3 : index
    %c0_143 = arith.constant 0 : index
    %c0_144 = arith.constant 0 : index
    %140 = vector.load %arg7[%c3_142, %c0_143, %c0_144] : memref<9x64x64xbf16, #tpu.memory_space<vmem>>, vector<1x64x64xbf16>
    %141 = vector.shape_cast %140 : vector<1x64x64xbf16> to vector<64x64xbf16>
    %cst_145 = arith.constant dense<0.000000e+00> : vector<80x64xf32>
    %142 = tpu.matmul %139, %141, %cst_145 {dimension_numbers = #tpu.dot_dimension_numbers<[1], [0], [0], [1], [0, 0, 1, 1], [], []>} : vector<80x64xbf16>, vector<64x64xbf16>, vector<80x64xf32> -> vector<80x64xf32>
    %143 = arith.addf %138, %142 : vector<80x64xf32>
    %c16_146 = arith.constant 16 : index
    %c0_147 = arith.constant 0 : index
    %144 = vector.load %arg12[%c16_146, %c0_147] : memref<112x64xbf16, #tpu.memory_space<vmem>>, vector<80x64xbf16>
    %c4_148 = arith.constant 4 : index
    %c0_149 = arith.constant 0 : index
    %c0_150 = arith.constant 0 : index
    %145 = vector.load %arg7[%c4_148, %c0_149, %c0_150] : memref<9x64x64xbf16, #tpu.memory_space<vmem>>, vector<1x64x64xbf16>
    %146 = vector.shape_cast %145 : vector<1x64x64xbf16> to vector<64x64xbf16>
    %cst_151 = arith.constant dense<0.000000e+00> : vector<80x64xf32>
    %147 = tpu.matmul %144, %146, %cst_151 {dimension_numbers = #tpu.dot_dimension_numbers<[1], [0], [0], [1], [0, 0, 1, 1], [], []>} : vector<80x64xbf16>, vector<64x64xbf16>, vector<80x64xf32> -> vector<80x64xf32>
    %148 = arith.addf %143, %147 : vector<80x64xf32>
    %c17 = arith.constant 17 : index
    %c0_152 = arith.constant 0 : index
    %149 = vector.load %arg12[%c17, %c0_152] : memref<112x64xbf16, #tpu.memory_space<vmem>>, vector<80x64xbf16>
    %c5_153 = arith.constant 5 : index
    %c0_154 = arith.constant 0 : index
    %c0_155 = arith.constant 0 : index
    %150 = vector.load %arg7[%c5_153, %c0_154, %c0_155] : memref<9x64x64xbf16, #tpu.memory_space<vmem>>, vector<1x64x64xbf16>
    %151 = vector.shape_cast %150 : vector<1x64x64xbf16> to vector<64x64xbf16>
    %cst_156 = arith.constant dense<0.000000e+00> : vector<80x64xf32>
    %152 = tpu.matmul %149, %151, %cst_156 {dimension_numbers = #tpu.dot_dimension_numbers<[1], [0], [0], [1], [0, 0, 1, 1], [], []>} : vector<80x64xbf16>, vector<64x64xbf16>, vector<80x64xf32> -> vector<80x64xf32>
    %153 = arith.addf %148, %152 : vector<80x64xf32>
    %c25 = arith.constant 25 : index
    %c0_157 = arith.constant 0 : index
    %154 = vector.load %arg12[%c25, %c0_157] : memref<112x64xbf16, #tpu.memory_space<vmem>>, vector<80x64xbf16>
    %c6_158 = arith.constant 6 : index
    %c0_159 = arith.constant 0 : index
    %c0_160 = arith.constant 0 : index
    %155 = vector.load %arg7[%c6_158, %c0_159, %c0_160] : memref<9x64x64xbf16, #tpu.memory_space<vmem>>, vector<1x64x64xbf16>
    %156 = vector.shape_cast %155 : vector<1x64x64xbf16> to vector<64x64xbf16>
    %cst_161 = arith.constant dense<0.000000e+00> : vector<80x64xf32>
    %157 = tpu.matmul %154, %156, %cst_161 {dimension_numbers = #tpu.dot_dimension_numbers<[1], [0], [0], [1], [0, 0, 1, 1], [], []>} : vector<80x64xbf16>, vector<64x64xbf16>, vector<80x64xf32> -> vector<80x64xf32>
    %158 = arith.addf %153, %157 : vector<80x64xf32>
    %c26 = arith.constant 26 : index
    %c0_162 = arith.constant 0 : index
    %159 = vector.load %arg12[%c26, %c0_162] : memref<112x64xbf16, #tpu.memory_space<vmem>>, vector<80x64xbf16>
    %c7_163 = arith.constant 7 : index
    %c0_164 = arith.constant 0 : index
    %c0_165 = arith.constant 0 : index
    %160 = vector.load %arg7[%c7_163, %c0_164, %c0_165] : memref<9x64x64xbf16, #tpu.memory_space<vmem>>, vector<1x64x64xbf16>
    %161 = vector.shape_cast %160 : vector<1x64x64xbf16> to vector<64x64xbf16>
    %cst_166 = arith.constant dense<0.000000e+00> : vector<80x64xf32>
    %162 = tpu.matmul %159, %161, %cst_166 {dimension_numbers = #tpu.dot_dimension_numbers<[1], [0], [0], [1], [0, 0, 1, 1], [], []>} : vector<80x64xbf16>, vector<64x64xbf16>, vector<80x64xf32> -> vector<80x64xf32>
    %163 = arith.addf %158, %162 : vector<80x64xf32>
    %c27 = arith.constant 27 : index
    %c0_167 = arith.constant 0 : index
    %164 = vector.load %arg12[%c27, %c0_167] : memref<112x64xbf16, #tpu.memory_space<vmem>>, vector<80x64xbf16>
    %c8_168 = arith.constant 8 : index
    %c0_169 = arith.constant 0 : index
    %c0_170 = arith.constant 0 : index
    %165 = vector.load %arg7[%c8_168, %c0_169, %c0_170] : memref<9x64x64xbf16, #tpu.memory_space<vmem>>, vector<1x64x64xbf16>
    %166 = vector.shape_cast %165 : vector<1x64x64xbf16> to vector<64x64xbf16>
    %cst_171 = arith.constant dense<0.000000e+00> : vector<80x64xf32>
    %167 = tpu.matmul %164, %166, %cst_171 {dimension_numbers = #tpu.dot_dimension_numbers<[1], [0], [0], [1], [0, 0, 1, 1], [], []>} : vector<80x64xbf16>, vector<64x64xbf16>, vector<80x64xf32> -> vector<80x64xf32>
    %168 = arith.addf %163, %167 : vector<80x64xf32>
    %c0_172 = arith.constant 0 : index
    %c0_173 = arith.constant 0 : index
    %169 = vector.load %arg8[%c0_172, %c0_173] : memref<1x64xf32, #tpu.memory_space<vmem>>, vector<1x64xf32>
    %170 = vector.broadcast %169 : vector<1x64xf32> to vector<80x64xf32>
    %171 = arith.addf %168, %170 : vector<80x64xf32>
    %cst_174 = arith.constant 0.000000e+00 : f32
    %172 = vector.broadcast %cst_174 : f32 to vector<80x64xf32>
    %173 = arith.maximumf %171, %172 : vector<80x64xf32>
    %174 = arith.truncf %173 : vector<80x64xf32> to vector<80x64xbf16>
    %c0_175 = arith.constant 0 : index
    %c0_176 = arith.constant 0 : index
    %175 = vector.load %arg9[%c0_175, %c0_176] : memref<64x6xbf16, #tpu.memory_space<vmem>>, vector<64x6xbf16>
    %cst_177 = arith.constant dense<0.000000e+00> : vector<80x6xf32>
    %176 = tpu.matmul %174, %175, %cst_177 {dimension_numbers = #tpu.dot_dimension_numbers<[1], [0], [0], [1], [0, 0, 1, 1], [], []>} : vector<80x64xbf16>, vector<64x6xbf16>, vector<80x6xf32> -> vector<80x6xf32>
    %c0_178 = arith.constant 0 : index
    %c0_179 = arith.constant 0 : index
    %177 = vector.load %arg10[%c0_178, %c0_179] : memref<1x6xf32, #tpu.memory_space<vmem>>, vector<1x6xf32>
    %178 = vector.broadcast %177 : vector<1x6xf32> to vector<80x6xf32>
    %179 = arith.addf %176, %178 : vector<80x6xf32>
    %c0_180 = arith.constant 0 : index
    %c0_181 = arith.constant 0 : index
    %c0_182 = arith.constant 0 : index
    %180 = vector.load %arg11[%c0_180, %c0_181, %c0_182] : memref<1x80x6xf32, #tpu.memory_space<vmem>>, vector<1x80x6xf32>
    %181 = vector.shape_cast %180 : vector<1x80x6xf32> to vector<80x6xf32>
    %182 = vector.shape_cast %179 : vector<80x6xf32> to vector<1x80x6xf32>
    tpu.vector_store %arg11[%c0_180, %c0_181, %c0_182], %182 {strides = array<i32>} : memref<1x80x6xf32, #tpu.memory_space<vmem>>, vector<1x80x6xf32>,
    return
  }
  func.func @transform_0(%arg0: i32) -> (i32, i32, i32) {
    %c0_i32 = arith.constant 0 : i32
    %c0_i32_0 = arith.constant 0 : i32
    %c0_i32_1 = arith.constant 0 : i32
    return %arg0, %c0_i32, %c0_i32_0 : i32, i32, i32
  }
  func.func @transform_1(%arg0: i32) -> (i32, i32, i32) {
    %c0_i32 = arith.constant 0 : i32
    %c0_i32_0 = arith.constant 0 : i32
    %c0_i32_1 = arith.constant 0 : i32
    return %arg0, %c0_i32, %c0_i32_0 : i32, i32, i32
  }
  func.func @transform_2(%arg0: i32) -> (i32, i32) {
    %c0_i32 = arith.constant 0 : i32
    %c0_i32_0 = arith.constant 0 : i32
    %c0_i32_1 = arith.constant 0 : i32
    return %c0_i32, %c0_i32_0 : i32, i32
  }
  func.func @transform_3(%arg0: i32) -> (i32, i32, i32) {
    %c0_i32 = arith.constant 0 : i32
    %c0_i32_0 = arith.constant 0 : i32
    %c0_i32_1 = arith.constant 0 : i32
    %c0_i32_2 = arith.constant 0 : i32
    return %c0_i32, %c0_i32_0, %c0_i32_1 : i32, i32, i32
  }
  func.func @transform_4(%arg0: i32) -> (i32, i32, i32) {
    %c0_i32 = arith.constant 0 : i32
    %c0_i32_0 = arith.constant 0 : i32
    %c0_i32_1 = arith.constant 0 : i32
    %c0_i32_2 = arith.constant 0 : i32
    return %c0_i32, %c0_i32_0, %c0_i32_1 : i32, i32, i32
  }
  func.func @transform_5(%arg0: i32) -> (i32, i32) {
    %c0_i32 = arith.constant 0 : i32
    %c0_i32_0 = arith.constant 0 : i32
    %c0_i32_1 = arith.constant 0 : i32
    return %c0_i32, %c0_i32_0 : i32, i32
  }
  func.func @transform_6(%arg0: i32) -> (i32, i32, i32) {
    %c0_i32 = arith.constant 0 : i32
    %c0_i32_0 = arith.constant 0 : i32
    %c0_i32_1 = arith.constant 0 : i32
    %c0_i32_2 = arith.constant 0 : i32
    return %c0_i32, %c0_i32_0, %c0_i32_1 : i32, i32, i32
  }
  func.func @transform_7(%arg0: i32) -> (i32, i32) {
    %c0_i32 = arith.constant 0 : i32
    %c0_i32_0 = arith.constant 0 : i32
    %c0_i32_1 = arith.constant 0 : i32
    return %c0_i32, %c0_i32_0 : i32, i32
  }
  func.func @transform_8(%arg0: i32) -> (i32, i32) {
    %c0_i32 = arith.constant 0 : i32
    %c0_i32_0 = arith.constant 0 : i32
    %c0_i32_1 = arith.constant 0 : i32
    return %c0_i32, %c0_i32_0 : i32, i32
  }
  func.func @transform_9(%arg0: i32) -> (i32, i32) {
    %c0_i32 = arith.constant 0 : i32
    %c0_i32_0 = arith.constant 0 : i32
    %c0_i32_1 = arith.constant 0 : i32
    return %c0_i32, %c0_i32_0 : i32, i32
  }
  func.func @transform_10(%arg0: i32) -> (i32, i32, i32) {
    %c0_i32 = arith.constant 0 : i32
    %c0_i32_0 = arith.constant 0 : i32
    %c0_i32_1 = arith.constant 0 : i32
    return %arg0, %c0_i32, %c0_i32_0 : i32, i32, i32
  }
}

</mosaic_0001>

<bundles_post_ra>
// kernel: tile.8
= control target key start
LH: loop header
LB: loop body
LE: loop exit
PB: predicated region body
PF: predicated region fallthrough
CT: control target
= control target key end

     0   :  { %s22_s0 = inlined_call_operand.vmem [shape: f32[10], index: 0, kind: input, shape index: {}]   ;;  %s23_s1 = inlined_call_operand.vmem [shape: f32[8,10], index: 1, kind: output, shape index: {}]  }
   0x1   :  { %v4_v0 = vld [vmem:[%s22_s0] ss:$0 sm:$0xff] }
   0x2   :  { %5 = vst [vmem:[%s23_s1] sm:$0xff] %v4_v0 }

// kernel: tile.0
= control target key start
LH: loop header
LB: loop body
LE: loop exit
PB: predicated region body
PF: predicated region fallthrough
CT: control target
= control target key end

     0   :  { %s140_s10 = smov 125   ;;  %vm3_vm0 = vcmask 7168   ;;  %s141_s11 = smov 127   ;;  %s295_s0 = inlined_call_operand.vmem [shape: f32[8,10], index: 0, kind: input, shape index: {}]   ;;  %s296_s1 = inlined_call_operand.vmem [shape: f32[80,1], index: 1, kind: output, shape index: {}]  }
   0x1   :  { %v29_v0 = vld.sshfl [vmem:[%s295_s0] sm:$0xff pattern:$0x62514703]   ;;  %s143_s18 = smov 124   ;;  %s144_s19 = smov 126  }
   0x2   :  { %v5_v1 = vld.sshfl [vmem:[%s295_s0] sm:$0xff pattern:$0x36251470]   ;;  %30 = vrot.lane.b32.xlu1 %v29_v0, %s140_s10  ;;  %s145_s20 = smov 122   ;;  %s146_s21 = smov 120  }
   0x3   :  { %6 = vrot.lane.b32.xlu0 %v5_v1, %s141_s11  ;;  %v2_v2 = vld [vmem:[%s295_s0] sm:$0xff]   ;;  %s147_s22 = smov 121   ;;  %s148_s23 = smov 119  }
   0x4   :  { %4 = vst.msk [vmem:[%s296_s1] ss:$10 sm:$0xff] %vm3_vm0, %v2_v2   ;;  %v41_v3 = vld.sshfl [vmem:[%s295_s0] sm:$0xff pattern:$0x25147036]   ;;  %s142_s0 = smov 123  }
   0x5   :  { %52 = vrot.lane.b32.xlu2 %v41_v3, %s142_s0 }
   0xa   :  { %42 = vrot.lane.b32.xlu1 %v41_v3, %s143_s18 }
   0xb   :  { %18 = vrot.lane.b32.xlu0 %v29_v0, %s144_s19 }
   0xd   :  { %62 = vrot.lane.b32.xlu2 %v41_v3, %s145_s20 }
  0x12   :  { %82 = vrot.lane.b32.xlu1 %v41_v3, %s146_s21 }
  0x13   :  { %72 = vrot.lane.b32.xlu0 %v41_v3, %s147_s22 }
  0x15   :  { %92 = vrot.lane.b32.xlu2 %v41_v3, %s148_s23 }
  0x5f   :  { %v53_v4 = vpop.permute.xlu2 %52  }
  0x60   :  { %116 = vst.msk [vmem:[%s296_s1 + $0x41] ss:$-30 sm:$0x7] %vm3_vm0, %v53_v4  }
  0x61   :  { %117 = vst.msk [vmem:[%s296_s1 + $0xa5] ss:$-30 sm:$0x38] %vm3_vm0, %v53_v4  }
  0x62   :  { %118 = vst.msk [vmem:[%s296_s1 + $0xeb] ss:$-30 sm:$0xc0] %vm3_vm0, %v53_v4  }
  0x67   :  { %v63_v5 = vpop.permute.xlu2 %62  }
  0x68   :  { %119 = vst.msk [vmem:[%s296_s1 + $0x42] ss:$-30 sm:$0x7] %vm3_vm0, %v63_v5  }
  0x69   :  { %120 = vst.msk [vmem:[%s296_s1 + $0xa6] ss:$-30 sm:$0x38] %vm3_vm0, %v63_v5  }
  0x6a   :  { %121 = vst.msk [vmem:[%s296_s1 + $0xec] ss:$-30 sm:$0xc0] %vm3_vm0, %v63_v5  }
  0x6f   :  { %v93_v6 = vpop.permute.xlu2 %92  }
  0x70   :  { %128 = vst.msk [vmem:[%s296_s1 + $0x45] ss:$-30 sm:$0x7] %vm3_vm0, %v93_v6  }
  0x71   :  { %129 = vst.msk [vmem:[%s296_s1 + $0xa9] ss:$-30 sm:$0x38] %vm3_vm0, %v93_v6  }
  0x72   :  { %130 = vst.msk [vmem:[%s296_s1 + $0xef] ss:$-30 sm:$0xc0] %vm3_vm0, %v93_v6  }
  0x74   :  { %v31_v7 = vpop.permute.xlu1 %30  }
  0x75   :  { %v7_v8 = vpop.permute.xlu0 %6   ;;  %109 = vst.msk [vmem:[%s296_s1 + $0x21] ss:$-30 sm:$0x3] %vm3_vm0, %v31_v7  }
  0x76   :  { %110 = vst.msk [vmem:[%s296_s1 + $0x85] ss:$-30 sm:$0x1c] %vm3_vm0, %v31_v7  }
  0x77   :  { %111 = vst.msk [vmem:[%s296_s1 + $0xcb] ss:$-30 sm:$0x60] %vm3_vm0, %v31_v7  }
  0x78   :  { %112 = vst.msk [vmem:[%s296_s1 + $0x38] sm:$0x80] %vm3_vm0, %v31_v7  }
  0x79   :  { %101 = vst.msk [vmem:[%s296_s1 + $0x1] ss:$70 sm:$0x3] %vm3_vm0, %v7_v8  }
  0x7a   :  { %102 = vst.msk [vmem:[%s296_s1 + $0x65] ss:$-30 sm:$0xc] %vm3_vm0, %v7_v8  }
  0x7b   :  { %103 = vst.msk [vmem:[%s296_s1 + $0xab] ss:$-30 sm:$0x30] %vm3_vm0, %v7_v8  }
  0x7c   :  { %104 = vst.msk [vmem:[%s296_s1 + $0xf1] ss:$-30 sm:$0xc0] %vm3_vm0, %v7_v8   ;;  %v43_v9 = vpop.permute.xlu1 %42  }
  0x7d   :  { %v19_v10 = vpop.permute.xlu0 %18   ;;  %113 = vst.msk [vmem:[%s296_s1 + $0x40] ss:$-30 sm:$0x7] %vm3_vm0, %v43_v9  }
  0x7e   :  { %114 = vst.msk [vmem:[%s296_s1 + $0xa4] ss:$-30 sm:$0x38] %vm3_vm0, %v43_v9  }
  0x7f   :  { %115 = vst.msk [vmem:[%s296_s1 + $0xea] ss:$-30 sm:$0xc0] %vm3_vm0, %v43_v9  }
  0x80   :  { %105 = vst.msk [vmem:[%s296_s1 + $0x20] ss:$-30 sm:$0x3] %vm3_vm0, %v19_v10  }
  0x81   :  { %106 = vst.msk [vmem:[%s296_s1 + $0x84] ss:$-30 sm:$0x1c] %vm3_vm0, %v19_v10  }
  0x82   :  { %107 = vst.msk [vmem:[%s296_s1 + $0xca] ss:$-30 sm:$0x60] %vm3_vm0, %v19_v10  }
  0x83   :  { %108 = vst.msk [vmem:[%s296_s1 + $0x37] sm:$0x80] %vm3_vm0, %v19_v10  }
  0x84   :  { %v83_v11 = vpop.permute.xlu1 %82  }
  0x85   :  { %v73_v12 = vpop.permute.xlu0 %72   ;;  %125 = vst.msk [vmem:[%s296_s1 + $0x44] ss:$-30 sm:$0x7] %vm3_vm0, %v83_v11  }
  0x86   :  { %126 = vst.msk [vmem:[%s296_s1 + $0xa8] ss:$-30 sm:$0x38] %vm3_vm0, %v83_v11  }
  0x87   :  { %127 = vst.msk [vmem:[%s296_s1 + $0xee] ss:$-30 sm:$0xc0] %vm3_vm0, %v83_v11  }
  0x88   :  { %122 = vst.msk [vmem:[%s296_s1 + $0x43] ss:$-30 sm:$0x7] %vm3_vm0, %v73_v12  }
  0x89   :  { %123 = vst.msk [vmem:[%s296_s1 + $0xa7] ss:$-30 sm:$0x38] %vm3_vm0, %v73_v12  }
  0x8a   :  { %124 = vst.msk [vmem:[%s296_s1 + $0xed] ss:$-30 sm:$0xc0] %vm3_vm0, %v73_v12  }

// kernel: feedformer_decoder_forward.2
= control target key start
LH: loop header
LB: loop body
LE: loop exit
PB: predicated region body
PF: predicated region fallthrough
CT: control target
= control target key end

     0   :  { %s3499_s18 = smov 0   ;;  %s4222_s0 = inlined_call_operand.vmem [shape: bf16[2,64,24], index: 0, kind: input, shape index: {}]   ;;  %s4223_s1 = inlined_call_operand.vmem [shape: bf16[24,48], index: 1, kind: input, shape index: {}]   ;;  %s4224_s2 = inlined_call_operand.vmem [shape: f32[1,48], index: 2, kind: input, shape index: {}]   ;;  %s4225_s3 = inlined_call_operand.vmem [shape: bf16[4,48,12], index: 3, kind: input, shape index: {}]   ;;  %s4226_s4 = inlined_call_operand.vmem [shape: bf16[4,48,12], index: 4, kind: input, shape index: {}]   ;;  %s4227_s5 = inlined_call_operand.vmem [shape: bf16[4,48,12], index: 5, kind: input, shape index: {}]   ;;  %s4228_s6 = inlined_call_operand.vmem [shape: f32[4,1,12], index: 6, kind: input, shape index: {}]   ;;  %s4229_s7 = inlined_call_operand.vmem [shape: f32[4,1,12], index: 7, kind: input, shape index: {}]   ;;  %s4230_s8 = inlined_call_operand.vmem [shape: f32[4,1,12], index: 8, kind: input, shape index: {}]   ;;  %s4231_s9 = inlined_call_operand.vmem [shape: bf16[4,12,48], index: 9, kind: input, shape index: {}]   ;;  %s4232_s10 = inlined_call_operand.vmem [shape: f32[1,48], index: 10, kind: input, shape index: {}]   ;;  %s4233_s11 = inlined_call_operand.vmem [shape: bf16[48,192], index: 11, kind: input, shape index: {}]   ;;  %s4234_s12 = inlined_call_operand.vmem [shape: f32[1,192], index: 12, kind: input, shape index: {}]   ;;  %s4235_s13 = inlined_call_operand.vmem [shape: bf16[192,48], index: 13, kind: input, shape index: {}]   ;;  %s4236_s14 = inlined_call_operand.vmem [shape: f32[1,48], index: 14, kind: input, shape index: {}]   ;;  %s4237_s15 = inlined_call_operand.vmem [shape: bf16[2,64,48], index: 15, kind: output, shape index: {}]  }
   0x1 LB: > { %s2749_s19 = sadd.s32 4294967295, %s3417_s18   ;;  %p2753_p0 = scmp.ge.s32.totalorder %s3417_s18, 1  ;;  %s3417_s18 = sphi %s3499_s18, %s25_s18  }
   0x2   : > { %p437_p1 = scmp.lt.s32.totalorder %s3417_s18, 3 }
   0x4   : > { %p438_p2 = pnand %p2753_p0, %p437_p1 }
   0x5   : > { %p485_p3 = scmp.lt.s32.totalorder (!%p438_p2), %s2749_s19, 1 }
   0x6   : > { %441 = sbr.rel (%p438_p2) target bundleno = 3125 (0xc35), region = 80 }
   0xb   : > { %v506_v0 = vld [vmem:[%s4223_s1 + $0x8] sm:$0xf]  ;;  %vm553_vm0 = vcmask 1043456   ;;  %s4243_s19 = smov (!%p485_p3, %s2749_s19), 1  ;;  %v3199_v4 = vld [vmem:[%s4223_s1] sm:$0xff]  ;;  %vm540_vm1 = vcmask 195584  }
   0xc   : > { %v536_v1 = vunpack.c.l.b16 %v506_v0  ;;  %s3193_s22 = sshll.u32 %s4243_s19, 5  ;;  %v3202_v9 = vld [vmem:[%s4225_s3 + $0x10] sm:$0xff]  ;;  %v3201_v12 = vld [vmem:[%s4225_s3 + $0x8] sm:$0xff]  ;;  %v3200_v15 = vld [vmem:[%s4225_s3] sm:$0xff]  ;;  %vm626_vm2 = vcmask 392192   ;;  %vm790_vm3 = vcmask 97280  }
   0xd   : > { %s489_s27 = scalar_lea.vmem %s4222_s0, %s3193_s22  ;;  %v3205_v10 = vld [vmem:[%s4226_s4 + $0x10] sm:$0xff]  ;;  %v3204_v13 = vld [vmem:[%s4226_s4 + $0x8] sm:$0xff]  ;;  %v3203_v16 = vld [vmem:[%s4226_s4] sm:$0xff]  ;;  %vm844_vm4 = vcmask 523264   ;;  %vm1387_vm5 = vcmask 1045504   ;;  %s4201_s30 = scalar_lea.vmem %s4237_s15, %s3193_s22  ;;  %vm2685_vm6 = vcmask 388096  }
   0xe   : > { %v538_v2 = vpack.c.b16 %v536_v1, %v536_v1  ;;  %v3195_v5 = vld [vmem:[%s489_s27] sm:$0xff]  ;;  %v3197_v6 = vld [vmem:[%s489_s27 + $0x10] sm:$0xff]  ;;  %v3196_v7 = vld [vmem:[%s489_s27 + $0x8] sm:$0xff]  ;;  %701 = vmatpush.bf16.msra.mxu2 %v3205_v10 }
   0xf   : > { %v3198_v8 = vld [vmem:[%s489_s27 + $0x18] sm:$0xff]  ;;  %v3208_v11 = vld [vmem:[%s4227_s5 + $0x10] sm:$0xff]  ;;  %v3207_v14 = vld [vmem:[%s4227_s5 + $0x8] sm:$0xff] }
  0x10   : > { %v555_v3 = vsel %vm553_vm0, %v538_v2, 0  ;;  %758 = vmatpush.bf16.msra.mxu3 %v3208_v11  ;;  %v3206_v17 = vld [vmem:[%s4227_s5] sm:$0xff]  ;;  %v3212_v35 = vld [vmem:[%s4225_s3 + $0x28] sm:$0xff]  ;;  %v3210_v41 = vld [vmem:[%s4225_s3 + $0x18] sm:$0xff] }
  0x11   : > { %563 = vmatpush.bf16.msra.mxu0 %v555_v3  ;;  %3258 = vmatpush.bf16.msra.mxu1 %v555_v3  ;;  %v3268_v19 = vld [vmem:[%s4224_s2] ss:$0 sm:$0xff]  ;;  %v3215_v36 = vld [vmem:[%s4226_s4 + $0x28] sm:$0xff]  ;;  %v3213_v42 = vld [vmem:[%s4226_s4 + $0x18] sm:$0xff] }
  0x12   : > { %702 = vmatpush.bf16.msra.mxu2 %v3204_v13  ;;  %v3211_v37 = vld [vmem:[%s4225_s3 + $0x20] sm:$0xff] }
  0x13   : > { %v3214_v38 = vld [vmem:[%s4226_s4 + $0x20] sm:$0xff] }
  0x14   : > { %759 = vmatpush.bf16.msra.mxu3 %v3207_v14  ;;  %v3270_v3 = vld [vmem:[%s4229_s7] ss:$0 sm:$0xff] }
  0x15   : > { %564 = vmatpush.bf16.msra.mxu0 %v3199_v4  ;;  %3259 = vmatpush.bf16.msra.mxu1 %v3199_v4  ;;  %v3271_v4 = vld [vmem:[%s4230_s8] ss:$0 sm:$0xff] }
  0x16   : > { %703 = vmatpush.bf16.msra.mxu2 %v3203_v16 }
  0x18   : > { %2778 = vmatmul.msk.bf16.vlgmr.msra.gmra.mxu0 %vm540_vm1, %v3195_v5  ;;  %2780 = vmatmul.msk.bf16.vlgmr.msra.gmra.mxu1 %vm540_vm1, %v3197_v6 }
  0x19   : > { %644 = vmatpush.bf16.msrb.mxu1 %v3202_v9  ;;  %760 = vmatpush.bf16.msra.mxu3 %v3206_v17 }
  0x1a   : > { %1023 = vmatpush.bf16.msrb.mxu2 %v3212_v35 }
  0x1d   : > { %645 = vmatpush.bf16.msrb.mxu1 %v3201_v12  ;;  %1082 = vmatpush.bf16.msrb.mxu3 %v3215_v36 }
  0x1e   : > { %1024 = vmatpush.bf16.msrb.mxu2 %v3211_v37 }
  0x21   : > { %646 = vmatpush.bf16.msrb.mxu1 %v3200_v15  ;;  %1083 = vmatpush.bf16.msrb.mxu3 %v3214_v38 }
  0x22   : > { %1025 = vmatpush.bf16.msrb.mxu2 %v3210_v41 }
  0x25   : > { %1084 = vmatpush.bf16.msrb.mxu3 %v3213_v42 }
  0x28   : > { %2779 = vmatmul.msk.bf16.gmra.mxu0 %vm540_vm1, %v3196_v7  ;;  %2781 = vmatmul.msk.bf16.gmra.mxu1 %vm540_vm1, %v3198_v8 }
  0x95   : > { %v566_v18 = vpop.f32.mrf.mxu0  ;;  %v576_v27 = vpop.f32.mrf.mxu1 }
  0x96   : > { %v3551_v20 = vadd.f32 %v3268_v19, %v566_v18  ;;  %v3599_v39 = vadd.f32 %v3268_v19, %v576_v27 }
  0x98   : > { %v586_v23 = vmax.f32 %v3551_v20, 0.0  ;;  %v590_v44 = vmax.f32 %v3599_v39, 0.0 }
  0x9d   : > { %v568_v21 = vpop.f32.mrf.mxu0  ;;  %v578_v34 = vpop.f32.mrf.mxu1 }
  0x9e   : > { %v3553_v22 = vadd.f32 %v3268_v19, %v568_v21  ;;  %v3601_v40 = vadd.f32 %v3268_v19, %v578_v34 }
  0xa0   : > { %v587_v24 = vmax.f32 %v3553_v22, 0.0  ;;  %v591_v45 = vmax.f32 %v3601_v40, 0.0 }
  0xa2   : > { %v3561_v25 = vpack.c.bf16 %v587_v24, %v586_v23  ;;  %v3615_v46 = vpack.c.bf16 %v591_v45, %v590_v44 }
  0xa4   : > { %2794 = vmatmul.msk.bf16.vlgmr.msrb.gmra.mxu1 %vm626_vm2, %v3561_v25  ;;  %2810 = vmatmul.msk.bf16.vlgmr.msra.gmra.mxu2 %vm626_vm2, %v3561_v25 }
  0xa5   : > { %2826 = vmatmul.msk.bf16.vlgmr.msra.gmra.mxu3 %vm626_vm2, %v3561_v25  ;;  %v571_v26 = vpop.f32.mrf.mxu0  ;;  %v581_v43 = vpop.f32.mrf.mxu1 }
  0xa6   : > { %v3569_v28 = vadd.f32 %v3268_v19, %v571_v26  ;;  %v3623_v48 = vadd.f32 %v3268_v19, %v581_v43 }
  0xa8   : > { %v588_v31 = vmax.f32 %v3569_v28, 0.0  ;;  %v4239_v50 = vmax.f32 %v3623_v48, 0.0  ;;  %v3252_v28 = vld [vmem:[%s4235_s13 + $0x30] sm:$0xff]  ;;  %v4240_v40 = vmax.f32 %v3623_v48, 0.0  ;;  %v3247_v48 = vld [vmem:[%s4235_s13 + $0x8] sm:$0xff] }
  0xad   : > { %v573_v29 = vpop.f32.mrf.mxu0  ;;  %v583_v47 = vpop.f32.mrf.mxu1 }
  0xae   : > { %v3571_v30 = vadd.f32 %v3268_v19, %v573_v29  ;;  %v3625_v49 = vadd.f32 %v3268_v19, %v583_v47 }
  0xb0   : > { %v589_v32 = vmax.f32 %v3571_v30, 0.0  ;;  %v4238_v51 = vmax.f32 %v3625_v49, 0.0 }
  0xb2   : > { %v3579_v33 = vpack.c.bf16 %v589_v32, %v588_v31  ;;  %v3633_v52 = vpack.c.bf16 %v4238_v51, %v4239_v50 }
  0xb4   : > { %2795 = vmatmul.msk.bf16.gmra.mxu1 %vm626_vm2, %v3579_v33  ;;  %2811 = vmatmul.msk.bf16.gmra.mxu2 %vm626_vm2, %v3579_v33 }
  0xb5   : > { %2827 = vmatmul.msk.bf16.gmra.mxu3 %vm626_vm2, %v3579_v33 }
  0xc4   : > { %2796 = vmatmul.msk.bf16.gmra.mxu1 %vm626_vm2, %v3615_v46  ;;  %2812 = vmatmul.msk.bf16.gmra.mxu2 %vm626_vm2, %v3615_v46 }
  0xc5   : > { %2828 = vmatmul.msk.bf16.gmra.mxu3 %vm626_vm2, %v3615_v46 }
  0xd4   : > { %2797 = vmatmul.msk.bf16.gmra.mxu1 %vm626_vm2, %v3633_v52  ;;  %2813 = vmatmul.msk.bf16.gmra.mxu2 %vm626_vm2, %v3633_v52 }
  0xd5   : > { %2829 = vmatmul.msk.bf16.gmra.mxu3 %vm626_vm2, %v3633_v52 }
  0xe4   : > { %2857 = vmatmul.msk.bf16.vlgmr.msrb.gmra.mxu2 %vm626_vm2, %v3561_v25 }
  0xe5   : > { %2880 = vmatmul.msk.bf16.vlgmr.msrb.gmra.mxu3 %vm626_vm2, %v3561_v25 }
  0xf4   : > { %2858 = vmatmul.msk.bf16.gmra.mxu2 %vm626_vm2, %v3579_v33 }
  0xf5   : > { %2881 = vmatmul.msk.bf16.gmra.mxu3 %vm626_vm2, %v3579_v33 }
 0x104   : > { %2859 = vmatmul.msk.bf16.gmra.mxu2 %vm626_vm2, %v3615_v46 }
 0x105   : > { %2882 = vmatmul.msk.bf16.gmra.mxu3 %vm626_vm2, %v3615_v46 }
 0x114   : > { %2860 = vmatmul.msk.bf16.gmra.mxu2 %vm626_vm2, %v3633_v52 }
 0x115   : > { %2883 = vmatmul.msk.bf16.gmra.mxu3 %vm626_vm2, %v3633_v52 }
 0x121   : > { %v648_v16 = vpop.f32.mrf.mxu1 }
 0x127   : > { %v705_v53 = vpop.f32.mrf.mxu2 }
 0x128   : > { %v762_v54 = vpop.f32.mrf.mxu3 }
 0x129   : > { %v763_v38 = vadd.f32 %v3271_v4, %v762_v54  ;;  %v650_v42 = vpop.f32.mrf.mxu1  ;;  %v3269_v54 = vld [vmem:[%s4228_s6] ss:$0 sm:$0xff] }
 0x12f   : > { %v707_v55 = vpop.f32.mrf.mxu2 }
 0x130   : > { %v764_v56 = vpop.f32.mrf.mxu3 }
 0x131   : > { %v765_v34 = vadd.f32 %v3271_v4, %v764_v56 }
 0x133   : > { %v937_v43 = vpack.c.bf16 %v765_v34, %v763_v38 }
 0x137   : > { %v710_v57 = vpop.f32.mrf.mxu2 }
 0x138   : > { %v767_v58 = vpop.f32.mrf.mxu3  ;;  %v711_v41 = vadd.f32 %v3270_v3, %v710_v57  ;;  %v651_v57 = vadd.f32 %v3269_v54, %v650_v42 }
 0x139   : > { %v768_v29 = vadd.f32 %v3271_v4, %v767_v58  ;;  %v706_v58 = vadd.f32 %v3270_v3, %v705_v53 }
 0x13f   : > { %v712_v59 = vpop.f32.mrf.mxu2 }
 0x140   : > { %v769_v60 = vpop.f32.mrf.mxu3  ;;  %v713_v36 = vadd.f32 %v3270_v3, %v712_v59 }
 0x141   : > { %v770_v19 = vadd.f32 %v3271_v4, %v769_v60  ;;  %v708_v60 = vadd.f32 %v3270_v3, %v707_v55 }
 0x143   : > { %v938_v35 = vpack.c.bf16 %v770_v19, %v768_v29  ;;  %v786_v56 = vpack.c.bf16 %v708_v60, %v706_v58 }
 0x145   : > { %v804_v59 = vsel %vm790_vm3, %v786_v56, 0 }
 0x147   : > { %v715_v61 = vpop.f32.mrf.mxu2 }
 0x148   : > { %v772_v62 = vpop.f32.mrf.mxu3  ;;  %v716_v18 = vadd.f32 %v3270_v3, %v715_v61  ;;  %v787_v61 = vpack.c.bf16 %v713_v36, %v711_v41 }
 0x149   : > { %v773_v17 = vadd.f32 %v3271_v4, %v772_v62 }
 0x14a   : > { %v807_v62 = vsel %vm790_vm3, %v787_v61, 0 }
 0x14f   : > { %v717_v63 = vpop.f32.mrf.mxu2 }
 0x150   : > { %v774_v0 = vpop.f32.mrf.mxu3  ;;  %v718_v14 = vadd.f32 %v3270_v3, %v717_v63 }
 0x151   : > { %v775_v12 = vadd.f32 %v3271_v4, %v774_v0  ;;  %v653_v0 = vpop.f32.mrf.mxu1 }
 0x152   : > { %v788_v27 = vpack.c.bf16 %v718_v14, %v716_v18  ;;  %v3216_v14 = vld [vmem:[%s4227_s5 + $0x18] sm:$0xff] }
 0x153   : > { %v939_v21 = vpack.c.bf16 %v775_v12, %v773_v17  ;;  %v3217_v12 = vld [vmem:[%s4227_s5 + $0x20] sm:$0xff] }
 0x154   : > { %v810_v37 = vsel %vm790_vm3, %v788_v27, 0 }
 0x157   : > { %v720_v1 = vpop.f32.mrf.mxu2 }
 0x158   : > { %v777_v2 = vpop.f32.mrf.mxu3  ;;  %v721_v6 = vadd.f32 %v3270_v3, %v720_v1  ;;  %v649_v1 = vadd.f32 %v3269_v54, %v648_v16 }
 0x159   : > { %v778_v9 = vadd.f32 %v3271_v4, %v777_v2 }
 0x15f   : > { %v722_v5 = vpop.f32.mrf.mxu2 }
 0x160   : > { %v723_v7 = vadd.f32 %v3270_v3, %v722_v5  ;;  %v779_v8 = vpop.f32.mrf.mxu3  ;;  %v655_v5 = vpop.f32.mrf.mxu1  ;;  %v654_v3 = vadd.f32 %v3269_v54, %v653_v0 }
 0x161   : > { %v780_v10 = vadd.f32 %v3271_v4, %v779_v8  ;;  %v782_v4 = vpack.c.bf16 %v651_v57, %v649_v1  ;;  %v656_v53 = vadd.f32 %v3269_v54, %v655_v5 }
 0x162   : > { %v789_v11 = vpack.c.bf16 %v723_v7, %v721_v6 }
 0x163   : > { %v940_v13 = vpack.c.bf16 %v780_v10, %v778_v9  ;;  %v783_v8 = vpack.c.bf16 %v656_v53, %v654_v3  ;;  %v3218_v9 = vld [vmem:[%s4227_s5 + $0x28] sm:$0xff] }
 0x164   : > { %v813_v15 = vsel %vm790_vm3, %v789_v11, 0 }
 0x165   : > { %957 = vmatpush.bf16.msra.mxu1 %v940_v13  ;;  %819 = vmatpush.bf16.xpose.msrb.mxu0 %v813_v15  ;;  %v3273_v15 = vld [vmem:[%s4229_s7 + $0x1] ss:$0 sm:$0xff] }
 0x168   : > { %v3664_v26 = vpop.f32.mrf.mxu3  ;;  %v658_v6 = vpop.f32.mrf.mxu1 }
 0x169   : > { %958 = vmatpush.bf16.msra.mxu1 %v939_v21  ;;  %v659_v16 = vadd.f32 %v3269_v54, %v658_v6 }
 0x16d   : > { %959 = vmatpush.bf16.msra.mxu1 %v938_v35  ;;  %820 = vmatpush.bf16.xpose.msrb.mxu0 %v810_v37 }
 0x170   : > { %v1088_v47 = vpop.f32.mrf.mxu3  ;;  %v660_v10 = vpop.f32.mrf.mxu1 }
 0x171   : > { %960 = vmatpush.bf16.msra.mxu1 %v937_v43  ;;  %v661_v13 = vadd.f32 %v3269_v54, %v660_v10  ;;  %v1089_v56 = vadd.f32 %v3273_v15, %v1088_v47 }
 0x173   : > { %v784_v27 = vpack.c.bf16 %v661_v13, %v659_v16 }
 0x175   : > { %821 = vmatpush.bf16.xpose.msrb.mxu0 %v807_v62 }
 0x178   : > { %v1091_v63 = vpop.f32.mrf.mxu3  ;;  %v663_v18 = vpop.f32.mrf.mxu1 }
 0x179   : > { %v1092_v61 = vadd.f32 %v3273_v15, %v1091_v63  ;;  %v664_v60 = vadd.f32 %v3269_v54, %v663_v18 }
 0x17d   : > { %822 = vmatpush.bf16.xpose.msrb.mxu0 %v804_v59  ;;  %v1087_v59 = vadd.f32 %v3273_v15, %v3664_v26 }
 0x17f   : > { %v1169_v57 = vpack.c.bf16 %v1089_v56, %v1087_v59 }
 0x180   : > { %v1093_v2 = vpop.f32.mrf.mxu3  ;;  %v665_v38 = vpop.f32.mrf.mxu1 }
 0x181   : > { %v1094_v41 = vadd.f32 %v3273_v15, %v1093_v2  ;;  %v666_v43 = vadd.f32 %v3269_v54, %v665_v38  ;;  %v1186_v1 = vsel %vm790_vm3, %v1169_v57, 0 }
 0x183   : > { %v1170_v62 = vpack.c.bf16 %v1094_v41, %v1092_v61  ;;  %v785_v58 = vpack.c.bf16 %v666_v43, %v664_v60 }
 0x184   : > { %2830 = vmatmul.msk.bf16.vlgmr.msrb.gmra.mxu0 %vm790_vm3, %v782_v4 }
 0x185   : > { %1141 = vmatpush.bf16.msra.mxu0 %v3218_v9  ;;  %v1189_v0 = vsel %vm790_vm3, %v1170_v62, 0 }
 0x188   : > { %v1096_v55 = vpop.f32.mrf.mxu3 }
 0x189   : > { %1142 = vmatpush.bf16.msra.mxu0 %v3217_v12  ;;  %v1097_v36 = vadd.f32 %v3273_v15, %v1096_v55 }
 0x18d   : > { %1143 = vmatpush.bf16.msra.mxu0 %v3216_v14 }
 0x190   : > { %v1098_v7 = vpop.f32.mrf.mxu3 }
 0x191   : > { %v1099_v34 = vadd.f32 %v3273_v15, %v1098_v7 }
 0x193   : > { %v1171_v37 = vpack.c.bf16 %v1099_v34, %v1097_v36 }
 0x194   : > { %2831 = vmatmul.msk.bf16.gmra.mxu0 %vm790_vm3, %v783_v8 }
 0x195   : > { %v1192_v42 = vsel %vm790_vm3, %v1171_v37, 0 }
 0x198   : > { %v1101_v11 = vpop.f32.mrf.mxu3 }
 0x199   : > { %v1102_v19 = vadd.f32 %v3273_v15, %v1101_v11 }
 0x1a0   : > { %v1103_v17 = vpop.f32.mrf.mxu3 }
 0x1a1   : > { %v1104_v21 = vadd.f32 %v3273_v15, %v1103_v17 }
 0x1a3   : > { %v1172_v29 = vpack.c.bf16 %v1104_v21, %v1102_v19 }
 0x1a4   : > { %2832 = vmatmul.msk.bf16.gmra.mxu0 %vm790_vm3, %v784_v27  ;;  %v3274_v27 = vld [vmem:[%s4230_s8 + $0x1] ss:$0 sm:$0xff] }
 0x1a5   : > { %v1195_v35 = vsel %vm790_vm3, %v1172_v29, 0 }
 0x1a6   : > { %1201 = vmatpush.bf16.xpose.msrb.mxu1 %v1195_v35 }
 0x1ae   : > { %1202 = vmatpush.bf16.xpose.msrb.mxu1 %v1192_v42 }
 0x1b4   : > { %2833 = vmatmul.msk.bf16.gmra.mxu0 %vm790_vm3, %v785_v58 }
 0x1b6   : > { %1203 = vmatpush.bf16.xpose.msrb.mxu1 %v1189_v0 }
 0x1be   : > { %1204 = vmatpush.bf16.xpose.msrb.mxu1 %v1186_v1 }
 0x1c4   : > { %2903 = vmatmul.msk.bf16.vlgmr.msra.gmra.mxu0 %vm626_vm2, %v3561_v25 }
 0x1d4   : > { %2904 = vmatmul.msk.bf16.gmra.mxu0 %vm626_vm2, %v3579_v33 }
 0x1e4   : > { %2905 = vmatmul.msk.bf16.gmra.mxu0 %vm626_vm2, %v3615_v46 }
 0x1f4   : > { %2906 = vmatmul.msk.bf16.gmra.mxu0 %vm626_vm2, %v3633_v52 }
 0x201   : > { %v824_v47 = vpop.f32.mrf.mxu0 }
 0x202   : > { %v845_v26 = vsel %vm844_vm4, %v824_v47, -inf }
 0x203   : > { %846 = vmax.xlane.f32.xlu0 %v845_v26 }
 0x209   : > { %v826_v63 = vpop.f32.mrf.mxu0 }
 0x20a   : > { %v848_v54 = vsel %vm844_vm4, %v826_v63, -inf }
 0x20b   : > { %849 = vmax.xlane.f32.xlu0 %v848_v54 }
 0x211   : > { %v829_v2 = vpop.f32.mrf.mxu0 }
 0x212   : > { %v851_v4 = vsel %vm844_vm4, %v829_v2, -inf }
 0x213   : > { %852 = vmax.xlane.f32.xlu1 %v851_v4 }
 0x219   : > { %v831_v5 = vpop.f32.mrf.mxu0 }
 0x21a   : > { %v854_v55 = vsel %vm844_vm4, %v831_v5, -inf }
 0x21b   : > { %855 = vmax.xlane.f32.xlu1 %v854_v55 }
 0x221   : > { %v3705_v6 = vpop.f32.mrf.mxu0 }
 0x222   : > { %v857_v53 = vsel %vm844_vm4, %v3705_v6, -inf }
 0x223   : > { %858 = vmax.xlane.f32.xlu2 %v857_v53 }
 0x229   : > { %v3709_v3 = vpop.f32.mrf.mxu0 }
 0x22a   : > { %v860_v7 = vsel %vm844_vm4, %v3709_v3, -inf }
 0x22b   : > { %861 = vmax.xlane.f32.xlu2 %v860_v7 }
 0x231   : > { %v3713_v8 = vpop.f32.mrf.mxu0 }
 0x232   : > { %v863_v9 = vsel %vm844_vm4, %v3713_v8, -inf }
 0x233   : > { %864 = vmax.xlane.f32.xlu0 %v863_v9 }
 0x239   : > { %v3717_v10 = vpop.f32.mrf.mxu0 }
 0x23a   : > { %v866_v11 = vsel %vm844_vm4, %v3717_v10, -inf }
 0x23b   : > { %867 = vmax.xlane.f32.xlu1 %v866_v11 }
 0x241   : > { %v1145_v12 = vpop.f32.mrf.mxu0 }
 0x242   : > { %v1146_v1 = vadd.f32 %v3274_v27, %v1145_v12 }
 0x249   : > { %v1147_v13 = vpop.f32.mrf.mxu0 }
 0x24a   : > { %v1148_v59 = vadd.f32 %v3274_v27, %v1147_v13 }
 0x24c   : > { %v1318_v54 = vpack.c.bf16 %v1148_v59, %v1146_v1 }
 0x251   : > { %v1150_v14 = vpop.f32.mrf.mxu0 }
 0x252   : > { %v1151_v56 = vadd.f32 %v3274_v27, %v1150_v14 }
 0x259   : > { %v1152_v15 = vpop.f32.mrf.mxu0 }
 0x25a   : > { %v1153_v61 = vadd.f32 %v3274_v27, %v1152_v15 }
 0x25c   : > { %v1319_v57 = vpack.c.bf16 %v1153_v61, %v1151_v56 }
 0x261   : > { %v1155_v16 = vpop.f32.mrf.mxu0 }
 0x262   : > { %v1156_v41 = vadd.f32 %v3274_v27, %v1155_v16 }
 0x269   : > { %v1157_v17 = vpop.f32.mrf.mxu0 }
 0x26a   : > { %v1158_v37 = vadd.f32 %v3274_v27, %v1157_v17 }
 0x26c   : > { %v1320_v60 = vpack.c.bf16 %v1158_v37, %v1156_v41 }
 0x271   : > { %v1160_v18 = vpop.f32.mrf.mxu0 }
 0x272   : > { %v1161_v35 = vadd.f32 %v3274_v27, %v1160_v18 }
 0x276   : > { %v847_v19 = vpop.xlane.xlu0 %846 }
 0x277   : > { %v869_v21 = vsub.f32 %v824_v47, %v847_v19 }
 0x279   : > { %v877_v29 = vmul.f32 1.442695, %v869_v21  ;;  %v1162_v34 = vpop.f32.mrf.mxu0 }
 0x27a   : > { %v1163_v36 = vadd.f32 %v3274_v27, %v1162_v34 }
 0x27b   : > { %3283 = vpow2.f32 %v877_v29 }
 0x27c   : > { %v1321_v38 = vpack.c.bf16 %v1163_v36, %v1161_v35 }
 0x27e   : > { %v850_v42 = vpop.xlane.xlu0 %849  ;;  %1338 = vmatpush.bf16.msra.mxu2 %v1321_v38 }
 0x27f   : > { %v870_v43 = vsub.f32 %v826_v63, %v850_v42 }
 0x281   : > { %v3724_v62 = vpop.eup %3283  ;;  %v879_v58 = vmul.f32 1.442695, %v870_v43 }
 0x282   : > { %1339 = vmatpush.bf16.msra.mxu2 %v1320_v60  ;;  %v893_v0 = vsel %vm844_vm4, %v3724_v62, 0.0 }
 0x283   : > { %3285 = vpow2.f32 %v879_v58  ;;  %894 = vadd.xlane.f32.xlu2 %v893_v0 }
 0x286   : > { %v853_v47 = vpop.xlane.xlu1 %852  ;;  %1340 = vmatpush.bf16.msra.mxu2 %v1319_v57 }
 0x287   : > { %v871_v26 = vsub.f32 %v829_v2, %v853_v47 }
 0x289   : > { %v3286_v63 = vpop.eup %3285  ;;  %v881_v4 = vmul.f32 1.442695, %v871_v26 }
 0x28a   : > { %1341 = vmatpush.bf16.msra.mxu2 %v1318_v54  ;;  %v896_v55 = vsel %vm844_vm4, %v3286_v63, 0.0 }
 0x28b   : > { %3287 = vpow2.f32 %v881_v4  ;;  %897 = vadd.xlane.f32.xlu0 %v896_v55 }
 0x28e   : > { %v856_v53 = vpop.xlane.xlu1 %855 }
 0x28f   : > { %v872_v7 = vsub.f32 %v831_v5, %v856_v53 }
 0x291   : > { %v3288_v9 = vpop.eup %3287  ;;  %v883_v11 = vmul.f32 1.442695, %v872_v7 }
 0x292   : > { %v899_v14 = vsel %vm844_vm4, %v3288_v9, 0.0 }
 0x293   : > { %3289 = vpow2.f32 %v883_v11  ;;  %900 = vadd.xlane.f32.xlu1 %v899_v14 }
 0x296   : > { %v859_v12 = vpop.xlane.xlu2 %858 }
 0x297   : > { %v873_v13 = vsub.f32 %v3705_v6, %v859_v12 }
 0x299   : > { %v3290_v2 = vpop.eup %3289  ;;  %v885_v15 = vmul.f32 1.442695, %v873_v13  ;;  %v1027_v13 = vpop.f32.mrf.mxu2 }
 0x29a   : > { %v902_v16 = vsel %vm844_vm4, %v3290_v2, 0.0 }
 0x29b   : > { %3291 = vpow2.f32 %v885_v15  ;;  %903 = vadd.xlane.f32.xlu2 %v902_v16 }
 0x29e   : > { %v862_v17 = vpop.xlane.xlu2 %861 }
 0x29f   : > { %v874_v18 = vsub.f32 %v3709_v3, %v862_v17 }
 0x2a1   : > { %v3292_v19 = vpop.eup %3291  ;;  %v887_v5 = vmul.f32 1.442695, %v874_v18  ;;  %v1029_v16 = vpop.f32.mrf.mxu2 }
 0x2a2   : > { %v905_v21 = vsel %vm844_vm4, %v3292_v19, 0.0 }
 0x2a3   : > { %3293 = vpow2.f32 %v887_v5  ;;  %906 = vadd.xlane.f32.xlu0 %v905_v21 }
 0x2a6   : > { %v865_v27 = vpop.xlane.xlu0 %864 }
 0x2a7   : > { %v875_v29 = vsub.f32 %v3713_v8, %v865_v27 }
 0x2a9   : > { %v3294_v34 = vpop.eup %3293  ;;  %v889_v6 = vmul.f32 1.442695, %v875_v29  ;;  %v1032_v21 = vpop.f32.mrf.mxu2 }
 0x2aa   : > { %v908_v35 = vsel %vm844_vm4, %v3294_v34, 0.0 }
 0x2ab   : > { %3295 = vpow2.f32 %v889_v6  ;;  %909 = vadd.xlane.f32.xlu1 %v908_v35 }
 0x2ae   : > { %v868_v36 = vpop.xlane.xlu1 %867 }
 0x2af   : > { %v876_v37 = vsub.f32 %v3717_v10, %v868_v36 }
 0x2b1   : > { %v3296_v38 = vpop.eup %3295  ;;  %v891_v3 = vmul.f32 1.442695, %v876_v37  ;;  %v1034_v6 = vpop.f32.mrf.mxu2 }
 0x2b2   : > { %v911_v41 = vsel %vm844_vm4, %v3296_v38, 0.0 }
 0x2b3   : > { %3297 = vpow2.f32 %v891_v3  ;;  %912 = vadd.xlane.f32.xlu2 %v911_v41  ;;  %v3221_v41 = vld [vmem:[%s4225_s3 + $0x38] sm:$0xff] }
 0x2b9   : > { %v3298_v42 = vpop.eup %3297  ;;  %v1037_v35 = vpop.f32.mrf.mxu2 }
 0x2ba   : > { %v914_v43 = vsel %vm844_vm4, %v3298_v42, 0.0 }
 0x2bb   : > { %915 = vadd.xlane.f32.xlu0 %v914_v43 }
 0x2f6   : > { %v895_v8 = vpop.xlane.xlu2 %894 }
 0x2f7   : > { %3299 = vrcp.f32 %v895_v8 }
 0x2fd   : > { %v3300_v60 = vpop.eup %3299 }
 0x2fe   : > { %v898_v61 = vpop.xlane.xlu0 %897  ;;  %v925_v56 = vmul.f32 %v3300_v60, %v3724_v62 }
 0x2ff   : > { %3301 = vrcp.f32 %v898_v61  ;;  %v3220_v61 = vld [vmem:[%s4225_s3 + $0x30] sm:$0xff] }
 0x305   : > { %v3302_v58 = vpop.eup %3301 }
 0x306   : > { %v926_v0 = vmul.f32 %v3302_v58, %v3286_v63  ;;  %v901_v59 = vpop.xlane.xlu1 %900 }
 0x307   : > { %3303 = vrcp.f32 %v901_v59 }
 0x308   : > { %v933_v10 = vpack.c.bf16 %v926_v0, %v925_v56  ;;  %v2927_v56 = vld [vmem:[%s4231_s9] sm:$0xf]  ;;  %v3209_v0 = vld [vmem:[%s4231_s9] sm:$0x30] }
 0x30a   : > { %2834 = vmatmul.msk.bf16.vlgmr.msra.gmra.mxu1 %vm844_vm4, %v933_v10  ;;  %v2928_v10 = vor.u32 %v3209_v0, %v2927_v56 }
 0x30c   : > { %v1438_v59 = vsel %vm1387_vm5, %v2928_v10, 0 }
 0x30d   : > { %v3304_v1 = vpop.eup %3303  ;;  %1447 = vmatpush.bf16.msrb.mxu0 %v1438_v59 }
 0x30e   : > { %v904_v57 = vpop.xlane.xlu2 %903  ;;  %v927_v26 = vmul.f32 %v3304_v1, %v3288_v9 }
 0x30f   : > { %3305 = vrcp.f32 %v904_v57 }
 0x315   : > { %v3306_v47 = vpop.eup %3305 }
 0x316   : > { %v928_v54 = vmul.f32 %v3306_v47, %v3290_v2  ;;  %v907_v55 = vpop.xlane.xlu0 %906 }
 0x317   : > { %3307 = vrcp.f32 %v907_v55 }
 0x318   : > { %v934_v4 = vpack.c.bf16 %v928_v54, %v927_v26 }
 0x31a   : > { %2835 = vmatmul.msk.bf16.gmra.mxu1 %vm844_vm4, %v934_v4 }
 0x31d   : > { %v3308_v62 = vpop.eup %3307 }
 0x31e   : > { %v910_v53 = vpop.xlane.xlu1 %909  ;;  %v929_v7 = vmul.f32 %v3308_v62, %v3292_v19  ;;  %v3272_v19 = vld [vmem:[%s4228_s6 + $0x1] ss:$0 sm:$0xff] }
 0x31f   : > { %3309 = vrcp.f32 %v910_v53  ;;  %v1030_v27 = vadd.f32 %v3272_v19, %v1029_v16  ;;  %v1028_v29 = vadd.f32 %v3272_v19, %v1027_v13  ;;  %v1035_v36 = vadd.f32 %v3272_v19, %v1034_v6 }
 0x320   : > { %v1033_v37 = vadd.f32 %v3272_v19, %v1032_v21  ;;  %v1038_v8 = vadd.f32 %v3272_v19, %v1037_v35 }
 0x322   : > { %v1166_v3 = vpack.c.bf16 %v1035_v36, %v1033_v37 }
 0x325   : > { %v3310_v63 = vpop.eup %3309 }
 0x326   : > { %v930_v11 = vmul.f32 %v3310_v63, %v3294_v34  ;;  %v913_v12 = vpop.xlane.xlu2 %912  ;;  %v1165_v34 = vpack.c.bf16 %v1030_v27, %v1028_v29 }
 0x327   : > { %3311 = vrcp.f32 %v913_v12 }
 0x328   : > { %v935_v14 = vpack.c.bf16 %v930_v11, %v929_v7 }
 0x32a   : > { %2836 = vmatmul.msk.bf16.gmra.mxu1 %vm844_vm4, %v935_v14 }
 0x32d   : > { %v3312_v9 = vpop.eup %3311 }
 0x32e   : > { %v916_v15 = vpop.xlane.xlu0 %915  ;;  %v931_v17 = vmul.f32 %v3312_v9, %v3296_v38  ;;  %v3222_v38 = vld [vmem:[%s4225_s3 + $0x40] sm:$0xff] }
 0x32f   : > { %3313 = vrcp.f32 %v916_v15  ;;  %1504 = vmatpush.bf16.msra.mxu1 %v3222_v38 }
 0x333   : > { %1505 = vmatpush.bf16.msra.mxu1 %v3221_v41 }
 0x335   : > { %v3314_v2 = vpop.eup %3313 }
 0x336   : > { %v932_v18 = vmul.f32 %v3314_v2, %v3298_v42  ;;  %v1039_v42 = vpop.f32.mrf.mxu2 }
 0x337   : > { %v1040_v43 = vadd.f32 %v3272_v19, %v1039_v42  ;;  %1506 = vmatpush.bf16.msra.mxu1 %v3220_v61 }
 0x338   : > { %v936_v5 = vpack.c.bf16 %v932_v18, %v931_v17 }
 0x339   : > { %v1167_v58 = vpack.c.bf16 %v1040_v43, %v1038_v8 }
 0x33a   : > { %2837 = vmatmul.msk.bf16.gmra.mxu1 %vm844_vm4, %v936_v5 }
 0x33e   : > { %v1042_v60 = vpop.f32.mrf.mxu2 }
 0x33f   : > { %v1043_v47 = vadd.f32 %v3272_v19, %v1042_v60 }
 0x346   : > { %v1044_v57 = vpop.f32.mrf.mxu2 }
 0x347   : > { %v1045_v1 = vadd.f32 %v3272_v19, %v1044_v57 }
 0x349   : > { %v1168_v26 = vpack.c.bf16 %v1045_v1, %v1043_v47 }
 0x34a   : > { %2907 = vmatmul.msk.bf16.vlgmr.msrb.gmra.mxu1 %vm790_vm3, %v1165_v34 }
 0x35a   : > { %2908 = vmatmul.msk.bf16.gmra.mxu1 %vm790_vm3, %v1166_v3 }
 0x36a   : > { %2909 = vmatmul.msk.bf16.gmra.mxu1 %vm790_vm3, %v1167_v58 }
 0x37a   : > { %2910 = vmatmul.msk.bf16.gmra.mxu1 %vm790_vm3, %v1168_v26 }
 0x387   : > { %v962_v54 = vpop.f32.mrf.mxu1 }
 0x38a   : > { %2952 = vmatmul.msk.bf16.vlgmr.msra.gmra.mxu1 %vm626_vm2, %v3561_v25 }
 0x38f   : > { %v964_v4 = vpop.f32.mrf.mxu1 }
 0x390   : > { %v982_v55 = vpack.c.bf16 %v964_v4, %v962_v54 }
 0x392   : > { %2929 = vmatmul.msk.bf16.vlgmr.msrb.gmra.mxu0 %vm790_vm3, %v982_v55 }
 0x397   : > { %v967_v53 = vpop.f32.mrf.mxu1 }
 0x39a   : > { %2953 = vmatmul.msk.bf16.gmra.mxu1 %vm626_vm2, %v3579_v33 }
 0x39f   : > { %v969_v62 = vpop.f32.mrf.mxu1 }
 0x3a0   : > { %v983_v63 = vpack.c.bf16 %v969_v62, %v967_v53 }
 0x3a2   : > { %2930 = vmatmul.msk.bf16.gmra.mxu0 %vm790_vm3, %v983_v63 }
 0x3a7   : > { %v972_v7 = vpop.f32.mrf.mxu1 }
 0x3aa   : > { %2954 = vmatmul.msk.bf16.gmra.mxu1 %vm626_vm2, %v3615_v46 }
 0x3af   : > { %v974_v11 = vpop.f32.mrf.mxu1 }
 0x3b0   : > { %v984_v14 = vpack.c.bf16 %v974_v11, %v972_v7 }
 0x3b2   : > { %2931 = vmatmul.msk.bf16.gmra.mxu0 %vm790_vm3, %v984_v14 }
 0x3b7   : > { %v977_v12 = vpop.f32.mrf.mxu1 }
 0x3ba   : > { %2955 = vmatmul.msk.bf16.gmra.mxu1 %vm626_vm2, %v3633_v52 }
 0x3bf   : > { %v979_v13 = vpop.f32.mrf.mxu1 }
 0x3c0   : > { %v985_v15 = vpack.c.bf16 %v979_v13, %v977_v12 }
 0x3c2   : > { %2932 = vmatmul.msk.bf16.gmra.mxu0 %vm790_vm3, %v985_v15 }
 0x3c7   : > { %v1206_v9 = vpop.f32.mrf.mxu1 }
 0x3c8   : > { %v1226_v2 = vsel %vm844_vm4, %v1206_v9, -inf }
 0x3c9   : > { %1227 = vmax.xlane.f32.xlu1 %v1226_v2 }
 0x3cf   : > { %v1208_v16 = vpop.f32.mrf.mxu1 }
 0x3d0   : > { %v1229_v17 = vsel %vm844_vm4, %v1208_v16, -inf }
 0x3d1   : > { %1230 = vmax.xlane.f32.xlu2 %v1229_v17 }
 0x3d7   : > { %v1211_v18 = vpop.f32.mrf.mxu1 }
 0x3d8   : > { %v1232_v5 = vsel %vm844_vm4, %v1211_v18, -inf }
 0x3d9   : > { %1233 = vmax.xlane.f32.xlu0 %v1232_v5 }
 0x3df   : > { %v1213_v21 = vpop.f32.mrf.mxu1 }
 0x3e0   : > { %v1235_v19 = vsel %vm844_vm4, %v1213_v21, -inf }
 0x3e1   : > { %1236 = vmax.xlane.f32.xlu1 %v1235_v19 }
 0x3e7   : > { %v1216_v27 = vpop.f32.mrf.mxu1 }
 0x3e8   : > { %v1238_v29 = vsel %vm844_vm4, %v1216_v27, -inf }
 0x3e9   : > { %1239 = vmax.xlane.f32.xlu2 %v1238_v29 }
 0x3ef   : > { %v1218_v34 = vpop.f32.mrf.mxu1 }
 0x3f0   : > { %v1241_v6 = vsel %vm844_vm4, %v1218_v34, -inf }
 0x3f1   : > { %1242 = vmax.xlane.f32.xlu0 %v1241_v6 }
 0x3f7   : > { %v1221_v35 = vpop.f32.mrf.mxu1 }
 0x3f8   : > { %v1244_v36 = vsel %vm844_vm4, %v1221_v35, -inf }
 0x3f9   : > { %1245 = vmax.xlane.f32.xlu1 %v1244_v36 }
 0x3ff   : > { %v1223_v37 = vpop.f32.mrf.mxu1 }
 0x400   : > { %v1247_v3 = vsel %vm844_vm4, %v1223_v37, -inf }
 0x401   : > { %1248 = vmax.xlane.f32.xlu2 %v1247_v3 }
 0x43c   : > { %v1228_v38 = vpop.xlane.xlu1 %1227 }
 0x43d   : > { %v1250_v41 = vsub.f32 %v1206_v9, %v1228_v38 }
 0x43f   : > { %v1258_v42 = vmul.f32 1.442695, %v1250_v41 }
 0x441   : > { %3315 = vpow2.f32 %v1258_v42 }
 0x444   : > { %v1231_v43 = vpop.xlane.xlu2 %1230 }
 0x445   : > { %v1251_v8 = vsub.f32 %v1208_v16, %v1231_v43 }
 0x447   : > { %v3316_v61 = vpop.eup %3315  ;;  %v1260_v60 = vmul.f32 1.442695, %v1251_v8  ;;  %v3225_v8 = vld [vmem:[%s4226_s4 + $0x40] sm:$0xff] }
 0x448   : > { %v1274_v58 = vsel %vm844_vm4, %v3316_v61, 0.0  ;;  %1563 = vmatpush.bf16.msrb.mxu2 %v3225_v8 }
 0x449   : > { %3317 = vpow2.f32 %v1260_v60  ;;  %1275 = vadd.xlane.f32.xlu0 %v1274_v58 }
 0x44c   : > { %v1234_v56 = vpop.xlane.xlu0 %1233 }
 0x44d   : > { %v1252_v0 = vsub.f32 %v1211_v18, %v1234_v56 }
 0x44f   : > { %v3318_v10 = vpop.eup %3317  ;;  %v1262_v59 = vmul.f32 1.442695, %v1252_v0 }
 0x450   : > { %v1277_v57 = vsel %vm844_vm4, %v3318_v10, 0.0 }
 0x451   : > { %3319 = vpow2.f32 %v1262_v59  ;;  %1278 = vadd.xlane.f32.xlu1 %v1277_v57 }
 0x454   : > { %v1237_v1 = vpop.xlane.xlu1 %1236 }
 0x455   : > { %v1253_v47 = vsub.f32 %v1213_v21, %v1237_v1 }
 0x457   : > { %v3320_v26 = vpop.eup %3319  ;;  %v1264_v54 = vmul.f32 1.442695, %v1253_v47 }
 0x458   : > { %v1280_v4 = vsel %vm844_vm4, %v3320_v26, 0.0 }
 0x459   : > { %3321 = vpow2.f32 %v1264_v54  ;;  %1281 = vadd.xlane.f32.xlu2 %v1280_v4 }
 0x45c   : > { %v1240_v55 = vpop.xlane.xlu2 %1239 }
 0x45d   : > { %v1254_v53 = vsub.f32 %v1216_v27, %v1240_v55 }
 0x45f   : > { %v3322_v62 = vpop.eup %3321  ;;  %v1266_v63 = vmul.f32 1.442695, %v1254_v53 }
 0x460   : > { %v1283_v7 = vsel %vm844_vm4, %v3322_v62, 0.0 }
 0x461   : > { %3323 = vpow2.f32 %v1266_v63  ;;  %1284 = vadd.xlane.f32.xlu0 %v1283_v7 }
 0x464   : > { %v1243_v11 = vpop.xlane.xlu0 %1242 }
 0x465   : > { %v1255_v14 = vsub.f32 %v1218_v34, %v1243_v11 }
 0x467   : > { %v3324_v12 = vpop.eup %3323  ;;  %v1268_v13 = vmul.f32 1.442695, %v1255_v14 }
 0x468   : > { %v1286_v15 = vsel %vm844_vm4, %v3324_v12, 0.0 }
 0x469   : > { %3325 = vpow2.f32 %v1268_v13  ;;  %1287 = vadd.xlane.f32.xlu1 %v1286_v15 }
 0x46c   : > { %v1246_v9 = vpop.xlane.xlu1 %1245 }
 0x46d   : > { %v1256_v2 = vsub.f32 %v1221_v35, %v1246_v9  ;;  %v3219_v9 = vld [vmem:[%s4231_s9 + $0x8] sm:$0x30] }
 0x46f   : > { %v3326_v16 = vpop.eup %3325  ;;  %v1270_v17 = vmul.f32 1.442695, %v1256_v2 }
 0x470   : > { %v1289_v18 = vsel %vm844_vm4, %v3326_v16, 0.0 }
 0x471   : > { %3327 = vpow2.f32 %v1270_v17  ;;  %1290 = vadd.xlane.f32.xlu2 %v1289_v18 }
 0x474   : > { %v1249_v5 = vpop.xlane.xlu2 %1248 }
 0x475   : > { %v1257_v21 = vsub.f32 %v1223_v37, %v1249_v5 }
 0x477   : > { %v3328_v19 = vpop.eup %3327  ;;  %v1272_v27 = vmul.f32 1.442695, %v1257_v21 }
 0x478   : > { %v1292_v29 = vsel %vm844_vm4, %v3328_v19, 0.0 }
 0x479   : > { %3329 = vpow2.f32 %v1272_v27  ;;  %1293 = vadd.xlane.f32.xlu0 %v1292_v29  ;;  %v3228_v29 = vld [vmem:[%s4227_s5 + $0x40] sm:$0xff] }
 0x47f   : > { %v3330_v34 = vpop.eup %3329 }
 0x480   : > { %v1295_v6 = vsel %vm844_vm4, %v3330_v34, 0.0 }
 0x481   : > { %1296 = vadd.xlane.f32.xlu1 %v1295_v6  ;;  %v3227_v6 = vld [vmem:[%s4227_s5 + $0x38] sm:$0xff] }
 0x4bc   : > { %v1276_v36 = vpop.xlane.xlu0 %1275 }
 0x4bd   : > { %3331 = vrcp.f32 %v1276_v36  ;;  %v3226_v36 = vld [vmem:[%s4227_s5 + $0x30] sm:$0xff] }
 0x4c3   : > { %v3332_v3 = vpop.eup %3331 }
 0x4c4   : > { %v1279_v35 = vpop.xlane.xlu1 %1278  ;;  %v1306_v41 = vmul.f32 %v3332_v3, %v3316_v61  ;;  %v3224_v61 = vld [vmem:[%s4226_s4 + $0x38] sm:$0xff] }
 0x4c5   : > { %3333 = vrcp.f32 %v1279_v35  ;;  %1564 = vmatpush.bf16.msrb.mxu2 %v3224_v61  ;;  %v3276_v61 = vld [vmem:[%s4229_s7 + $0x2] ss:$0 sm:$0xff] }
 0x4cb   : > { %v3334_v38 = vpop.eup %3333 }
 0x4cc   : > { %v1307_v42 = vmul.f32 %v3334_v38, %v3318_v10  ;;  %v1282_v37 = vpop.xlane.xlu2 %1281  ;;  %v3223_v10 = vld [vmem:[%s4226_s4 + $0x30] sm:$0xff] }
 0x4cd   : > { %3335 = vrcp.f32 %v1282_v37  ;;  %1565 = vmatpush.bf16.msrb.mxu2 %v3223_v10 }
 0x4ce   : > { %v1314_v43 = vpack.c.bf16 %v1307_v42, %v1306_v41 }
 0x4d0   : > { %2911 = vmatmul.msk.bf16.vlgmr.msra.gmra.mxu2 %vm844_vm4, %v1314_v43 }
 0x4d3   : > { %v3336_v58 = vpop.eup %3335 }
 0x4d4   : > { %v1285_v60 = vpop.xlane.xlu0 %1284  ;;  %v1308_v0 = vmul.f32 %v3336_v58, %v3320_v26  ;;  %v3232_v58 = vld [vmem:[%s4225_s3 + $0x58] sm:$0xff] }
 0x4d5   : > { %3337 = vrcp.f32 %v1285_v60 }
 0x4db   : > { %v3338_v56 = vpop.eup %3337 }
 0x4dc   : > { %v1309_v59 = vmul.f32 %v3338_v56, %v3322_v62  ;;  %v1288_v1 = vpop.xlane.xlu1 %1287 }
 0x4dd   : > { %3339 = vrcp.f32 %v1288_v1 }
 0x4de   : > { %v1315_v57 = vpack.c.bf16 %v1309_v59, %v1308_v0  ;;  %v3231_v0 = vld [vmem:[%s4225_s3 + $0x50] sm:$0xff]  ;;  %v3230_v59 = vld [vmem:[%s4225_s3 + $0x48] sm:$0xff] }
 0x4e0   : > { %2912 = vmatmul.msk.bf16.gmra.mxu2 %vm844_vm4, %v1315_v57 }
 0x4e3   : > { %v3340_v54 = vpop.eup %3339 }
 0x4e4   : > { %v1291_v47 = vpop.xlane.xlu2 %1290  ;;  %v1310_v4 = vmul.f32 %v3340_v54, %v3324_v12  ;;  %v2919_v12 = vld [vmem:[%s4231_s9 + $0x8] sm:$0xf] }
 0x4e5   : > { %3341 = vrcp.f32 %v1291_v47  ;;  %v2920_v2 = vor.u32 %v3219_v9, %v2919_v12 }
 0x4eb   : > { %v3342_v26 = vpop.eup %3341 }
 0x4ec   : > { %v1311_v55 = vmul.f32 %v3342_v26, %v3326_v16  ;;  %v1294_v62 = vpop.xlane.xlu0 %1293  ;;  %v1389_v16 = vsel %vm1387_vm5, %v2920_v2, 0 }
 0x4ed   : > { %3343 = vrcp.f32 %v1294_v62  ;;  %1398 = vmatpush.bf16.msra.mxu3 %v1389_v16 }
 0x4ee   : > { %v1316_v53 = vpack.c.bf16 %v1311_v55, %v1310_v4 }
 0x4f0   : > { %2913 = vmatmul.msk.bf16.gmra.mxu2 %vm844_vm4, %v1316_v53  ;;  %v1508_v53 = vpop.f32.mrf.mxu1 }
 0x4f1   : > { %1622 = vmatpush.bf16.msrb.mxu3 %v3228_v29 }
 0x4f3   : > { %v3344_v7 = vpop.eup %3343 }
 0x4f4   : > { %v1297_v63 = vpop.xlane.xlu1 %1296  ;;  %v1312_v14 = vmul.f32 %v3344_v7, %v3328_v19 }
 0x4f5   : > { %3345 = vrcp.f32 %v1297_v63  ;;  %1623 = vmatpush.bf16.msrb.mxu3 %v3227_v6 }
 0x4f9   : > { %1624 = vmatpush.bf16.msrb.mxu3 %v3226_v36 }
 0x4fb   : > { %v3346_v11 = vpop.eup %3345 }
 0x4fc   : > { %v1313_v13 = vmul.f32 %v3346_v11, %v3330_v34 }
 0x4fe   : > { %v1317_v15 = vpack.c.bf16 %v1313_v13, %v1312_v14  ;;  %v1510_v13 = vpop.f32.mrf.mxu1 }
 0x500   : > { %2914 = vmatmul.msk.bf16.gmra.mxu2 %vm844_vm4, %v1317_v15 }
 0x510   : > { %2975 = vmatmul.msk.bf16.vlgmr.msrb.gmra.mxu2 %vm626_vm2, %v3561_v25 }
 0x520   : > { %2976 = vmatmul.msk.bf16.gmra.mxu2 %vm626_vm2, %v3579_v33 }
 0x530   : > { %2977 = vmatmul.msk.bf16.gmra.mxu2 %vm626_vm2, %v3615_v46 }
 0x540   : > { %2978 = vmatmul.msk.bf16.gmra.mxu2 %vm626_vm2, %v3633_v52 }
 0x553   : > { %v1343_v17 = vpop.f32.mrf.mxu2 }
 0x55b   : > { %v1345_v18 = vpop.f32.mrf.mxu2 }
 0x55c   : > { %v1363_v5 = vpack.c.bf16 %v1345_v18, %v1343_v17  ;;  %v1513_v18 = vpop.f32.mrf.mxu1 }
 0x55e   : > { %2921 = vmatmul.msk.bf16.vlgmr.msra.gmra.mxu3 %vm790_vm3, %v1363_v5  ;;  %v3275_v5 = vld [vmem:[%s4228_s6 + $0x2] ss:$0 sm:$0xff] }
 0x55f   : > { %1943 = vmatpush.bf16.msra.mxu3 %v3232_v58  ;;  %v1509_v29 = vadd.f32 %v3275_v5, %v1508_v53 }
 0x563   : > { %v1348_v21 = vpop.f32.mrf.mxu2  ;;  %1944 = vmatpush.bf16.msra.mxu3 %v3231_v0 }
 0x564   : > { %v1515_v6 = vpop.f32.mrf.mxu1 }
 0x567   : > { %1945 = vmatpush.bf16.msra.mxu3 %v3230_v59  ;;  %v3233_v59 = vld [vmem:[%s4226_s4 + $0x48] sm:$0xff] }
 0x56b   : > { %v1350_v19 = vpop.f32.mrf.mxu2 }
 0x56c   : > { %v1364_v27 = vpack.c.bf16 %v1350_v19, %v1348_v21 }
 0x56e   : > { %2922 = vmatmul.msk.bf16.gmra.mxu3 %vm790_vm3, %v1364_v27  ;;  %v1511_v27 = vadd.f32 %v3275_v5, %v1510_v13 }
 0x573   : > { %v1353_v34 = vpop.f32.mrf.mxu2 }
 0x57b   : > { %v1355_v35 = vpop.f32.mrf.mxu2 }
 0x57c   : > { %v1365_v3 = vpack.c.bf16 %v1355_v35, %v1353_v34  ;;  %v1646_v34 = vpack.c.bf16 %v1511_v27, %v1509_v29  ;;  %v1518_v35 = vpop.f32.mrf.mxu1 }
 0x57d   : > { %v1519_v0 = vadd.f32 %v3275_v5, %v1518_v35 }
 0x57e   : > { %2923 = vmatmul.msk.bf16.gmra.mxu3 %vm790_vm3, %v1365_v3 }
 0x583   : > { %v1358_v38 = vpop.f32.mrf.mxu2 }
 0x58b   : > { %v1360_v41 = vpop.f32.mrf.mxu2 }
 0x58c   : > { %v1366_v42 = vpack.c.bf16 %v1360_v41, %v1358_v38  ;;  %v1516_v38 = vadd.f32 %v3275_v5, %v1515_v6  ;;  %v1514_v41 = vadd.f32 %v3275_v5, %v1513_v18  ;;  %v3277_v18 = vld [vmem:[%s4230_s8 + $0x2] ss:$0 sm:$0xff] }
 0x58e   : > { %2924 = vmatmul.msk.bf16.gmra.mxu3 %vm790_vm3, %v1366_v42  ;;  %v1647_v42 = vpack.c.bf16 %v1516_v38, %v1514_v41 }
 0x593   : > { %v1567_v43 = vpop.f32.mrf.mxu2 }
 0x594   : > { %v1568_v16 = vadd.f32 %v3276_v61, %v1567_v43 }
 0x59b   : > { %v1569_v37 = vpop.f32.mrf.mxu2 }
 0x59c   : > { %v1570_v12 = vadd.f32 %v3276_v61, %v1569_v37  ;;  %v3235_v37 = vld [vmem:[%s4226_s4 + $0x58] sm:$0xff] }
 0x59e   : > { %2998 = vmatmul.msk.bf16.vlgmr.msrb.gmra.mxu3 %vm626_vm2, %v3561_v25  ;;  %v1650_v17 = vpack.c.bf16 %v1570_v12, %v1568_v16 }
 0x5a0   : > { %v1667_v21 = vsel %vm790_vm3, %v1650_v17, 0 }
 0x5a3   : > { %v1572_v8 = vpop.f32.mrf.mxu2 }
 0x5a4   : > { %v1573_v14 = vadd.f32 %v3276_v61, %v1572_v8  ;;  %v1520_v8 = vpop.f32.mrf.mxu1 }
 0x5ab   : > { %v1574_v60 = vpop.f32.mrf.mxu2 }
 0x5ac   : > { %v1575_v7 = vadd.f32 %v3276_v61, %v1574_v60  ;;  %v3234_v60 = vld [vmem:[%s4226_s4 + $0x50] sm:$0xff] }
 0x5ae   : > { %2999 = vmatmul.msk.bf16.gmra.mxu3 %vm626_vm2, %v3579_v33  ;;  %v1651_v15 = vpack.c.bf16 %v1575_v7, %v1573_v14 }
 0x5b0   : > { %v1670_v9 = vsel %vm790_vm3, %v1651_v15, 0 }
 0x5b3   : > { %v1577_v56 = vpop.f32.mrf.mxu2 }
 0x5b4   : > { %v1578_v62 = vadd.f32 %v3276_v61, %v1577_v56  ;;  %v1521_v56 = vadd.f32 %v3275_v5, %v1520_v8 }
 0x5bb   : > { %v1579_v57 = vpop.f32.mrf.mxu2 }
 0x5bc   : > { %v1580_v4 = vadd.f32 %v3276_v61, %v1579_v57  ;;  %v1523_v57 = vpop.f32.mrf.mxu1 }
 0x5be   : > { %3000 = vmatmul.msk.bf16.gmra.mxu3 %vm626_vm2, %v3615_v46  ;;  %v1652_v63 = vpack.c.bf16 %v1580_v4, %v1578_v62 }
 0x5c0   : > { %v1673_v11 = vsel %vm790_vm3, %v1652_v63, 0 }
 0x5c3   : > { %v1582_v1 = vpop.f32.mrf.mxu2 }
 0x5c4   : > { %v1583_v47 = vadd.f32 %v3276_v61, %v1582_v1  ;;  %v1648_v1 = vpack.c.bf16 %v1521_v56, %v1519_v0 }
 0x5cb   : > { %v1584_v10 = vpop.f32.mrf.mxu2 }
 0x5cc   : > { %v1585_v54 = vadd.f32 %v3276_v61, %v1584_v10  ;;  %v1525_v10 = vpop.f32.mrf.mxu1 }
 0x5ce   : > { %v1653_v26 = vpack.c.bf16 %v1585_v54, %v1583_v47  ;;  %3001 = vmatmul.msk.bf16.gmra.mxu3 %vm626_vm2, %v3633_v52  ;;  %v1526_v54 = vadd.f32 %v3275_v5, %v1525_v10 }
 0x5d0   : > { %v1676_v55 = vsel %vm790_vm3, %v1653_v26, 0  ;;  %v1524_v26 = vadd.f32 %v3275_v5, %v1523_v57 }
 0x5d1   : > { %1682 = vmatpush.bf16.xpose.msra.mxu0 %v1676_v55  ;;  %v3899_v55 = vpop.f32.mrf.mxu0 }
 0x5d2   : > { %v1649_v4 = vpack.c.bf16 %v1526_v54, %v1524_v26 }
 0x5d9   : > { %1683 = vmatpush.bf16.xpose.msra.mxu0 %v1673_v11  ;;  %v3902_v62 = vpop.f32.mrf.mxu0 }
 0x5de   : > { %3039 = vmatmul.msk.bf16.vlgmr.msra.gmra.mxu3 %vm626_vm2, %v3561_v25 }
 0x5e1   : > { %v3861_v2 = vpop.f32.mrf.mxu3  ;;  %1684 = vmatpush.bf16.xpose.msra.mxu0 %v1670_v9  ;;  %v3906_v11 = vpop.f32.mrf.mxu0 }
 0x5e9   : > { %v3867_v19 = vpop.f32.mrf.mxu3  ;;  %1685 = vmatpush.bf16.xpose.msra.mxu0 %v1667_v21  ;;  %v3908_v13 = vpop.f32.mrf.mxu0 }
 0x5ee   : > { %3040 = vmatmul.msk.bf16.gmra.mxu3 %vm626_vm2, %v3579_v33 }
 0x5f0   : > { %3002 = vmatmul.msk.bf16.vlgmr.msra.gmra.mxu0 %vm790_vm3, %v1646_v34 }
 0x5f1   : > { %v3872_v36 = vpop.f32.mrf.mxu3  ;;  %2002 = vmatpush.bf16.msrb.mxu0 %v3235_v37  ;;  %v3912_v12 = vpop.f32.mrf.mxu0 }
 0x5f5   : > { %2003 = vmatpush.bf16.msrb.mxu0 %v3234_v60 }
 0x5f9   : > { %v3874_v3 = vpop.f32.mrf.mxu3  ;;  %2004 = vmatpush.bf16.msrb.mxu0 %v3233_v59  ;;  %v3916_v16 = vpop.f32.mrf.mxu0 }
 0x5fe   : > { %3041 = vmatmul.msk.bf16.gmra.mxu3 %vm626_vm2, %v3615_v46 }
 0x600   : > { %3003 = vmatmul.msk.bf16.gmra.mxu0 %vm790_vm3, %v1647_v42 }
 0x601   : > { %v3879_v43 = vpop.f32.mrf.mxu3  ;;  %v3921_v29 = vpop.f32.mrf.mxu0 }
 0x609   : > { %v3887_v58 = vpop.f32.mrf.mxu3  ;;  %v3925_v60 = vpop.f32.mrf.mxu0 }
 0x60a   : > { %v1462_v30 = vadd.f32 %v3916_v16, %v3887_v58 }
 0x60e   : > { %3042 = vmatmul.msk.bf16.gmra.mxu3 %vm626_vm2, %v3633_v52 }
 0x610   : > { %3004 = vmatmul.msk.bf16.gmra.mxu0 %vm790_vm3, %v1648_v1 }
 0x611   : > { %v3895_v61 = vpop.f32.mrf.mxu3 }
 0x619   : > { %v3897_v47 = vpop.f32.mrf.mxu3 }
 0x620   : > { %3005 = vmatmul.msk.bf16.gmra.mxu0 %vm790_vm3, %v1649_v4 }
 0x621   : > { %v1626_v53 = vpop.f32.mrf.mxu3 }
 0x622   : > { %v1627_v56 = vadd.f32 %v3277_v18, %v1626_v53 }
 0x629   : > { %v1628_v63 = vpop.f32.mrf.mxu3 }
 0x62a   : > { %v1629_v37 = vadd.f32 %v3277_v18, %v1628_v63 }
 0x62c   : > { %v1799_v0 = vpack.c.bf16 %v1629_v37, %v1627_v56  ;;  %v3014_v37 = vld [vmem:[%s4231_s9 + $0x10] sm:$0xf] }
 0x630   : > { %3062 = vmatmul.msk.bf16.vlgmr.msrb.gmra.mxu0 %vm626_vm2, %v3561_v25 }
 0x631   : > { %v1631_v7 = vpop.f32.mrf.mxu3 }
 0x632   : > { %v1632_v42 = vadd.f32 %v3277_v18, %v1631_v7 }
 0x639   : > { %v1633_v14 = vpop.f32.mrf.mxu3 }
 0x63a   : > { %v1634_v38 = vadd.f32 %v3277_v18, %v1633_v14 }
 0x63c   : > { %v1800_v8 = vpack.c.bf16 %v1634_v38, %v1632_v42 }
 0x640   : > { %3063 = vmatmul.msk.bf16.gmra.mxu0 %vm626_vm2, %v3579_v33 }
 0x641   : > { %v1636_v15 = vpop.f32.mrf.mxu3 }
 0x642   : > { %v1637_v35 = vadd.f32 %v3277_v18, %v1636_v15 }
 0x649   : > { %v1638_v9 = vpop.f32.mrf.mxu3 }
 0x64a   : > { %v1639_v34 = vadd.f32 %v3277_v18, %v1638_v9 }
 0x64c   : > { %v1801_v41 = vpack.c.bf16 %v1639_v34, %v1637_v35 }
 0x650   : > { %3064 = vmatmul.msk.bf16.gmra.mxu0 %vm626_vm2, %v3615_v46 }
 0x651   : > { %v1641_v17 = vpop.f32.mrf.mxu3 }
 0x652   : > { %v1642_v21 = vadd.f32 %v3277_v18, %v1641_v17 }
 0x659   : > { %v1643_v5 = vpop.f32.mrf.mxu3 }
 0x65a   : > { %v1644_v27 = vadd.f32 %v3277_v18, %v1643_v5 }
 0x65c   : > { %v1802_v6 = vpack.c.bf16 %v1644_v27, %v1642_v21  ;;  %v3279_v27 = vld [vmem:[%s4229_s7 + $0x3] ss:$0 sm:$0xff] }
 0x65e   : > { %1819 = vmatpush.bf16.msrb.mxu1 %v1802_v6 }
 0x660   : > { %3065 = vmatmul.msk.bf16.gmra.mxu0 %vm626_vm2, %v3633_v52 }
 0x662   : > { %1820 = vmatpush.bf16.msrb.mxu1 %v1801_v41 }
 0x666   : > { %1821 = vmatpush.bf16.msrb.mxu1 %v1800_v8  ;;  %v3229_v8 = vld [vmem:[%s4231_s9 + $0x10] sm:$0x30] }
 0x667   : > { %v3015_v56 = vor.u32 %v3229_v8, %v3014_v37 }
 0x66a   : > { %1822 = vmatpush.bf16.msrb.mxu1 %v1799_v0  ;;  %v1869_v0 = vsel %vm1387_vm5, %v3015_v56, 0 }
 0x66b   : > { %1878 = vmatpush.bf16.msra.mxu2 %v1869_v0 }
 0x66d   : > { %v1687_v59 = vpop.f32.mrf.mxu0 }
 0x66e   : > { %v1707_v57 = vsel %vm844_vm4, %v1687_v59, -inf }
 0x66f   : > { %1708 = vmax.xlane.f32.xlu2 %v1707_v57 }
 0x675   : > { %v1689_v1 = vpop.f32.mrf.mxu0 }
 0x676   : > { %v1710_v10 = vsel %vm844_vm4, %v1689_v1, -inf }
 0x677   : > { %1711 = vmax.xlane.f32.xlu0 %v1710_v10 }
 0x67d   : > { %v1692_v54 = vpop.f32.mrf.mxu0 }
 0x67e   : > { %v1713_v26 = vsel %vm844_vm4, %v1692_v54, -inf }
 0x67f   : > { %1714 = vmax.xlane.f32.xlu1 %v1713_v26 }
 0x685   : > { %v3930_v4 = vpop.f32.mrf.mxu0 }
 0x686   : > { %v1716_v53 = vsel %vm844_vm4, %v3930_v4, -inf }
 0x687   : > { %1717 = vmax.xlane.f32.xlu2 %v1716_v53 }
 0x68d   : > { %v3934_v63 = vpop.f32.mrf.mxu0 }
 0x68e   : > { %v1719_v7 = vsel %vm844_vm4, %v3934_v63, -inf }
 0x68f   : > { %1720 = vmax.xlane.f32.xlu0 %v1719_v7 }
 0x695   : > { %v3938_v14 = vpop.f32.mrf.mxu0 }
 0x696   : > { %v1722_v15 = vsel %vm844_vm4, %v3938_v14, -inf }
 0x697   : > { %1723 = vmax.xlane.f32.xlu1 %v1722_v15 }
 0x69d   : > { %v3942_v9 = vpop.f32.mrf.mxu0 }
 0x69e   : > { %v1725_v17 = vsel %vm844_vm4, %v3942_v9, -inf }
 0x69f   : > { %1726 = vmax.xlane.f32.xlu2 %v1725_v17 }
 0x6a5   : > { %v3946_v18 = vpop.f32.mrf.mxu0 }
 0x6a6   : > { %v1728_v5 = vsel %vm844_vm4, %v3946_v18, -inf }
 0x6a7   : > { %1729 = vmax.xlane.f32.xlu0 %v1728_v5 }
 0x6ad   : > { %v2006_v21 = vpop.f32.mrf.mxu0 }
 0x6ae   : > { %v2007_v6 = vadd.f32 %v3279_v27, %v2006_v21 }
 0x6b5   : > { %v2008_v34 = vpop.f32.mrf.mxu0 }
 0x6b6   : > { %v2009_v35 = vadd.f32 %v3279_v27, %v2008_v34 }
 0x6b8   : > { %v2089_v38 = vpack.c.bf16 %v2009_v35, %v2007_v6 }
 0x6bd   : > { %v2011_v41 = vpop.f32.mrf.mxu0 }
 0x6c5   : > { %v2013_v42 = vpop.f32.mrf.mxu0 }
 0x6cd   : > { %v2016_v57 = vpop.f32.mrf.mxu0 }
 0x6ce   : > { %v2017_v37 = vadd.f32 %v3279_v27, %v2016_v57 }
 0x6d5   : > { %v2018_v10 = vpop.f32.mrf.mxu0 }
 0x6d6   : > { %v2019_v6 = vadd.f32 %v3279_v27, %v2018_v10 }
 0x6d8   : > { %v2091_v0 = vpack.c.bf16 %v2019_v6, %v2017_v37 }
 0x6dd   : > { %v2021_v26 = vpop.f32.mrf.mxu0 }
 0x6de   : > { %v2022_v5 = vadd.f32 %v3279_v27, %v2021_v26  ;;  %v2014_v26 = vadd.f32 %v3279_v27, %v2013_v42 }
 0x6e2   : > { %v1709_v53 = vpop.xlane.xlu2 %1708 }
 0x6e3   : > { %v1731_v7 = vsub.f32 %v1687_v59, %v1709_v53 }
 0x6e5   : > { %v1739_v15 = vmul.f32 1.442695, %v1731_v7  ;;  %v2023_v17 = vpop.f32.mrf.mxu0  ;;  %v2112_v7 = vsel %vm790_vm3, %v2091_v0, 0 }
 0x6e6   : > { %v2024_v21 = vadd.f32 %v3279_v27, %v2023_v17 }
 0x6e7   : > { %3347 = vpow2.f32 %v1739_v15  ;;  %v2012_v15 = vadd.f32 %v3279_v27, %v2011_v41  ;;  %v2106_v27 = vsel %vm790_vm3, %v2089_v38, 0 }
 0x6e8   : > { %v2092_v34 = vpack.c.bf16 %v2024_v21, %v2022_v5 }
 0x6ea   : > { %v1712_v35 = vpop.xlane.xlu0 %1711  ;;  %v2115_v51 = vsel %vm790_vm3, %v2092_v34, 0 }
 0x6eb   : > { %v1732_v50 = vsub.f32 %v1689_v1, %v1712_v35  ;;  %2121 = vmatpush.bf16.xpose.msrb.mxu2 %v2115_v51  ;;  %v2090_v51 = vpack.c.bf16 %v2014_v26, %v2012_v15 }
 0x6ed   : > { %v3961_v8 = vpop.eup %3347  ;;  %v1741_v56 = vmul.f32 1.442695, %v1732_v50  ;;  %v2109_v5 = vsel %vm790_vm3, %v2090_v51, 0 }
 0x6ee   : > { %v1755_v59 = vsel %vm844_vm4, %v3961_v8, 0.0 }
 0x6ef   : > { %3349 = vpow2.f32 %v1741_v56  ;;  %1756 = vadd.xlane.f32.xlu1 %v1755_v59 }
 0x6f2   : > { %v1715_v53 = vpop.xlane.xlu1 %1714 }
 0x6f3   : > { %v1733_v10 = vsub.f32 %v1692_v54, %v1715_v53  ;;  %2122 = vmatpush.bf16.xpose.msrb.mxu2 %v2112_v7 }
 0x6f5   : > { %v3350_v17 = vpop.eup %3349  ;;  %v1743_v1 = vmul.f32 1.442695, %v1733_v10 }
 0x6f6   : > { %v1758_v57 = vsel %vm844_vm4, %v3350_v17, 0.0 }
 0x6f7   : > { %3351 = vpow2.f32 %v1743_v1  ;;  %1759 = vadd.xlane.f32.xlu2 %v1758_v57 }
 0x6fa   : > { %v1718_v50 = vpop.xlane.xlu2 %1717 }
 0x6fb   : > { %v1734_v21 = vsub.f32 %v3930_v4, %v1718_v50  ;;  %2123 = vmatpush.bf16.xpose.msrb.mxu2 %v2109_v5 }
 0x6fd   : > { %v3352_v42 = vpop.eup %3351  ;;  %v1745_v34 = vmul.f32 1.442695, %v1734_v21 }
 0x6fe   : > { %v1761_v6 = vsel %vm844_vm4, %v3352_v42, 0.0 }
 0x6ff   : > { %3353 = vpow2.f32 %v1745_v34  ;;  %1762 = vadd.xlane.f32.xlu0 %v1761_v6 }
 0x702   : > { %v1721_v54 = vpop.xlane.xlu0 %1720 }
 0x703   : > { %v1735_v41 = vsub.f32 %v3934_v63, %v1721_v54  ;;  %2124 = vmatpush.bf16.xpose.msrb.mxu2 %v2106_v27 }
 0x705   : > { %v3354_v35 = vpop.eup %3353  ;;  %v1747_v37 = vmul.f32 1.442695, %v1735_v41 }
 0x706   : > { %v1764_v56 = vsel %vm844_vm4, %v3354_v35, 0.0 }
 0x707   : > { %3355 = vpow2.f32 %v1747_v37  ;;  %1765 = vadd.xlane.f32.xlu1 %v1764_v56 }
 0x70a   : > { %v1724_v4 = vpop.xlane.xlu1 %1723 }
 0x70b   : > { %v1736_v0 = vsub.f32 %v3938_v14, %v1724_v4 }
 0x70d   : > { %v3356_v59 = vpop.eup %3355  ;;  %v1749_v26 = vmul.f32 1.442695, %v1736_v0 }
 0x70e   : > { %v1767_v53 = vsel %vm844_vm4, %v3356_v59, 0.0 }
 0x70f   : > { %3357 = vpow2.f32 %v1749_v26  ;;  %1768 = vadd.xlane.f32.xlu2 %v1767_v53 }
 0x712   : > { %v1727_v7 = vpop.xlane.xlu2 %1726 }
 0x713   : > { %v1737_v38 = vsub.f32 %v3942_v9, %v1727_v7 }
 0x715   : > { %v3358_v63 = vpop.eup %3357  ;;  %v1751_v10 = vmul.f32 1.442695, %v1737_v38 }
 0x716   : > { %v1770_v15 = vsel %vm844_vm4, %v3358_v63, 0.0 }
 0x717   : > { %3359 = vpow2.f32 %v1751_v10  ;;  %1771 = vadd.xlane.f32.xlu0 %v1770_v15 }
 0x71a   : > { %v1730_v1 = vpop.xlane.xlu0 %1729 }
 0x71b   : > { %v1738_v51 = vsub.f32 %v3946_v18, %v1730_v1 }
 0x71d   : > { %v3360_v57 = vpop.eup %3359  ;;  %v1753_v14 = vmul.f32 1.442695, %v1738_v51 }
 0x71e   : > { %v1773_v50 = vsel %vm844_vm4, %v3360_v57, 0.0 }
 0x71f   : > { %3361 = vpow2.f32 %v1753_v14  ;;  %1774 = vadd.xlane.f32.xlu1 %v1773_v50 }
 0x725   : > { %v3362_v5 = vpop.eup %3361 }
 0x726   : > { %v1776_v21 = vsel %vm844_vm4, %v3362_v5, 0.0 }
 0x727   : > { %1777 = vadd.xlane.f32.xlu2 %v1776_v21 }
 0x762   : > { %v1757_v9 = vpop.xlane.xlu1 %1756 }
 0x763   : > { %3363 = vrcp.f32 %v1757_v9 }
 0x769   : > { %v3364_v6 = vpop.eup %3363 }
 0x76a   : > { %v1760_v34 = vpop.xlane.xlu2 %1759  ;;  %v1787_v27 = vmul.f32 %v3364_v6, %v3961_v8  ;;  %v3238_v8 = vld [vmem:[%s4227_s5 + $0x58] sm:$0xff] }
 0x76b   : > { %3365 = vrcp.f32 %v1760_v34  ;;  %2061 = vmatpush.bf16.msra.mxu1 %v3238_v8 }
 0x771   : > { %v3366_v54 = vpop.eup %3365 }
 0x772   : > { %v1788_v41 = vmul.f32 %v3366_v54, %v3350_v17  ;;  %v1763_v37 = vpop.xlane.xlu0 %1762  ;;  %v3237_v17 = vld [vmem:[%s4227_s5 + $0x50] sm:$0xff] }
 0x773   : > { %3367 = vrcp.f32 %v1763_v37  ;;  %2062 = vmatpush.bf16.msra.mxu1 %v3237_v17 }
 0x774   : > { %v1795_v18 = vpack.c.bf16 %v1788_v41, %v1787_v27 }
 0x776   : > { %3006 = vmatmul.msk.bf16.vlgmr.msrb.gmra.mxu1 %vm844_vm4, %v1795_v18 }
 0x779   : > { %v3368_v4 = vpop.eup %3367 }
 0x77a   : > { %v1766_v56 = vpop.xlane.xlu1 %1765  ;;  %v1789_v26 = vmul.f32 %v3368_v4, %v3352_v42  ;;  %v3236_v42 = vld [vmem:[%s4227_s5 + $0x48] sm:$0xff] }
 0x77b   : > { %3369 = vrcp.f32 %v1766_v56  ;;  %2063 = vmatpush.bf16.msra.mxu1 %v3236_v42 }
 0x781   : > { %v3370_v0 = vpop.eup %3369 }
 0x782   : > { %v1790_v53 = vmul.f32 %v3370_v0, %v3354_v35  ;;  %v1769_v38 = vpop.xlane.xlu2 %1768 }
 0x783   : > { %3371 = vrcp.f32 %v1769_v38 }
 0x784   : > { %v1796_v7 = vpack.c.bf16 %v1790_v53, %v1789_v26 }
 0x786   : > { %3007 = vmatmul.msk.bf16.gmra.mxu1 %vm844_vm4, %v1796_v7  ;;  %v3278_v7 = vld [vmem:[%s4228_s6 + $0x3] ss:$0 sm:$0xff] }
 0x789   : > { %v3372_v35 = vpop.eup %3371 }
 0x78a   : > { %v1772_v10 = vpop.xlane.xlu0 %1771  ;;  %v1791_v1 = vmul.f32 %v3372_v35, %v3356_v59 }
 0x78b   : > { %3373 = vrcp.f32 %v1772_v10 }
 0x791   : > { %v3374_v15 = vpop.eup %3373 }
 0x792   : > { %v1792_v51 = vmul.f32 %v3374_v15, %v3358_v63  ;;  %v1775_v50 = vpop.xlane.xlu1 %1774 }
 0x793   : > { %3375 = vrcp.f32 %v1775_v50 }
 0x794   : > { %v1797_v14 = vpack.c.bf16 %v1792_v51, %v1791_v1 }
 0x796   : > { %3008 = vmatmul.msk.bf16.gmra.mxu1 %vm844_vm4, %v1797_v14 }
 0x799   : > { %v3376_v9 = vpop.eup %3375 }
 0x79a   : > { %v1778_v21 = vpop.xlane.xlu2 %1777  ;;  %v1793_v6 = vmul.f32 %v3376_v9, %v3360_v57 }
 0x79b   : > { %3377 = vrcp.f32 %v1778_v21 }
 0x7a1   : > { %v3378_v34 = vpop.eup %3377 }
 0x7a2   : > { %v1794_v54 = vmul.f32 %v3378_v34, %v3362_v5 }
 0x7a4   : > { %v1798_v27 = vpack.c.bf16 %v1794_v54, %v1793_v6 }
 0x7a6   : > { %3009 = vmatmul.msk.bf16.gmra.mxu1 %vm844_vm4, %v1798_v27 }
 0x7b6   : > { %3085 = vmatmul.msk.bf16.vlgmr.msra.gmra.mxu1 %vm626_vm2, %v3561_v25 }
 0x7c6   : > { %3086 = vmatmul.msk.bf16.gmra.mxu1 %vm626_vm2, %v3579_v33  ;;  %v1947_v33 = vpop.f32.mrf.mxu3 }
 0x7c7   : > { %v1948_v8 = vadd.f32 %v3278_v7, %v1947_v33 }
 0x7ce   : > { %v1949_v4 = vpop.f32.mrf.mxu3 }
 0x7cf   : > { %v1950_v38 = vadd.f32 %v3278_v7, %v1949_v4 }
 0x7d1   : > { %v2085_v10 = vpack.c.bf16 %v1950_v38, %v1948_v8 }
 0x7d6   : > { %3087 = vmatmul.msk.bf16.gmra.mxu1 %vm626_vm2, %v3615_v46  ;;  %v1952_v26 = vpop.f32.mrf.mxu3 }
 0x7d7   : > { %v1953_v51 = vadd.f32 %v3278_v7, %v1952_v26 }
 0x7de   : > { %v1954_v42 = vpop.f32.mrf.mxu3 }
 0x7df   : > { %v1955_v1 = vadd.f32 %v3278_v7, %v1954_v42 }
 0x7e1   : > { %v2086_v50 = vpack.c.bf16 %v1955_v1, %v1953_v51 }
 0x7e6   : > { %3088 = vmatmul.msk.bf16.gmra.mxu1 %vm626_vm2, %v3633_v52  ;;  %v1957_v15 = vpop.f32.mrf.mxu3 }
 0x7e7   : > { %v1958_v6 = vadd.f32 %v3278_v7, %v1957_v15  ;;  %v1450_v15 = vadd.f32 %v3899_v55, %v3861_v2  ;;  %v1465_v55 = vadd.f32 %v3921_v29, %v3895_v61 }
 0x7ee   : > { %v1959_v21 = vpop.f32.mrf.mxu3 }
 0x7ef   : > { %v1960_v34 = vadd.f32 %v3278_v7, %v1959_v21 }
 0x7f3   : > { %v1824_v59 = vpop.f32.mrf.mxu1 }
 0x7f6   : > { %v1962_v54 = vpop.f32.mrf.mxu3 }
 0x7fb   : > { %v1826_v63 = vpop.f32.mrf.mxu1 }
 0x7fc   : > { %v1844_v41 = vpack.c.bf16 %v1826_v63, %v1824_v59  ;;  %v2087_v59 = vpack.c.bf16 %v1960_v34, %v1958_v6 }
 0x7fe   : > { %3016 = vmatmul.msk.bf16.vlgmr.msra.gmra.mxu2 %vm790_vm3, %v1844_v41  ;;  %v1964_v41 = vpop.f32.mrf.mxu3 }
 0x803   : > { %v1829_v57 = vpop.f32.mrf.mxu1 }
 0x80b   : > { %v1831_v5 = vpop.f32.mrf.mxu1 }
 0x80c   : > { %v1845_v18 = vpack.c.bf16 %v1831_v5, %v1829_v57  ;;  %v1965_v57 = vadd.f32 %v3278_v7, %v1964_v41  ;;  %v1963_v5 = vadd.f32 %v3278_v7, %v1962_v54 }
 0x80e   : > { %3017 = vmatmul.msk.bf16.gmra.mxu2 %vm790_vm3, %v1845_v18  ;;  %v3280_v18 = vld [vmem:[%s4230_s8 + $0x3] ss:$0 sm:$0xff] }
 0x813   : > { %v1834_v25 = vpop.f32.mrf.mxu1 }
 0x81b   : > { %v1836_v37 = vpop.f32.mrf.mxu1 }
 0x81c   : > { %v1846_v56 = vpack.c.bf16 %v1836_v37, %v1834_v25  ;;  %v2088_v37 = vpack.c.bf16 %v1965_v57, %v1963_v5 }
 0x81e   : > { %3018 = vmatmul.msk.bf16.gmra.mxu2 %vm790_vm3, %v1846_v56 }
 0x823   : > { %v1839_v46 = vpop.f32.mrf.mxu1 }
 0x82b   : > { %v1841_v0 = vpop.f32.mrf.mxu1 }
 0x82c   : > { %v1847_v52 = vpack.c.bf16 %v1841_v0, %v1839_v46 }
 0x82e   : > { %3019 = vmatmul.msk.bf16.gmra.mxu2 %vm790_vm3, %v1847_v52 }
 0x833   : > { %v2065_v53 = vpop.f32.mrf.mxu1 }
 0x83b   : > { %v2067_v17 = vpop.f32.mrf.mxu1 }
 0x83c   : > { %v2068_v8 = vadd.f32 %v3280_v18, %v2067_v17 }
 0x83e   : > { %3089 = vmatmul.msk.bf16.vlgmr.msrb.gmra.mxu2 %vm790_vm3, %v2085_v10  ;;  %v2066_v10 = vadd.f32 %v3280_v18, %v2065_v53  ;;  %v1460_v53 = vadd.f32 %v3912_v12, %v3879_v43 }
 0x840   : > { %v2238_v42 = vpack.c.bf16 %v2068_v8, %v2066_v10 }
 0x843   : > { %v2070_v35 = vpop.f32.mrf.mxu1 }
 0x844   : > { %v2071_v38 = vadd.f32 %v3280_v18, %v2070_v35 }
 0x84b   : > { %v2072_v14 = vpop.f32.mrf.mxu1 }
 0x84c   : > { %v2073_v52 = vadd.f32 %v3280_v18, %v2072_v14  ;;  %v1455_v14 = vadd.f32 %v3906_v11, %v3872_v36 }
 0x84e   : > { %3090 = vmatmul.msk.bf16.gmra.mxu2 %vm790_vm3, %v2086_v50  ;;  %v2239_v7 = vpack.c.bf16 %v2073_v52, %v2071_v38 }
 0x853   : > { %v2075_v9 = vpop.f32.mrf.mxu1 }
 0x854   : > { %v2076_v0 = vadd.f32 %v3280_v18, %v2075_v9 }
 0x85b   : > { %v2077_v27 = vpop.f32.mrf.mxu1 }
 0x85c   : > { %v2078_v46 = vadd.f32 %v3280_v18, %v2077_v27 }
 0x85e   : > { %3091 = vmatmul.msk.bf16.gmra.mxu2 %vm790_vm3, %v2087_v59  ;;  %v2240_v26 = vpack.c.bf16 %v2078_v46, %v2076_v0 }
 0x863   : > { %v2080_v63 = vpop.f32.mrf.mxu1 }
 0x864   : > { %v2081_v56 = vadd.f32 %v3280_v18, %v2080_v63 }
 0x86b   : > { %v2082_v25 = vpop.f32.mrf.mxu1 }
 0x86c   : > { %v2083_v33 = vadd.f32 %v3280_v18, %v2082_v25 }
 0x86e   : > { %v2241_v4 = vpack.c.bf16 %v2083_v33, %v2081_v56  ;;  %3092 = vmatmul.msk.bf16.gmra.mxu2 %vm790_vm3, %v2088_v37 }
 0x870   : > { %2258 = vmatpush.bf16.msrb.mxu3 %v2241_v4 }
 0x874   : > { %2259 = vmatpush.bf16.msrb.mxu3 %v2240_v26 }
 0x878   : > { %2260 = vmatpush.bf16.msrb.mxu3 %v2239_v7 }
 0x87c   : > { %2261 = vmatpush.bf16.msrb.mxu3 %v2238_v42 }
 0x881   : > { %v1880_v1 = vpop.f32.mrf.mxu2 }
 0x882   : > { %v4018_v51 = vadd.f32 %v1880_v1, %v1450_v15 }
 0x889   : > { %v4020_v50 = vpop.f32.mrf.mxu2 }
 0x891   : > { %v1885_v21 = vpop.f32.mrf.mxu2 }
 0x892   : > { %v4024_v35 = vadd.f32 %v1885_v21, %v1455_v14 }
 0x899   : > { %v4026_v17 = vpop.f32.mrf.mxu2 }
 0x8a1   : > { %v1890_v9 = vpop.f32.mrf.mxu2 }
 0x8a2   : > { %v4030_v34 = vadd.f32 %v1890_v9, %v1460_v53 }
 0x8a9   : > { %v4032_v2 = vpop.f32.mrf.mxu2 }
 0x8b1   : > { %v1895_v6 = vpop.f32.mrf.mxu2 }
 0x8b2   : > { %v4036_v54 = vadd.f32 %v1895_v6, %v1465_v55 }
 0x8b9   : > { %v4038_v36 = vpop.f32.mrf.mxu2 }
 0x8c1   : > { %v2126_v11 = vpop.f32.mrf.mxu2 }
 0x8c2   : > { %v2146_v27 = vsel %vm844_vm4, %v2126_v11, -inf }
 0x8c3   : > { %2147 = vmax.xlane.f32.xlu0 %v2146_v27 }
 0x8c9   : > { %v2128_v59 = vpop.f32.mrf.mxu2 }
 0x8ca   : > { %v2149_v43 = vsel %vm844_vm4, %v2128_v59, -inf }
 0x8cb   : > { %2150 = vmax.xlane.f32.xlu1 %v2149_v43 }
 0x8d1   : > { %v2131_v12 = vpop.f32.mrf.mxu2 }
 0x8d2   : > { %v2152_v63 = vsel %vm844_vm4, %v2131_v12, -inf }
 0x8d3   : > { %2153 = vmax.xlane.f32.xlu2 %v2152_v63 }
 0x8d9   : > { %v2133_v41 = vpop.f32.mrf.mxu2 }
 0x8da   : > { %v2155_v61 = vsel %vm844_vm4, %v2133_v41, -inf }
 0x8db   : > { %2156 = vmax.xlane.f32.xlu0 %v2155_v61 }
 0x8e1   : > { %v2136_v29 = vpop.f32.mrf.mxu2 }
 0x8e2   : > { %v2158_v57 = vsel %vm844_vm4, %v2136_v29, -inf }
 0x8e3   : > { %2159 = vmax.xlane.f32.xlu1 %v2158_v57 }
 0x8e9   : > { %v2138_v5 = vpop.f32.mrf.mxu2 }
 0x8ea   : > { %v2161_v18 = vsel %vm844_vm4, %v2138_v5, -inf }
 0x8eb   : > { %2162 = vmax.xlane.f32.xlu2 %v2161_v18 }
 0x8f1   : > { %v2141_v25 = vpop.f32.mrf.mxu2 }
 0x8f2   : > { %v2164_v37 = vsel %vm844_vm4, %v2141_v25, -inf }
 0x8f3   : > { %2165 = vmax.xlane.f32.xlu0 %v2164_v37 }
 0x8f9   : > { %v2143_v56 = vpop.f32.mrf.mxu2 }
 0x8fa   : > { %v2167_v33 = vsel %vm844_vm4, %v2143_v56, -inf }
 0x8fb   : > { %2168 = vmax.xlane.f32.xlu1 %v2167_v33 }
 0x936   : > { %v2148_v46 = vpop.xlane.xlu0 %2147 }
 0x937   : > { %v2170_v4 = vsub.f32 %v2126_v11, %v2148_v46 }
 0x939   : > { %v2178_v0 = vmul.f32 1.442695, %v2170_v4 }
 0x93b   : > { %3379 = vpow2.f32 %v2178_v0 }
 0x93e   : > { %v2151_v52 = vpop.xlane.xlu1 %2150 }
 0x93f   : > { %v2171_v26 = vsub.f32 %v2128_v59, %v2151_v52 }
 0x941   : > { %v3380_v38 = vpop.eup %3379  ;;  %v2180_v8 = vmul.f32 1.442695, %v2171_v26 }
 0x942   : > { %v2194_v7 = vsel %vm844_vm4, %v3380_v38, 0.0 }
 0x943   : > { %3381 = vpow2.f32 %v2180_v8  ;;  %2195 = vadd.xlane.f32.xlu2 %v2194_v7 }
 0x946   : > { %v2154_v10 = vpop.xlane.xlu2 %2153 }
 0x947   : > { %v2172_v42 = vsub.f32 %v2131_v12, %v2154_v10 }
 0x949   : > { %v3382_v15 = vpop.eup %3381  ;;  %v2182_v1 = vmul.f32 1.442695, %v2172_v42 }
 0x94a   : > { %v2197_v14 = vsel %vm844_vm4, %v3382_v15, 0.0 }
 0x94b   : > { %3383 = vpow2.f32 %v2182_v1  ;;  %2198 = vadd.xlane.f32.xlu0 %v2197_v14 }
 0x94e   : > { %v2157_v21 = vpop.xlane.xlu0 %2156 }
 0x94f   : > { %v2173_v53 = vsub.f32 %v2133_v41, %v2157_v21 }
 0x951   : > { %v3384_v9 = vpop.eup %3383  ;;  %v2184_v55 = vmul.f32 1.442695, %v2173_v53 }
 0x952   : > { %v2200_v6 = vsel %vm844_vm4, %v3384_v9, 0.0 }
 0x953   : > { %3385 = vpow2.f32 %v2184_v55  ;;  %2201 = vadd.xlane.f32.xlu1 %v2200_v6 }
 0x956   : > { %v2160_v11 = vpop.xlane.xlu1 %2159 }
 0x957   : > { %v2174_v27 = vsub.f32 %v2136_v29, %v2160_v11 }
 0x959   : > { %v3386_v59 = vpop.eup %3385  ;;  %v2186_v43 = vmul.f32 1.442695, %v2174_v27 }
 0x95a   : > { %v2203_v12 = vsel %vm844_vm4, %v3386_v59, 0.0 }
 0x95b   : > { %3387 = vpow2.f32 %v2186_v43  ;;  %2204 = vadd.xlane.f32.xlu2 %v2203_v12 }
 0x95e   : > { %v2163_v63 = vpop.xlane.xlu2 %2162 }
 0x95f   : > { %v2175_v61 = vsub.f32 %v2138_v5, %v2163_v63 }
 0x961   : > { %v3388_v57 = vpop.eup %3387  ;;  %v2188_v18 = vmul.f32 1.442695, %v2175_v61 }
 0x962   : > { %v2206_v41 = vsel %vm844_vm4, %v3388_v57, 0.0 }
 0x963   : > { %3389 = vpow2.f32 %v2188_v18  ;;  %2207 = vadd.xlane.f32.xlu0 %v2206_v41 }
 0x966   : > { %v2166_v37 = vpop.xlane.xlu0 %2165 }
 0x967   : > { %v2176_v33 = vsub.f32 %v2141_v25, %v2166_v37 }
 0x969   : > { %v3390_v46 = vpop.eup %3389  ;;  %v2190_v4 = vmul.f32 1.442695, %v2176_v33 }
 0x96a   : > { %v2209_v29 = vsel %vm844_vm4, %v3390_v46, 0.0 }
 0x96b   : > { %3391 = vpow2.f32 %v2190_v4  ;;  %2210 = vadd.xlane.f32.xlu1 %v2209_v29 }
 0x96e   : > { %v2169_v0 = vpop.xlane.xlu1 %2168 }
 0x96f   : > { %v2177_v52 = vsub.f32 %v2143_v56, %v2169_v0 }
 0x971   : > { %v3392_v26 = vpop.eup %3391  ;;  %v2192_v8 = vmul.f32 1.442695, %v2177_v52 }
 0x972   : > { %v2212_v5 = vsel %vm844_vm4, %v3392_v26, 0.0 }
 0x973   : > { %3393 = vpow2.f32 %v2192_v8  ;;  %2213 = vadd.xlane.f32.xlu2 %v2212_v5 }
 0x979   : > { %v3394_v7 = vpop.eup %3393 }
 0x97a   : > { %v2215_v10 = vsel %vm844_vm4, %v3394_v7, 0.0 }
 0x97b   : > { %2216 = vadd.xlane.f32.xlu0 %v2215_v10 }
 0x9b6   : > { %v2196_v42 = vpop.xlane.xlu2 %2195 }
 0x9b7   : > { %3395 = vrcp.f32 %v2196_v42 }
 0x9bd   : > { %v3396_v1 = vpop.eup %3395 }
 0x9be   : > { %v2199_v25 = vpop.xlane.xlu0 %2198  ;;  %v2226_v21 = vmul.f32 %v3396_v1, %v3380_v38  ;;  %v3101_v38 = vld [vmem:[%s4231_s9 + $0x18] sm:$0xf] }
 0x9bf   : > { %3397 = vrcp.f32 %v2199_v25 }
 0x9c5   : > { %v3398_v14 = vpop.eup %3397 }
 0x9c6   : > { %v2227_v53 = vmul.f32 %v3398_v14, %v3382_v15  ;;  %v2202_v56 = vpop.xlane.xlu1 %2201  ;;  %v3239_v15 = vld [vmem:[%s4231_s9 + $0x18] sm:$0x30] }
 0x9c7   : > { %3399 = vrcp.f32 %v2202_v56  ;;  %v3102_v18 = vor.u32 %v3239_v15, %v3101_v38  ;;  %v3117_v15 = vld [vmem:[%s4233_s11 + $0x10] sm:$0xf] }
 0x9c8   : > { %v2234_v55 = vpack.c.bf16 %v2227_v53, %v2226_v21 }
 0x9c9   : > { %v2308_v41 = vsel %vm1387_vm5, %v3102_v18, 0  ;;  %v3243_v18 = vld [vmem:[%s4233_s11 + $0x14] sm:$0xf0] }
 0x9ca   : > { %3093 = vmatmul.msk.bf16.vlgmr.msrb.gmra.mxu3 %vm844_vm4, %v2234_v55  ;;  %2317 = vmatpush.bf16.msra.mxu0 %v2308_v41  ;;  %v3125_v55 = vld [vmem:[%s4233_s11 + $0x20] sm:$0xf]  ;;  %v3242_v41 = vld [vmem:[%s4233_s11 + $0x14] sm:$0xf] }
 0x9cd   : > { %v3400_v11 = vpop.eup %3399 }
 0x9ce   : > { %v2205_v6 = vpop.xlane.xlu2 %2204  ;;  %v2228_v43 = vmul.f32 %v3400_v11, %v3384_v9 }
 0x9cf   : > { %3401 = vrcp.f32 %v2205_v6  ;;  %v3127_v6 = vld [vmem:[%s4233_s11 + $0x28] sm:$0xf0] }
 0x9d5   : > { %v3402_v27 = vpop.eup %3401 }
 0x9d6   : > { %v2229_v12 = vmul.f32 %v3402_v27, %v3386_v59  ;;  %v2208_v61 = vpop.xlane.xlu0 %2207 }
 0x9d7   : > { %3403 = vrcp.f32 %v2208_v61 }
 0x9d8   : > { %v2235_v63 = vpack.c.bf16 %v2229_v12, %v2228_v43 }
 0x9da   : > { %3094 = vmatmul.msk.bf16.gmra.mxu3 %vm844_vm4, %v2235_v63 }
 0x9dd   : > { %v3404_v9 = vpop.eup %3403 }
 0x9de   : > { %v2211_v37 = vpop.xlane.xlu1 %2210  ;;  %v2230_v33 = vmul.f32 %v3404_v9, %v3388_v57  ;;  %v3119_v9 = vld [vmem:[%s4233_s11 + $0x18] sm:$0xf0] }
 0x9df   : > { %3405 = vrcp.f32 %v2211_v37  ;;  %v3118_v37 = vor.u32 %v3243_v18, %v3117_v15 }
 0x9e5   : > { %v3406_v59 = vpop.eup %3405 }
 0x9e6   : > { %v2231_v4 = vmul.f32 %v3406_v59, %v3390_v46  ;;  %v2214_v0 = vpop.xlane.xlu2 %2213  ;;  %v3122_v59 = vor.u32 %v3242_v41, %v3119_v9 }
 0x9e7   : > { %3407 = vrcp.f32 %v2214_v0 }
 0x9e8   : > { %v2236_v29 = vpack.c.bf16 %v2231_v4, %v2230_v33  ;;  %v3109_v33 = vld [vmem:[%s4233_s11] sm:$0xf]  ;;  %v3241_v4 = vld [vmem:[%s4233_s11 + $0x4] sm:$0xf0] }
 0x9e9   : > { %v3110_v0 = vor.u32 %v3241_v4, %v3109_v33  ;;  %v3254_v33 = vld [vmem:[%s4235_s13 + $0x40] sm:$0xff] }
 0x9ea   : > { %3095 = vmatmul.msk.bf16.gmra.mxu3 %vm844_vm4, %v2236_v29  ;;  %v3240_v29 = vld [vmem:[%s4233_s11 + $0x4] sm:$0xf]  ;;  %v2377_v4 = vld [vmem:[%s4234_s12] sm:$0x3] }
 0x9ed   : > { %v3408_v8 = vpop.eup %3407 }
 0x9ee   : > { %v2217_v52 = vpop.xlane.xlu0 %2216  ;;  %v2232_v10 = vmul.f32 %v3408_v8, %v3392_v26  ;;  %v3245_v26 = vld [vmem:[%s4233_s11 + $0x24] sm:$0xf0] }
 0x9ef   : > { %3409 = vrcp.f32 %v2217_v52  ;;  %v3126_v56 = vor.u32 %v3245_v26, %v3125_v55  ;;  %v3111_v52 = vld [vmem:[%s4233_s11 + $0x8] sm:$0xf0] }
 0x9f0   : > { %v3114_v8 = vor.u32 %v3240_v29, %v3111_v52 }
 0x9f1   : > { %2430 = vmatpush.bf16.msrb.mxu1 %v3126_v56 }
 0x9f5   : > { %v3410_v5 = vpop.eup %3409  ;;  %2431 = vmatpush.bf16.msrb.mxu1 %v3118_v37  ;;  %v4241_v37 = vmax.f32 %v3625_v49, 0.0  ;;  %v3256_v49 = vld [vmem:[%s4235_s13 + $0x50] sm:$0xff] }
 0x9f6   : > { %v2233_v42 = vmul.f32 %v3410_v5, %v3394_v7  ;;  %v3244_v7 = vld [vmem:[%s4233_s11 + $0x24] sm:$0xf] }
 0x9f7   : > { %v3130_v11 = vor.u32 %v3244_v7, %v3127_v6 }
 0x9f8   : > { %v2237_v25 = vpack.c.bf16 %v2233_v42, %v2232_v10  ;;  %v1452_v10 = vadd.f32 %v3902_v62, %v3867_v19  ;;  %v1457_v62 = vadd.f32 %v3908_v13, %v3874_v3  ;;  %v3253_v3 = vld [vmem:[%s4235_s13 + $0x38] sm:$0xff] }
 0x9f9   : > { %2459 = vmatpush.bf16.msra.mxu2 %v3130_v11  ;;  %2432 = vmatpush.bf16.msrb.mxu1 %v3110_v0  ;;  %v3257_v13 = vld [vmem:[%s4235_s13 + $0x58] sm:$0xff]  ;;  %v2379_v0 = vperm.slane %v2377_v4, 0 }
 0x9fa   : > { %3096 = vmatmul.msk.bf16.gmra.mxu3 %vm844_vm4, %v2237_v25  ;;  %v3281_v25 = vld [vmem:[%s4232_s10] ss:$0 sm:$0xff]  ;;  %2652 = vmatpush.bf16.msrb.mxu0 %v3257_v13 }
 0x9fb   : > { %2619 = vmatpush.bf16.msra.mxu3 %v3253_v3 }
 0x9fd   : > { %2460 = vmatpush.bf16.msra.mxu2 %v3122_v59 }
 0x9fe   : > { %2653 = vmatpush.bf16.msrb.mxu0 %v3256_v49 }
 0x9ff   : > { %2620 = vmatpush.bf16.msra.mxu3 %v3252_v28 }
 0xa01   : > { %2461 = vmatpush.bf16.msra.mxu2 %v3114_v8 }
 0xa4d   : > { %v2263_v1 = vpop.f32.mrf.mxu3 }
 0xa55   : > { %v2265_v14 = vpop.f32.mrf.mxu3 }
 0xa56   : > { %v2283_v21 = vpack.c.bf16 %v2265_v14, %v2263_v1  ;;  %v1901_v1 = vadd.f32 %v4020_v50, %v1452_v10  ;;  %v1903_v50 = vadd.f32 %v4026_v17, %v1457_v62  ;;  %v2380_v10 = vperm.slane %v2377_v4, 1 }
 0xa58   : > { %3103 = vmatmul.msk.bf16.vlgmr.msra.gmra.mxu0 %vm790_vm3, %v2283_v21 }
 0xa5d   : > { %v2268_v57 = vpop.f32.mrf.mxu3 }
 0xa65   : > { %v2270_v46 = vpop.f32.mrf.mxu3 }
 0xa66   : > { %v2284_v53 = vpack.c.bf16 %v2270_v46, %v2268_v57 }
 0xa68   : > { %3104 = vmatmul.msk.bf16.gmra.mxu0 %vm790_vm3, %v2284_v53 }
 0xa6d   : > { %v2273_v27 = vpop.f32.mrf.mxu3 }
 0xa75   : > { %v2275_v43 = vpop.f32.mrf.mxu3 }
 0xa76   : > { %v2285_v12 = vpack.c.bf16 %v2275_v43, %v2273_v27 }
 0xa78   : > { %3105 = vmatmul.msk.bf16.gmra.mxu0 %vm790_vm3, %v2285_v12 }
 0xa7d   : > { %v2278_v63 = vpop.f32.mrf.mxu3 }
 0xa85   : > { %v2280_v61 = vpop.f32.mrf.mxu3 }
 0xa86   : > { %v2286_v38 = vpack.c.bf16 %v2280_v61, %v2278_v63  ;;  %v3250_v63 = vld [vmem:[%s4235_s13 + $0x20] sm:$0xff]  ;;  %v1467_v61 = vadd.f32 %v3925_v60, %v3897_v47  ;;  %v3249_v47 = vld [vmem:[%s4235_s13 + $0x18] sm:$0xff]  ;;  %v3248_v60 = vld [vmem:[%s4235_s13 + $0x10] sm:$0xff] }
 0xa88   : > { %3106 = vmatmul.msk.bf16.gmra.mxu0 %vm790_vm3, %v2286_v38  ;;  %v1907_v15 = vadd.f32 %v4038_v36, %v1467_v61  ;;  %v3255_v36 = vld [vmem:[%s4235_s13 + $0x48] sm:$0xff] }
 0xa89   : > { %2654 = vmatpush.bf16.msrb.mxu0 %v3255_v36 }
 0xa8d   : > { %2655 = vmatpush.bf16.msrb.mxu0 %v3254_v33 }
 0xad5   : > { %v2319_v5 = vpop.f32.mrf.mxu0 }
 0xad6   : > { %v2339_v42 = vadd.f32 %v2319_v5, %v4018_v51 }
 0xad8   : > { %v2351_v21 = vadd.f32 %v3281_v25, %v2339_v42 }
 0xada   : > { %v2359_v53 = vadd.f32 %v2351_v21, %v586_v23 }
 0xadd   : > { %v2321_v14 = vpop.f32.mrf.mxu0 }
 0xade   : > { %v2340_v57 = vadd.f32 %v2321_v14, %v1901_v1 }
 0xae0   : > { %v2352_v46 = vadd.f32 %v3281_v25, %v2340_v57 }
 0xae2   : > { %v2360_v55 = vadd.f32 %v2352_v46, %v587_v24 }
 0xae4   : > { %v2367_v26 = vpack.c.bf16 %v2360_v55, %v2359_v53 }
 0xae5   : > { %v2324_v19 = vpop.f32.mrf.mxu0 }
 0xae6   : > { %3131 = vmatmul.msk.bf16.vlgmr.msrb.gmra.mxu1 %vm626_vm2, %v2367_v26  ;;  %3135 = vmatmul.msk.bf16.vlgmr.msra.gmra.mxu2 %vm626_vm2, %v2367_v26  ;;  %v2341_v51 = vadd.f32 %v2324_v19, %v4024_v35  ;;  %v3251_v35 = vld [vmem:[%s4235_s13 + $0x28] sm:$0xff] }
 0xae7   : > { %2621 = vmatpush.bf16.msra.mxu3 %v3251_v35 }
 0xae8   : > { %v2353_v56 = vadd.f32 %v3281_v25, %v2341_v51 }
 0xaea   : > { %v2361_v22 = vadd.f32 %v2353_v56, %v588_v31 }
 0xaeb   : > { %2622 = vmatpush.bf16.msra.mxu3 %v3250_v63 }
 0xaed   : > { %v2326_v7 = vpop.f32.mrf.mxu0 }
 0xaee   : > { %v2342_v20 = vadd.f32 %v2326_v7, %v1903_v50 }
 0xaef   : > { %2623 = vmatpush.bf16.msra.mxu3 %v3249_v47 }
 0xaf0   : > { %v2354_v23 = vadd.f32 %v3281_v25, %v2342_v20 }
 0xaf2   : > { %v2362_v24 = vadd.f32 %v2354_v23, %v589_v32  ;;  %v1905_v32 = vadd.f32 %v4032_v2, %v1462_v30 }
 0xaf3   : > { %2624 = vmatpush.bf16.msra.mxu3 %v3248_v60 }
 0xaf4   : > { %v2368_v6 = vpack.c.bf16 %v2362_v24, %v2361_v22 }
 0xaf5   : > { %v2329_v11 = vpop.f32.mrf.mxu0 }
 0xaf6   : > { %3132 = vmatmul.msk.bf16.gmra.mxu1 %vm626_vm2, %v2368_v6  ;;  %3136 = vmatmul.msk.bf16.gmra.mxu2 %vm626_vm2, %v2368_v6  ;;  %v2343_v31 = vadd.f32 %v2329_v11, %v4030_v34 }
 0xaf7   : > { %2625 = vmatpush.bf16.msra.mxu3 %v3247_v48  ;;  %v3282_v48 = vld [vmem:[%s4236_s14] ss:$0 sm:$0xff] }
 0xaf8   : > { %v2355_v27 = vadd.f32 %v3281_v25, %v2343_v31 }
 0xafa   : > { %v2363_v58 = vadd.f32 %v2355_v27, %v590_v44 }
 0xafd   : > { %v2331_v17 = vpop.f32.mrf.mxu0 }
 0xafe   : > { %v2344_v43 = vadd.f32 %v2331_v17, %v1905_v32 }
 0xb00   : > { %v2356_v12 = vadd.f32 %v3281_v25, %v2344_v43 }
 0xb02   : > { %v2364_v16 = vadd.f32 %v2356_v12, %v591_v45 }
 0xb04   : > { %v2369_v34 = vpack.c.bf16 %v2364_v16, %v2363_v58 }
 0xb05   : > { %v2334_v2 = vpop.f32.mrf.mxu0 }
 0xb06   : > { %3133 = vmatmul.msk.bf16.gmra.mxu1 %vm626_vm2, %v2369_v34  ;;  %3137 = vmatmul.msk.bf16.gmra.mxu2 %vm626_vm2, %v2369_v34  ;;  %v2345_v38 = vadd.f32 %v2334_v2, %v4036_v54  ;;  %v3246_v54 = vld [vmem:[%s4235_s13] sm:$0xff] }
 0xb07   : > { %2626 = vmatpush.bf16.msra.mxu3 %v3246_v54 }
 0xb08   : > { %v2357_v39 = vadd.f32 %v3281_v25, %v2345_v38 }
 0xb0a   : > { %v2365_v45 = vadd.f32 %v2357_v39, %v4240_v40 }
 0xb0d   : > { %v2336_v18 = vpop.f32.mrf.mxu0 }
 0xb0e   : > { %v2346_v44 = vadd.f32 %v2336_v18, %v1907_v15 }
 0xb10   : > { %v2358_v41 = vadd.f32 %v3281_v25, %v2346_v44 }
 0xb12   : > { %v2366_v9 = vadd.f32 %v2358_v41, %v4241_v37 }
 0xb14   : > { %v2370_v59 = vpack.c.bf16 %v2366_v9, %v2365_v45 }
 0xb16   : > { %3134 = vmatmul.msk.bf16.gmra.mxu1 %vm626_vm2, %v2370_v59  ;;  %3138 = vmatmul.msk.bf16.gmra.mxu2 %vm626_vm2, %v2370_v59 }
 0xb63   : > { %v2434_v29 = vpop.f32.mrf.mxu1 }
 0xb64   : > { %v2435_v8 = vadd.f32 %v2434_v29, %v2379_v0 }
 0xb66   : > { %v2483_v25 = vmax.f32 %v2435_v8, 0.0 }
 0xb69   : > { %v2463_v52 = vpop.f32.mrf.mxu2 }
 0xb6a   : > { %v2464_v14 = vadd.f32 %v2463_v52, %v2380_v10 }
 0xb6b   : > { %v2436_v5 = vpop.f32.mrf.mxu1 }
 0xb6c   : > { %v2437_v42 = vadd.f32 %v2436_v5, %v2379_v0  ;;  %v2484_v55 = vmax.f32 %v2464_v14, 0.0 }
 0xb6e   : > { %v2485_v1 = vmax.f32 %v2437_v42, 0.0 }
 0xb70   : > { %v2499_v21 = vpack.c.bf16 %v2485_v1, %v2483_v25 }
 0xb71   : > { %v2465_v57 = vpop.f32.mrf.mxu2 }
 0xb72   : > { %v2466_v46 = vadd.f32 %v2465_v57, %v2380_v10  ;;  %2627 = vmatmul.bf16.vlgmr.msra.gmra.mxu3 %v2499_v21 }
 0xb73   : > { %v2439_v53 = vpop.f32.mrf.mxu1 }
 0xb74   : > { %v2486_v26 = vmax.f32 %v2466_v46, 0.0  ;;  %v2440_v51 = vadd.f32 %v2439_v53, %v2379_v0 }
 0xb76   : > { %v2500_v19 = vpack.c.bf16 %v2486_v26, %v2484_v55  ;;  %v2487_v56 = vmax.f32 %v2440_v51, 0.0 }
 0xb78   : > { %3187 = vmatmul.msk.bf16.vlgmr.msrb.gmra.mxu0 %vm844_vm4, %v2500_v19 }
 0xb79   : > { %v2468_v62 = vpop.f32.mrf.mxu2 }
 0xb7a   : > { %v2469_v23 = vadd.f32 %v2468_v62, %v2380_v10 }
 0xb7b   : > { %v2441_v50 = vpop.f32.mrf.mxu1 }
 0xb7c   : > { %v2442_v7 = vadd.f32 %v2441_v50, %v2379_v0  ;;  %v2488_v3 = vmax.f32 %v2469_v23, 0.0 }
 0xb7e   : > { %v2489_v20 = vmax.f32 %v2442_v7, 0.0 }
 0xb80   : > { %v2501_v22 = vpack.c.bf16 %v2489_v20, %v2487_v56 }
 0xb81   : > { %v2470_v24 = vpop.f32.mrf.mxu2 }
 0xb82   : > { %v2471_v6 = vadd.f32 %v2470_v24, %v2380_v10  ;;  %2632 = vmatmul.bf16.gmra.mxu3 %v2501_v22 }
 0xb83   : > { %v2444_v11 = vpop.f32.mrf.mxu1 }
 0xb84   : > { %v2490_v13 = vmax.f32 %v2471_v6, 0.0  ;;  %v2445_v31 = vadd.f32 %v2444_v11, %v2379_v0 }
 0xb86   : > { %v2502_v28 = vpack.c.bf16 %v2490_v13, %v2488_v3  ;;  %v2491_v17 = vmax.f32 %v2445_v31, 0.0 }
 0xb88   : > { %3188 = vmatmul.msk.bf16.gmra.mxu0 %vm844_vm4, %v2502_v28 }
 0xb89   : > { %v2473_v30 = vpop.f32.mrf.mxu2 }
 0xb8a   : > { %v2474_v43 = vadd.f32 %v2473_v30, %v2380_v10 }
 0xb8b   : > { %v2446_v32 = vpop.f32.mrf.mxu1 }
 0xb8c   : > { %v2447_v35 = vadd.f32 %v2446_v32, %v2379_v0  ;;  %v2492_v34 = vmax.f32 %v2474_v43, 0.0 }
 0xb8e   : > { %v2493_v27 = vmax.f32 %v2447_v35, 0.0 }
 0xb90   : > { %v2503_v12 = vpack.c.bf16 %v2493_v27, %v2491_v17 }
 0xb91   : > { %v2475_v63 = vpop.f32.mrf.mxu2 }
 0xb92   : > { %v2476_v58 = vadd.f32 %v2475_v63, %v2380_v10  ;;  %2637 = vmatmul.bf16.gmra.mxu3 %v2503_v12 }
 0xb93   : > { %v2449_v16 = vpop.f32.mrf.mxu1 }
 0xb94   : > { %v2494_v2 = vmax.f32 %v2476_v58, 0.0  ;;  %v2450_v15 = vadd.f32 %v2449_v16, %v2379_v0 }
 0xb96   : > { %v2504_v61 = vpack.c.bf16 %v2494_v2, %v2492_v34  ;;  %v2495_v44 = vmax.f32 %v2450_v15, 0.0 }
 0xb98   : > { %3189 = vmatmul.msk.bf16.gmra.mxu0 %vm844_vm4, %v2504_v61 }
 0xb99   : > { %v2478_v38 = vpop.f32.mrf.mxu2 }
 0xb9a   : > { %v2479_v40 = vadd.f32 %v2478_v38, %v2380_v10 }
 0xb9b   : > { %v2451_v18 = vpop.f32.mrf.mxu1 }
 0xb9c   : > { %v2452_v39 = vadd.f32 %v2451_v18, %v2379_v0  ;;  %v2496_v59 = vmax.f32 %v2479_v40, 0.0 }
 0xb9e   : > { %v2497_v41 = vmax.f32 %v2452_v39, 0.0 }
 0xba0   : > { %v2505_v45 = vpack.c.bf16 %v2497_v41, %v2495_v44 }
 0xba1   : > { %v2480_v37 = vpop.f32.mrf.mxu2 }
 0xba2   : > { %v2481_v9 = vadd.f32 %v2480_v37, %v2380_v10  ;;  %2642 = vmatmul.bf16.gmra.mxu3 %v2505_v45 }
 0xba4   : > { %v2498_v47 = vmax.f32 %v2481_v9, 0.0 }
 0xba6   : > { %v2506_v60 = vpack.c.bf16 %v2498_v47, %v2496_v59 }
 0xba8   : > { %3190 = vmatmul.msk.bf16.gmra.mxu0 %vm844_vm4, %v2506_v60 }
 0xbf5   : > { %v2628_v49 = vpop.f32.mrf.mxu3  ;;  %v2657_v54 = vpop.f32.mrf.mxu0 }
 0xbf6   : > { %v2629_v36 = vadd.f32 %v3282_v48, %v2628_v49 }
 0xbf8   : > { %v2658_v33 = vadd.f32 %v2657_v54, %v2629_v36 }
 0xbfa   : > { %v2677_v4 = vpack.c.bf16 %v2658_v33, %v2658_v33 }
 0xbfc   : > { %2686 = vst.msk [vmem:[%s4201_s30] sm:$0xf] %vm2685_vm6, %v2677_v4 }
 0xbfd   : > { %v2630_v29 = vpop.f32.mrf.mxu3  ;;  %v2659_v0 = vpop.f32.mrf.mxu0 }
 0xbfe   : > { %v2631_v52 = vadd.f32 %v3282_v48, %v2630_v29 }
 0xc00   : > { %v2660_v8 = vadd.f32 %v2659_v0, %v2631_v52 }
 0xc02   : > { %v2678_v5 = vpack.c.bf16 %v2660_v8, %v2660_v8 }
 0xc04   : > { %2687 = vst.msk [vmem:[%s4201_s30 + $0x4] sm:$0xf] %vm2685_vm6, %v2678_v5 }
 0xc05   : > { %v2633_v10 = vpop.f32.mrf.mxu3  ;;  %v2662_v42 = vpop.f32.mrf.mxu0 }
 0xc06   : > { %v2634_v25 = vadd.f32 %v3282_v48, %v2633_v10 }
 0xc08   : > { %v2663_v1 = vadd.f32 %v2662_v42, %v2634_v25 }
 0xc0a   : > { %v2679_v14 = vpack.c.bf16 %v2663_v1, %v2663_v1 }
 0xc0c   : > { %2688 = vst.msk [vmem:[%s4201_s30 + $0x8] sm:$0xf] %vm2685_vm6, %v2679_v14 }
 0xc0d   : > { %v2635_v21 = vpop.f32.mrf.mxu3  ;;  %v2664_v57 = vpop.f32.mrf.mxu0 }
 0xc0e   : > { %v2636_v46 = vadd.f32 %v3282_v48, %v2635_v21 }
 0xc10   : > { %v2665_v53 = vadd.f32 %v2664_v57, %v2636_v46 }
 0xc12   : > { %v2680_v55 = vpack.c.bf16 %v2665_v53, %v2665_v53 }
 0xc14   : > { %2689 = vst.msk [vmem:[%s4201_s30 + $0xc] sm:$0xf] %vm2685_vm6, %v2680_v55 }
 0xc15   : > { %v2638_v26 = vpop.f32.mrf.mxu3  ;;  %v2667_v19 = vpop.f32.mrf.mxu0 }
 0xc16   : > { %v2639_v62 = vadd.f32 %v3282_v48, %v2638_v26 }
 0xc18   : > { %v2668_v51 = vadd.f32 %v2667_v19, %v2639_v62 }
 0xc1a   : > { %v2681_v50 = vpack.c.bf16 %v2668_v51, %v2668_v51 }
 0xc1c   : > { %2690 = vst.msk [vmem:[%s4201_s30 + $0x10] sm:$0xf] %vm2685_vm6, %v2681_v50 }
 0xc1d   : > { %v2640_v7 = vpop.f32.mrf.mxu3  ;;  %v2669_v56 = vpop.f32.mrf.mxu0 }
 0xc1e   : > { %v2641_v20 = vadd.f32 %v3282_v48, %v2640_v7 }
 0xc20   : > { %v2670_v23 = vadd.f32 %v2669_v56, %v2641_v20 }
 0xc22   : > { %v2682_v22 = vpack.c.bf16 %v2670_v23, %v2670_v23 }
 0xc24   : > { %2691 = vst.msk [vmem:[%s4201_s30 + $0x14] sm:$0xf] %vm2685_vm6, %v2682_v22 }
 0xc25   : > { %v2643_v24 = vpop.f32.mrf.mxu3  ;;  %v2672_v6 = vpop.f32.mrf.mxu0 }
 0xc26   : > { %v2644_v11 = vadd.f32 %v3282_v48, %v2643_v24 }
 0xc28   : > { %v2673_v3 = vadd.f32 %v2672_v6, %v2644_v11 }
 0xc2a   : > { %v2683_v13 = vpack.c.bf16 %v2673_v3, %v2673_v3 }
 0xc2c   : > { %2692 = vst.msk [vmem:[%s4201_s30 + $0x18] sm:$0xf] %vm2685_vm6, %v2683_v13 }
 0xc2d   : > { %v2645_v28 = vpop.f32.mrf.mxu3  ;;  %v2674_v31 = vpop.f32.mrf.mxu0 }
 0xc2e   : > { %v2646_v30 = vadd.f32 %v3282_v48, %v2645_v28 }
 0xc30   : > { %v2675_v32 = vadd.f32 %v2674_v31, %v2646_v30 }
 0xc32   : > { %v2684_v35 = vpack.c.bf16 %v2675_v32, %v2675_v32 }
 0xc34   : > { %2693 = vst.msk [vmem:[%s4201_s30 + $0x1c] sm:$0xf] %vm2685_vm6, %v2684_v35 }
 0xc35 PF: > { %s25_s18 = sadd.s32 1, %s3417_s18  }
 0xc36   : > { %p22_p4 = scmp.ge.s32.totalorder %s25_s18, 4  }
 0xc38   :  { %24 = sbr.rel (!%p22_p4) target bundleno = 1 (0x1), region = 131 }

// kernel: feedformer_decoder_forward.3
= control target key start
LH: loop header
LB: loop body
LE: loop exit
PB: predicated region body
PF: predicated region fallthrough
CT: control target
= control target key end

     0   :  { %s7697_s13 = smov 0   ;;  %s9718_s0 = inlined_call_operand.vmem [shape: bf16[2,110,256], index: 0, kind: input, shape index: {}]   ;;  %s9719_s1 = inlined_call_operand.vmem [shape: bf16[2,110,48], index: 1, kind: input, shape index: {}]   ;;  %s9720_s2 = inlined_call_operand.vmem [shape: f32[80,1], index: 2, kind: input, shape index: {}]   ;;  %s9721_s3 = inlined_call_operand.vmem [shape: bf16[9,256,64], index: 3, kind: input, shape index: {}]   ;;  %s9722_s4 = inlined_call_operand.vmem [shape: bf16[9,48,64], index: 4, kind: input, shape index: {}]   ;;  %s9723_s5 = inlined_call_operand.vmem [shape: f32[1,64], index: 5, kind: input, shape index: {}]   ;;  %s9724_s6 = inlined_call_operand.vmem [shape: bf16[9,64,64], index: 6, kind: input, shape index: {}]   ;;  %s9725_s7 = inlined_call_operand.vmem [shape: f32[1,64], index: 7, kind: input, shape index: {}]   ;;  %s9726_s8 = inlined_call_operand.vmem [shape: bf16[64,6], index: 8, kind: input, shape index: {}]   ;;  %s9727_s9 = inlined_call_operand.vmem [shape: f32[1,6], index: 9, kind: input, shape index: {}]   ;;  %s9728_s10 = inlined_call_operand.vmem [shape: f32[2,80,6], index: 10, kind: output, shape index: {}]  }
   0x1 LB: > { %s5689_s14 = sadd.s32 4294967295, %s7639_s13   ;;  %p5693_p0 = scmp.ge.s32.totalorder %s7639_s13, 1  ;;  %s7639_s13 = sphi %s7697_s13, %s20_s13  }
   0x2   : > { %p322_p1 = scmp.lt.s32.totalorder %s7639_s13, 3 }
   0x4   : > { %p323_p2 = pnand %p5693_p0, %p322_p1 }
   0x5   : > { %p365_p3 = scmp.lt.s32.totalorder (!%p323_p2), %s5689_s14, 1 }
   0x6   : > { %326 = sbr.rel (%p323_p2) target bundleno = 1205 (0x4b5), region = 60 }
   0xb   : > { %v7295_v0 = vld [vmem:[%s9722_s4 + $0x10] sm:$0xff]  ;;  %v7311_v1 = vld [vmem:[%s9721_s3 + $0xb8] sm:$0xff]  ;;  %v7294_v2 = vld [vmem:[%s9722_s4 + $0x8] sm:$0xff]  ;;  %s9730_s14 = smov (!%p365_p3, %s5689_s14), 1  ;;  %vm482_vm0 = vcmask 392192   ;;  %vm1314_vm2 = vcmask 1046528  }
   0xc   : > { %7593 = vmatpush.bf16.msra.mxu1 %v7295_v0  ;;  %7594 = vmatpush.bf16.msra.mxu2 %v7295_v0  ;;  %v7310_v3 = vld [vmem:[%s9721_s3 + $0xb0] sm:$0xff]  ;;  %s7609_s23 = smul.u32 56, %s9730_s14  ;;  %v7293_v4 = vld [vmem:[%s9722_s4] sm:$0xff]  ;;  %v7287_v5 = vld [vmem:[%s9721_s3 + $0x78] sm:$0xff]  ;;  %vm835_vm1 = vsmask.f32 7424 }
   0xd   : > { %503 = vmatpush.bf16.msra.mxu0 %v7295_v0  ;;  %1030 = vmatpush.bf16.msra.mxu3 %v7311_v1  ;;  %s7608_s26 = smul.u32 112, %s9730_s14  ;;  %v7279_v6 = vld [vmem:[%s9721_s3 + $0x38] sm:$0xff]  ;;  %v7309_v11 = vld [vmem:[%s9721_s3 + $0xa8] sm:$0xff]  ;;  %v7286_v12 = vld [vmem:[%s9721_s3 + $0x70] sm:$0xff]  ;;  %vm2088_vm3 = vsmask.f32 6400 }
   0xe   : > { %s7730_s11 = scalar_lea.vmem %s9719_s1, %s7609_s23  ;;  %v7319_v7 = vld [vmem:[%s9721_s3 + $0xf8] sm:$0xff]  ;;  %v7278_v13 = vld [vmem:[%s9721_s3 + $0x30] sm:$0xff]  ;;  %v7308_v16 = vld [vmem:[%s9721_s3 + $0xa0] sm:$0xff]  ;;  %vm2559_vm4 = vcmask 1045504   ;;  %vm3333_vm5 = vsmask.f32 5376 }
   0xf   : > { %v7290_v8 = vld [vmem:[%s7730_s11 + $0x10] sm:$0xff]  ;;  %v7292_v9 = vld [vmem:[%s7730_s11 + $0x20] sm:$0xff]  ;;  %s7743_s20 = scalar_lea.vmem %s9718_s0, %s7608_s26  ;;  %v7285_v19 = vld [vmem:[%s9721_s3 + $0x68] sm:$0xff]  ;;  %vm3804_vm6 = vcmask 1044480   ;;  %vm4204_vm7 = vcmask 519168   ;;  %vm4321_vm8 = vcmask 523264  }
  0x10   : > { %7595 = vmatpush.bf16.msra.mxu1 %v7294_v2  ;;  %7596 = vmatpush.bf16.msra.mxu2 %v7294_v2  ;;  %v7288_v10 = vld [vmem:[%s7730_s11] sm:$0xff]  ;;  %v7318_v14 = vld [vmem:[%s9721_s3 + $0xf0] sm:$0xff]  ;;  %v7766_v17 = vld [vmem:[%s7743_s20 + $0x8] sm:$0xff]  ;;  %vm4513_vm9 = vsmask.f32 4352  ;;  %s7610_s23 = smul.u32 80, %s9730_s14 }
  0x11   : > { %504 = vmatpush.bf16.msra.mxu0 %v7294_v2  ;;  %1031 = vmatpush.bf16.msra.mxu3 %v7310_v3  ;;  %v746_v15 = vld [vmem:[%s7743_s20] sm:$0xff]  ;;  %v803_v20 = vunpack.c.l.b16 %v7766_v17  ;;  %v7277_v21 = vld [vmem:[%s9721_s3 + $0x28] sm:$0xff]  ;;  %v7307_v25 = vld [vmem:[%s9721_s3 + $0x98] sm:$0xff]  ;;  %v804_v35 = vunpack.c.h.b16 %v7766_v17  ;;  %vm5611_vm10 = vcmask 48128  }
  0x12   : > { %v801_v18 = vunpack.c.l.b16 %v746_v15  ;;  %v7317_v22 = vld [vmem:[%s9721_s3 + $0xe8] sm:$0xff]  ;;  %v7284_v23 = vld [vmem:[%s9721_s3 + $0x60] sm:$0xff]  ;;  %v5872_v27 = vld [vmem:[%s7743_s20 + $0x10] sm:$0xf]  ;;  %v802_v34 = vunpack.c.h.b16 %v746_v15  ;;  %s9693_s26 = scalar_lea.vmem %s9728_s10, %s7610_s23 }
  0x13   : > { %v7276_v24 = vld [vmem:[%s9721_s3 + $0x20] sm:$0xff]  ;;  %v7297_v28 = vld [vmem:[%s7743_s20 + $0x14] sm:$0xf0]  ;;  %v7306_v30 = vld [vmem:[%s9721_s3 + $0x90] sm:$0xff] }
  0x14   : > { %7597 = vmatpush.bf16.msra.mxu1 %v7293_v4  ;;  %7598 = vmatpush.bf16.msra.mxu2 %v7293_v4  ;;  %v823_v26 = vpack.c.b16 %v803_v20, %v801_v18  ;;  %v7316_v29 = vld [vmem:[%s9721_s3 + $0xe0] sm:$0xff]  ;;  %v7797_v31 = vor.u32 %v7297_v28, %v5872_v27  ;;  %v7283_v33 = vld [vmem:[%s9721_s3 + $0x58] sm:$0xff]  ;;  %v7289_v39 = vld [vmem:[%s7730_s11 + $0x8] sm:$0xff]  ;;  %v824_v46 = vpack.c.b16 %v804_v35, %v802_v34 }
  0x15   : > { %505 = vmatpush.bf16.msra.mxu0 %v7293_v4  ;;  %1032 = vmatpush.bf16.msra.mxu3 %v7309_v11  ;;  %v7275_v36 = vld [vmem:[%s9721_s3 + $0x18] sm:$0xff]  ;;  %v7305_v40 = vld [vmem:[%s9721_s3 + $0x88] sm:$0xff]  ;;  %v7282_v44 = vld [vmem:[%s9721_s3 + $0x50] sm:$0xff] }
  0x16   : > { %v839_v32 = vshll.u32 %v823_v26, 16  ;;  %v7315_v37 = vld [vmem:[%s9721_s3 + $0xd8] sm:$0xff]  ;;  %v837_v41 = vshrl.u32 %v823_v26, 16  ;;  %v844_v43 = vshll.u32 %v7797_v31, 16  ;;  %v7274_v45 = vld [vmem:[%s9721_s3 + $0x10] sm:$0xff]  ;;  %v7304_v50 = vld [vmem:[%s9721_s3 + $0x80] sm:$0xff] }
  0x17   : > { %5731 = vmatmul.msk.bf16.vlgmr.msra.gmra.mxu1 %vm482_vm0, %v7290_v8  ;;  %5733 = vmatmul.msk.bf16.vlgmr.msra.gmra.mxu2 %vm482_vm0, %v7292_v9  ;;  %v7291_v38 = vld [vmem:[%s7730_s11 + $0x18] sm:$0xff]  ;;  %v7314_v47 = vld [vmem:[%s9721_s3 + $0xd0] sm:$0xff]  ;;  %v7281_v53 = vld [vmem:[%s9721_s3 + $0x48] sm:$0xff]  ;;  %v851_v55 = vshll.u32 %v824_v46, 16  ;;  %v849_v63 = vshrl.u32 %v824_v46, 16  ;;  %v860_v15 = vshrl.u32 %v7797_v31, 16 }
  0x18   : > { %712 = vmatpush.bf16.msrb.mxu2 %v7287_v5  ;;  %678 = vmatpush.bf16.msrb.mxu1 %v7279_v6  ;;  %v841_v42 = vrot.slane %v839_v32, 1  ;;  %v7296_v48 = vld [vmem:[%s7743_s20 + $0x14] sm:$0xf]  ;;  %v5874_v49 = vld [vmem:[%s7743_s20 + $0x18] sm:$0xf0]  ;;  %v846_v52 = vrot.slane %v844_v43, 1 }
  0x19   : > { %1064 = vmatpush.bf16.msrb.mxu0 %v7319_v7  ;;  %1033 = vmatpush.bf16.msra.mxu3 %v7308_v16  ;;  %v7836_v54 = vor.u32 %v7296_v48, %v5874_v49  ;;  %v7273_v56 = vld [vmem:[%s9721_s3 + $0x8] sm:$0xff]  ;;  %v7262_v58 = vld [vmem:[%s7743_s20 + $0x4] sm:$0xf]  ;;  %v5880_v61 = vld [vmem:[%s7743_s20 + $0x20] sm:$0xf]  ;;  %v853_v0 = vrot.slane %v851_v55, 1 }
  0x1a   : > { %5729 = vmatmul.msk.bf16.vlgmr.msra.gmra.mxu0 %vm482_vm0, %v7288_v10  ;;  %v842_v51 = vor.u32 %v841_v42, %v837_v41  ;;  %v7313_v57 = vld [vmem:[%s9721_s3 + $0xc8] sm:$0xff]  ;;  %v7280_v62 = vld [vmem:[%s9721_s3 + $0x40] sm:$0xff]  ;;  %v7334_v4 = vld [vmem:[%s9721_s3 + $0x138] sm:$0xff] }
  0x1b   : > { %v5738_v59 = vld [vmem:[%s7743_s20 + $0x8] sm:$0xf0]  ;;  %v856_v1 = vshll.u32 %v7836_v54, 16  ;;  %v7299_v2 = vld [vmem:[%s7743_s20 + $0x24] sm:$0xf0]  ;;  %v7272_v3 = vld [vmem:[%s9721_s3] sm:$0xff]  ;;  %v854_v11 = vor.u32 %v853_v0, %v849_v63 }
  0x1c   : > { %713 = vmatpush.bf16.msrb.mxu2 %v7286_v12  ;;  %679 = vmatpush.bf16.msrb.mxu1 %v7278_v13  ;;  %v847_v60 = vsel %vm835_vm1, %v842_v51, %v846_v52  ;;  %v7312_v5 = vld [vmem:[%s9721_s3 + $0xc0] sm:$0xff]  ;;  %v7326_v6 = vld [vmem:[%s9722_s4 + $0x28] sm:$0xff]  ;;  %v5741_v7 = vor.u32 %v7262_v58, %v5738_v59  ;;  %v7867_v10 = vor.u32 %v7299_v2, %v5880_v61  ;;  %v7333_v13 = vld [vmem:[%s9721_s3 + $0x130] sm:$0xff]  ;;  %v868_v32 = vshrl.u32 %v7836_v54, 16 }
  0x1d   : > { %1065 = vmatpush.bf16.msrb.mxu0 %v7318_v14  ;;  %1034 = vmatpush.bf16.msra.mxu3 %v7307_v25  ;;  %v5736_v8 = vld [vmem:[%s7743_s20] sm:$0xf]  ;;  %v7263_v9 = vld [vmem:[%s7743_s20 + $0x4] sm:$0xf0]  ;;  %v858_v12 = vrot.slane %v856_v1, 1  ;;  %v7329_v51 = vld [vmem:[%s9721_s3 + $0x110] sm:$0xff] }
  0x1e   : > { %v5737_v14 = vor.u32 %v7263_v9, %v5736_v8  ;;  %v864_v16 = vshll.u32 %v7867_v10, 16  ;;  %v7325_v18 = vld [vmem:[%s9722_s4 + $0x20] sm:$0xff]  ;;  %v7264_v28 = vld [vmem:[%s7743_s20 + $0x14] sm:$0xf]  ;;  %v5888_v34 = vld [vmem:[%s7743_s20 + $0x30] sm:$0xf] }
  0x1f   : > { %v7331_v27 = vld [vmem:[%s9721_s3 + $0x120] sm:$0xff]  ;;  %v870_v42 = vor.u32 %v868_v32, %v858_v12  ;;  %v876_v46 = vshrl.u32 %v7867_v10, 16  ;;  %v7300_v49 = vld [vmem:[%s7743_s20 + $0x34] sm:$0xf]  ;;  %v7340_v58 = vld [vmem:[%s9721_s3 + $0x168] sm:$0xff] }
  0x20   : > { %714 = vmatpush.bf16.msrb.mxu2 %v7285_v19  ;;  %680 = vmatpush.bf16.msrb.mxu1 %v7277_v21  ;;  %v859_v19 = vsel %vm835_vm1, %v854_v11, %v858_v12  ;;  %v7332_v21 = vld [vmem:[%s9721_s3 + $0x128] sm:$0xff]  ;;  %v866_v25 = vrot.slane %v864_v16, 1  ;;  %v5896_v1 = vld [vmem:[%s7743_s20 + $0x40] sm:$0xf]  ;;  %v7338_v12 = vld [vmem:[%s9721_s3 + $0x158] sm:$0xff] }
  0x21   : > { %1066 = vmatpush.bf16.msrb.mxu0 %v7317_v22  ;;  %1035 = vmatpush.bf16.msra.mxu3 %v7306_v30  ;;  %v7298_v22 = vld [vmem:[%s7743_s20 + $0x24] sm:$0xf]  ;;  %v7328_v59 = vld [vmem:[%s9721_s3 + $0x108] sm:$0xff] }
  0x22   : > { %v5754_v61 = vld [vmem:[%s7743_s20 + $0x28] sm:$0xf0]  ;;  %v7303_v2 = vld [vmem:[%s7743_s20 + $0x44] sm:$0xf0]  ;;  %v7302_v16 = vld [vmem:[%s7743_s20 + $0x44] sm:$0xf] }
  0x24   : > { %715 = vmatpush.bf16.msrb.mxu2 %v7284_v23  ;;  %681 = vmatpush.bf16.msrb.mxu1 %v7276_v24  ;;  %v5882_v23 = vld [vmem:[%s7743_s20 + $0x28] sm:$0xf0]  ;;  %v862_v24 = vor.u32 %v860_v15, %v846_v52  ;;  %v7341_v52 = vld [vmem:[%s9721_s3 + $0x170] sm:$0xff] }
  0x25   : > { %1067 = vmatpush.bf16.msrb.mxu0 %v7316_v29  ;;  %1036 = vmatpush.bf16.msra.mxu3 %v7305_v40  ;;  %v7883_v26 = vor.u32 %v7298_v22, %v5882_v23  ;;  %v5746_v29 = vld [vmem:[%s7743_s20 + $0x18] sm:$0xf0]  ;;  %v7265_v40 = vld [vmem:[%s7743_s20 + $0x14] sm:$0xf0]  ;;  %v7327_v23 = vld [vmem:[%s9721_s3 + $0x100] sm:$0xff] }
  0x26   : > { %v867_v30 = vsel %vm835_vm1, %v862_v24, %v866_v25  ;;  %v7345_v24 = vld [vmem:[%s9722_s4 + $0x40] sm:$0xff] }
  0x27   : > { %5732 = vmatmul.msk.bf16.gmra.mxu1 %vm482_vm0, %v7291_v38  ;;  %v5749_v38 = vor.u32 %v7264_v28, %v5746_v29  ;;  %v884_v63 = vshrl.u32 %v7883_v26, 16  ;;  %v7336_v28 = vld [vmem:[%s9721_s3 + $0x148] sm:$0xff]  ;;  %v7268_v29 = vld [vmem:[%s7743_s20 + $0x34] sm:$0xf] }
  0x28   : > { %716 = vmatpush.bf16.msrb.mxu2 %v7283_v33  ;;  %682 = vmatpush.bf16.msrb.mxu1 %v7275_v36  ;;  %v872_v33 = vshll.u32 %v7883_v26, 16  ;;  %v7301_v36 = vld [vmem:[%s7743_s20 + $0x34] sm:$0xf0] }
  0x29   : > { %1068 = vmatpush.bf16.msrb.mxu0 %v7315_v37  ;;  %1037 = vmatpush.bf16.msra.mxu3 %v7304_v50  ;;  %v7330_v37 = vld [vmem:[%s9721_s3 + $0x118] sm:$0xff]  ;;  %v7900_v41 = vor.u32 %v7301_v36, %v5888_v34 }
  0x2a   : > { %5730 = vmatmul.msk.bf16.gmra.mxu0 %vm482_vm0, %v7289_v39  ;;  %v5744_v39 = vld [vmem:[%s7743_s20 + $0x10] sm:$0xf]  ;;  %v874_v43 = vrot.slane %v872_v33, 1  ;;  %v5890_v50 = vld [vmem:[%s7743_s20 + $0x38] sm:$0xf0] }
  0x2b   : > { %v5762_v33 = vld [vmem:[%s7743_s20 + $0x38] sm:$0xf0] }
  0x2c   : > { %717 = vmatpush.bf16.msrb.mxu2 %v7282_v44  ;;  %683 = vmatpush.bf16.msrb.mxu1 %v7274_v45  ;;  %v5745_v44 = vor.u32 %v7265_v40, %v5744_v39  ;;  %v7342_v45 = vld [vmem:[%s9721_s3 + $0x178] sm:$0xff]  ;;  %v875_v48 = vsel %vm835_vm1, %v870_v42, %v874_v43  ;;  %v886_v8 = vor.u32 %v884_v63, %v874_v43  ;;  %v5760_v39 = vld [vmem:[%s7743_s20 + $0x30] sm:$0xf]  ;;  %v5770_v63 = vld [vmem:[%s7743_s20 + $0x48] sm:$0xf0] }
  0x2d   : > { %1069 = vmatpush.bf16.msrb.mxu0 %v7314_v47  ;;  %1038 = vmatmul.bf16.vlgmr.msra.gmra.mxu3 %v847_v60  ;;  %v880_v47 = vshll.u32 %v7900_v41, 16  ;;  %v7266_v60 = vld [vmem:[%s7743_s20 + $0x24] sm:$0xf]  ;;  %v7269_v40 = vld [vmem:[%s7743_s20 + $0x34] sm:$0xf0] }
  0x2e   : > { %1477 = vmatpush.bf16.msrb.mxu3 %v7342_v45  ;;  %v7344_v45 = vld [vmem:[%s9722_s4 + $0x38] sm:$0xff] }
  0x2f   : > { %v882_v55 = vrot.slane %v880_v47, 1 }
  0x30   : > { %718 = vmatpush.bf16.msrb.mxu2 %v7281_v53  ;;  %684 = vmatpush.bf16.msrb.mxu1 %v7273_v56  ;;  %v878_v53 = vor.u32 %v876_v46, %v866_v25  ;;  %v7324_v56 = vld [vmem:[%s9722_s4 + $0x18] sm:$0xff]  ;;  %v5761_v46 = vor.u32 %v7269_v40, %v5760_v39 }
  0x31   : > { %1070 = vmatpush.bf16.msrb.mxu0 %v7313_v57  ;;  %v7919_v57 = vor.u32 %v7300_v49, %v5890_v50  ;;  %v7369_v49 = vld [vmem:[%s9721_s3 + $0x1f8] sm:$0xff] }
  0x32   : > { %1478 = vmatpush.bf16.msrb.mxu3 %v7341_v52  ;;  %v7343_v52 = vld [vmem:[%s9722_s4 + $0x30] sm:$0xff] }
  0x33   : > { %v888_v0 = vshll.u32 %v7919_v57, 16  ;;  %v900_v34 = vshrl.u32 %v7919_v57, 16 }
  0x34   : > { %719 = vmatpush.bf16.msrb.mxu2 %v7280_v62  ;;  %685 = vmatpush.bf16.msrb.mxu1 %v7272_v3  ;;  %v883_v62 = vsel %vm835_vm1, %v878_v53, %v882_v55  ;;  %v7339_v3 = vld [vmem:[%s9721_s3 + $0x160] sm:$0xff]  ;;  %v7361_v53 = vld [vmem:[%s9721_s3 + $0x1b8] sm:$0xff] }
  0x35   : > { %1071 = vmatpush.bf16.msrb.mxu0 %v7312_v5  ;;  %v5752_v5 = vld [vmem:[%s7743_s20 + $0x20] sm:$0xf]  ;;  %v890_v9 = vrot.slane %v888_v0, 1 }
  0x36   : > { %1479 = vmatpush.bf16.msrb.mxu3 %v7340_v58  ;;  %v7368_v58 = vld [vmem:[%s9721_s3 + $0x1f0] sm:$0xff] }
  0x37   : > { %720 = vmatmul.bf16.vlgmr.msrb.gmra.mxu2 %v5741_v7  ;;  %686 = vmatmul.bf16.vlgmr.msrb.gmra.mxu1 %v5737_v14  ;;  %v7939_v7 = vor.u32 %v7303_v2, %v5896_v1  ;;  %v891_v15 = vsel %vm835_vm1, %v886_v8, %v890_v9  ;;  %v902_v43 = vor.u32 %v900_v34, %v890_v9  ;;  %v1275_v2 = vld [vmem:[%s7743_s20] sm:$0xee] }
  0x38   : > { %1443 = vmatpush.bf16.msra.mxu2 %v7334_v4  ;;  %1236 = vmatpush.bf16.msra.mxu1 %v7326_v6  ;;  %v5757_v4 = vor.u32 %v7266_v60, %v5754_v61  ;;  %v7267_v6 = vld [vmem:[%s7743_s20 + $0x24] sm:$0xf0]  ;;  %v7360_v60 = vld [vmem:[%s9721_s3 + $0x1b0] sm:$0xff]  ;;  %v7270_v61 = vld [vmem:[%s7743_s20 + $0x44] sm:$0xf] }
  0x39   : > { %v5753_v11 = vor.u32 %v7267_v6, %v5752_v5  ;;  %v896_v14 = vshll.u32 %v7939_v7, 16  ;;  %1581 = vmatpush.bf16.msra.mxu0 %v7345_v24  ;;  %v908_v47 = vshrl.u32 %v7939_v7, 16  ;;  %v7271_v5 = vld [vmem:[%s7743_s20 + $0x44] sm:$0xf0]  ;;  %v1311_v6 = vunpack.c.h.b16 %v1275_v2  ;;  %v7561_v24 = vld [vmem:[%s7730_s11] sm:$0xf0] }
  0x3a   : > { %1072 = vmatmul.bf16.vlgmr.msrb.gmra.mxu0 %v859_v19  ;;  %1480 = vmatpush.bf16.msrb.mxu3 %v7339_v3  ;;  %v7337_v19 = vld [vmem:[%s9721_s3 + $0x150] sm:$0xff]  ;;  %v5773_v3 = vor.u32 %v7270_v61, %v5770_v63  ;;  %v1327_v61 = vrot.slane %v7919_v57, 1 }
  0x3b   : > { %v898_v22 = vrot.slane %v896_v14, 1  ;;  %v1310_v14 = vunpack.c.l.b16 %v1275_v2  ;;  %v7364_v63 = vld [vmem:[%s9721_s3 + $0x1d0] sm:$0xff] }
  0x3c   : > { %1444 = vmatpush.bf16.msra.mxu2 %v7333_v13  ;;  %1237 = vmatpush.bf16.msra.mxu1 %v7325_v18  ;;  %v892_v13 = vshrl.u32 %v7900_v41, 16  ;;  %v5898_v18 = vld [vmem:[%s7743_s20 + $0x48] sm:$0xf0] }
  0x3d   : > { %1043 = vmatmul.bf16.gmra.mxu3 %v867_v30  ;;  %v7958_v25 = vor.u32 %v7302_v16, %v5898_v18  ;;  %1582 = vmatpush.bf16.msra.mxu0 %v7344_v45  ;;  %v7367_v16 = vld [vmem:[%s9721_s3 + $0x1e8] sm:$0xff]  ;;  %v7321_v45 = vld [vmem:[%s7730_s11 + $0x10] sm:$0xff] }
  0x3e   : > { %1481 = vmatpush.bf16.msrb.mxu3 %v7338_v12  ;;  %v1313_v12 = vpack.c.b16 %v804_v35, %v1311_v6  ;;  %v7359_v35 = vld [vmem:[%s9721_s3 + $0x1a8] sm:$0xff]  ;;  %v1325_v6 = vrot.slane %v7900_v41, 1 }
  0x3f   : > { %v904_v36 = vshll.u32 %v7958_v25, 16  ;;  %v916_v0 = vshrl.u32 %v7958_v25, 16 }
  0x40   : > { %1445 = vmatpush.bf16.msra.mxu2 %v7332_v21  ;;  %1238 = vmatpush.bf16.msra.mxu1 %v7324_v56  ;;  %v894_v21 = vor.u32 %v892_v13, %v882_v55  ;;  %v910_v55 = vor.u32 %v908_v47, %v898_v22  ;;  %v1318_v18 = vrot.slane %v1313_v12, 1  ;;  %v7363_v12 = vld [vmem:[%s9721_s3 + $0x1c8] sm:$0xff] }
  0x41   : > { %1583 = vmatpush.bf16.msra.mxu0 %v7343_v52 }
  0x42   : > { %1482 = vmatpush.bf16.msrb.mxu3 %v7337_v19  ;;  %v899_v30 = vsel %vm835_vm1, %v894_v21, %v898_v22  ;;  %v1319_v19 = vrot.slane %v7836_v54, 1  ;;  %v7320_v21 = vld [vmem:[%s7730_s11 + $0x8] sm:$0xff] }
  0x43   : > { %v1533_v39 = vrot.slane %v7320_v21, 1  ;;  %v1166_v47 = vshrl.u32 %v7320_v21, 16 }
  0x44   : > { %1446 = vmatpush.bf16.msra.mxu2 %v7331_v27  ;;  %v756_v27 = vld [vmem:[%s7743_s20 + $0x50] sm:$0x11]  ;;  %1837 = vmatpush.bf16.msrb.mxu1 %v7361_v53 }
  0x45   : > { %v821_v32 = vunpack.c.l.b16 %v756_v27 }
  0x46   : > { %1483 = vmatpush.bf16.msrb.mxu3 %v7336_v28  ;;  %v1320_v28 = vsel %vm1314_vm2, %v1318_v18, %v1319_v19 }
  0x47   : > { %725 = vmatmul.bf16.gmra.mxu2 %v5749_v38  ;;  %691 = vmatmul.bf16.gmra.mxu1 %v5745_v44  ;;  %v5765_v38 = vor.u32 %v7268_v29, %v5762_v33  ;;  %v7974_v42 = vpack.c.b16 %v821_v32, %v821_v32  ;;  %v906_v44 = vrot.slane %v904_v36, 1  ;;  %v1162_v32 = vshll.u32 %v7320_v21, 16  ;;  %v7366_v36 = vld [vmem:[%s9721_s3 + $0x1e0] sm:$0xff] }
  0x48   : > { %1447 = vmatpush.bf16.msra.mxu2 %v7330_v37  ;;  %v7335_v37 = vld [vmem:[%s9721_s3 + $0x140] sm:$0xff]  ;;  %1838 = vmatpush.bf16.msrb.mxu1 %v7360_v60  ;;  %v1316_v33 = vrot.slane %v7797_v31, 1 }
  0x49   : > { %v907_v50 = vsel %vm835_vm1, %v902_v43, %v906_v44  ;;  %v918_v8 = vor.u32 %v916_v0, %v906_v44  ;;  %v7358_v31 = vld [vmem:[%s9721_s3 + $0x1a0] sm:$0xff]  ;;  %v1323_v44 = vrot.slane %v7883_v26, 1  ;;  %v7356_v0 = vld [vmem:[%s9721_s3 + $0x190] sm:$0xff] }
  0x4a   : > { %1077 = vmatmul.bf16.gmra.mxu0 %v875_v48  ;;  %1484 = vmatpush.bf16.msrb.mxu3 %v7335_v37  ;;  %v912_v48 = vshll.u32 %v7974_v42, 16 }
  0x4b   : > { %v1328_v57 = vsel %vm1314_vm2, %v1323_v44, %v1327_v61 }
  0x4c   : > { %1448 = vmatpush.bf16.msra.mxu2 %v7329_v51  ;;  %v822_v51 = vunpack.c.h.b16 %v756_v27  ;;  %v914_v56 = vrot.slane %v912_v48, 1  ;;  %v7562_v27 = vld [vmem:[%s7730_s11] sm:$0xe]  ;;  %1839 = vmatpush.bf16.msrb.mxu1 %v7359_v35  ;;  %v1170_v48 = vshll.u32 %v7321_v45, 16 }
  0x4d   : > { %1048 = vmatmul.bf16.gmra.mxu3 %v883_v62  ;;  %v7563_v34 = vor.u32 %v7562_v27, %v7561_v24  ;;  %v7381_v35 = vld [vmem:[%s9721_s3 + $0x220] sm:$0xff]  ;;  %v1331_v24 = vrot.slane %v7958_v25, 1 }
  0x4e   : > { %v915_v62 = vsel %vm835_vm1, %v910_v55, %v914_v56  ;;  %v1172_v52 = vrot.slane %v1170_v48, 1  ;;  %v1535_v55 = vrot.slane %v7321_v45, 1  ;;  %v8107_v27 = vld [vmem:[%s7730_s11 + $0x20] sm:$0xff] }
  0x4f   : > { %v1332_v25 = vsel %vm1314_vm2, %v1327_v61, %v1331_v24 }
  0x50   : > { %1449 = vmatpush.bf16.msra.mxu2 %v7328_v59  ;;  %v7994_v59 = vpack.c.b16 %v822_v51, %v822_v51  ;;  %1840 = vmatpush.bf16.msrb.mxu1 %v7358_v31  ;;  %v7357_v51 = vld [vmem:[%s9721_s3 + $0x198] sm:$0xff]  ;;  %v1118_v31 = vld [vmem:[%s7730_s11 + $0x28] sm:$0x1] }
  0x52   : > { %v920_v1 = vshll.u32 %v7994_v59, 16  ;;  %v1335_v61 = vrot.slane %v7994_v59, 1 }
  0x54   : > { %1450 = vmatpush.bf16.msra.mxu2 %v7327_v23  ;;  %v922_v9 = vrot.slane %v920_v1, 1  ;;  %v1312_v23 = vpack.c.b16 %v803_v20, %v1310_v14  ;;  %v1164_v20 = vrot.slane %v1162_v32, 1  ;;  %1841 = vmatpush.bf16.msrb.mxu1 %v7357_v51  ;;  %v7384_v1 = vld [vmem:[%s9721_s3 + $0x238] sm:$0xff] }
  0x55   : > { %2301 = vmatpush.bf16.msrb.mxu0 %v7384_v1  ;;  %v1190_v1 = vshrl.u32 %v8107_v27, 16 }
  0x56   : > { %v923_v13 = vsel %vm835_vm1, %v918_v8, %v922_v9  ;;  %v1315_v54 = vrot.slane %v1312_v23, 1  ;;  %v1168_v26 = vor.u32 %v1166_v47, %v1164_v20  ;;  %v7383_v8 = vld [vmem:[%s9721_s3 + $0x230] sm:$0xff]  ;;  %v7376_v23 = vld [vmem:[%s9722_s4 + $0x58] sm:$0xff]  ;;  %v1147_v47 = vunpack.c.l.b16 %v1118_v31  ;;  %v6160_v31 = vld [vmem:[%s7743_s20 + $0x20] sm:$0xf0] }
  0x57   : > { %730 = vmatmul.bf16.gmra.mxu2 %v5757_v4  ;;  %696 = vmatmul.bf16.gmra.mxu1 %v5753_v11  ;;  %v5768_v4 = vld [vmem:[%s7743_s20 + $0x40] sm:$0xf] }
  0x58   : > { %1871 = vmatpush.bf16.msrb.mxu2 %v7369_v49  ;;  %v5769_v11 = vor.u32 %v7271_v5, %v5768_v4  ;;  %v1317_v37 = vsel %vm1314_vm2, %v1315_v54, %v1316_v33  ;;  %v7365_v49 = vld [vmem:[%s9721_s3 + $0x1d8] sm:$0xff]  ;;  %1842 = vmatpush.bf16.msrb.mxu1 %v7356_v0 }
  0x59   : > { %2302 = vmatpush.bf16.msrb.mxu0 %v7383_v8  ;;  %2010 = vmatpush.bf16.msra.mxu3 %v7376_v23 }
  0x5a   : > { %1082 = vmatmul.bf16.gmra.mxu0 %v891_v15  ;;  %v7538_v15 = vld [vmem:[%s7730_s11] sm:$0xff]  }
  0x5b   : > { %v1157_v22 = vshll.u32 %v7538_v15, 16  ;;  %v1155_v29 = vshrl.u32 %v7538_v15, 16  ;;  %v7382_v15 = vld [vmem:[%s9721_s3 + $0x228] sm:$0xff] }
  0x5c   : > { %1872 = vmatpush.bf16.msrb.mxu2 %v7368_v58  ;;  %v1173_v58 = vsel %vm835_vm1, %v1168_v26, %v1172_v52 }
  0x5d   : > { %1053 = vmatmul.bf16.gmra.mxu3 %v899_v30  ;;  %v1159_v30 = vrot.slane %v1157_v22, 1  ;;  %2303 = vmatpush.bf16.msrb.mxu0 %v7382_v15  ;;  %v1620_v15 = vld [vmem:[%s7743_s20 + $0x8] sm:$0xee] }
  0x5e   : > { %v1675_v23 = vunpack.c.l.b16 %v1620_v15 }
  0x5f   : > { %v1160_v17 = vor.u32 %v1159_v30, %v1155_v29  ;;  %v7380_v29 = vld [vmem:[%s9721_s3 + $0x218] sm:$0xff]  ;;  %v7375_v30 = vld [vmem:[%s9722_s4 + $0x50] sm:$0xff] }
  0x60   : > { %1873 = vmatpush.bf16.msrb.mxu2 %v7367_v16  ;;  %2011 = vmatpush.bf16.msra.mxu3 %v7375_v30 }
  0x61   : > { %v1165_v40 = vsel %vm835_vm1, %v1160_v17, %v1164_v20  ;;  %2304 = vmatpush.bf16.msrb.mxu0 %v7381_v35  ;;  %v7354_v17 = vld [vmem:[%s9721_s3 + $0x180] sm:$0xff]  ;;  %v7379_v20 = vld [vmem:[%s9721_s3 + $0x210] sm:$0xff] }
  0x64   : > { %1874 = vmatpush.bf16.msrb.mxu2 %v7366_v36  ;;  %v1329_v36 = vrot.slane %v7939_v7, 1 }
  0x65   : > { %2305 = vmatpush.bf16.msrb.mxu0 %v7380_v29 }
  0x67   : > { %735 = vmatmul.bf16.gmra.mxu2 %v5765_v38  ;;  %701 = vmatmul.bf16.gmra.mxu1 %v5761_v46  ;;  %v1532_v38 = vrot.slane %v7563_v34, 1  ;;  %v1324_v46 = vsel %vm1314_vm2, %v1319_v19, %v1323_v44  ;;  %v1539_v44 = vrot.slane %v8107_v27, 1 }
  0x68   : > { %1875 = vmatpush.bf16.msrb.mxu2 %v7365_v49 }
  0x69   : > { %v1534_v43 = vsel %vm1314_vm2, %v1532_v38, %v1533_v39  ;;  %v7374_v38 = vld [vmem:[%s9722_s4 + $0x48] sm:$0xff]  ;;  %2306 = vmatpush.bf16.msrb.mxu0 %v7379_v20 }
  0x6a   : > { %1087 = vmatmul.bf16.gmra.mxu0 %v907_v50  ;;  %v1321_v50 = vrot.slane %v7867_v10, 1  ;;  %v1536_v10 = vsel %vm1314_vm2, %v1533_v39, %v1535_v55  ;;  %2012 = vmatpush.bf16.msra.mxu3 %v7374_v38 }
  0x6c   : > { %v1322_v53 = vsel %vm1314_vm2, %v1316_v33, %v1321_v50  ;;  %1876 = vmatpush.bf16.msrb.mxu2 %v7364_v63  ;;  %v1326_v14 = vsel %vm1314_vm2, %v1321_v50, %v1325_v6  ;;  %v1186_v33 = vshll.u32 %v8107_v27, 16 }
  0x6d   : > { %1058 = vmatmul.bf16.gmra.mxu3 %v915_v62  ;;  %v8057_v62 = vld [vmem:[%s7730_s11 + $0x18] sm:$0xff] }
  0x6e   : > { %v1178_v4 = vshll.u32 %v8057_v62, 16  ;;  %v1537_v41 = vrot.slane %v8057_v62, 1  ;;  %v1182_v54 = vshrl.u32 %v8057_v62, 16  ;;  %v7392_v62 = vld [vmem:[%s9721_s3 + $0x278] sm:$0xff] }
  0x70   : > { %1877 = vmatpush.bf16.msrb.mxu2 %v7363_v12  ;;  %v1538_v22 = vsel %vm1314_vm2, %v1535_v55, %v1537_v41  ;;  %v1540_v26 = vsel %vm1314_vm2, %v1537_v41, %v1539_v44  ;;  %v7377_v55 = vld [vmem:[%s9721_s3 + $0x200] sm:$0xff] }
  0x77   : > { %740 = vmatmul.bf16.gmra.mxu2 %v5773_v3  ;;  %706 = vmatmul.bf16.gmra.mxu1 %v5769_v11  ;;  %v1174_v3 = vshrl.u32 %v7321_v45, 16  ;;  %v1180_v11 = vrot.slane %v1178_v4, 1  ;;  %v1336_v4 = vsel %vm1314_vm2, %v1331_v24, %v1335_v61  ;;  %v7391_v24 = vld [vmem:[%s9721_s3 + $0x270] sm:$0xff] }
  0x79   : > { %v1176_v9 = vor.u32 %v1174_v3, %v1172_v52  ;;  %v1184_v39 = vor.u32 %v1182_v54, %v1180_v11  ;;  %v7395_v52 = vld [vmem:[%s9722_s4 + $0x70] sm:$0xff]  ;;  %v7347_v54 = vld [vmem:[%s7743_s20 + $0x1c] sm:$0xf0] }
  0x7a   : > { %1092 = vmatmul.bf16.gmra.mxu0 %v923_v13  ;;  %v7355_v13 = vld [vmem:[%s9721_s3 + $0x188] sm:$0xff] }
  0x7b   : > { %1843 = vmatpush.bf16.msrb.mxu1 %v7355_v13  ;;  %v1181_v18 = vsel %vm835_vm1, %v1176_v9, %v1180_v11  ;;  %v1333_v9 = vrot.slane %v7974_v42, 1  ;;  %v8170_v11 = vld [vmem:[%s7730_s11 + $0x8] sm:$0xf] }
  0x7c   : > { %v1945_v42 = vunpack.c.l.b16 %v8170_v11 }
  0x7d   : > { %1485 = vmatmul.bf16.vlgmr.msrb.gmra.mxu3 %v1320_v28  ;;  %v7362_v28 = vld [vmem:[%s9721_s3 + $0x1c0] sm:$0xff] }
  0x7e   : > { %1878 = vmatpush.bf16.msrb.mxu2 %v7362_v28  ;;  %v1334_v28 = vsel %vm1314_vm2, %v1329_v36, %v1333_v9 }
  0x7f   : > { %1844 = vmatpush.bf16.msrb.mxu1 %v7354_v17  ;;  %v1676_v17 = vunpack.c.h.b16 %v1620_v15 }
  0x87   : > { %1451 = vmatmul.bf16.vlgmr.msra.gmra.mxu2 %v1317_v37  ;;  %6000 = vmatmul.msk.bf16.vlgmr.msra.gmra.mxu1 %vm482_vm0, %v1165_v40  ;;  %v1188_v40 = vrot.slane %v1186_v33, 1 }
  0x88   : > { %2481 = vmatpush.bf16.msra.mxu2 %v7395_v52  ;;  %2335 = vmatpush.bf16.msra.mxu1 %v7392_v62 }
  0x89   : > { %v1189_v49 = vsel %vm835_vm1, %v1184_v39, %v1188_v40 }
  0x8a   : > { %6119 = vmatmul.msk.bf16.vlgmr.msra.gmra.mxu0 %vm482_vm0, %v1534_v43  ;;  %v1330_v43 = vsel %vm1314_vm2, %v1325_v6, %v1329_v36  ;;  %v1915_v6 = vld [vmem:[%s7730_s11 + $0x4] sm:$0xe] }
  0x8c   : > { %2336 = vmatpush.bf16.msra.mxu1 %v7391_v24 }
  0x8d   : > { %1490 = vmatmul.bf16.gmra.mxu3 %v1324_v46  ;;  %v7378_v46 = vld [vmem:[%s9721_s3 + $0x208] sm:$0xff] }
  0x8e   : > { %2307 = vmatpush.bf16.msrb.mxu0 %v7378_v46 }
  0x92   : > { %2308 = vmatpush.bf16.msrb.mxu0 %v7377_v55 }
  0x94   : > { %v8047_v56 = vpop.f32.mrf.mxu1 }
  0x97   : > { %1456 = vmatmul.bf16.gmra.mxu2 %v1322_v53  ;;  %v8050_v60 = vpop.f32.mrf.mxu0  ;;  %6001 = vmatmul.msk.bf16.gmra.mxu1 %vm482_vm0, %v1173_v58 }
  0x9a   : > { %6120 = vmatmul.msk.bf16.gmra.mxu0 %vm482_vm0, %v1536_v10  ;;  %v8092_v19 = vpop.f32.mrf.mxu2 }
  0x9c   : > { %v8068_v2 = vpop.f32.mrf.mxu1 }
  0x9d   : > { %1495 = vmatmul.bf16.gmra.mxu3 %v1328_v57 }
  0x9f   : > { %v8072_v5 = vpop.f32.mrf.mxu0 }
  0xa2   : > { %v8132_v37 = vpop.f32.mrf.mxu2 }
  0xa4   : > { %v8089_v16 = vpop.f32.mrf.mxu1 }
  0xa7   : > { %1461 = vmatmul.bf16.gmra.mxu2 %v1326_v14  ;;  %v8094_v21 = vpop.f32.mrf.mxu0  ;;  %6002 = vmatmul.msk.bf16.gmra.mxu1 %vm482_vm0, %v1181_v18  ;;  %v1192_v14 = vor.u32 %v1190_v1, %v1188_v40  ;;  %v8174_v18 = vld [vmem:[%s7743_s20 + $0x10] sm:$0xff]  ;;  %v7346_v40 = vld [vmem:[%s7743_s20 + $0x1c] sm:$0xf] }
  0xa8   : > { %v1678_v20 = vunpack.c.h.b16 %v8174_v18 }
  0xaa   : > { %6121 = vmatmul.msk.bf16.gmra.mxu0 %vm482_vm0, %v1538_v22  ;;  %v1944_v22 = vunpack.c.l.b16 %v1915_v6 }
  0xac   : > { %v8118_v32 = vpop.f32.mrf.mxu1  ;;  %v8197_v7 = vpack.c.b16 %v1945_v42, %v1944_v22  ;;  %v7394_v22 = vld [vmem:[%s9722_s4 + $0x68] sm:$0xff] }
  0xad   : > { %1500 = vmatmul.bf16.gmra.mxu3 %v1332_v25  ;;  %v6158_v25 = vld [vmem:[%s7743_s20 + $0x18] sm:$0xf]  ;;  %2482 = vmatpush.bf16.msra.mxu2 %v7394_v22 }
  0xae   : > { %v7403_v22 = vld [vmem:[%s9721_s3 + $0x2b8] sm:$0xff] }
  0xaf   : > { %v8123_v34 = vpop.f32.mrf.mxu0  ;;  %2688 = vmatpush.bf16.msrb.mxu3 %v7403_v22  ;;  %v6182_v22 = vld [vmem:[%s7743_s20 + $0x48] sm:$0xf] }
  0xb0   : > { %v1039_v45 = vpop.f32.mrf.mxu3 }
  0xb4   : > { %v687_v48 = vpop.f32.mrf.mxu1 }
  0xb5   : > { %v688_v50 = vadd.f32 %v687_v48, %v8050_v60  ;;  %v1153_v60 = vpack.c.b16 %v1147_v47, %v1147_v47  ;;  %v8205_v48 = vor.u32 %v7347_v54, %v6158_v25 }
  0xb7   : > { %1466 = vmatmul.bf16.gmra.mxu2 %v1330_v43  ;;  %v1073_v51 = vpop.f32.mrf.mxu0  ;;  %6003 = vmatmul.msk.bf16.gmra.mxu1 %vm482_vm0, %v1189_v49  ;;  %v1194_v57 = vshll.u32 %v1153_v60, 16  ;;  %v1541_v29 = vrot.slane %v1153_v60, 1  ;;  %v8193_v43 = vld [vmem:[%s7730_s11 + $0xc] sm:$0xff]  ;;  %v2101_v60 = vshll.u32 %v8205_v48, 16  ;;  %v1710_v15 = vrot.slane %v8205_v48, 1 }
  0xb8   : > { %v1074_v53 = vadd.f32 %v1073_v51, %v1039_v45  ;;  %v1041_v63 = vpop.f32.mrf.mxu3  ;;  %v8210_v51 = vpack.c.b16 %v1678_v20, %v1676_v17  ;;  %v1962_v27 = vrot.slane %v8193_v43, 1  ;;  %v8240_v17 = vld [vmem:[%s7730_s11 + $0x14] sm:$0xff] }
  0xb9   : > { %v1196_v41 = vrot.slane %v1194_v57, 1  ;;  %v1542_v47 = vsel %vm1314_vm2, %v1539_v44, %v1541_v29  ;;  %v2103_v9 = vrot.slane %v2101_v60, 2  ;;  %v7349_v29 = vld [vmem:[%s7743_s20 + $0x2c] sm:$0xf0] }
  0xba   : > { %v721_v58 = vpop.f32.mrf.mxu2  ;;  %6122 = vmatmul.msk.bf16.gmra.mxu0 %vm482_vm0, %v1540_v26  ;;  %v8212_v26 = vor.u32 %v7346_v40, %v6160_v31 }
  0xbb   : > { %v722_v10 = vadd.f32 %v721_v58, %v688_v50  ;;  %v1197_v39 = vsel %vm835_vm1, %v1192_v14, %v1196_v41  ;;  %v2098_v58 = vshrl.u32 %v8205_v48, 16 }
  0xbc   : > { %v689_v3 = vpop.f32.mrf.mxu1  ;;  %v1713_v1 = vrot.slane %v8212_v26, 1 }
  0xbd   : > { %v8162_v0 = vadd.f32 %v1074_v53, %v722_v10  ;;  %v690_v59 = vadd.f32 %v689_v3, %v8072_v5  ;;  %1505 = vmatmul.bf16.gmra.mxu3 %v1336_v4  ;;  %v1677_v5 = vunpack.c.l.b16 %v8174_v18  ;;  %v7390_v53 = vld [vmem:[%s9721_s3 + $0x268] sm:$0xff] }
  0xbe   : > { %2337 = vmatpush.bf16.msra.mxu1 %v7390_v53 }
  0xbf   : > { %v1075_v8 = vpop.f32.mrf.mxu0  ;;  %v1697_v36 = vpack.c.b16 %v1677_v5, %v1675_v23 }
  0xc0   : > { %v1076_v12 = vadd.f32 %v1075_v8, %v1041_v63  ;;  %v1044_v30 = vpop.f32.mrf.mxu3  ;;  %v1712_v63 = vrot.slane %v8210_v51, 1  ;;  %v2100_v8 = vrot.slane %v2098_v58, 1 }
  0xc1   : > { %v2090_v44 = vshrl.u32 %v1697_v36, 16  ;;  %v2093_v55 = vshll.u32 %v1697_v36, 16  ;;  %v1709_v41 = vrot.slane %v1697_v36, 1  ;;  %v7389_v36 = vld [vmem:[%s9721_s3 + $0x260] sm:$0xff] }
  0xc2   : > { %v723_v13 = vpop.f32.mrf.mxu2  ;;  %v2104_v23 = vor.u32 %v2103_v9, %v2100_v8  ;;  %2338 = vmatpush.bf16.msra.mxu1 %v7389_v36 }
  0xc3   : > { %v724_v35 = vadd.f32 %v723_v13, %v690_v59  ;;  %v2092_v3 = vrot.slane %v2090_v44, 1  ;;  %v2095_v59 = vrot.slane %v2093_v55, 2  ;;  %v1711_v54 = vsel %vm1314_vm2, %v1709_v41, %v1710_v15 }
  0xc4   : > { %v692_v38 = vpop.f32.mrf.mxu1 }
  0xc5   : > { %v8186_v33 = vadd.f32 %v1076_v12, %v724_v35  ;;  %v693_v45 = vadd.f32 %v692_v38, %v8094_v21  ;;  %v1961_v21 = vrot.slane %v8197_v7, 1  ;;  %v2096_v35 = vor.u32 %v2095_v59, %v2092_v3 }
  0xc7   : > { %1471 = vmatmul.bf16.gmra.mxu2 %v1334_v28  ;;  %v1078_v46 = vpop.f32.mrf.mxu0  ;;  %6004 = vmatmul.msk.bf16.gmra.mxu1 %vm482_vm0, %v1197_v39  ;;  %v1963_v57 = vsel %vm1314_vm2, %v1961_v21, %v1962_v27  ;;  %v6166_v28 = vld [vmem:[%s7743_s20 + $0x28] sm:$0xf]  ;;  %v2105_v40 = vsel %vm2088_vm3, %v2096_v35, %v2104_v23  ;;  %v8282_v35 = vld [vmem:[%s7730_s11 + $0x1c] sm:$0xff] }
  0xc8   : > { %v1079_v49 = vadd.f32 %v1078_v46, %v1044_v30  ;;  %v1046_v10 = vpop.f32.mrf.mxu3  ;;  %v8244_v31 = vor.u32 %v7349_v29, %v6166_v28  ;;  %v7348_v46 = vld [vmem:[%s7743_s20 + $0x2c] sm:$0xf] }
  0xca   : > { %v726_v50 = vpop.f32.mrf.mxu2  ;;  %6123 = vmatmul.msk.bf16.gmra.mxu0 %vm482_vm0, %v1542_v47  ;;  %v6168_v47 = vld [vmem:[%s7743_s20 + $0x30] sm:$0xf0]  ;;  %v2124_v21 = vshrl.u32 %v8244_v31, 16  ;;  %v2127_v44 = vshll.u32 %v8244_v31, 16  ;;  %v1715_v8 = vrot.slane %v8244_v31, 1 }
  0xcb   : > { %v727_v52 = vadd.f32 %v726_v50, %v693_v45 }
  0xcc   : > { %v694_v62 = vpop.f32.mrf.mxu1  ;;  %v2129_v3 = vrot.slane %v2127_v44, 2 }
  0xcd   : > { %v8222_v61 = vadd.f32 %v1079_v49, %v727_v52  ;;  %v695_v4 = vadd.f32 %v694_v62, %v8123_v34  ;;  %6286 = vmatmul.msk.bf16.vlgmr.msra.gmra.mxu3 %vm482_vm0, %v1963_v57  ;;  %v1714_v34 = vsel %vm1314_vm2, %v1712_v63, %v1713_v1  ;;  %v1964_v52 = vrot.slane %v8240_v17, 1 }
  0xce   : > { %v2126_v57 = vrot.slane %v2124_v21, 1  ;;  %v7401_v21 = vld [vmem:[%s9721_s3 + $0x2a8] sm:$0xff] }
  0xcf   : > { %v1080_v6 = vpop.f32.mrf.mxu0  ;;  %v1965_v60 = vsel %vm1314_vm2, %v1962_v27, %v1964_v52  ;;  %v7388_v27 = vld [vmem:[%s9721_s3 + $0x258] sm:$0xff] }
  0xd0   : > { %v1081_v12 = vadd.f32 %v1080_v6, %v1046_v10  ;;  %v1049_v24 = vpop.f32.mrf.mxu3  ;;  %v8269_v9 = vor.u32 %v2129_v3, %v2126_v57  ;;  %2339 = vmatpush.bf16.msra.mxu1 %v7388_v27 }
  0xd2   : > { %v728_v13 = vpop.f32.mrf.mxu2  ;;  %v2131_v29 = vsel %vm2088_vm3, %v2104_v23, %v8269_v9 }
  0xd3   : > { %v729_v14 = vadd.f32 %v728_v13, %v695_v4  ;;  %v6174_v13 = vld [vmem:[%s7743_s20 + $0x38] sm:$0xf] }
  0xd4   : > { %v697_v25 = vpop.f32.mrf.mxu1 }
  0xd5   : > { %v8236_v30 = vadd.f32 %v1081_v12, %v729_v14  ;;  %v698_v38 = vadd.f32 %v697_v25, %v8047_v56  ;;  %v8252_v56 = vor.u32 %v7348_v46, %v6168_v47  ;;  %v7351_v14 = vld [vmem:[%s7743_s20 + $0x3c] sm:$0xf0] }
  0xd6   : > { %v8287_v25 = vor.u32 %v7351_v14, %v6174_v13 }
  0xd7   : > { %1879 = vmatmul.bf16.vlgmr.msrb.gmra.mxu2 %v1714_v34  ;;  %v1083_v39 = vpop.f32.mrf.mxu0  ;;  %1845 = vmatmul.bf16.vlgmr.msrb.gmra.mxu1 %v1711_v54  ;;  %v1717_v63 = vrot.slane %v8252_v56, 1 }
  0xd8   : > { %v1084_v45 = vadd.f32 %v1083_v39, %v1049_v24  ;;  %v1051_v53 = vpop.f32.mrf.mxu3  ;;  %v6176_v39 = vld [vmem:[%s7743_s20 + $0x40] sm:$0xf0]  ;;  %v2142_v23 = vshrl.u32 %v8287_v25, 16  ;;  %v2145_v46 = vshll.u32 %v8287_v25, 16 }
  0xda   : > { %v731_v49 = vpop.f32.mrf.mxu2  ;;  %2309 = vmatmul.bf16.vlgmr.msrb.gmra.mxu0 %v2105_v40  ;;  %v2144_v3 = vrot.slane %v2142_v23, 1 }
  0xdb   : > { %v732_v50 = vadd.f32 %v731_v49, %v698_v38  ;;  %v7350_v38 = vld [vmem:[%s7743_s20 + $0x3c] sm:$0xf] }
  0xdc   : > { %v699_v58 = vpop.f32.mrf.mxu1  ;;  %v7411_v49 = vld [vmem:[%s9721_s3 + $0x2f8] sm:$0xff] }
  0xdd   : > { %v8256_v55 = vadd.f32 %v1084_v45, %v732_v50  ;;  %v700_v10 = vadd.f32 %v699_v58, %v8068_v2  ;;  %6287 = vmatmul.msk.bf16.gmra.mxu3 %vm482_vm0, %v1965_v60  ;;  %v1718_v2 = vsel %vm1314_vm2, %v1713_v1, %v1717_v63  ;;  %v1716_v1 = vsel %vm1314_vm2, %v1710_v15, %v1715_v8  ;;  %v7402_v15 = vld [vmem:[%s9721_s3 + $0x2b0] sm:$0xff]  ;;  %v7393_v60 = vld [vmem:[%s9722_s4 + $0x60] sm:$0xff] }
  0xde   : > { %v8295_v45 = vor.u32 %v7350_v38, %v6176_v39  ;;  %2689 = vmatpush.bf16.msrb.mxu3 %v7402_v15  ;;  %v7387_v58 = vld [vmem:[%s9721_s3 + $0x250] sm:$0xff]  ;;  %2722 = vmatpush.bf16.msra.mxu0 %v7411_v49  ;;  %v7386_v38 = vld [vmem:[%s9721_s3 + $0x248] sm:$0xff] }
  0xdf   : > { %v1085_v62 = vpop.f32.mrf.mxu0  ;;  %2340 = vmatpush.bf16.msra.mxu1 %v7387_v58  ;;  %2483 = vmatpush.bf16.msra.mxu2 %v7393_v60 }
  0xe0   : > { %v1086_v4 = vadd.f32 %v1085_v62, %v1051_v53  ;;  %v1054_v12 = vpop.f32.mrf.mxu3  ;;  %v1721_v57 = vrot.slane %v8295_v45, 1 }
  0xe2   : > { %v733_v6 = vpop.f32.mrf.mxu2  ;;  %2690 = vmatpush.bf16.msrb.mxu3 %v7401_v21 }
  0xe3   : > { %v734_v59 = vadd.f32 %v733_v6, %v700_v10  ;;  %v7410_v6 = vld [vmem:[%s9721_s3 + $0x2f0] sm:$0xff]  ;;  %2341 = vmatpush.bf16.msra.mxu1 %v7386_v38 }
  0xe4   : > { %v702_v34 = vpop.f32.mrf.mxu1  ;;  %2723 = vmatpush.bf16.msra.mxu0 %v7410_v6 }
  0xe5   : > { %v8273_v41 = vadd.f32 %v1086_v4, %v734_v59  ;;  %v703_v24 = vadd.f32 %v702_v34, %v8089_v16  ;;  %v1966_v16 = vrot.slane %v8282_v35, 1  ;;  %v2147_v4 = vrot.slane %v2145_v46, 2  ;;  %v7353_v34 = vld [vmem:[%s7743_s20 + $0x4c] sm:$0xf0]  ;;  %v7352_v46 = vld [vmem:[%s7743_s20 + $0x4c] sm:$0xf] }
  0xe7   : > { %1884 = vmatmul.bf16.gmra.mxu2 %v1718_v2  ;;  %v1088_v28 = vpop.f32.mrf.mxu0  ;;  %1850 = vmatmul.bf16.gmra.mxu1 %v1716_v1  ;;  %v1967_v53 = vsel %vm1314_vm2, %v1964_v52, %v1966_v16  ;;  %v1719_v2 = vrot.slane %v8287_v25, 1  ;;  %v8331_v13 = vor.u32 %v2147_v4, %v2144_v3  ;;  %v7409_v1 = vld [vmem:[%s9721_s3 + $0x2e8] sm:$0xff] }
  0xe8   : > { %v1089_v54 = vadd.f32 %v1088_v28, %v1054_v12  ;;  %v1056_v47 = vpop.f32.mrf.mxu3  ;;  %v1722_v12 = vsel %vm1314_vm2, %v1717_v63, %v1721_v57  ;;  %v7399_v28 = vld [vmem:[%s9721_s3 + $0x298] sm:$0xff]  ;;  %2724 = vmatpush.bf16.msra.mxu0 %v7409_v1  ;;  %v7397_v3 = vld [vmem:[%s9721_s3 + $0x288] sm:$0xff] }
  0xe9   : > { %v1720_v63 = vsel %vm1314_vm2, %v1715_v8, %v1719_v2  ;;  %v2149_v15 = vsel %vm2088_vm3, %v8269_v9, %v8331_v13  ;;  %v6184_v8 = vld [vmem:[%s7743_s20 + $0x50] sm:$0xf0]  ;;  %v8393_v1 = vld [vmem:[%s7743_s20 + $0x58] sm:$0x33] }
  0xea   : > { %v736_v40 = vpop.f32.mrf.mxu2  ;;  %2314 = vmatmul.bf16.gmra.mxu0 %v2131_v29 }
  0xeb   : > { %v737_v36 = vadd.f32 %v736_v40, %v703_v24 }
  0xec   : > { %v704_v44 = vpop.f32.mrf.mxu1 }
  0xed   : > { %v8302_v50 = vadd.f32 %v1089_v54, %v737_v36  ;;  %v705_v10 = vadd.f32 %v704_v44, %v8118_v32  ;;  %6288 = vmatmul.msk.bf16.gmra.mxu3 %vm482_vm0, %v1967_v53  ;;  %v7400_v32 = vld [vmem:[%s9721_s3 + $0x2a0] sm:$0xff]  ;;  %v8358_v36 = vor.u32 %v7353_v34, %v6182_v22  ;;  %v8369_v44 = vor.u32 %v7352_v46, %v6184_v8  ;;  %v1630_v46 = vld [vmem:[%s7743_s20 + $0x58] sm:$0x11]  ;;  %v7405_v8 = vld [vmem:[%s9721_s3 + $0x2c8] sm:$0xff] }
  0xee   : > { %2691 = vmatpush.bf16.msrb.mxu3 %v7400_v32  ;;  %v8349_v54 = vld [vmem:[%s7730_s11 + $0x24] sm:$0xff] }
  0xef   : > { %v1090_v62 = vpop.f32.mrf.mxu0  ;;  %v1968_v9 = vrot.slane %v8349_v54, 1  ;;  %v2160_v53 = vshrl.u32 %v8358_v36, 16  ;;  %v2163_v58 = vshll.u32 %v8358_v36, 16  ;;  %v1725_v32 = vrot.slane %v8369_v44, 1  ;;  %v7385_v22 = vld [vmem:[%s9721_s3 + $0x240] sm:$0xff] }
  0xf0   : > { %v1091_v52 = vadd.f32 %v1090_v62, %v1056_v47  ;;  %v1059_v14 = vpop.f32.mrf.mxu3  ;;  %v7408_v47 = vld [vmem:[%s9721_s3 + $0x2e0] sm:$0xff]  ;;  %2342 = vmatpush.bf16.msra.mxu1 %v7385_v22 }
  0xf1   : > { %2725 = vmatpush.bf16.msra.mxu0 %v7408_v47 }
  0xf2   : > { %v738_v59 = vpop.f32.mrf.mxu2  ;;  %2692 = vmatpush.bf16.msrb.mxu3 %v7399_v28  ;;  %v7396_v28 = vld [vmem:[%s9721_s3 + $0x280] sm:$0xff] }
  0xf3   : > { %v739_v27 = vadd.f32 %v738_v59, %v705_v10  ;;  %v7407_v10 = vld [vmem:[%s9721_s3 + $0x2d8] sm:$0xff] }
  0xf4   : > { %v707_v29 = vpop.f32.mrf.mxu1 }
  0xf5   : > { %v8338_v24 = vadd.f32 %v1091_v52, %v739_v27  ;;  %v708_v39 = vadd.f32 %v707_v29, %v8092_v19  ;;  %v7398_v19 = vld [vmem:[%s9721_s3 + $0x290] sm:$0xff]  ;;  %v1969_v52 = vsel %vm1314_vm2, %v1966_v16, %v1968_v9  ;;  %v2162_v27 = vrot.slane %v2160_v53, 1  ;;  %2726 = vmatpush.bf16.msra.mxu0 %v7407_v10 }
  0xf6   : > { %2693 = vmatpush.bf16.msrb.mxu3 %v7398_v19 }
  0xf7   : > { %1889 = vmatmul.bf16.gmra.mxu2 %v1722_v12  ;;  %v1093_v40 = vpop.f32.mrf.mxu0  ;;  %1855 = vmatmul.bf16.gmra.mxu1 %v1720_v63  ;;  %v2165_v12 = vrot.slane %v2163_v58, 2  ;;  %v1723_v63 = vrot.slane %v8358_v36, 1 }
  0xf8   : > { %v1094_v23 = vadd.f32 %v1093_v40, %v1059_v14  ;;  %v1061_v60 = vpop.f32.mrf.mxu3  ;;  %v1925_v14 = vld [vmem:[%s7730_s11 + $0x2c] sm:$0x1] }
  0xf9   : > { %v1954_v38 = vunpack.c.l.b16 %v1925_v14  ;;  %v8408_v40 = vor.u32 %v2165_v12, %v2162_v27 }
  0xfa   : > { %v741_v49 = vpop.f32.mrf.mxu2  ;;  %2319 = vmatmul.bf16.gmra.mxu0 %v2149_v15  ;;  %2694 = vmatpush.bf16.msrb.mxu3 %v7397_v3  ;;  %v2084_v15 = vunpack.c.l.b16 %v8393_v1  ;;  %v7430_v3 = vld [vmem:[%s9721_s3 + $0x338] sm:$0xff] }
  0xfb   : > { %v742_v21 = vadd.f32 %v741_v49, %v708_v39  ;;  %v1726_v39 = vsel %vm1314_vm2, %v1721_v57, %v1725_v32  ;;  %v1724_v57 = vsel %vm1314_vm2, %v1719_v2, %v1723_v63  ;;  %v1960_v19 = vpack.c.b16 %v1954_v38, %v1954_v38  ;;  %v7404_v2 = vld [vmem:[%s9721_s3 + $0x2c0] sm:$0xff]  ;;  %3082 = vmatpush.bf16.msrb.mxu2 %v7430_v3 }
  0xfc   : > { %v709_v4 = vpop.f32.mrf.mxu1  ;;  %v2167_v58 = vsel %vm2088_vm3, %v8331_v13, %v8408_v40  ;;  %v8426_v10 = vpack.c.b16 %v2084_v15, %v2084_v15  ;;  %v7414_v13 = vld [vmem:[%s9722_s4 + $0x88] sm:$0xff]  ;;  %v2394_v3 = vshll.u32 %v8197_v7, 16 }
  0xfd   : > { %v8376_v62 = vadd.f32 %v1094_v23, %v742_v21  ;;  %v710_v6 = vadd.f32 %v709_v4, %v8132_v37  ;;  %v7406_v37 = vld [vmem:[%s9721_s3 + $0x2d0] sm:$0xff]  ;;  %6289 = vmatmul.msk.bf16.gmra.mxu3 %vm482_vm0, %v1969_v52  ;;  %v1970_v52 = vrot.slane %v1960_v19, 1  ;;  %2826 = vmatpush.bf16.msrb.mxu1 %v7414_v13 }
  0xfe   : > { %2727 = vmatpush.bf16.msra.mxu0 %v7406_v37  ;;  %2695 = vmatpush.bf16.msrb.mxu3 %v7396_v28  ;;  %v2178_v27 = vshrl.u32 %v8426_v10, 16  ;;  %v2181_v12 = vshll.u32 %v8426_v10, 16 }
  0xff   : > { %v1095_v59 = vpop.f32.mrf.mxu0 }
 0x100   : > { %v1096_v34 = vadd.f32 %v1095_v59, %v1061_v60  ;;  %v1486_v23 = vpop.f32.mrf.mxu3  ;;  %v1696_v60 = vunpack.c.h.b16 %v1630_v46  ;;  %v2180_v15 = vrot.slane %v2178_v27, 1 }
 0x102   : > { %v743_v16 = vpop.f32.mrf.mxu2  ;;  %2728 = vmatpush.bf16.msra.mxu0 %v7405_v8  ;;  %v1708_v59 = vpack.c.b16 %v1696_v60, %v1696_v60  ;;  %v2391_v60 = vshrl.u32 %v8197_v7, 16  ;;  %v2402_v7 = vshll.u32 %v8193_v43, 16 }
 0x103   : > { %v744_v29 = vadd.f32 %v743_v16, %v710_v6  ;;  %v1695_v6 = vunpack.c.l.b16 %v1630_v46  ;;  %v1971_v16 = vsel %vm1314_vm2, %v1968_v9, %v1970_v52  ;;  %v2520_v46 = vld [vmem:[%s7743_s20 + $0x8] sm:$0xcc] }
 0x104   : > { %v1240_v49 = vpop.f32.mrf.mxu1  ;;  %v2555_v19 = vunpack.c.l.b16 %v2520_v46  ;;  %v2393_v27 = vrot.slane %v2391_v60, 1 }
 0x105   : > { %v8415_v47 = vadd.f32 %v1096_v34, %v744_v29  ;;  %v1265_v21 = vadd.f32 %v1240_v49, %v8162_v0  ;;  %v1707_v28 = vpack.c.b16 %v1695_v6, %v1695_v6 }
 0x106   : > { %2729 = vmatpush.bf16.msra.mxu0 %v7404_v2  ;;  %v2557_v52 = vpack.c.b16 %v1677_v5, %v2555_v19  ;;  %v2110_v5 = vshll.u32 %v8210_v51, 16 }
 0x107   : > { %1894 = vmatmul.bf16.gmra.mxu2 %v1726_v39  ;;  %v1585_v53 = vpop.f32.mrf.mxu0  ;;  %1860 = vmatmul.bf16.gmra.mxu1 %v1724_v57  ;;  %v1729_v39 = vrot.slane %v1708_v59, 1  ;;  %v1727_v57 = vrot.slane %v1707_v28, 1  ;;  %v2399_v59 = vshrl.u32 %v8193_v43, 16  ;;  %v2556_v43 = vunpack.c.h.b16 %v2520_v46 }
 0x108   : > { %v1488_v22 = vpop.f32.mrf.mxu3 }
 0x109   : > { %v1730_v9 = vsel %vm1314_vm2, %v1725_v32, %v1729_v39  ;;  %v2401_v28 = vrot.slane %v2399_v59, 1 }
 0x10a   : > { %v1452_v4 = vpop.f32.mrf.mxu2  ;;  %2324 = vmatmul.bf16.gmra.mxu0 %v2167_v58 }
 0x10b   : > { %v1487_v0 = vadd.f32 %v1486_v23, %v1452_v4  ;;  %v2183_v23 = vrot.slane %v2181_v12, 2 }
 0x10c   : > { %v1242_v37 = vpop.f32.mrf.mxu1 }
 0x10d   : > { %v1511_v14 = vadd.f32 %v1487_v0, %v1265_v21  ;;  %v1266_v29 = vadd.f32 %v1242_v37, %v8186_v33  ;;  %6290 = vmatmul.msk.bf16.gmra.mxu3 %vm482_vm0, %v1971_v16  ;;  %v7429_v21 = vld [vmem:[%s9721_s3 + $0x330] sm:$0xff]  ;;  %v2184_v33 = vor.u32 %v2183_v23, %v2180_v15  ;;  %v1728_v0 = vsel %vm1314_vm2, %v1723_v63, %v1727_v57 }
 0x10e   : > { %3083 = vmatpush.bf16.msrb.mxu2 %v7429_v21  ;;  %v2107_v63 = vshrl.u32 %v8210_v51, 16  ;;  %v2115_v16 = vshrl.u32 %v8212_v26, 16  ;;  %v2112_v23 = vrot.slane %v2110_v5, 2  ;;  %v7428_v21 = vld [vmem:[%s9721_s3 + $0x328] sm:$0xff]  ;;  %v2411_v5 = vshll.u32 %v8240_v17, 16 }
 0x10f   : > { %v8439_v34 = vadd.f32 %v1585_v53, %v1511_v14  ;;  %v1587_v38 = vpop.f32.mrf.mxu0  ;;  %v2185_v13 = vsel %vm2088_vm3, %v8408_v40, %v2184_v33  ;;  %v2396_v14 = vrot.slane %v2394_v3, 2  ;;  %v2118_v40 = vshll.u32 %v8212_v26, 16 }
 0x110   : > { %v1491_v58 = vpop.f32.mrf.mxu3  ;;  %v2109_v15 = vrot.slane %v2107_v63, 1  ;;  %v2117_v57 = vrot.slane %v2115_v16, 1  ;;  %v2408_v63 = vshrl.u32 %v8240_v17, 16  ;;  %v2566_v16 = vrot.slane %v8244_v31, 2 }
 0x111   : > { %v2120_v19 = vrot.slane %v2118_v40, 2  ;;  %v2397_v33 = vor.u32 %v2396_v14, %v2393_v27  ;;  %v7427_v27 = vld [vmem:[%s9721_s3 + $0x320] sm:$0xff]  ;;  %v2133_v40 = vshrl.u32 %v8252_v56, 16 }
 0x112   : > { %v1454_v8 = vpop.f32.mrf.mxu2  ;;  %3084 = vmatpush.bf16.msrb.mxu2 %v7428_v21 }
 0x113   : > { %v1489_v49 = vadd.f32 %v1488_v22, %v1454_v8  ;;  %v2561_v22 = vrot.slane %v8205_v48, 2  ;;  %v2568_v48 = vrot.slane %v8252_v56, 2 }
 0x114   : > { %v1245_v4 = vpop.f32.mrf.mxu1 }
 0x115   : > { %v1512_v53 = vadd.f32 %v1489_v49, %v1266_v29  ;;  %v1267_v32 = vadd.f32 %v1245_v4, %v8222_v61  ;;  %v2560_v61 = vrot.slane %v2557_v52, 2  ;;  %v2404_v29 = vrot.slane %v2402_v7, 2 }
 0x116   : > { %v2113_v4 = vor.u32 %v2112_v23, %v2109_v15  ;;  %3085 = vmatpush.bf16.msrb.mxu2 %v7427_v27  ;;  %v2567_v17 = vsel %vm2559_vm4, %v2561_v22, %v2566_v16  ;;  %v2135_v23 = vrot.slane %v2133_v40, 1  ;;  %v7436_v40 = vld [vmem:[%s9721_s3 + $0x368] sm:$0xff] }
 0x117   : > { %v8455_v2 = vadd.f32 %v1587_v38, %v1512_v53  ;;  %1899 = vmatmul.bf16.gmra.mxu2 %v1730_v9  ;;  %v1590_v6 = vpop.f32.mrf.mxu0  ;;  %1865 = vmatmul.bf16.gmra.mxu1 %v1728_v0  ;;  %v2562_v51 = vsel %vm2559_vm4, %v2560_v61, %v2561_v22  ;;  %v2405_v53 = vor.u32 %v2404_v29, %v2401_v28  ;;  %v2136_v28 = vshll.u32 %v8252_v56, 16 }
 0x118   : > { %v1493_v39 = vpop.f32.mrf.mxu3  ;;  %v2121_v0 = vor.u32 %v2120_v19, %v2117_v57  ;;  %v2413_v29 = vrot.slane %v2411_v5, 2  ;;  %v7426_v19 = vld [vmem:[%s9721_s3 + $0x318] sm:$0xff]  ;;  %v2417_v56 = vshrl.u32 %v8282_v35, 16 }
 0x119   : > { %v2406_v52 = vsel %vm2088_vm3, %v2397_v33, %v2405_v53 }
 0x11a   : > { %v1457_v12 = vpop.f32.mrf.mxu2  ;;  %2329 = vmatmul.bf16.gmra.mxu0 %v2185_v13  ;;  %v2122_v18 = vsel %vm2088_vm3, %v2113_v4, %v2121_v0  ;;  %3086 = vmatpush.bf16.msrb.mxu2 %v7426_v19  ;;  %v7438_v4 = vld [vmem:[%s9721_s3 + $0x378] sm:$0xff] }
 0x11b   : > { %v1492_v37 = vadd.f32 %v1491_v58, %v1457_v12  ;;  %v2558_v58 = vpack.c.b16 %v1678_v20, %v2556_v43  ;;  %v7413_v20 = vld [vmem:[%s9722_s4 + $0x80] sm:$0xff]  ;;  %3116 = vmatpush.bf16.msra.mxu3 %v7438_v4  ;;  %v2574_v4 = vrot.slane %v8358_v36, 2 }
 0x11c   : > { %v1247_v49 = vpop.f32.mrf.mxu1  ;;  %2827 = vmatpush.bf16.msrb.mxu1 %v7413_v20  ;;  %v2154_v20 = vshll.u32 %v8295_v45, 16 }
 0x11d   : > { %v1513_v38 = vadd.f32 %v1492_v37, %v1267_v32  ;;  %v1268_v9 = vadd.f32 %v1247_v49, %v8236_v30  ;;  %2696 = vmatmul.bf16.vlgmr.msrb.gmra.mxu3 %v2562_v51  ;;  %v2563_v32 = vrot.slane %v2558_v58, 2  ;;  %v2138_v49 = vrot.slane %v2136_v28, 2 }
 0x11f   : > { %v8472_v8 = vadd.f32 %v1590_v6, %v1513_v38  ;;  %v1592_v46 = vpop.f32.mrf.mxu0  ;;  %v2564_v6 = vrot.slane %v8212_v26, 2 }
 0x120   : > { %v1496_v59 = vpop.f32.mrf.mxu3 }
 0x121   : > { %v2565_v14 = vsel %vm2559_vm4, %v2563_v32, %v2564_v6 }
 0x122   : > { %v1459_v60 = vpop.f32.mrf.mxu2 }
 0x123   : > { %v1494_v3 = vadd.f32 %v1493_v39, %v1459_v60 }
 0x124   : > { %v1250_v7 = vpop.f32.mrf.mxu1 }
 0x125   : > { %v1514_v13 = vadd.f32 %v1494_v3, %v1268_v9  ;;  %v1269_v12 = vadd.f32 %v1250_v7, %v8256_v55  ;;  %v2410_v55 = vrot.slane %v2408_v63, 1 }
 0x127   : > { %v8485_v30 = vadd.f32 %v1592_v46, %v1514_v13  ;;  %6405 = vmatmul.msk.bf16.vlgmr.msra.gmra.mxu2 %vm482_vm0, %v2406_v52  ;;  %v1595_v26 = vpop.f32.mrf.mxu0  ;;  %2343 = vmatmul.bf16.vlgmr.msra.gmra.mxu1 %v2122_v18  ;;  %v2414_v57 = vor.u32 %v2413_v29, %v2410_v55  ;;  %v2139_v46 = vor.u32 %v2138_v49, %v2135_v23  ;;  %v2420_v13 = vshll.u32 %v8282_v35, 16 }
 0x128   : > { %v1498_v38 = vpop.f32.mrf.mxu3  ;;  %v2151_v18 = vshrl.u32 %v8295_v45, 16  ;;  %v2572_v23 = vrot.slane %v8295_v45, 2 }
 0x129   : > { %v2415_v33 = vsel %vm2088_vm3, %v2405_v53, %v2414_v57  ;;  %v2140_v3 = vsel %vm2088_vm3, %v2121_v0, %v2139_v46  ;;  %v2569_v53 = vsel %vm2559_vm4, %v2564_v6, %v2568_v48  ;;  %v2570_v0 = vrot.slane %v8287_v25, 2 }
 0x12a   : > { %v1462_v37 = vpop.f32.mrf.mxu2  ;;  %2730 = vmatmul.bf16.vlgmr.msra.gmra.mxu0 %v2565_v14  ;;  %v2419_v6 = vrot.slane %v2417_v56, 1  ;;  %v2422_v27 = vrot.slane %v2420_v13, 2  ;;  %v2153_v5 = vrot.slane %v2151_v18, 1  ;;  %v2156_v25 = vrot.slane %v2154_v20, 2  ;;  %v2379_v13 = vld [vmem:[%s7730_s11 + $0x2c] sm:$0x3] }
 0x12b   : > { %v1497_v61 = vadd.f32 %v1496_v59, %v1462_v37  ;;  %v2571_v63 = vsel %vm2559_vm4, %v2566_v16, %v2570_v0  ;;  %v7425_v37 = vld [vmem:[%s9721_s3 + $0x310] sm:$0xff]  ;;  %v2575_v18 = vsel %vm2559_vm4, %v2570_v0, %v2574_v4 }
 0x12c   : > { %v1252_v15 = vpop.f32.mrf.mxu1  ;;  %v2423_v29 = vor.u32 %v2422_v27, %v2419_v6  ;;  %3087 = vmatpush.bf16.msrb.mxu2 %v7425_v37  ;;  %v7423_v6 = vld [vmem:[%s9721_s3 + $0x300] sm:$0xff]  ;;  %v7432_v27 = vld [vmem:[%s9721_s3 + $0x348] sm:$0xff]  ;;  %v2085_v37 = vunpack.c.h.b16 %v8393_v1 }
 0x12d   : > { %v1515_v43 = vadd.f32 %v1497_v61, %v1269_v12  ;;  %v1270_v51 = vadd.f32 %v1252_v15, %v8273_v41  ;;  %2701 = vmatmul.bf16.gmra.mxu3 %v2567_v17  ;;  %v7412_v61 = vld [vmem:[%s9722_s4 + $0x78] sm:$0xff]  ;;  %v7435_v15 = vld [vmem:[%s9721_s3 + $0x360] sm:$0xff] }
 0x12e   : > { %2828 = vmatpush.bf16.msrb.mxu1 %v7412_v61  ;;  %v2424_v17 = vsel %vm2088_vm3, %v2414_v57, %v2423_v29  ;;  %v7434_v57 = vld [vmem:[%s9721_s3 + $0x358] sm:$0xff]  ;;  %v7431_v61 = vld [vmem:[%s9721_s3 + $0x340] sm:$0xff] }
 0x12f   : > { %v8502_v39 = vadd.f32 %v1595_v26, %v1515_v43  ;;  %v1597_v31 = vpop.f32.mrf.mxu0 }
 0x130   : > { %v1501_v58 = vpop.f32.mrf.mxu3 }
 0x132   : > { %v1464_v21 = vpop.f32.mrf.mxu2 }
 0x133   : > { %v1499_v9 = vadd.f32 %v1498_v38, %v1464_v21  ;;  %v8543_v38 = vor.u32 %v2156_v25, %v2153_v5  ;;  %v7424_v21 = vld [vmem:[%s9721_s3 + $0x308] sm:$0xff] }
 0x134   : > { %v1255_v41 = vpop.f32.mrf.mxu1  ;;  %3088 = vmatpush.bf16.msrb.mxu2 %v7424_v21 }
 0x135   : > { %v1516_v22 = vadd.f32 %v1499_v9, %v1270_v51  ;;  %v1271_v52 = vadd.f32 %v1255_v41, %v8302_v50  ;;  %v7437_v50 = vld [vmem:[%s9721_s3 + $0x370] sm:$0xff]  ;;  %v2158_v19 = vsel %vm2088_vm3, %v2139_v46, %v8543_v38  ;;  %v2429_v46 = vshll.u32 %v8349_v54, 16 }
 0x136   : > { %3117 = vmatpush.bf16.msra.mxu3 %v7437_v50 }
 0x137   : > { %v8513_v60 = vadd.f32 %v1597_v31, %v1516_v22  ;;  %6406 = vmatmul.msk.bf16.gmra.mxu2 %vm482_vm0, %v2415_v33  ;;  %v1600_v32 = vpop.f32.mrf.mxu0  ;;  %2348 = vmatmul.bf16.gmra.mxu1 %v2140_v3  ;;  %v2573_v22 = vsel %vm2559_vm4, %v2568_v48, %v2572_v23  ;;  %v7433_v48 = vld [vmem:[%s9721_s3 + $0x350] sm:$0xff] }
 0x138   : > { %v1503_v26 = vpop.f32.mrf.mxu3  ;;  %3089 = vmatpush.bf16.msrb.mxu2 %v7423_v6 }
 0x13a   : > { %v1467_v59 = vpop.f32.mrf.mxu2  ;;  %2735 = vmatmul.bf16.gmra.mxu0 %v2569_v53  ;;  %3118 = vmatpush.bf16.msra.mxu3 %v7436_v40  ;;  %v2431_v53 = vrot.slane %v2429_v46, 2 }
 0x13b   : > { %v1502_v7 = vadd.f32 %v1501_v58, %v1467_v59  ;;  %v2426_v58 = vshrl.u32 %v8349_v54, 16 }
 0x13c   : > { %v1257_v14 = vpop.f32.mrf.mxu1 }
 0x13d   : > { %v1517_v12 = vadd.f32 %v1502_v7, %v1271_v52  ;;  %v1272_v28 = vadd.f32 %v1257_v14, %v8338_v24  ;;  %2706 = vmatmul.bf16.gmra.mxu3 %v2571_v63  ;;  %v2169_v52 = vshrl.u32 %v8369_v44, 16  ;;  %v2388_v63 = vunpack.c.l.b16 %v2379_v13  ;;  %v8637_v13 = vld [vmem:[%s7743_s20 + $0x18] sm:$0xff] }
 0x13e   : > { %3119 = vmatpush.bf16.msra.mxu3 %v7435_v15 }
 0x13f   : > { %v8530_v35 = vadd.f32 %v1600_v32, %v1517_v12  ;;  %v1602_v55 = vpop.f32.mrf.mxu0  ;;  %v2428_v32 = vrot.slane %v2426_v58, 1  ;;  %v2171_v20 = vrot.slane %v2169_v52, 1 }
 0x140   : > { %v1506_v24 = vpop.f32.mrf.mxu3 }
 0x141   : > { %v2432_v14 = vor.u32 %v2431_v53, %v2428_v32  ;;  %v7453_v53 = vld [vmem:[%s9721_s3 + $0x3b8] sm:$0xff] }
 0x142   : > { %v1469_v16 = vpop.f32.mrf.mxu2  ;;  %3120 = vmatpush.bf16.msra.mxu3 %v7434_v57  ;;  %3546 = vmatpush.bf16.msra.mxu1 %v7453_v53  ;;  %v8700_v53 = vld [vmem:[%s7730_s11 + $0x10] sm:$0xff] }
 0x143   : > { %v1504_v43 = vadd.f32 %v1503_v26, %v1469_v16  ;;  %v2433_v40 = vsel %vm2088_vm3, %v2423_v29, %v2432_v14  ;;  %v2087_v29 = vpack.c.b16 %v2085_v37, %v2085_v37 }
 0x144   : > { %v1260_v31 = vpop.f32.mrf.mxu1 }
 0x145   : > { %v1518_v49 = vadd.f32 %v1504_v43, %v1272_v28  ;;  %v1273_v9 = vadd.f32 %v1260_v31, %v8376_v62  ;;  %v2172_v62 = vshll.u32 %v8369_v44, 16  ;;  %v8594_v28 = vpack.c.b16 %v2388_v63, %v2388_v63  ;;  %v7445_v43 = vld [vmem:[%s9722_s4 + $0xa0] sm:$0xff] }
 0x146   : > { %3121 = vmatpush.bf16.msra.mxu3 %v7433_v48  ;;  %3255 = vmatpush.bf16.msrb.mxu0 %v7445_v43  ;;  %v2190_v45 = vshll.u32 %v2087_v29, 16  ;;  %v2580_v6 = vrot.slane %v2087_v29, 2 }
 0x147   : > { %v8550_v51 = vadd.f32 %v1602_v55, %v1518_v49  ;;  %6407 = vmatmul.msk.bf16.gmra.mxu2 %vm482_vm0, %v2424_v17  ;;  %v1605_v33 = vpop.f32.mrf.mxu0  ;;  %2353 = vmatmul.bf16.gmra.mxu1 %v2158_v19  ;;  %v2174_v50 = vrot.slane %v2172_v62, 2  ;;  %v7461_v49 = vld [vmem:[%s9721_s3 + $0x3f8] sm:$0xff]  ;;  %v2435_v19 = vshrl.u32 %v8594_v28, 16  ;;  %v2438_v21 = vshll.u32 %v8594_v28, 16 }
 0x148   : > { %v1508_v54 = vpop.f32.mrf.mxu3  ;;  %3580 = vmatpush.bf16.msra.mxu2 %v7461_v49  ;;  %v2192_v32 = vrot.slane %v2190_v45, 2  ;;  %v3160_v49 = vld [vmem:[%s7730_s11 + $0x8] sm:$0xc] }
 0x149   : > { %v8586_v25 = vor.u32 %v2174_v50, %v2171_v20  ;;  %v2440_v58 = vrot.slane %v2438_v21, 2  ;;  %v2923_v20 = vunpack.c.h.b16 %v8637_v13 }
 0x14a   : > { %v1472_v41 = vpop.f32.mrf.mxu2  ;;  %2740 = vmatmul.bf16.gmra.mxu0 %v2573_v22  ;;  %3122 = vmatpush.bf16.msra.mxu3 %v7432_v27  ;;  %v2187_v22 = vshrl.u32 %v2087_v29, 16  ;;  %v7415_v27 = vld [vmem:[%s7743_s20 + $0x24] sm:$0xf]  ;;  %v7416_v29 = vld [vmem:[%s7743_s20 + $0x24] sm:$0xf0] }
 0x14b   : > { %v1507_v3 = vadd.f32 %v1506_v24, %v1472_v41  ;;  %v2176_v17 = vsel %vm2088_vm3, %v8543_v38, %v8586_v25  ;;  %v7444_v38 = vld [vmem:[%s9722_s4 + $0x98] sm:$0xff] }
 0x14c   : > { %v1262_v7 = vpop.f32.mrf.mxu1  ;;  %3256 = vmatpush.bf16.msrb.mxu0 %v7444_v38  ;;  %v2189_v48 = vrot.slane %v2187_v22, 1 }
 0x14d   : > { %v1519_v56 = vadd.f32 %v1507_v3, %v1273_v9  ;;  %v1274_v12 = vadd.f32 %v1262_v7, %v8415_v47  ;;  %2711 = vmatmul.bf16.gmra.mxu3 %v2575_v18  ;;  %v2576_v47 = vrot.slane %v8369_v44, 2  ;;  %v7443_v3 = vld [vmem:[%s9722_s4 + $0x90] sm:$0xff] }
 0x14e   : > { %3123 = vmatpush.bf16.msra.mxu3 %v7431_v61 }
 0x14f   : > { %v8574_v59 = vadd.f32 %v1605_v33, %v1519_v56  ;;  %v1607_v26 = vpop.f32.mrf.mxu0  ;;  %v2577_v31 = vsel %vm2559_vm4, %v2572_v23, %v2576_v47  ;;  %v2578_v33 = vrot.slane %v8426_v10, 2  ;;  %v2437_v23 = vrot.slane %v2435_v19, 1 }
 0x150   : > { %v2014_v16 = vpop.f32.mrf.mxu3  ;;  %3257 = vmatpush.bf16.msrb.mxu0 %v7443_v3 }
 0x151   : > { %v2579_v10 = vsel %vm2559_vm4, %v2574_v4, %v2578_v33  ;;  %v2441_v56 = vor.u32 %v2440_v58, %v2437_v23  ;;  %v2193_v4 = vor.u32 %v2192_v32, %v2189_v48  ;;  %v3189_v33 = vunpack.c.l.b16 %v3160_v49 }
 0x152   : > { %v1474_v5 = vpop.f32.mrf.mxu2 }
 0x153   : > { %v1509_v0 = vadd.f32 %v1508_v54, %v1474_v5  ;;  %v2865_v54 = vld [vmem:[%s7743_s20 + $0x10] sm:$0xcc]  ;;  %v2442_v50 = vsel %vm2088_vm3, %v2432_v14, %v2441_v56  ;;  %v2194_v37 = vsel %vm2088_vm3, %v8586_v25, %v2193_v4  ;;  %v2581_v25 = vsel %vm2559_vm4, %v2576_v47, %v2580_v6 }
 0x154   : > { %v1846_v1 = vpop.f32.mrf.mxu1  ;;  %v2921_v18 = vunpack.c.h.b16 %v2865_v54  ;;  %v2920_v43 = vunpack.c.l.b16 %v2865_v54  ;;  %v7417_v6 = vld [vmem:[%s7743_s20 + $0x34] sm:$0xf] }
 0x155   : > { %v1520_v55 = vadd.f32 %v1509_v0, %v1274_v12  ;;  %v6565_v12 = vld [vmem:[%s7743_s20 + $0x28] sm:$0xf0] }
 0x156   : > { %v8651_v14 = vpack.c.b16 %v2923_v20, %v2921_v18  ;;  %v8653_v61 = vor.u32 %v7415_v27, %v6565_v12  ;;  %v6573_v27 = vld [vmem:[%s7743_s20 + $0x38] sm:$0xf0] }
 0x157   : > { %v8599_v15 = vadd.f32 %v1607_v26, %v1520_v55  ;;  %6408 = vmatmul.msk.bf16.gmra.mxu2 %vm482_vm0, %v2433_v40  ;;  %v8608_v24 = vpop.f32.mrf.mxu0  ;;  %2358 = vmatmul.bf16.gmra.mxu1 %v2176_v17  ;;  %v7452_v40 = vld [vmem:[%s9721_s3 + $0x3b0] sm:$0xff]  ;;  %v2766_v17 = vld [vmem:[%s7730_s11 + $0x4] sm:$0xc] }
 0x158   : > { %v2016_v41 = vpop.f32.mrf.mxu3  ;;  %3547 = vmatpush.bf16.msra.mxu1 %v7452_v40  ;;  %v2957_v38 = vrot.slane %v8651_v14, 2  ;;  %v2958_v44 = vrot.slane %v8653_v61, 2  ;;  %v2775_v47 = vunpack.c.l.b16 %v2766_v17  ;;  %v7458_v40 = vld [vmem:[%s9721_s3 + $0x3e0] sm:$0xff]  ;;  %v7418_v17 = vld [vmem:[%s7743_s20 + $0x34] sm:$0xf0] }
 0x15a   : > { %v1880_v57 = vpop.f32.mrf.mxu2  ;;  %2745 = vmatmul.bf16.gmra.mxu0 %v2577_v31  ;;  %v8672_v31 = vld [vmem:[%s7730_s11 + $0xc] sm:$0xf]  ;;  %v2776_v3 = vpack.c.b16 %v1945_v42, %v2775_v47 }
 0x15b   : > { %v1881_v9 = vadd.f32 %v1880_v57, %v1846_v1  ;;  %v2922_v1 = vunpack.c.l.b16 %v8637_v13  ;;  %v3190_v22 = vunpack.c.l.b16 %v8672_v31 }
 0x15c   : > { %v1848_v62 = vpop.f32.mrf.mxu1  ;;  %v2777_v54 = vrot.slane %v2776_v3, 2 }
 0x15d   : > { %v1905_v46 = vadd.f32 %v1881_v9, %v8439_v34  ;;  %2716 = vmatmul.bf16.gmra.mxu3 %v2579_v10  ;;  %v8678_v57 = vpack.c.b16 %v2922_v1, %v2920_v43  ;;  %v7451_v10 = vld [vmem:[%s9721_s3 + $0x3a8] sm:$0xff]  ;;  %v8704_v11 = vpack.c.b16 %v3190_v22, %v3189_v33  ;;  %v6571_v43 = vld [vmem:[%s7743_s20 + $0x30] sm:$0xf] }
 0x15e   : > { %3548 = vmatpush.bf16.msra.mxu1 %v7451_v10 }
 0x15f   : > { %v8625_v52 = vadd.f32 %v2014_v16, %v1905_v46  ;;  %v8633_v34 = vpop.f32.mrf.mxu0  ;;  %v6563_v16 = vld [vmem:[%s7743_s20 + $0x20] sm:$0xf]  ;;  %v3206_v18 = vrot.slane %v8704_v11, 2 }
 0x160   : > { %v2019_v63 = vpop.f32.mrf.mxu3  ;;  %v8680_v9 = vor.u32 %v7416_v29, %v6563_v16 }
 0x162   : > { %v1882_v7 = vpop.f32.mrf.mxu2  ;;  %v2955_v32 = vrot.slane %v8680_v9, 2 }
 0x163   : > { %v1883_v36 = vadd.f32 %v1882_v7, %v1848_v62  ;;  %v7459_v62 = vld [vmem:[%s9721_s3 + $0x3e8] sm:$0xff] }
 0x164   : > { %v1851_v0 = vpop.f32.mrf.mxu1  ;;  %v7626_v7 = vld [vmem:[%s7730_s11 + $0xc] sm:$0xff] }
 0x165   : > { %v1906_v26 = vadd.f32 %v1883_v36, %v8455_v2  ;;  %v7460_v2 = vld [vmem:[%s9721_s3 + $0x3f0] sm:$0xff]  ;;  %v2778_v36 = vrot.slane %v7626_v7, 2  ;;  %v6581_v7 = vld [vmem:[%s7743_s20 + $0x48] sm:$0xf0] }
 0x166   : > { %3581 = vmatpush.bf16.msra.mxu2 %v7460_v2  ;;  %v8716_v2 = vor.u32 %v7417_v6, %v6573_v27 }
 0x167   : > { %v8644_v5 = vadd.f32 %v2016_v41, %v1906_v26  ;;  %6409 = vmatmul.msk.bf16.gmra.mxu2 %vm482_vm0, %v2442_v50  ;;  %v8661_v55 = vpop.f32.mrf.mxu0  ;;  %2363 = vmatmul.bf16.gmra.mxu1 %v2194_v37  ;;  %v2959_v41 = vsel %vm2559_vm4, %v2957_v38, %v2958_v44  ;;  %v3207_v50 = vrot.slane %v8700_v53, 2  ;;  %v2779_v37 = vsel %vm2559_vm4, %v2777_v54, %v2778_v36  ;;  %v7419_v54 = vld [vmem:[%s7743_s20 + $0x44] sm:$0xf] }
 0x168   : > { %v2021_v23 = vpop.f32.mrf.mxu3 }
 0x16a   : > { %v1885_v19 = vpop.f32.mrf.mxu2  ;;  %2750 = vmatmul.bf16.gmra.mxu0 %v2581_v25  ;;  %3582 = vmatpush.bf16.msra.mxu2 %v7459_v62  ;;  %v7450_v25 = vld [vmem:[%s9721_s3 + $0x3a0] sm:$0xff]  ;;  %v8745_v62 = vld [vmem:[%s7730_s11 + $0x18] sm:$0xff] }
 0x16b   : > { %v1886_v21 = vadd.f32 %v1885_v19, %v1851_v0  ;;  %3549 = vmatpush.bf16.msra.mxu1 %v7450_v25  ;;  %v2962_v19 = vrot.slane %v8716_v2, 2  ;;  %v7420_v25 = vld [vmem:[%s7743_s20 + $0x44] sm:$0xf0] }
 0x16c   : > { %v1853_v46 = vpop.f32.mrf.mxu1 }
 0x16d   : > { %v1907_v45 = vadd.f32 %v1886_v21, %v8472_v8  ;;  %v2954_v8 = vrot.slane %v8678_v57, 2  ;;  %3124 = vmatmul.bf16.vlgmr.msra.gmra.mxu3 %v2959_v41  ;;  %v8732_v21 = vor.u32 %v7418_v17, %v6571_v43  ;;  %v7456_v17 = vld [vmem:[%s9721_s3 + $0x3d0] sm:$0xff] }
 0x16e   : > { %3583 = vmatpush.bf16.msra.mxu2 %v7458_v40  ;;  %v6579_v40 = vld [vmem:[%s7743_s20 + $0x40] sm:$0xf] }
 0x16f   : > { %v8684_v58 = vadd.f32 %v2019_v63, %v1907_v45  ;;  %v8695_v48 = vpop.f32.mrf.mxu0  ;;  %v2956_v4 = vsel %vm2559_vm4, %v2954_v8, %v2955_v32  ;;  %v2960_v3 = vrot.slane %v8732_v21, 2  ;;  %v7627_v8 = vld [vmem:[%s7730_s11 + $0x14] sm:$0xff]  ;;  %v8769_v43 = vor.u32 %v7420_v25, %v6579_v40 }
 0x170   : > { %v2024_v26 = vpop.f32.mrf.mxu3 }
 0x171   : > { %v3815_v13 = vrot.slane %v8769_v43, 3 }
 0x172   : > { %v1887_v42 = vpop.f32.mrf.mxu2 }
 0x173   : > { %v1888_v56 = vadd.f32 %v1887_v42, %v1853_v46  ;;  %v7457_v46 = vld [vmem:[%s9721_s3 + $0x3d8] sm:$0xff]  ;;  %v2780_v42 = vrot.slane %v7627_v8, 2 }
 0x174   : > { %v1856_v0 = vpop.f32.mrf.mxu1  ;;  %3584 = vmatpush.bf16.msra.mxu2 %v7457_v46  ;;  %v2964_v46 = vrot.slane %v8769_v43, 2 }
 0x175   : > { %v1908_v12 = vadd.f32 %v1888_v56, %v8485_v30  ;;  %v3208_v30 = vsel %vm2559_vm4, %v3206_v18, %v3207_v50  ;;  %v3209_v56 = vrot.slane %v8745_v62, 2 }
 0x177   : > { %v8713_v63 = vadd.f32 %v2021_v23, %v1908_v12  ;;  %3090 = vmatmul.bf16.vlgmr.msrb.gmra.mxu2 %v2956_v4  ;;  %v8724_v16 = vpop.f32.mrf.mxu0  ;;  %6524 = vmatmul.msk.bf16.vlgmr.msrb.gmra.mxu1 %vm482_vm0, %v2779_v37  ;;  %v2963_v23 = vsel %vm2559_vm4, %v2958_v44, %v2962_v19  ;;  %v2961_v44 = vsel %vm2559_vm4, %v2955_v32, %v2960_v3 }
 0x178   : > { %v2026_v47 = vpop.f32.mrf.mxu3  ;;  %v2781_v12 = vsel %vm2559_vm4, %v2778_v36, %v2780_v42  ;;  %v3210_v37 = vsel %vm2559_vm4, %v3207_v50, %v3209_v56  ;;  %v7448_v50 = vld [vmem:[%s9721_s3 + $0x390] sm:$0xff]  ;;  %3585 = vmatpush.bf16.msra.mxu2 %v7456_v17 }
 0x179   : > { %v6587_v17 = vld [vmem:[%s7743_s20 + $0x50] sm:$0xf] }
 0x17a   : > { %v1890_v29 = vpop.f32.mrf.mxu2  ;;  %6691 = vmatmul.msk.bf16.vlgmr.msrb.gmra.mxu0 %vm482_vm0, %v3208_v30 }
 0x17b   : > { %v1891_v49 = vadd.f32 %v1890_v29, %v1856_v0  ;;  %v7449_v0 = vld [vmem:[%s9721_s3 + $0x398] sm:$0xff] }
 0x17c   : > { %v1858_v45 = vpop.f32.mrf.mxu1  ;;  %3550 = vmatpush.bf16.msra.mxu1 %v7449_v0 }
 0x17d   : > { %v1909_v38 = vadd.f32 %v1891_v49, %v8502_v39  ;;  %3129 = vmatmul.bf16.gmra.mxu3 %v2963_v23 }
 0x17f   : > { %v8735_v33 = vadd.f32 %v2024_v26, %v1909_v38  ;;  %v8741_v41 = vpop.f32.mrf.mxu0  ;;  %v8756_v26 = vor.u32 %v7419_v54, %v6581_v7  ;;  %v7421_v54 = vld [vmem:[%s7743_s20 + $0x54] sm:$0xf]  ;;  %v2965_v7 = vsel %vm2559_vm4, %v2960_v3, %v2964_v46 }
 0x180   : > { %v2029_v18 = vpop.f32.mrf.mxu3  ;;  %3551 = vmatpush.bf16.msra.mxu1 %v7448_v50  ;;  %v7422_v50 = vld [vmem:[%s7743_s20 + $0x54] sm:$0xf0] }
 0x181   : > { %v2966_v36 = vrot.slane %v8756_v26, 2 }
 0x182   : > { %v1892_v39 = vpop.f32.mrf.mxu2 }
 0x183   : > { %v1893_v10 = vadd.f32 %v1892_v39, %v1858_v45  ;;  %v2967_v45 = vsel %vm2559_vm4, %v2962_v19, %v2966_v36  ;;  %v8785_v39 = vld [vmem:[%s7730_s11 + $0x20] sm:$0xff]  ;;  %v7455_v19 = vld [vmem:[%s9721_s3 + $0x3c8] sm:$0xff] }
 0x184   : > { %v1861_v27 = vpop.f32.mrf.mxu1  ;;  %3586 = vmatpush.bf16.msra.mxu2 %v7455_v19  ;;  %v8828_v19 = vld [vmem:[%s7730_s11 + $0x28] sm:$0xff] }
 0x185   : > { %v1910_v4 = vadd.f32 %v1893_v10, %v8513_v60 }
 0x187   : > { %v8753_v6 = vadd.f32 %v2026_v47, %v1910_v4  ;;  %3095 = vmatmul.bf16.gmra.mxu2 %v2961_v44  ;;  %v8761_v32 = vpop.f32.mrf.mxu0  ;;  %6525 = vmatmul.msk.bf16.gmra.mxu1 %vm482_vm0, %v2781_v12  ;;  %v7628_v44 = vld [vmem:[%s7730_s11 + $0x1c] sm:$0xff]  ;;  %v3211_v4 = vrot.slane %v8785_v39, 2 }
 0x188   : > { %v2031_v49 = vpop.f32.mrf.mxu3 }
 0x18a   : > { %v1895_v60 = vpop.f32.mrf.mxu2  ;;  %6692 = vmatmul.msk.bf16.gmra.mxu0 %vm482_vm0, %v3210_v37 }
 0x18b   : > { %v1896_v30 = vadd.f32 %v1895_v60, %v1861_v27  ;;  %v7447_v27 = vld [vmem:[%s9721_s3 + $0x388] sm:$0xff] }
 0x18c   : > { %v1863_v47 = vpop.f32.mrf.mxu1  ;;  %3552 = vmatpush.bf16.msra.mxu1 %v7447_v27  ;;  %v2875_v27 = vld [vmem:[%s7743_s20 + $0x60] sm:$0x33] }
 0x18d   : > { %v1911_v29 = vadd.f32 %v1896_v30, %v8530_v35  ;;  %3134 = vmatmul.bf16.gmra.mxu3 %v2967_v45  ;;  %v2782_v35 = vrot.slane %v7628_v44, 2  ;;  %v3212_v30 = vsel %vm2559_vm4, %v3209_v56, %v3211_v4 }
 0x18f   : > { %v8778_v38 = vadd.f32 %v2029_v18, %v1911_v29  ;;  %v8781_v23 = vpop.f32.mrf.mxu0  ;;  %v6589_v18 = vld [vmem:[%s7743_s20 + $0x58] sm:$0xf0]  ;;  %v2783_v40 = vsel %vm2559_vm4, %v2780_v42, %v2782_v35  ;;  %v7454_v42 = vld [vmem:[%s9721_s3 + $0x3c0] sm:$0xff] }
 0x190   : > { %v2034_v0 = vpop.f32.mrf.mxu3  ;;  %v8802_v25 = vor.u32 %v7421_v54, %v6589_v18  ;;  %3587 = vmatpush.bf16.msra.mxu2 %v7454_v42  ;;  %v7464_v54 = vld [vmem:[%s9722_s4 + $0xb8] sm:$0xff] }
 0x191   : > { %3726 = vmatpush.bf16.msrb.mxu3 %v7464_v54  ;;  %v3170_v54 = vld [vmem:[%s7730_s11 + $0x30] sm:$0x3] }
 0x192   : > { %v1897_v10 = vpop.f32.mrf.mxu2 }
 0x193   : > { %v1898_v8 = vadd.f32 %v1897_v10, %v1863_v47  ;;  %v8812_v47 = vor.u32 %v7422_v50, %v6587_v17  ;;  %v3213_v50 = vrot.slane %v8828_v19, 2 }
 0x194   : > { %v1866_v3 = vpop.f32.mrf.mxu1 }
 0x195   : > { %v1912_v12 = vadd.f32 %v1898_v8, %v8550_v51  ;;  %v2968_v18 = vrot.slane %v8812_v47, 2 }
 0x197   : > { %v8799_v37 = vadd.f32 %v2031_v49, %v1912_v12  ;;  %3100 = vmatmul.bf16.gmra.mxu2 %v2965_v7  ;;  %v8804_v60 = vpop.f32.mrf.mxu0  ;;  %6526 = vmatmul.msk.bf16.gmra.mxu1 %vm482_vm0, %v2783_v40  ;;  %v2970_v49 = vrot.slane %v8802_v25, 2  ;;  %v2941_v40 = vunpack.c.h.b16 %v2875_v27  ;;  %v2969_v17 = vsel %vm2559_vm4, %v2964_v46, %v2968_v18 }
 0x198   : > { %v2036_v45 = vpop.f32.mrf.mxu3 }
 0x199   : > { %v2971_v44 = vsel %vm2559_vm4, %v2966_v36, %v2970_v49 }
 0x19a   : > { %v1900_v29 = vpop.f32.mrf.mxu2  ;;  %6693 = vmatmul.msk.bf16.gmra.mxu0 %vm482_vm0, %v3212_v30  ;;  %v7463_v30 = vld [vmem:[%s9722_s4 + $0xb0] sm:$0xff] }
 0x19b   : > { %v1901_v51 = vadd.f32 %v1900_v29, %v1866_v3  ;;  %3727 = vmatpush.bf16.msrb.mxu3 %v7463_v30  ;;  %v3199_v30 = vunpack.c.l.b16 %v3170_v54 }
 0x19c   : > { %v1868_v8 = vpop.f32.mrf.mxu1 }
 0x19d   : > { %v1913_v56 = vadd.f32 %v1901_v51, %v8574_v59  ;;  %v7446_v59 = vld [vmem:[%s9721_s3 + $0x380] sm:$0xff]  ;;  %3139 = vmatmul.bf16.gmra.mxu3 %v2971_v44  ;;  %v2953_v44 = vpack.c.b16 %v2941_v40, %v2941_v40 }
 0x19e   : > { %3553 = vmatpush.bf16.msra.mxu1 %v7446_v59  ;;  %v7462_v59 = vld [vmem:[%s9722_s4 + $0xa8] sm:$0xff] }
 0x19f   : > { %v8818_v10 = vadd.f32 %v2034_v0, %v1913_v56  ;;  %v8824_v7 = vpop.f32.mrf.mxu0  ;;  %v7629_v0 = vld [vmem:[%s7730_s11 + $0x24] sm:$0xff]  ;;  %3728 = vmatpush.bf16.msrb.mxu3 %v7462_v59 }
 0x1a0   : > { %v2784_v3 = vrot.slane %v7629_v0, 2  ;;  %v2697_v51 = vpop.f32.mrf.mxu3  ;;  %v3214_v0 = vsel %vm2559_vm4, %v3211_v4, %v3213_v50  ;;  %v7472_v4 = vld [vmem:[%s9721_s3 + $0x438] sm:$0xff] }
 0x1a1   : > { %3933 = vmatpush.bf16.msra.mxu0 %v7472_v4  ;;  %v3352_v4 = vshrl.u32 %v8651_v14, 16 }
 0x1a2   : > { %v1902_v12 = vpop.f32.mrf.mxu2 }
 0x1a3   : > { %v1903_v36 = vadd.f32 %v1902_v12, %v1868_v8  ;;  %v2785_v8 = vsel %vm2559_vm4, %v2782_v35, %v2784_v3 }
 0x1a4   : > { %v2344_v56 = vpop.f32.mrf.mxu1 }
 0x1a5   : > { %v1914_v29 = vadd.f32 %v1903_v36, %v8599_v15  ;;  %v2345_v46 = vadd.f32 %v2344_v56, %v8608_v24  ;;  %v2940_v15 = vunpack.c.l.b16 %v2875_v27  ;;  %v2974_v24 = vrot.slane %v2953_v44, 2  ;;  %v7480_v27 = vld [vmem:[%s9721_s3 + $0x478] sm:$0xff] }
 0x1a6   : > { %3967 = vmatpush.bf16.msrb.mxu1 %v7480_v27 }
 0x1a7   : > { %v8843_v42 = vadd.f32 %v2036_v45, %v1914_v29  ;;  %3105 = vmatmul.bf16.gmra.mxu2 %v2969_v17  ;;  %v2731_v12 = vpop.f32.mrf.mxu0  ;;  %v7483_v45 = vld [vmem:[%s9722_s4 + $0xd0] sm:$0xff]  ;;  %v2369_v35 = vadd.f32 %v2345_v46, %v8625_v52  ;;  %6527 = vmatmul.msk.bf16.gmra.mxu1 %vm482_vm0, %v2785_v8  ;;  %v2952_v29 = vpack.c.b16 %v2940_v15, %v2940_v15 }
 0x1a8   : > { %v2732_v36 = vadd.f32 %v2731_v12, %v2697_v51  ;;  %4071 = vmatpush.bf16.msrb.mxu2 %v7483_v45  ;;  %v2699_v51 = vpop.f32.mrf.mxu3  ;;  %v3205_v52 = vpack.c.b16 %v3199_v30, %v3199_v30  ;;  %v2975_v54 = vsel %vm2559_vm4, %v2970_v49, %v2974_v24  ;;  %v2786_v45 = vrot.slane %v8594_v28, 2  ;;  %v7479_v28 = vld [vmem:[%s9721_s3 + $0x470] sm:$0xff] }
 0x1a9   : > { %v2972_v46 = vrot.slane %v2952_v29, 2  ;;  %v3644_v30 = vshrl.u32 %v8700_v53, 16  ;;  %v3647_v49 = vshll.u32 %v8700_v53, 16 }
 0x1aa   : > { %v2485_v40 = vpop.f32.mrf.mxu2  ;;  %6694 = vmatmul.msk.bf16.gmra.mxu0 %vm482_vm0, %v3214_v0  ;;  %3968 = vmatpush.bf16.msrb.mxu1 %v7479_v28 }
 0x1ab   : > { %v2510_v17 = vadd.f32 %v2485_v40, %v2369_v35  ;;  %v3215_v35 = vrot.slane %v3205_v52, 2  ;;  %v3636_v40 = vshrl.u32 %v8704_v11, 16 }
 0x1ac   : > { %v2346_v8 = vpop.f32.mrf.mxu1 }
 0x1ad   : > { %v8864_v56 = vadd.f32 %v2732_v36, %v2510_v17  ;;  %v2347_v44 = vadd.f32 %v2346_v8, %v8633_v34  ;;  %3144 = vmatmul.bf16.gmra.mxu3 %v2975_v54  ;;  %v3639_v36 = vshll.u32 %v8704_v11, 16  ;;  %v2973_v34 = vsel %vm2559_vm4, %v2968_v18, %v2972_v46 }
 0x1ae   : > { %v2787_v11 = vsel %vm2559_vm4, %v2784_v3, %v2786_v45  ;;  %v3216_v29 = vsel %vm2559_vm4, %v3213_v50, %v3215_v35  ;;  %v3646_v8 = vrot.slane %v3644_v30, 2  ;;  %v3649_v54 = vrot.slane %v3647_v49, 3 }
 0x1af   : > { %v2733_v59 = vpop.f32.mrf.mxu0  ;;  %v2370_v12 = vadd.f32 %v2347_v44, %v8644_v5  ;;  %v7471_v5 = vld [vmem:[%s9721_s3 + $0x430] sm:$0xff]  ;;  %v3641_v52 = vrot.slane %v3639_v36, 3  ;;  %v3355_v46 = vshll.u32 %v8651_v14, 16  ;;  %v3360_v3 = vshrl.u32 %v8653_v61, 16 }
 0x1b0   : > { %v2734_v15 = vadd.f32 %v2733_v59, %v2699_v51  ;;  %v2702_v17 = vpop.f32.mrf.mxu3  ;;  %3934 = vmatpush.bf16.msra.mxu0 %v7471_v5  ;;  %v3638_v51 = vrot.slane %v3636_v40, 2  ;;  %v3363_v50 = vshll.u32 %v8653_v61, 16  ;;  %v3354_v45 = vrot.slane %v3352_v4, 2  ;;  %v7470_v5 = vld [vmem:[%s9721_s3 + $0x428] sm:$0xff] }
 0x1b1   : > { %v3335_v35 = vshrl.u32 %v8678_v57, 16  ;;  %v3338_v40 = vshll.u32 %v8678_v57, 16  ;;  %v3346_v14 = vshll.u32 %v8680_v9, 16  ;;  %v8899_v30 = vor.u32 %v3649_v54, %v3646_v8  ;;  %v7478_v57 = vld [vmem:[%s9721_s3 + $0x468] sm:$0xff] }
 0x1b2   : > { %v2487_v0 = vpop.f32.mrf.mxu2  ;;  %v3642_v36 = vor.u32 %v3641_v52, %v3638_v51  ;;  %3969 = vmatpush.bf16.msrb.mxu1 %v7478_v57  ;;  %v3381_v57 = vshll.u32 %v8716_v2, 16 }
 0x1b3   : > { %v2511_v24 = vadd.f32 %v2487_v0, %v2370_v12  ;;  %v3340_v4 = vrot.slane %v3338_v40, 3  ;;  %v3348_v51 = vrot.slane %v3346_v14, 3 }
 0x1b4   : > { %v2349_v18 = vpop.f32.mrf.mxu1  ;;  %3935 = vmatpush.bf16.msra.mxu0 %v7470_v5  ;;  %v3651_v52 = vsel %vm3333_vm5, %v3642_v36, %v8899_v30  ;;  %v3378_v5 = vshrl.u32 %v8716_v2, 16 }
 0x1b5   : > { %v8886_v27 = vadd.f32 %v2734_v15, %v2511_v24  ;;  %v2350_v44 = vadd.f32 %v2349_v18, %v8661_v55  ;;  %v3343_v55 = vshrl.u32 %v8680_v9, 16  ;;  %v3357_v24 = vrot.slane %v3355_v46, 3 }
 0x1b7   : > { %3110 = vmatmul.bf16.gmra.mxu2 %v2973_v34  ;;  %v2736_v59 = vpop.f32.mrf.mxu0  ;;  %v2371_v0 = vadd.f32 %v2350_v44, %v8684_v58  ;;  %6528 = vmatmul.msk.bf16.gmra.mxu1 %vm482_vm0, %v2787_v11  ;;  %v3362_v58 = vrot.slane %v3360_v3, 2  ;;  %v3365_v34 = vrot.slane %v3363_v50, 3  ;;  %v3345_v18 = vrot.slane %v3343_v55, 2 }
 0x1b8   : > { %v2737_v12 = vadd.f32 %v2736_v59, %v2702_v17  ;;  %v2704_v28 = vpop.f32.mrf.mxu3  ;;  %v3337_v17 = vrot.slane %v3335_v35, 2  ;;  %v3358_v44 = vor.u32 %v3357_v24, %v3354_v45  ;;  %v3656_v35 = vshll.u32 %v8745_v62, 16 }
 0x1b9   : > { %v3366_v59 = vor.u32 %v3365_v34, %v3362_v58 }
 0x1ba   : > { %v2490_v15 = vpop.f32.mrf.mxu2  ;;  %6695 = vmatmul.msk.bf16.gmra.mxu0 %vm482_vm0, %v3216_v29  ;;  %v3658_v24 = vrot.slane %v3656_v35, 3 }
 0x1bb   : > { %v2512_v49 = vadd.f32 %v2490_v15, %v2371_v0  ;;  %v3349_v0 = vor.u32 %v3348_v51, %v3345_v18  ;;  %v3653_v15 = vshrl.u32 %v8745_v62, 16  ;;  %v3367_v55 = vsel %vm3333_vm5, %v3358_v44, %v3366_v59 }
 0x1bc   : > { %v2351_v29 = vpop.f32.mrf.mxu1  ;;  %v3372_v51 = vshll.u32 %v8732_v21, 16  ;;  %v3383_v44 = vrot.slane %v3381_v57, 3 }
 0x1bd   : > { %v8907_v11 = vadd.f32 %v2737_v12, %v2512_v49  ;;  %v2352_v8 = vadd.f32 %v2351_v29, %v8695_v48  ;;  %6810 = vmatmul.msk.bf16.vlgmr.msrb.gmra.mxu3 %vm482_vm0, %v3651_v52  ;;  %v3341_v12 = vor.u32 %v3340_v4, %v3337_v17  ;;  %v7482_v48 = vld [vmem:[%s9722_s4 + $0xc8] sm:$0xff]  ;;  %v3655_v49 = vrot.slane %v3653_v15, 2  ;;  %v7477_v17 = vld [vmem:[%s9721_s3 + $0x460] sm:$0xff] }
 0x1be   : > { %4072 = vmatpush.bf16.msrb.mxu2 %v7482_v48  ;;  %3970 = vmatpush.bf16.msrb.mxu1 %v7477_v17  ;;  %v3374_v15 = vrot.slane %v3372_v51, 3 }
 0x1bf   : > { %v2738_v54 = vpop.f32.mrf.mxu0  ;;  %v2372_v46 = vadd.f32 %v2352_v8, %v8713_v63  ;;  %v3350_v36 = vsel %vm3333_vm5, %v3341_v12, %v3349_v0  ;;  %v3659_v52 = vor.u32 %v3658_v24, %v3655_v49  ;;  %v3662_v49 = vshrl.u32 %v8785_v39, 16 }
 0x1c0   : > { %v2739_v50 = vadd.f32 %v2738_v54, %v2704_v28  ;;  %v2707_v45 = vpop.f32.mrf.mxu3  ;;  %v7469_v28 = vld [vmem:[%s9721_s3 + $0x420] sm:$0xff]  ;;  %v3380_v54 = vrot.slane %v3378_v5, 2  ;;  %v3665_v24 = vshll.u32 %v8785_v39, 16 }
 0x1c1   : > { %3936 = vmatpush.bf16.msra.mxu0 %v7469_v28  ;;  %v3664_v17 = vrot.slane %v3662_v49, 2  ;;  %v7481_v49 = vld [vmem:[%s9722_s4 + $0xc0] sm:$0xff] }
 0x1c2   : > { %v2492_v3 = vpop.f32.mrf.mxu2  ;;  %4073 = vmatpush.bf16.msrb.mxu2 %v7481_v49 }
 0x1c3   : > { %v2513_v40 = vadd.f32 %v2492_v3, %v2372_v46 }
 0x1c4   : > { %v2354_v14 = vpop.f32.mrf.mxu1 }
 0x1c5   : > { %v8920_v63 = vadd.f32 %v2739_v50, %v2513_v40  ;;  %v2355_v58 = vadd.f32 %v2354_v14, %v8724_v16  ;;  %v3369_v16 = vshrl.u32 %v8732_v21, 16 }
 0x1c7   : > { %3588 = vmatmul.bf16.vlgmr.msra.gmra.mxu2 %v3367_v55  ;;  %v2741_v34 = vpop.f32.mrf.mxu0  ;;  %v2373_v4 = vadd.f32 %v2355_v58, %v8735_v33  ;;  %3554 = vmatmul.bf16.vlgmr.msra.gmra.mxu1 %v3350_v36  ;;  %v3371_v12 = vrot.slane %v3369_v16, 2  ;;  %v3660_v33 = vsel %vm3333_vm5, %v8899_v30, %v3659_v52  ;;  %v3384_v55 = vor.u32 %v3383_v44, %v3380_v54 }
 0x1c8   : > { %v2742_v29 = vadd.f32 %v2741_v34, %v2707_v45  ;;  %v2709_v46 = vpop.f32.mrf.mxu3  ;;  %v3399_v16 = vshll.u32 %v8756_v26, 16  ;;  %v3387_v44 = vshrl.u32 %v8769_v43, 16 }
 0x1c9   : > { %v3375_v36 = vor.u32 %v3374_v15, %v3371_v12  ;;  %v3385_v34 = vsel %vm3333_vm5, %v3366_v59, %v3384_v55 }
 0x1ca   : > { %v2495_v18 = vpop.f32.mrf.mxu2 }
 0x1cb   : > { %v2514_v8 = vadd.f32 %v2495_v18, %v2373_v4  ;;  %v3376_v28 = vsel %vm3333_vm5, %v3349_v0, %v3375_v36  ;;  %v3396_v18 = vshrl.u32 %v8756_v26, 16  ;;  %v7475_v0 = vld [vmem:[%s9721_s3 + $0x450] sm:$0xff] }
 0x1cc   : > { %v2356_v50 = vpop.f32.mrf.mxu1 }
 0x1cd   : > { %v8935_v3 = vadd.f32 %v2742_v29, %v2514_v8  ;;  %v2357_v35 = vadd.f32 %v2356_v50, %v8741_v41  ;;  %6811 = vmatmul.msk.bf16.gmra.mxu3 %vm482_vm0, %v3660_v33  ;;  %v7468_v41 = vld [vmem:[%s9721_s3 + $0x418] sm:$0xff]  ;;  %v3667_v29 = vrot.slane %v3665_v24, 3  ;;  %v3398_v15 = vrot.slane %v3396_v18, 2 }
 0x1ce   : > { %3937 = vmatpush.bf16.msra.mxu0 %v7468_v41  ;;  %v3401_v33 = vrot.slane %v3399_v16, 3 }
 0x1cf   : > { %v2743_v40 = vpop.f32.mrf.mxu0  ;;  %v2374_v48 = vadd.f32 %v2357_v35, %v8753_v6  ;;  %v7476_v6 = vld [vmem:[%s9721_s3 + $0x458] sm:$0xff]  ;;  %v8960_v50 = vor.u32 %v3667_v29, %v3664_v17  ;;  %v3389_v35 = vrot.slane %v3387_v44, 2 }
 0x1d0   : > { %v2744_v14 = vadd.f32 %v2743_v40, %v2709_v46  ;;  %v2712_v30 = vpop.f32.mrf.mxu3  ;;  %3971 = vmatpush.bf16.msrb.mxu1 %v7476_v6  ;;  %v3390_v46 = vshll.u32 %v8769_v43, 16  ;;  %v4137_v43 = vld [vmem:[%s9720_s2 + $0x18] sm:$0xff] }
 0x1d2   : > { %v2497_v45 = vpop.f32.mrf.mxu2  ;;  %v3392_v40 = vrot.slane %v3390_v46, 3 }
 0x1d3   : > { %v2515_v58 = vadd.f32 %v2497_v45, %v2374_v48 }
 0x1d4   : > { %v2359_v57 = vpop.f32.mrf.mxu1  ;;  %3972 = vmatpush.bf16.msrb.mxu1 %v7475_v0  ;;  %v3405_v0 = vshrl.u32 %v8812_v47, 16 }
 0x1d5   : > { %v8951_v5 = vadd.f32 %v2744_v14, %v2515_v58  ;;  %v2360_v59 = vadd.f32 %v2359_v57, %v8761_v32  ;;  %v7467_v32 = vld [vmem:[%s9721_s3 + $0x410] sm:$0xff]  ;;  %v3669_v14 = vsel %vm3333_vm5, %v3659_v52, %v8960_v50  ;;  %v3671_v52 = vshrl.u32 %v8828_v19, 16 }
 0x1d6   : > { %3938 = vmatpush.bf16.msra.mxu0 %v7467_v32  ;;  %v3674_v57 = vshll.u32 %v8828_v19, 16 }
 0x1d7   : > { %3593 = vmatmul.bf16.gmra.mxu2 %v3385_v34  ;;  %v2746_v4 = vpop.f32.mrf.mxu0  ;;  %v2375_v8 = vadd.f32 %v2360_v59, %v8778_v38  ;;  %3559 = vmatmul.bf16.gmra.mxu1 %v3376_v28  ;;  %v8980_v34 = vor.u32 %v3401_v33, %v3398_v15  ;;  %v3414_v59 = vshrl.u32 %v8802_v25, 16  ;;  %v3673_v18 = vrot.slane %v3671_v52, 2 }
 0x1d8   : > { %v2747_v51 = vadd.f32 %v2746_v4, %v2712_v30  ;;  %v8968_v38 = vpop.f32.mrf.mxu3  ;;  %v8983_v30 = vor.u32 %v3392_v40, %v3389_v35  ;;  %v3417_v4 = vshll.u32 %v8802_v25, 16  ;;  %v3676_v16 = vrot.slane %v3674_v57, 3 }
 0x1d9   : > { %v3416_v15 = vrot.slane %v3414_v59, 2 }
 0x1da   : > { %v2500_v54 = vpop.f32.mrf.mxu2  ;;  %v3394_v29 = vsel %vm3333_vm5, %v3375_v36, %v8983_v30  ;;  %v3419_v33 = vrot.slane %v3417_v4, 3  ;;  %v9007_v35 = vor.u32 %v3676_v16, %v3673_v18 }
 0x1db   : > { %v2516_v12 = vadd.f32 %v2500_v54, %v2375_v8  ;;  %v3624_v54 = vld [vmem:[%s7730_s11 + $0x30] sm:$0x7] }
 0x1dc   : > { %v2361_v45 = vpop.f32.mrf.mxu1  ;;  %v3633_v40 = vunpack.c.l.b16 %v3624_v54 }
 0x1dd   : > { %v8970_v48 = vadd.f32 %v2747_v51, %v2516_v12  ;;  %v2362_v24 = vadd.f32 %v2361_v45, %v8781_v23  ;;  %6812 = vmatmul.msk.bf16.gmra.mxu3 %vm482_vm0, %v3669_v14  ;;  %v3403_v23 = vsel %vm3333_vm5, %v3384_v55, %v8980_v34  ;;  %v7466_v51 = vld [vmem:[%s9721_s3 + $0x408] sm:$0xff]  ;;  %v3408_v12 = vshll.u32 %v8812_v47, 16 }
 0x1de   : > { %v7474_v55 = vld [vmem:[%s9721_s3 + $0x448] sm:$0xff]  ;;  %3939 = vmatpush.bf16.msra.mxu0 %v7466_v51  ;;  %v3806_v51 = vrot.slane %v8680_v9, 3 }
 0x1df   : > { %v8978_v58 = vpop.f32.mrf.mxu0  ;;  %v2376_v41 = vadd.f32 %v2362_v24, %v8799_v37  ;;  %3973 = vmatpush.bf16.msrb.mxu1 %v7474_v55  ;;  %v3294_v24 = vld [vmem:[%s7743_s20 + $0x60] sm:$0x77] }
 0x1e0   : > { %v2717_v17 = vpop.f32.mrf.mxu3  ;;  %v3330_v18 = vunpack.c.h.b16 %v3294_v24 }
 0x1e2   : > { %v2502_v6 = vpop.f32.mrf.mxu2 }
 0x1e3   : > { %v8988_v28 = vadd.f32 %v2502_v6, %v2376_v41  ;;  %v3410_v41 = vrot.slane %v3408_v12, 3  ;;  %v7465_v6 = vld [vmem:[%s9721_s3 + $0x400] sm:$0xff] }
 0x1e4   : > { %v2364_v37 = vpop.f32.mrf.mxu1  ;;  %3940 = vmatpush.bf16.msra.mxu0 %v7465_v6 }
 0x1e5   : > { %v2365_v8 = vadd.f32 %v2364_v37, %v8804_v60  ;;  %v9010_v60 = vld [vmem:[%s7743_s20 + $0x10] sm:$0x88]  ;;  %v9028_v37 = vpack.c.b16 %v3633_v40, %v3633_v40 }
 0x1e6   : > { %v3800_v14 = vunpack.c.l.b16 %v9010_v60 }
 0x1e7   : > { %3598 = vmatmul.bf16.gmra.mxu2 %v3403_v23  ;;  %v2751_v36 = vpop.f32.mrf.mxu0  ;;  %v2377_v46 = vadd.f32 %v2365_v8, %v8818_v10  ;;  %3564 = vmatmul.bf16.gmra.mxu1 %v3394_v29  ;;  %v3407_v10 = vrot.slane %v3405_v0, 2  ;;  %v3678_v29 = vsel %vm3333_vm5, %v8960_v50, %v9007_v35  ;;  %v3680_v54 = vshrl.u32 %v9028_v37, 16 }
 0x1e8   : > { %v2752_v44 = vadd.f32 %v2751_v36, %v2717_v17  ;;  %v9013_v49 = vpop.f32.mrf.mxu3  ;;  %v3802_v52 = vpack.c.b16 %v2922_v1, %v3800_v14  ;;  %v9023_v17 = vor.u32 %v3419_v33, %v3416_v15  ;;  %v7473_v1 = vld [vmem:[%s9721_s3 + $0x440] sm:$0xff] }
 0x1e9   : > { %v9038_v50 = vor.u32 %v3410_v41, %v3407_v10  ;;  %3974 = vmatpush.bf16.msrb.mxu1 %v7473_v1  ;;  %v3682_v33 = vrot.slane %v3680_v54, 2  ;;  %v4135_v54 = vld [vmem:[%s9720_s2 + $0x8] sm:$0xff] }
 0x1ea   : > { %v2505_v32 = vpop.f32.mrf.mxu2  ;;  %v3805_v16 = vrot.slane %v3802_v52, 3  ;;  %v3421_v9 = vsel %vm3333_vm5, %v8980_v34, %v9023_v17 }
 0x1eb   : > { %v2518_v45 = vadd.f32 %v2505_v32, %v2377_v46  ;;  %v7641_v32 = vmov 0   ;;  %v3412_v15 = vsel %vm3333_vm5, %v8983_v30, %v9038_v50 }
 0x1ec   : > { %v2366_v23 = vpop.f32.mrf.mxu1  ;;  %v3807_v36 = vsel %vm3804_vm6, %v3805_v16, %v3806_v51  ;;  %7620 = vset.pattern.permute.xlu0 %v7641_v32  ;;  %4205 = vst.msk [vmem:[#allocation2] sm:$0xf] %vm4204_vm7, %v7641_v32  ;;  %7621 = vset.pattern.permute.xlu1 %v7641_v32 }
 0x1ed   : > { %v9021_v57 = vadd.f32 %v2752_v44, %v2518_v45  ;;  %v2367_v59 = vadd.f32 %v2366_v23, %v8824_v7  ;;  %6813 = vmatmul.msk.bf16.gmra.mxu3 %vm482_vm0, %v3678_v29  ;;  %v3329_v7 = vunpack.c.l.b16 %v3294_v24  ;;  %v3683_v44 = vshll.u32 %v9028_v37, 16  ;;  %3941 = vmatmul.bf16.vlgmr.msra.gmra.mxu0 %v3807_v36  ;;  %4206 = vst.msk [vmem:[#allocation2 + $0x4] sm:$0xf] %vm4204_vm7, %v7641_v32  ;;  %v4134_v45 = vld [vmem:[%s9720_s2] sm:$0xff] }
 0x1ee   : > { %7622 = vset.pattern.permute.xlu2 %v7641_v32  ;;  %4227 = vst.msk [vmem:[#allocation2 + $0x30] sm:$0xf] %vm4204_vm7, %v7641_v32  ;;  %4146 = vperm.xlu0 %7620, %v4134_v45  }
 0x1ef   : > { %v9031_v4 = vpop.f32.mrf.mxu0  ;;  %v2378_v55 = vadd.f32 %v2367_v59, %v8843_v42  ;;  %v9049_v42 = vpack.c.b16 %v3330_v18, %v3330_v18  ;;  %v9057_v34 = vpack.c.b16 %v3329_v7, %v3329_v7  ;;  %v3685_v40 = vrot.slane %v3683_v44, 3  ;;  %4228 = vst.msk [vmem:[#allocation2 + $0x34] sm:$0xf] %vm4204_vm7, %v7641_v32 }
 0x1f0   : > { %v3125_v0 = vpop.f32.mrf.mxu3 }
 0x1f1   : > { %v3432_v10 = vshrl.u32 %v9049_v42, 16  ;;  %v3435_v41 = vshll.u32 %v9049_v42, 16  ;;  %v3423_v52 = vshrl.u32 %v9057_v34, 16  ;;  %v3426_v23 = vshll.u32 %v9057_v34, 16 }
 0x1f2   : > { %v2507_v8 = vpop.f32.mrf.mxu2  ;;  %v3686_v29 = vor.u32 %v3685_v40, %v3682_v33 }
 0x1f3   : > { %v9044_v46 = vadd.f32 %v2507_v8, %v2378_v55  ;;  %v3434_v59 = vrot.slane %v3432_v10, 2  ;;  %v3437_v18 = vrot.slane %v3435_v41, 3  ;;  %v3425_v8 = vrot.slane %v3423_v52, 2  ;;  %v4140_v10 = vld [vmem:[%s9720_s2 + $0x30] sm:$0xff] }
 0x1f4   : > { %v2830_v12 = vpop.f32.mrf.mxu1  ;;  %v3428_v7 = vrot.slane %v3426_v23, 3  ;;  %v3687_v36 = vsel %vm3333_vm5, %v9007_v35, %v3686_v29  ;;  %v3801_v52 = vunpack.c.h.b16 %v9010_v60 }
 0x1f5   : > { %v2855_v14 = vadd.f32 %v2830_v12, %v8864_v56  ;;  %v3438_v32 = vor.u32 %v3437_v18, %v3434_v59 }
 0x1f6   : > { %4151 = vperm.xlu0 %7620, %v4135_v54   ;;  %v3429_v35 = vor.u32 %v3428_v7, %v3425_v8  ;;  %v3809_v54 = vrot.slane %v8653_v61, 3 }
 0x1f7   : > { %3603 = vmatmul.bf16.gmra.mxu2 %v3421_v9  ;;  %v3259_v24 = vpop.f32.mrf.mxu0  ;;  %3569 = vmatmul.bf16.gmra.mxu1 %v3412_v15  ;;  %v3439_v40 = vsel %vm3333_vm5, %v9023_v17, %v3438_v32 }
 0x1f8   : > { %v3127_v16 = vpop.f32.mrf.mxu3 }
 0x1fa   : > { %v3091_v6 = vpop.f32.mrf.mxu2 }
 0x1fb   : > { %v3126_v30 = vadd.f32 %v3125_v0, %v3091_v6  ;;  %v3811_v0 = vrot.slane %v8732_v21, 3  ;;  %v3430_v21 = vsel %vm3333_vm5, %v9038_v50, %v3429_v35 }
 0x1fc   : > { %v2832_v56 = vpop.f32.mrf.mxu1 }
 0x1fd   : > { %v3150_v1 = vadd.f32 %v3126_v30, %v2855_v14  ;;  %v2856_v44 = vadd.f32 %v2832_v56, %v8886_v27  ;;  %6814 = vmatmul.msk.bf16.gmra.mxu3 %vm482_vm0, %v3687_v36  ;;  %v3812_v15 = vsel %vm3804_vm6, %v3806_v51, %v3811_v0  ;;  %v4011_v14 = vld [vmem:[%s7730_s11 + $0x8] sm:$0x8]  ;;  %v4023_v56 = vrot.slane %v8700_v53, 3 }
 0x1fe   : > { %3946 = vmatmul.bf16.gmra.mxu0 %v3812_v15  ;;  %v4020_v6 = vunpack.c.l.b16 %v4011_v14  ;;  %4176 = vperm.xlu0 %7620, %v4140_v10   ;;  %v3816_v8 = vsel %vm3804_vm6, %v3811_v0, %v3815_v13 }
 0x1ff   : > { %v9068_v55 = vadd.f32 %v3259_v24, %v3150_v1  ;;  %v9076_v9 = vpop.f32.mrf.mxu0  ;;  %v3803_v1 = vpack.c.b16 %v2923_v20, %v3801_v52 }
 0x200   : > { %v3130_v27 = vpop.f32.mrf.mxu3  ;;  %v4021_v23 = vpack.c.b16 %v3190_v22, %v4020_v6 }
 0x201   : > { %v3808_v36 = vrot.slane %v3803_v1, 3 }
 0x202   : > { %v3093_v12 = vpop.f32.mrf.mxu2  ;;  %v4022_v22 = vrot.slane %v4021_v23, 3 }
 0x203   : > { %v3128_v33 = vadd.f32 %v3127_v16, %v3093_v12  ;;  %v4143_v16 = vld [vmem:[%s9720_s2 + $0x48] sm:$0xff]  ;;  %v3810_v53 = vsel %vm3804_vm6, %v3808_v36, %v3809_v54 }
 0x204   : > { %v2835_v24 = vpop.f32.mrf.mxu1 }
 0x205   : > { %v9083_v45 = vadd.f32 %v3128_v33, %v2856_v44  ;;  %v2857_v51 = vadd.f32 %v2835_v24, %v8907_v11  ;;  %v4136_v11 = vld [vmem:[%s9720_s2 + $0x10] sm:$0xff]  ;;  %v4024_v44 = vsel %vm3804_vm6, %v4022_v22, %v4023_v56  ;;  %v4141_v24 = vld [vmem:[%s9720_s2 + $0x38] sm:$0xff]  ;;  %v4027_v22 = vrot.slane %v8785_v39, 3 }
 0x206   : > { %4156 = vperm.xlu1 %7621, %v4136_v11   ;;  %4191 = vperm.xlu0 %7620, %v4143_v16  }
 0x207   : > { %3608 = vmatmul.bf16.gmra.mxu2 %v3439_v40  ;;  %v3264_v41 = vpop.f32.mrf.mxu0  ;;  %3574 = vmatmul.bf16.gmra.mxu1 %v3430_v21 }
 0x208   : > { %v3132_v59 = vpop.f32.mrf.mxu3 }
 0x20a   : > { %v3096_v30 = vpop.f32.mrf.mxu2 }
 0x20b   : > { %v3131_v17 = vadd.f32 %v3130_v27, %v3096_v30 }
 0x20c   : > { %v2837_v18 = vpop.f32.mrf.mxu1 }
 0x20d   : > { %v3152_v29 = vadd.f32 %v3131_v17, %v2857_v51  ;;  %v2858_v60 = vadd.f32 %v2837_v18, %v8920_v63  ;;  %v3819_v51 = vrot.slane %v8812_v47, 3  ;;  %v3813_v17 = vrot.slane %v8716_v2, 3 }
 0x20e   : > { %3951 = vmatmul.bf16.gmra.mxu0 %v3816_v8  ;;  %4161 = vperm.xlu1 %7621, %v4137_v43   ;;  %v3823_v8 = vrot.slane %v9057_v34, 3 }
 0x20f   : > { %v9095_v50 = vadd.f32 %v3264_v41, %v3152_v29  ;;  %v9106_v31 = vpop.f32.mrf.mxu0  ;;  %v3820_v6 = vsel %vm3804_vm6, %v3815_v13, %v3819_v51 }
 0x210   : > { %v3135_v32 = vpop.f32.mrf.mxu3  ;;  %v3824_v39 = vsel %vm3804_vm6, %v3819_v51, %v3823_v8 }
 0x212   : > { %v3098_v20 = vpop.f32.mrf.mxu2 }
 0x213   : > { %v3133_v7 = vadd.f32 %v3132_v59, %v3098_v20  ;;  %v3817_v20 = vrot.slane %v8756_v26, 3 }
 0x214   : > { %v2840_v12 = vpop.f32.mrf.mxu1 }
 0x215   : > { %v9113_v63 = vadd.f32 %v3133_v7, %v2858_v60  ;;  %v2859_v0 = vadd.f32 %v2840_v12, %v8935_v3  ;;  %v4025_v3 = vrot.slane %v8745_v62, 3  ;;  %v3814_v62 = vsel %vm3804_vm6, %v3809_v54, %v3813_v17  ;;  %v4138_v54 = vld [vmem:[%s9720_s2 + $0x20] sm:$0xff] }
 0x216   : > { %4181 = vperm.xlu1 %7621, %v4141_v24   ;;  %v3818_v36 = vsel %vm3804_vm6, %v3813_v17, %v3817_v20  ;;  %4166 = vperm.xlu2 %7622, %v4138_v54   ;;  %v4142_v24 = vld [vmem:[%s9720_s2 + $0x40] sm:$0xff] }
 0x217   : > { %6929 = vmatmul.msk.bf16.vlgmr.msrb.gmra.mxu2 %vm482_vm0, %v4024_v44  ;;  %v3269_v15 = vpop.f32.mrf.mxu0  ;;  %3975 = vmatmul.bf16.vlgmr.msrb.gmra.mxu1 %v3810_v53  ;;  %v4026_v52 = vsel %vm3804_vm6, %v4023_v56, %v4025_v3 }
 0x218   : > { %v3137_v40 = vpop.f32.mrf.mxu3 }
 0x21a   : > { %v3101_v61 = vpop.f32.mrf.mxu2 }
 0x21b   : > { %v3136_v33 = vadd.f32 %v3135_v32, %v3101_v61  ;;  %v4029_v61 = vrot.slane %v8828_v19, 3 }
 0x21c   : > { %v2842_v14 = vpop.f32.mrf.mxu1 }
 0x21d   : > { %v3154_v35 = vadd.f32 %v3136_v33, %v2859_v0  ;;  %v2860_v21 = vadd.f32 %v2842_v14, %v8951_v5 }
 0x21e   : > { %3956 = vmatmul.bf16.gmra.mxu0 %v3820_v6 }
 0x21f   : > { %v9121_v27 = vadd.f32 %v3269_v15, %v3154_v35  ;;  %v9127_v10 = vpop.f32.mrf.mxu0  ;;  %v4139_v15 = vld [vmem:[%s9720_s2 + $0x28] sm:$0xff]  ;;  %v4030_v35 = vsel %vm3804_vm6, %v4027_v22, %v4029_v61 }
 0x220   : > { %v3140_v29 = vpop.f32.mrf.mxu3  ;;  %4171 = vperm.xlu2 %7622, %v4139_v15  }
 0x222   : > { %v3103_v41 = vpop.f32.mrf.mxu2 }
 0x223   : > { %v3138_v30 = vadd.f32 %v3137_v40, %v3103_v41  ;;  %v4031_v41 = vrot.slane %v9028_v37, 3  ;;  %v7494_v37 = vld [vmem:[%s9724_s6 + $0x30] sm:$0xff] }
 0x224   : > { %v2845_v5 = vpop.f32.mrf.mxu1 }
 0x225   : > { %v9134_v23 = vadd.f32 %v3138_v30, %v2860_v21  ;;  %v2861_v59 = vadd.f32 %v2845_v5, %v8970_v48  ;;  %v4028_v48 = vsel %vm3804_vm6, %v4025_v3, %v4027_v22  ;;  %v7495_v3 = vld [vmem:[%s9724_s6 + $0x38] sm:$0xff]  ;;  %v3825_v30 = vrot.slane %v9049_v42, 3 }
 0x226   : > { %4341 = vmatpush.bf16.msra.mxu3 %v7495_v3  ;;  %v4032_v17 = vsel %vm3804_vm6, %v4029_v61, %v4031_v41  ;;  %v7489_v3 = vld [vmem:[%s9724_s6 + $0x8] sm:$0xff] }
 0x227   : > { %6930 = vmatmul.msk.bf16.gmra.mxu2 %vm482_vm0, %v4026_v52  ;;  %v3274_v47 = vpop.f32.mrf.mxu0  ;;  %3980 = vmatmul.bf16.gmra.mxu1 %v3814_v62  ;;  %v7497_v41 = vld [vmem:[%s9724_s6 + $0x48] sm:$0xff] }
 0x228   : > { %v9139_v16 = vpop.f32.mrf.mxu3  ;;  %4186 = vperm.xlu2 %7622, %v4142_v24   ;;  %v7490_v24 = vld [vmem:[%s9724_s6 + $0x10] sm:$0xff] }
 0x22a   : > { %v3106_v18 = vpop.f32.mrf.mxu2  ;;  %4342 = vmatpush.bf16.msra.mxu3 %v7494_v37  ;;  %v3285_v37 = vadd.f32 %v9076_v9, %v9083_v45  ;;  %v7501_v45 = vld [vmem:[%s9724_s6 + $0x68] sm:$0xff] }
 0x22b   : > { %v3141_v1 = vadd.f32 %v3140_v29, %v3106_v18 }
 0x22c   : > { %v9143_v60 = vpop.f32.mrf.mxu1 }
 0x22d   : > { %v3156_v11 = vadd.f32 %v3141_v1, %v2861_v59 }
 0x22e   : > { %3961 = vmatmul.bf16.gmra.mxu0 %v3824_v39 }
 0x22f   : > { %v9141_v2 = vadd.f32 %v3274_v47, %v3156_v11  ;;  %v9148_v13 = vpop.f32.mrf.mxu0 }
 0x230   : > { %v3145_v32 = vpop.f32.mrf.mxu3 }
 0x232   : > { %v9146_v56 = vpop.f32.mrf.mxu2 }
 0x234   : > { %v2850_v7 = vpop.f32.mrf.mxu1 }
 0x235   : > { %v2863_v44 = vadd.f32 %v2850_v7, %v9021_v57  ;;  %v3821_v57 = vrot.slane %v8802_v25, 3 }
 0x237   : > { %6931 = vmatmul.msk.bf16.gmra.mxu2 %vm482_vm0, %v4028_v48  ;;  %3985 = vmatmul.bf16.gmra.mxu1 %v3818_v36  ;;  %v3279_v34 = vpop.f32.mrf.mxu0  ;;  %v3822_v14 = vsel %vm3804_vm6, %v3817_v20, %v3821_v57  ;;  %v3826_v29 = vsel %vm3804_vm6, %v3821_v57, %v3825_v30  ;;  %v7492_v57 = vld [vmem:[%s9724_s6 + $0x20] sm:$0xff]  ;;  %v7503_v30 = vld [vmem:[%s9724_s6 + $0x78] sm:$0xff] }
 0x238   : > { %v9204_v8 = vpop.f32.mrf.mxu3  ;;  %4774 = vmatpush.bf16.msra.mxu2 %v7503_v30  ;;  %v4229_v30 = vld [vmem:[#allocation2] sm:$0xc] }
 0x23a   : > { %v3111_v26 = vpop.f32.mrf.mxu2 }
 0x23b   : > { %v3146_v12 = vadd.f32 %v3145_v32, %v3111_v26 }
 0x23c   : > { %v9160_v0 = vpop.f32.mrf.mxu1 }
 0x23d   : > { %v3158_v53 = vadd.f32 %v3146_v12, %v2863_v44 }
 0x23f   : > { %v3292_v43 = vadd.f32 %v3279_v34, %v3158_v53  ;;  %v9209_v39 = vpop.f32.mrf.mxu0 }
 0x240   : > { %v3730_v44 = vpop.f32.mrf.mxu3 }
 0x242   : > { %v9166_v33 = vpop.f32.mrf.mxu2 }
 0x244   : > { %v3555_v40 = vpop.f32.mrf.mxu1 }
 0x247   : > { %6932 = vmatmul.msk.bf16.gmra.mxu2 %vm482_vm0, %v4030_v35  ;;  %3990 = vmatmul.bf16.gmra.mxu1 %v3822_v14  ;;  %v7499_v35 = vld [vmem:[%s9724_s6 + $0x58] sm:$0xff] }
 0x248   : > { %v3732_v15 = vpop.f32.mrf.mxu3  ;;  %4590 = vmatpush.bf16.msra.mxu1 %v7499_v35  ;;  %v7500_v35 = vld [vmem:[%s9724_s6 + $0x60] sm:$0xff] }
 0x24a   : > { %v3589_v21 = vpop.f32.mrf.mxu2 }
 0x24b   : > { %v3590_v19 = vadd.f32 %v3589_v21, %v3555_v40  ;;  %v7498_v21 = vld [vmem:[%s9724_s6 + $0x50] sm:$0xff] }
 0x24c   : > { %v3557_v51 = vpop.f32.mrf.mxu1  ;;  %4591 = vmatpush.bf16.msra.mxu1 %v7498_v21 }
 0x24d   : > { %v3614_v25 = vadd.f32 %v3590_v19, %v9068_v55 }
 0x250   : > { %v3735_v19 = vpop.f32.mrf.mxu3  ;;  %4592 = vmatpush.bf16.msra.mxu1 %v7497_v41  ;;  %v4230_v41 = vld [vmem:[#allocation2 + $0x4] sm:$0xf] }
 0x252   : > { %v3591_v6 = vpop.f32.mrf.mxu2 }
 0x254   : > { %v3560_v52 = vpop.f32.mrf.mxu1 }
 0x257   : > { %6933 = vmatmul.msk.bf16.gmra.mxu2 %vm482_vm0, %v4032_v17  ;;  %3995 = vmatmul.bf16.gmra.mxu1 %v3826_v29  ;;  %v3592_v29 = vadd.f32 %v3591_v6, %v3557_v51  ;;  %v7502_v51 = vld [vmem:[%s9724_s6 + $0x70] sm:$0xff] }
 0x258   : > { %4775 = vmatpush.bf16.msra.mxu2 %v7502_v51 }
 0x25a   : > { %v3594_v5 = vpop.f32.mrf.mxu2 }
 0x25b   : > { %v3595_v62 = vadd.f32 %v3594_v5, %v3560_v52  ;;  %v3755_v52 = vadd.f32 %v3730_v44, %v3614_v25  ;;  %v7496_v25 = vld [vmem:[%s9724_s6 + $0x40] sm:$0xff] }
 0x25c   : > { %v9187_v55 = vpop.f32.mrf.mxu1  ;;  %4593 = vmatpush.bf16.msra.mxu1 %v7496_v25  ;;  %4776 = vmatpush.bf16.msra.mxu2 %v7501_v45  ;;  %v3287_v25 = vadd.f32 %v9106_v31, %v9113_v63 }
 0x25d   : > { %v9185_v59 = vadd.f32 %v3595_v62, %v9095_v50  ;;  %v7493_v50 = vld [vmem:[%s9724_s6 + $0x28] sm:$0xff]  ;;  %v9248_v62 = vld [vmem:[%s9723_s5] ss:$0 sm:$0xff] }
 0x25e   : > { %4343 = vmatpush.bf16.msra.mxu3 %v7493_v50  ;;  %v3615_v50 = vadd.f32 %v3592_v29, %v3285_v37 }
 0x260   : > { %v3756_v44 = vadd.f32 %v3732_v15, %v3615_v50  ;;  %4777 = vmatpush.bf16.msra.mxu2 %v7500_v35 }
 0x262   : > { %v9192_v42 = vpop.f32.mrf.mxu2  ;;  %4344 = vmatpush.bf16.msra.mxu3 %v7492_v57 }
 0x264   : > { %v3565_v47 = vpop.f32.mrf.mxu1 }
 0x26a   : > { %v3599_v18 = vpop.f32.mrf.mxu2  ;;  %v3942_v12 = vpop.f32.mrf.mxu0 }
 0x26b   : > { %v3600_v1 = vadd.f32 %v3599_v18, %v3565_v47 }
 0x26c   : > { %v9197_v22 = vpop.f32.mrf.mxu1 }
 0x26d   : > { %v9195_v11 = vadd.f32 %v3600_v1, %v9121_v27  ;;  %v7488_v1 = vld [vmem:[%s9724_s6] sm:$0xff] }
 0x272   : > { %v9199_v20 = vpop.f32.mrf.mxu2  ;;  %v3944_v14 = vpop.f32.mrf.mxu0 }
 0x274   : > { %v3570_v48 = vpop.f32.mrf.mxu1 }
 0x27a   : > { %v3604_v7 = vpop.f32.mrf.mxu2 }
 0x27b   : > { %v3605_v36 = vadd.f32 %v3604_v7, %v3570_v48  ;;  %v3947_v6 = vpop.f32.mrf.mxu0  ;;  %v4147_v7 = vpop.permute.xlu0 %4146 }
 0x27c   : > { %v9211_v27 = vpop.f32.mrf.mxu1 }
 0x27d   : > { %v9207_v54 = vadd.f32 %v3605_v36, %v9141_v2  ;;  %v7491_v2 = vld [vmem:[%s9724_s6 + $0x18] sm:$0xff] }
 0x27e   : > { %4470 = vmatpush.bf16.msrb.mxu0 %v7491_v2 }
 0x282   : > { %v9213_v32 = vpop.f32.mrf.mxu2  ;;  %4471 = vmatpush.bf16.msrb.mxu0 %v7490_v24 }
 0x283   : > { %v4152_v51 = vpop.permute.xlu0 %4151 }
 0x284   : > { %v3575_v26 = vpop.f32.mrf.mxu1 }
 0x286   : > { %4472 = vmatpush.bf16.msrb.mxu0 %v7489_v3  ;;  %v3949_v3 = vpop.f32.mrf.mxu0 }
 0x28a   : > { %v3609_v34 = vpop.f32.mrf.mxu2  ;;  %4473 = vmatpush.bf16.msrb.mxu0 %v7488_v1  ;;  %v4372_v1 = vunpack.c.l.b16 %v4229_v30 }
 0x28b   : > { %v3610_v53 = vadd.f32 %v3609_v34, %v3575_v26  ;;  %v3737_v26 = vpop.f32.mrf.mxu3 }
 0x28c   : > { %v9226_v40 = vpop.f32.mrf.mxu1 }
 0x28d   : > { %v9215_v61 = vadd.f32 %v3610_v53, %v3292_v43 }
 0x292   : > { %v9228_v43 = vpop.f32.mrf.mxu2 }
 0x293   : > { %v3740_v50 = vpop.f32.mrf.mxu3 }
 0x294   : > { %v3976_v17 = vpop.f32.mrf.mxu1 }
 0x295   : > { %v3977_v5 = vadd.f32 %v3976_v17, %v3942_v12  ;;  %v3757_v17 = vadd.f32 %v3735_v19, %v9185_v59 }
 0x297   : > { %v4001_v47 = vadd.f32 %v3977_v5, %v3755_v52  ;;  %v3597_v52 = vadd.f32 %v9192_v42, %v9187_v55  ;;  %v4248_v5 = vld [vmem:[#allocation2] sm:$0x8]  ;;  %v4157_v42 = vpop.permute.xlu1 %4156 }
 0x299   : > { %v3617_v59 = vadd.f32 %v3597_v52, %v3287_v25 }
 0x29a   : > { %v4075_v18 = vpop.f32.mrf.mxu2 }
 0x29b   : > { %v4100_v48 = vadd.f32 %v4075_v18, %v4001_v47  ;;  %v4270_v18 = vunpack.c.l.b16 %v4230_v41 }
 0x29c   : > { %v3978_v36 = vpop.f32.mrf.mxu1 }
 0x29d   : > { %v4114_v9 = vadd.f32 %v9248_v62, %v4100_v48  ;;  %v3979_v34 = vadd.f32 %v3978_v36, %v3944_v14  ;;  %v7507_v14 = vld [vmem:[%s9724_s6 + $0x98] sm:$0xff]  ;;  %v4373_v55 = vpack.c.b16 %v4270_v18, %v4372_v1 }
 0x29e   : > { %4871 = vmatpush.bf16.msrb.mxu3 %v7507_v14 }
 0x29f   : > { %v4124_v12 = vmax.f32 %v4114_v9, 0.0  ;;  %v4002_v57 = vadd.f32 %v3979_v34, %v3756_v44  ;;  %v3952_v34 = vpop.f32.mrf.mxu0 }
 0x2a1   : > { %v4194_v53 = vmul.f32 %v4147_v7, %v4124_v12  ;;  %v4269_v7 = vunpack.c.l.b16 %v4248_v5  ;;  %v3758_v12 = vadd.f32 %v3737_v26, %v3617_v59  ;;  %v7571_v5 = vld [vmem:[#allocation2 + $0x4] sm:$0x8]  ;;  %v2749_v26 = vadd.f32 %v8978_v58, %v8968_v38 }
 0x2a2   : > { %v4077_v2 = vpop.f32.mrf.mxu2 }
 0x2a3   : > { %v4207_v24 = vpack.c.bf16 %v4194_v53, %v4194_v53  ;;  %v4101_v21 = vadd.f32 %v4077_v2, %v4002_v57  ;;  %v4280_v44 = vpack.c.b16 %v4270_v18, %v4269_v7  ;;  %v4375_v57 = vshrl.u32 %v4373_v55, 16 }
 0x2a4   : > { %v3981_v29 = vpop.f32.mrf.mxu1  ;;  %v4378_v2 = vshll.u32 %v4373_v55, 16 }
 0x2a5   : > { %4217 = vst.msk [vmem:[#allocation2 + $0x8] sm:$0xf] %vm4204_vm7, %v4207_v24  ;;  %v4115_v15 = vadd.f32 %v9248_v62, %v4101_v21  ;;  %v3982_v47 = vadd.f32 %v3981_v29, %v3947_v6  ;;  %v4515_v41 = vshrl.u32 %v4280_v44, 16  ;;  %v4518_v30 = vshll.u32 %v4280_v44, 16 }
 0x2a6   : > { %v4377_v52 = vrot.slane %v4375_v57, 2  ;;  %v4380_v29 = vrot.slane %v4378_v2, 3  ;;  %v4286_v1 = vrot.slane %v4280_v44, 3 }
 0x2a7   : > { %v4125_v37 = vmax.f32 %v4115_v15, 0.0  ;;  %v4003_v9 = vadd.f32 %v3982_v47, %v3757_v17  ;;  %v9280_v15 = vpop.f32.mrf.mxu3  ;;  %v3759_v47 = vadd.f32 %v3740_v50, %v9195_v11  ;;  %v3602_v50 = vadd.f32 %v9199_v20, %v9197_v22 }
 0x2a8   : > { %v4381_v59 = vor.u32 %v4380_v29, %v4377_v52 }
 0x2a9   : > { %v4195_v48 = vmul.f32 %v4152_v51, %v4125_v37  ;;  %v4517_v51 = vrot.slane %v4515_v41, 3 }
 0x2aa   : > { %v4080_v45 = vpop.f32.mrf.mxu2 }
 0x2ab   : > { %v4208_v19 = vpack.c.bf16 %v4195_v48, %v4195_v48  ;;  %v4102_v36 = vadd.f32 %v4080_v45, %v4003_v9  ;;  %v4520_v48 = vrot.slane %v4518_v30, 4  ;;  %v7506_v9 = vld [vmem:[%s9724_s6 + $0x90] sm:$0xff] }
 0x2ac   : > { %v3983_v53 = vpop.f32.mrf.mxu1  ;;  %v7600_v37 = vld [vmem:[#allocation2 + $0x4] sm:$0xf0]   ;;  %4872 = vmatpush.bf16.msrb.mxu3 %v7506_v9 }
 0x2ad   : > { %4218 = vst.msk [vmem:[#allocation2 + $0xc] sm:$0xf] %vm4204_vm7, %v4208_v19  ;;  %v4116_v6 = vadd.f32 %v9248_v62, %v4102_v36  ;;  %v3984_v63 = vadd.f32 %v3983_v53, %v3949_v3  ;;  %v3289_v3 = vadd.f32 %v9127_v10, %v9134_v23  ;;  %v7572_v11 = vor.u32 %v7600_v37, %v7571_v5  ;;  %v4162_v19 = vpop.permute.xlu1 %4161  ;;  %v3954_v36 = vpop.f32.mrf.mxu0 }
 0x2ae   : > { %v4167_v5 = vpop.permute.xlu2 %4166 }
 0x2af   : > { %v4126_v31 = vmax.f32 %v4116_v6, 0.0  ;;  %v4004_v24 = vadd.f32 %v3984_v63, %v3758_v12  ;;  %v4521_v63 = vor.u32 %v4520_v48, %v4517_v51  ;;  %v4682_v57 = vshll.u32 %v7572_v11, 16 }
 0x2b0   : > { %v3619_v2 = vadd.f32 %v3602_v50, %v3289_v3 }
 0x2b1   : > { %v4196_v35 = vmul.f32 %v4157_v42, %v4126_v31 }
 0x2b2   : > { %v4082_v21 = vpop.f32.mrf.mxu2 }
 0x2b3   : > { %v4209_v14 = vpack.c.bf16 %v4196_v35, %v4196_v35  ;;  %v4103_v17 = vadd.f32 %v4082_v21, %v4004_v24 }
 0x2b4   : > { %v9287_v18 = vld [vmem:[#allocation2 + $0x8] sm:$0xff]  ;;  %v3986_v38 = vpop.f32.mrf.mxu1 }
 0x2b5   : > { %4219 = vst.msk [vmem:[#allocation2 + $0x10] sm:$0xf] %vm4204_vm7, %v4209_v14  ;;  %v4117_v25 = vadd.f32 %v9248_v62, %v4103_v17  ;;  %v4287_v58 = vrot.slane %v9287_v18, 3  ;;  %v4383_v10 = vshrl.u32 %v9287_v18, 16  ;;  %v4386_v23 = vshll.u32 %v9287_v18, 16  ;;  %v3745_v17 = vpop.f32.mrf.mxu3 }
 0x2b6   : > { %v3987_v7 = vadd.f32 %v3986_v38, %v3952_v34  ;;  %v4679_v34 = vshrl.u32 %v7572_v11, 16  ;;  %v2763_v14 = vadd.f32 %v2749_v26, %v8988_v28  ;;  %v3143_v28 = vadd.f32 %v9139_v16, %v9146_v56 }
 0x2b7   : > { %v4127_v45 = vmax.f32 %v4117_v25, 0.0  ;;  %v4288_v55 = vsel %vm3804_vm6, %v4286_v1, %v4287_v58  ;;  %v4385_v42 = vrot.slane %v4383_v10, 2  ;;  %v4388_v6 = vrot.slane %v4386_v23, 3 }
 0x2b8   : > { %v4522_v44 = vrot.slane %v4383_v10, 3  ;;  %v4005_v53 = vadd.f32 %v3987_v7, %v3759_v47  ;;  %6974 = vmatmul.msk.bf16.vlgmr.msra.gmra.mxu3 %vm4321_vm8, %v4288_v55  ;;  %v4523_v22 = vrot.slane %v4386_v23, 4  ;;  %v4681_v3 = vrot.slane %v4679_v34, 3 }
 0x2b9   : > { %v4197_v12 = vmul.f32 %v4162_v19, %v4127_v45  ;;  %v9303_v20 = vor.u32 %v4388_v6, %v4385_v42  ;;  %v4684_v47 = vrot.slane %v4682_v57, 4  ;;  %v3760_v26 = vadd.f32 %v9280_v15, %v3619_v2  ;;  %v3957_v19 = vpop.f32.mrf.mxu0 }
 0x2ba   : > { %v4085_v31 = vpop.f32.mrf.mxu2  ;;  %v9305_v21 = vor.u32 %v4523_v22, %v4522_v44  ;;  %v2862_v11 = vadd.f32 %v9143_v60, %v2763_v14  ;;  %v3607_v44 = vadd.f32 %v9213_v32, %v9211_v27  ;;  %v3761_v57 = vadd.f32 %v3745_v17, %v9207_v54 }
 0x2bb   : > { %v4210_v35 = vpack.c.bf16 %v4197_v12, %v4197_v12  ;;  %v4104_v24 = vadd.f32 %v4085_v31, %v4005_v53  ;;  %v4390_v41 = vsel %vm3333_vm5, %v4381_v59, %v9303_v20  ;;  %v7635_v59 = vld [vmem:[#allocation2 + $0xc] sm:$0xe]  ;;  %v4685_v55 = vor.u32 %v4684_v47, %v4681_v3 }
 0x2bc   : > { %v7602_v30 = vld [vmem:[#allocation2 + $0xc] sm:$0xff]   ;;  %6995 = vmatmul.msk.bf16.vlgmr.msrb.gmra.mxu0 %vm4321_vm8, %v4390_v41  ;;  %v4525_v29 = vsel %vm4513_vm9, %v4521_v63, %v9305_v21  ;;  %v3988_v37 = vpop.f32.mrf.mxu1  ;;  %v3157_v16 = vadd.f32 %v3143_v28, %v2862_v11 }
 0x2bd   : > { %4220 = vst.msk [vmem:[#allocation2 + $0x14] sm:$0xf] %vm4204_vm7, %v4210_v35  ;;  %v4118_v52 = vadd.f32 %v9248_v62, %v4104_v24  ;;  %7024 = vmatmul.msk.bf16.vlgmr.msra.gmra.mxu1 %vm4321_vm8, %v4525_v29  ;;  %v4687_v1 = vshrl.u32 %v7602_v30, 16  ;;  %v4690_v25 = vshll.u32 %v7602_v30, 16  ;;  %v3989_v48 = vadd.f32 %v3988_v37, %v3954_v36  ;;  %v9319_v9 = vld [vmem:[#allocation2 + $0xc] sm:$0xff]   ;;  %v3747_v2 = vpop.f32.mrf.mxu3  ;;  %v4172_v35 = vpop.permute.xlu2 %4171 }
 0x2be   : > { %v7634_v38 = vld [vmem:[#allocation2 + $0xc] sm:$0xf0]  ;;  %v3291_v34 = vadd.f32 %v9148_v13, %v3157_v16  ;;  %v4177_v16 = vpop.permute.xlu0 %4176 }
 0x2bf   : > { %v4128_v51 = vmax.f32 %v4118_v52, 0.0  ;;  %v4689_v10 = vrot.slane %v4687_v1, 3  ;;  %v4692_v23 = vrot.slane %v4690_v25, 4  ;;  %v4006_v45 = vadd.f32 %v3989_v48, %v3760_v26 }
 0x2c0   : > { %v9336_v22 = vor.u32 %v7635_v59, %v7634_v38  ;;  %v3621_v52 = vadd.f32 %v3607_v44, %v3291_v34 }
 0x2c1   : > { %v4198_v50 = vmul.f32 %v4167_v5, %v4128_v51  ;;  %v9322_v42 = vor.u32 %v4692_v23, %v4689_v10  ;;  %v3959_v25 = vpop.f32.mrf.mxu0 }
 0x2c2   : > { %v4087_v7 = vpop.f32.mrf.mxu2  ;;  %v5382_v17 = vshrl.u32 %v9336_v22, 16  ;;  %v5385_v18 = vshll.u32 %v9336_v22, 16  ;;  %v3762_v48 = vadd.f32 %v3747_v2, %v3621_v52 }
 0x2c3   : > { %v4211_v56 = vpack.c.bf16 %v4198_v50, %v4198_v50  ;;  %v4105_v15 = vadd.f32 %v4087_v7, %v4006_v45  ;;  %v4694_v36 = vsel %vm4513_vm9, %v4685_v55, %v9322_v42  ;;  %v3148_v55 = vadd.f32 %v9204_v8, %v9166_v33 }
 0x2c4   : > { %v9326_v6 = vld [vmem:[#allocation2 + $0x10] sm:$0xff]  ;;  %7053 = vmatmul.msk.bf16.vlgmr.msra.gmra.mxu2 %vm4321_vm8, %v4694_v36  ;;  %v3991_v12 = vpop.f32.mrf.mxu1  ;;  %v5384_v50 = vrot.slane %v5382_v17, 1 }
 0x2c5   : > { %4221 = vst.msk [vmem:[#allocation2 + $0x18] sm:$0xf] %vm4204_vm7, %v4211_v56  ;;  %v4119_v60 = vadd.f32 %v9248_v62, %v4105_v15  ;;  %v4289_v53 = vrot.slane %v9326_v6, 3  ;;  %v4392_v31 = vshrl.u32 %v9326_v6, 16  ;;  %v4395_v63 = vshll.u32 %v9326_v6, 16  ;;  %v3750_v34 = vpop.f32.mrf.mxu3 }
 0x2c6   : > { %v3992_v32 = vadd.f32 %v3991_v12, %v3957_v19  ;;  %v5387_v19 = vrot.slane %v5385_v18, 2 }
 0x2c7   : > { %v4129_v27 = vmax.f32 %v4119_v60, 0.0  ;;  %v4290_v24 = vsel %vm3804_vm6, %v4287_v58, %v4289_v53  ;;  %v4394_v41 = vrot.slane %v4392_v31, 2  ;;  %v4397_v30 = vrot.slane %v4395_v63, 3 }
 0x2c8   : > { %v4526_v14 = vrot.slane %v4392_v31, 3  ;;  %v4007_v5 = vadd.f32 %v3992_v32, %v3761_v57  ;;  %6975 = vmatmul.msk.bf16.gmra.mxu3 %vm4321_vm8, %v4290_v24  ;;  %v4527_v13 = vrot.slane %v4395_v63, 4  ;;  %v2754_v58 = vadd.f32 %v9031_v4, %v9013_v49  ;;  %v7505_v49 = vld [vmem:[%s9724_s6 + $0x88] sm:$0xff] }
 0x2c9   : > { %v4199_v29 = vmul.f32 %v4172_v35, %v4129_v27  ;;  %v9346_v54 = vor.u32 %v4397_v30, %v4394_v41  ;;  %4873 = vmatpush.bf16.msrb.mxu3 %v7505_v49  ;;  %v5388_v33 = vor.u32 %v5387_v19, %v5384_v50  ;;  %v3962_v32 = vpop.f32.mrf.mxu0  ;;  %v7504_v41 = vld [vmem:[%s9724_s6 + $0x80] sm:$0xff] }
 0x2ca   : > { %v4090_v37 = vpop.f32.mrf.mxu2  ;;  %v9349_v1 = vor.u32 %v4527_v13, %v4526_v14 }
 0x2cb   : > { %v4212_v3 = vpack.c.bf16 %v4199_v29, %v4199_v29  ;;  %v4106_v47 = vadd.f32 %v4090_v37, %v4007_v5  ;;  %v4399_v28 = vsel %vm3333_vm5, %v9303_v20, %v9346_v54  ;;  %v3763_v5 = vadd.f32 %v3750_v34, %v9215_v61 }
 0x2cc   : > { %v7604_v26 = vld [vmem:[#allocation2 + $0x14] sm:$0xff]   ;;  %6996 = vmatmul.msk.bf16.gmra.mxu0 %vm4321_vm8, %v4399_v28  ;;  %v4529_v10 = vsel %vm4513_vm9, %v9305_v21, %v9349_v1  ;;  %v3993_v4 = vpop.f32.mrf.mxu1  ;;  %v2765_v21 = vadd.f32 %v2754_v58, %v9044_v46  ;;  %v3612_v37 = vadd.f32 %v9228_v43, %v9226_v40 }
 0x2cd   : > { %v9357_v51 = vld [vmem:[#allocation2 + $0x14] sm:$0xff]  ;;  %4222 = vst.msk [vmem:[#allocation2 + $0x1c] sm:$0xf] %vm4204_vm7, %v4212_v3  ;;  %v4120_v38 = vadd.f32 %v9248_v62, %v4106_v47  ;;  %7025 = vmatmul.msk.bf16.gmra.mxu1 %vm4321_vm8, %v4529_v10  ;;  %v4696_v20 = vshrl.u32 %v7604_v26, 16  ;;  %v4699_v23 = vshll.u32 %v7604_v26, 16  ;;  %v3994_v7 = vadd.f32 %v3993_v4, %v3959_v25  ;;  %4874 = vmatpush.bf16.msrb.mxu3 %v7504_v41  ;;  %v4182_v3 = vpop.permute.xlu1 %4181  ;;  %v3752_v6 = vpop.f32.mrf.mxu3 }
 0x2ce   : > { %v5142_v11 = vshll.u32 %v9357_v51, 16  ;;  %v5146_v59 = vshrl.u32 %v9357_v51, 16  ;;  %v2864_v63 = vadd.f32 %v9160_v0, %v2765_v21 }
 0x2cf   : > { %v4130_v45 = vmax.f32 %v4120_v38, 0.0  ;;  %v4698_v56 = vrot.slane %v4696_v20, 3  ;;  %v4701_v15 = vrot.slane %v4699_v23, 4  ;;  %v4008_v44 = vadd.f32 %v3994_v7, %v3762_v48 }
 0x2d0   : > { %v5389_v12 = vrot.slane %v5146_v59, 1  ;;  %v5390_v31 = vrot.slane %v5142_v11, 2  ;;  %v3159_v24 = vadd.f32 %v3148_v55, %v2864_v63 }
 0x2d1   : > { %v4200_v36 = vmul.f32 %v4177_v16, %v4130_v45  ;;  %v9379_v57 = vor.u32 %v4701_v15, %v4698_v56  ;;  %v7516_v45 = vld [vmem:[%s9724_s6 + $0xb8] sm:$0xff]  ;;  %v3964_v7 = vpop.f32.mrf.mxu0 }
 0x2d2   : > { %v4092_v60 = vpop.f32.mrf.mxu2  ;;  %v9381_v8 = vor.u32 %v5390_v31, %v5389_v12  ;;  %v3293_v28 = vadd.f32 %v9209_v39, %v3159_v24  ;;  %5046 = vmatpush.bf16.msra.mxu0 %v7516_v45  ;;  %v4187_v12 = vpop.permute.xlu2 %4186 }
 0x2d3   : > { %v4213_v46 = vpack.c.bf16 %v4200_v36, %v4200_v36  ;;  %v4107_v27 = vadd.f32 %v4092_v60, %v4008_v44  ;;  %v4703_v2 = vsel %vm4513_vm9, %v9322_v42, %v9379_v57  ;;  %v7523_v44 = vld [vmem:[%s9724_s6 + $0xd0] sm:$0xff] }
 0x2d4   : > { %v9386_v35 = vld [vmem:[#allocation2 + $0x18] sm:$0xff]  ;;  %7054 = vmatmul.msk.bf16.gmra.mxu2 %vm4321_vm8, %v4703_v2  ;;  %v9396_v30 = vsel %vm2088_vm3, %v5388_v33, %v9381_v8  ;;  %v3996_v14 = vpop.f32.mrf.mxu1  ;;  %v3623_v38 = vadd.f32 %v3612_v37, %v3293_v28  ;;  %v7522_v37 = vld [vmem:[%s9724_s6 + $0xc8] sm:$0xff] }
 0x2d5   : > { %4223 = vst.msk [vmem:[#allocation2 + $0x20] sm:$0xf] %vm4204_vm7, %v4213_v46  ;;  %v4121_v0 = vadd.f32 %v9248_v62, %v4107_v27  ;;  %v4291_v42 = vrot.slane %v9386_v35, 3  ;;  %v4401_v52 = vshrl.u32 %v9386_v35, 16  ;;  %v4404_v29 = vshll.u32 %v9386_v35, 16  ;;  %v7521_v35 = vld [vmem:[%s9724_s6 + $0xc0] sm:$0xff] }
 0x2d6   : > { %v3997_v17 = vadd.f32 %v3996_v14, %v3962_v32  ;;  %v3764_v56 = vadd.f32 %v3752_v6, %v3623_v38  ;;  %v7527_v38 = vld [vmem:[%s9724_s6 + $0xf0] sm:$0xff] }
 0x2d7   : > { %v4131_v13 = vmax.f32 %v4121_v0, 0.0  ;;  %v4292_v47 = vsel %vm3804_vm6, %v4289_v53, %v4291_v42  ;;  %v4403_v18 = vrot.slane %v4401_v52, 2  ;;  %v4406_v58 = vrot.slane %v4404_v29, 3 }
 0x2d8   : > { %v4530_v25 = vrot.slane %v4401_v52, 3  ;;  %v4009_v61 = vadd.f32 %v3997_v17, %v3763_v5  ;;  %6976 = vmatmul.msk.bf16.gmra.mxu3 %vm4321_vm8, %v4292_v47  ;;  %v4531_v40 = vrot.slane %v4404_v29, 4  ;;  %v7514_v5 = vld [vmem:[%s9724_s6 + $0xa8] sm:$0xff] }
 0x2d9   : > { %v4201_v26 = vmul.f32 %v4182_v3, %v4131_v13  ;;  %v9411_v43 = vor.u32 %v4406_v58, %v4403_v18  ;;  %v4192_v18 = vpop.permute.xlu0 %4191 }
 0x2da   : > { %v4095_v48 = vpop.f32.mrf.mxu2  ;;  %v9413_v4 = vor.u32 %v4531_v40, %v4530_v25  ;;  %v7513_v40 = vld [vmem:[%s9724_s6 + $0xa0] sm:$0xff] }
 0x2db   : > { %v4214_v10 = vpack.c.bf16 %v4201_v26, %v4201_v26  ;;  %v4108_v49 = vadd.f32 %v4095_v48, %v4009_v61  ;;  %v4408_v53 = vsel %vm3333_vm5, %v9346_v54, %v9411_v43  ;;  %v7524_v54 = vld [vmem:[%s9724_s6 + $0xd8] sm:$0xff] }
 0x2dc   : > { %v7606_v20 = vld [vmem:[#allocation2 + $0x1c] sm:$0xff]   ;;  %6997 = vmatmul.msk.bf16.gmra.mxu0 %vm4321_vm8, %v4408_v53  ;;  %v4533_v50 = vsel %vm4513_vm9, %v9349_v1, %v9413_v4  ;;  %v3998_v19 = vpop.f32.mrf.mxu1  ;;  %5221 = vmatpush.bf16.msrb.mxu1 %v7524_v54  ;;  %v7515_v1 = vld [vmem:[%s9724_s6 + $0xb0] sm:$0xff] }
 0x2dd   : > { %v9418_v39 = vld [vmem:[#allocation2 + $0x1c] sm:$0xff]  ;;  %4224 = vst.msk [vmem:[#allocation2 + $0x24] sm:$0xf] %vm4204_vm7, %v4214_v10  ;;  %v4122_v23 = vadd.f32 %v9248_v62, %v4108_v49  ;;  %7026 = vmatmul.msk.bf16.gmra.mxu1 %vm4321_vm8, %v4533_v50  ;;  %v4705_v21 = vshrl.u32 %v7606_v20, 16  ;;  %v4708_v55 = vshll.u32 %v7606_v20, 16  ;;  %v3999_v36 = vadd.f32 %v3998_v19, %v3964_v7  ;;  %5047 = vmatpush.bf16.msra.mxu0 %v7515_v1  ;;  %v7526_v7 = vld [vmem:[%s9724_s6 + $0xe8] sm:$0xff] }
 0x2de   : > { %v5150_v16 = vshll.u32 %v9418_v39, 16  ;;  %v5154_v60 = vshrl.u32 %v9418_v39, 16 }
 0x2df   : > { %v4132_v15 = vmax.f32 %v4122_v23, 0.0  ;;  %v4707_v31 = vrot.slane %v4705_v21, 3  ;;  %v4710_v63 = vrot.slane %v4708_v55, 4  ;;  %v4010_v46 = vadd.f32 %v3999_v36, %v3764_v56 }
 0x2e0   : > { %v5393_v33 = vrot.slane %v5154_v60, 1  ;;  %v5394_v2 = vrot.slane %v5150_v16, 2  ;;  %5222 = vmatpush.bf16.msrb.mxu1 %v7523_v44 }
 0x2e1   : > { %v4202_v34 = vmul.f32 %v4187_v12, %v4132_v15  ;;  %v9443_v32 = vor.u32 %v4710_v63, %v4707_v31  ;;  %5048 = vmatpush.bf16.msra.mxu0 %v7514_v5 }
 0x2e2   : > { %v4097_v27 = vpop.f32.mrf.mxu2  ;;  %v9452_v52 = vor.u32 %v5394_v2, %v5393_v33 }
 0x2e3   : > { %v4215_v24 = vpack.c.bf16 %v4202_v34, %v4202_v34  ;;  %v4109_v0 = vadd.f32 %v4097_v27, %v4010_v46  ;;  %v4712_v41 = vsel %vm4513_vm9, %v9379_v57, %v9443_v32  ;;  %v7528_v57 = vld [vmem:[%s9724_s6 + $0xf8] sm:$0xff] }
 0x2e4   : > { %v9450_v14 = vld [vmem:[#allocation2 + $0x20] sm:$0xff]  ;;  %7055 = vmatmul.msk.bf16.gmra.mxu2 %vm4321_vm8, %v4712_v41  ;;  %5223 = vmatpush.bf16.msrb.mxu1 %v7522_v37  ;;  %v9472_v47 = vsel %vm2088_vm3, %v9381_v8, %v9452_v52  ;;  %v7532_v8 = vld [vmem:[%s9724_s6 + $0x118] sm:$0xff] }
 0x2e5   : > { %4225 = vst.msk [vmem:[#allocation2 + $0x28] sm:$0xf] %vm4204_vm7, %v4215_v24  ;;  %v4123_v29 = vadd.f32 %v9248_v62, %v4109_v0  ;;  %v4293_v13 = vrot.slane %v9450_v14, 3  ;;  %v4410_v17 = vshrl.u32 %v9450_v14, 16  ;;  %v4413_v62 = vshll.u32 %v9450_v14, 16  ;;  %5328 = vmatpush.bf16.msrb.mxu2 %v7528_v57  ;;  %5457 = vmatpush.bf16.msra.mxu3 %v7532_v8 }
 0x2e6   : > { %5049 = vmatpush.bf16.msra.mxu0 %v7513_v40 }
 0x2e7   : > { %v4133_v3 = vmax.f32 %v4123_v29, 0.0  ;;  %v4294_v58 = vsel %vm3804_vm6, %v4291_v42, %v4293_v13  ;;  %v4412_v25 = vrot.slane %v4410_v17, 2  ;;  %v4415_v28 = vrot.slane %v4413_v62, 3 }
 0x2e8   : > { %v4534_v26 = vrot.slane %v4410_v17, 3  ;;  %6977 = vmatmul.msk.bf16.gmra.mxu3 %vm4321_vm8, %v4294_v58  ;;  %v4535_v48 = vrot.slane %v4413_v62, 4  ;;  %5224 = vmatpush.bf16.msrb.mxu1 %v7521_v35 }
 0x2e9   : > { %v4203_v61 = vmul.f32 %v4192_v18, %v4133_v3  ;;  %v4416_v42 = vor.u32 %v4415_v28, %v4412_v25  ;;  %5329 = vmatpush.bf16.msrb.mxu2 %v7527_v38 }
 0x2ea   : > { %v9492_v49 = vor.u32 %v4535_v48, %v4534_v26 }
 0x2eb   : > { %v4216_v10 = vpack.c.bf16 %v4203_v61, %v4203_v61  ;;  %v4417_v6 = vsel %vm3333_vm5, %v9411_v43, %v4416_v42 }
 0x2ec   : > { %v7607_v53 = vld [vmem:[#allocation2 + $0x24] sm:$0xff]   ;;  %6998 = vmatmul.msk.bf16.gmra.mxu0 %vm4321_vm8, %v4417_v6  ;;  %v4537_v50 = vsel %vm4513_vm9, %v9413_v4, %v9492_v49 }
 0x2ed   : > { %v4239_v20 = vld [vmem:[#allocation2 + $0x28] sm:$0x7]  ;;  %4226 = vst.msk [vmem:[#allocation2 + $0x2c] sm:$0xf] %vm4204_vm7, %v4216_v10  ;;  %7027 = vmatmul.msk.bf16.gmra.mxu1 %vm4321_vm8, %v4537_v50  ;;  %v4714_v19 = vshrl.u32 %v7607_v53, 16  ;;  %v4717_v21 = vshll.u32 %v7607_v53, 16  ;;  %5330 = vmatpush.bf16.msrb.mxu2 %v7526_v7 }
 0x2ee   : > { %v4500_v23 = vld [vmem:[#allocation2 + $0x28] sm:$0xf]  ;;  %v4279_v45 = vunpack.c.l.b16 %v4239_v20  ;;  %v7525_v4 = vld [vmem:[%s9724_s6 + $0xe0] sm:$0xff]  ;;  %v7509_v53 = vld [vmem:[#allocation2 + $0x10] sm:$0xff]  ;;  %v5137_v50 = vshll.u32 %v9319_v9, 16 }
 0x2ef   : > { %v4511_v54 = vunpack.c.l.b16 %v4500_v23  ;;  %v9504_v43 = vld [vmem:[#allocation2 + $0x24] sm:$0xff]  ;;  %v4716_v15 = vrot.slane %v4714_v19, 3  ;;  %v4719_v36 = vrot.slane %v4717_v21, 4 }
 0x2f0   : > { %v4285_v55 = vpack.c.b16 %v4279_v45, %v4279_v45  ;;  %v5158_v1 = vshll.u32 %v9504_v43, 16  ;;  %v5162_v63 = vshrl.u32 %v9504_v43, 16  ;;  %v7508_v10 = vld [vmem:[#allocation2 + $0x8] sm:$0xff]  ;;  %v4967_v45 = vshll.u32 %v7509_v53, 16 }
 0x2f1   : > { %v4512_v56 = vpack.c.b16 %v4511_v54, %v4511_v54  ;;  %v4720_v34 = vor.u32 %v4719_v36, %v4716_v15  ;;  %5331 = vmatpush.bf16.msrb.mxu2 %v7525_v4  ;;  %v4962_v23 = vshll.u32 %v7508_v10, 16  ;;  %v5139_v7 = vrot.slane %v5137_v50, 1  ;;  %v7564_v19 = vld [vmem:[#allocation2 + $0x8] sm:$0xff]  }
 0x2f2   : > { %v4419_v44 = vshrl.u32 %v4285_v55, 16  ;;  %v4422_v12 = vshll.u32 %v4285_v55, 16  ;;  %v4295_v27 = vrot.slane %v4285_v55, 3  ;;  %v5397_v57 = vrot.slane %v5162_v63, 1 }
 0x2f3   : > { %v4539_v31 = vshrl.u32 %v4512_v56, 16  ;;  %v4542_v46 = vshll.u32 %v4512_v56, 16  ;;  %v4721_v33 = vsel %vm4513_vm9, %v9443_v32, %v4720_v34  ;;  %v5398_v17 = vrot.slane %v5158_v1, 2 }
 0x2f4   : > { %v4421_v2 = vrot.slane %v4419_v44, 2  ;;  %v4424_v24 = vrot.slane %v4422_v12, 3  ;;  %v9514_v41 = vld [vmem:[#allocation2 + $0x28] sm:$0xff]   ;;  %7056 = vmatmul.msk.bf16.gmra.mxu2 %vm4321_vm8, %v4721_v33  ;;  %v4296_v3 = vsel %vm3804_vm6, %v4293_v13, %v4295_v27  ;;  %v4964_v54 = vrot.slane %v4962_v23, 1  ;;  %v7565_v33 = vld [vmem:[#allocation2 + $0x10] sm:$0xff]  }
 0x2f5   : > { %v4541_v0 = vrot.slane %v4539_v31, 3  ;;  %v9516_v29 = vld [vmem:[#allocation2 + $0x2c] sm:$0xff]  ;;  %v4544_v5 = vrot.slane %v4542_v46, 4  ;;  %v7560_v37 = vunpack.c.h.b16 %v9514_v41  ;;  %v5399_v61 = vor.u32 %v5398_v17, %v5397_v57 }
 0x2f6   : > { %v5170_v62 = vshrl.u32 %v9516_v29, 16  ;;  %v4425_v18 = vor.u32 %v4424_v24, %v4421_v2  ;;  %v5166_v58 = vshll.u32 %v9516_v29, 16  ;;  %v4960_v21 = vshrl.u32 %v7508_v10, 16  ;;  %v7530_v31 = vld [vmem:[%s9724_s6 + $0x108] sm:$0xff] }
 0x2f7   : > { %v4677_v32 = vpack.c.b16 %v7560_v37, %v7560_v37  ;;  %v4545_v25 = vor.u32 %v4544_v5, %v4541_v0  ;;  %v9532_v48 = vsel %vm2088_vm3, %v9452_v52, %v5399_v61  ;;  %v7531_v52 = vld [vmem:[%s9724_s6 + $0x110] sm:$0xff]  ;;  %v4969_v55 = vrot.slane %v4967_v45, 1 }
 0x2f8   : > { %6978 = vmatmul.msk.bf16.gmra.mxu3 %vm4321_vm8, %v4296_v3  ;;  %v5401_v8 = vrot.slane %v5170_v62, 1  ;;  %v4426_v14 = vsel %vm3333_vm5, %v4416_v42, %v4425_v18  ;;  %v5402_v35 = vrot.slane %v5166_v58, 2  ;;  %v5135_v56 = vshrl.u32 %v9319_v9, 16  ;;  %v7510_v9 = vld [vmem:[#allocation2 + $0x18] sm:$0xff] }
 0x2f9   : > { %v4723_v28 = vshrl.u32 %v4677_v32, 16  ;;  %v4726_v26 = vshll.u32 %v4677_v32, 16  ;;  %v4546_v38 = vsel %vm4513_vm9, %v9492_v49, %v4545_v25  ;;  %5458 = vmatpush.bf16.msra.mxu3 %v7531_v52  ;;  %v5144_v15 = vrot.slane %v5142_v11, 1  ;;  %v7511_v32 = vld [vmem:[#allocation2 + $0x20] sm:$0xff]  ;;  %v4921_v52 = vld [vmem:[#allocation2 + $0x30] sm:$0x1] }
 0x2fa   : > { %v9546_v6 = vor.u32 %v5402_v35, %v5401_v8  ;;  %v4965_v36 = vor.u32 %v4964_v54, %v4960_v21  ;;  %v5140_v4 = vor.u32 %v5139_v7, %v5135_v56  ;;  %v5274_v11 = vrot.slane %v9336_v22, 1  ;;  %v5096_v7 = vld [vmem:[#allocation2 + $0x34] sm:$0x1] }
 0x2fb   : > { %v4725_v40 = vrot.slane %v4723_v28, 3  ;;  %v4728_v13 = vrot.slane %v4726_v26, 4  ;;  %v4975_v27 = vshll.u32 %v7510_v9, 16  ;;  %v4971_v2 = vshrl.u32 %v7509_v53, 16 }
 0x2fc   : > { %6999 = vmatmul.msk.bf16.gmra.mxu0 %vm4321_vm8, %v4426_v14  ;;  %v9550_v20 = vsel %vm2088_vm3, %v5399_v61, %v9546_v6  ;;  %v4970_v44 = vsel %vm835_vm1, %v4965_v36, %v4969_v55  ;;  %v5145_v12 = vsel %vm835_vm1, %v5140_v4, %v5144_v15  ;;  %v5152_v0 = vrot.slane %v5150_v16, 1 }
 0x2fd   : > { %7028 = vmatmul.msk.bf16.gmra.mxu1 %vm4321_vm8, %v4546_v38  ;;  %v4729_v42 = vor.u32 %v4728_v13, %v4725_v40  ;;  %5459 = vmatpush.bf16.msra.mxu3 %v7530_v31  ;;  %v4977_v24 = vrot.slane %v4975_v27, 1  ;;  %v4973_v5 = vor.u32 %v4971_v2, %v4969_v55  ;;  %v5148_v37 = vor.u32 %v5146_v59, %v5144_v15  ;;  %v7566_v59 = vld [vmem:[#allocation2 + $0x18] sm:$0xff]   ;;  %v7512_v13 = vld [vmem:[#allocation2 + $0x28] sm:$0xff] }
 0x2fe   : > { %v5277_v17 = vrot.slane %v9418_v39, 1  ;;  %v4983_v18 = vshll.u32 %v7511_v32, 16  ;;  %v4979_v16 = vshrl.u32 %v7510_v9, 16  ;;  %v5160_v28 = vrot.slane %v5158_v1, 1  ;;  %v7567_v1 = vld [vmem:[#allocation2 + $0x20] sm:$0xff]  }
 0x2ff   : > { %v4730_v49 = vsel %vm4513_vm9, %v4720_v34, %v4729_v42  ;;  %v5275_v34 = vrot.slane %v9357_v51, 1  ;;  %v4978_v57 = vsel %vm835_vm1, %v4973_v5, %v4977_v24  ;;  %v5153_v22 = vsel %vm835_vm1, %v5148_v37, %v5152_v0  ;;  %v7529_v51 = vld [vmem:[%s9724_s6 + $0x100] sm:$0xff] }
 0x300   : > { %v4985_v25 = vrot.slane %v4983_v18, 1  ;;  %v4981_v26 = vor.u32 %v4979_v16, %v4977_v24  ;;  %v5156_v61 = vor.u32 %v5154_v60, %v5152_v0  ;;  %v5279_v40 = vrot.slane %v9504_v43, 1 }
 0x301   : > { %v5276_v46 = vsel %vm1314_vm2, %v5274_v11, %v5275_v34  ;;  %v5278_v3 = vsel %vm1314_vm2, %v5275_v34, %v5277_v17  ;;  %5460 = vmatpush.bf16.msra.mxu3 %v7529_v51  ;;  %v4991_v38 = vshll.u32 %v7512_v13, 16  ;;  %v4987_v10 = vshrl.u32 %v7511_v32, 16 }
 0x302   : > { %v4986_v8 = vsel %vm835_vm1, %v4981_v26, %v4985_v25  ;;  %v5161_v14 = vsel %vm835_vm1, %v5156_v61, %v5160_v28  ;;  %v5280_v35 = vsel %vm1314_vm2, %v5277_v17, %v5279_v40  ;;  %v5168_v60 = vrot.slane %v5166_v58, 1 }
 0x303   : > { %v4993_v39 = vrot.slane %v4991_v38, 1  ;;  %v4989_v53 = vor.u32 %v4987_v10, %v4985_v25  ;;  %v5164_v50 = vor.u32 %v5162_v63, %v5160_v28  ;;  %v4952_v54 = vunpack.c.l.b16 %v4921_v52 }
 0x304   : > { %7057 = vmatmul.msk.bf16.gmra.mxu2 %vm4321_vm8, %v4730_v49  ;;  %v5127_v55 = vunpack.c.l.b16 %v5096_v7  ;;  %v5281_v56 = vrot.slane %v9516_v29, 1  ;;  %v4995_v9 = vshrl.u32 %v7512_v13, 16  ;;  %v5172_v24 = vor.u32 %v5170_v62, %v5168_v60 }
 0x305   : > { %v4994_v45 = vsel %vm835_vm1, %v4989_v53, %v4993_v39  ;;  %v5169_v21 = vsel %vm835_vm1, %v5164_v50, %v5168_v60  ;;  %v4958_v15 = vpack.c.b16 %v4952_v54, %v4952_v54 }
 0x306   : > { %v5133_v63 = vpack.c.b16 %v5127_v55, %v5127_v55  ;;  %v4997_v27 = vor.u32 %v4995_v9, %v4993_v39 }
 0x308   : > { %7082 = vmatmul.msk.bf16.vlgmr.msrb.gmra.mxu3 %vm4321_vm8, %v7564_v19  ;;  %v5174_v34 = vshll.u32 %v5133_v63, 16  ;;  %v5283_v51 = vrot.slane %v5133_v63, 1 }
 0x30a   : > { %v5176_v0 = vrot.slane %v5174_v34, 1  ;;  %v5284_v16 = vsel %vm1314_vm2, %v5281_v56, %v5283_v51 }
 0x30c   : > { %7131 = vmatmul.msk.bf16.vlgmr.msra.gmra.mxu0 %vm4321_vm8, %v4970_v44  ;;  %v5282_v44 = vsel %vm1314_vm2, %v5279_v40, %v5281_v56  ;;  %v5177_v32 = vsel %vm835_vm1, %v5172_v24, %v5176_v0 }
 0x30d   : > { %7176 = vmatmul.msk.bf16.vlgmr.msrb.gmra.mxu1 %vm4321_vm8, %v5145_v12  ;;  %v4999_v12 = vshll.u32 %v4958_v15, 16 }
 0x314   : > { %7205 = vmatmul.msk.bf16.vlgmr.msrb.gmra.mxu2 %vm4321_vm8, %v5276_v46 }
 0x318   : > { %7083 = vmatmul.msk.bf16.gmra.mxu3 %vm4321_vm8, %v7565_v33  ;;  %v5001_v33 = vrot.slane %v4999_v12, 1 }
 0x31c   : > { %7132 = vmatmul.msk.bf16.gmra.mxu0 %vm4321_vm8, %v4978_v57 }
 0x31d   : > { %7177 = vmatmul.msk.bf16.gmra.mxu1 %vm4321_vm8, %v5153_v22  ;;  %v5002_v22 = vsel %vm835_vm1, %v4997_v27, %v5001_v33 }
 0x324   : > { %7206 = vmatmul.msk.bf16.gmra.mxu2 %vm4321_vm8, %v5278_v3 }
 0x328   : > { %7084 = vmatmul.msk.bf16.gmra.mxu3 %vm4321_vm8, %v7566_v59 }
 0x32c   : > { %7133 = vmatmul.msk.bf16.gmra.mxu0 %vm4321_vm8, %v4986_v8 }
 0x32d   : > { %7178 = vmatmul.msk.bf16.gmra.mxu1 %vm4321_vm8, %v5161_v14 }
 0x334   : > { %7207 = vmatmul.msk.bf16.gmra.mxu2 %vm4321_vm8, %v5280_v35 }
 0x338   : > { %7085 = vmatmul.msk.bf16.gmra.mxu3 %vm4321_vm8, %v7567_v1 }
 0x339   : > { %v4475_v42 = vpop.f32.mrf.mxu0 }
 0x33a   : > { %v4595_v23 = vpop.f32.mrf.mxu1 }
 0x33b   : > { %v4346_v49 = vpop.f32.mrf.mxu3 }
 0x33c   : > { %v4476_v19 = vadd.f32 %v4475_v42, %v4346_v49  ;;  %7134 = vmatmul.msk.bf16.gmra.mxu0 %vm4321_vm8, %v4994_v45 }
 0x33d   : > { %7179 = vmatmul.msk.bf16.gmra.mxu1 %vm4321_vm8, %v5169_v21 }
 0x33e   : > { %v4620_v58 = vadd.f32 %v4595_v23, %v4476_v19 }
 0x341   : > { %v4477_v36 = vpop.f32.mrf.mxu0 }
 0x342   : > { %v4597_v43 = vpop.f32.mrf.mxu1 }
 0x343   : > { %v4348_v4 = vpop.f32.mrf.mxu3 }
 0x344   : > { %v4478_v31 = vadd.f32 %v4477_v36, %v4348_v4  ;;  %7208 = vmatmul.msk.bf16.gmra.mxu2 %vm4321_vm8, %v5282_v44 }
 0x346   : > { %v4621_v11 = vadd.f32 %v4597_v43, %v4478_v31  ;;  %v7536_v31 = vld [vmem:[%s9726_s8 + $0x18] sm:$0xff] }
 0x347   : > { %v4779_v46 = vpop.f32.mrf.mxu2  ;;  %5581 = vmatpush.bf16.msrb.mxu0 %v7536_v31 }
 0x348   : > { %v9609_v2 = vadd.f32 %v4779_v46, %v4620_v58  ;;  %7086 = vmatmul.msk.bf16.gmra.mxu3 %vm4321_vm8, %v9514_v41 }
 0x349   : > { %v4480_v5 = vpop.f32.mrf.mxu0 }
 0x34a   : > { %v4600_v37 = vpop.f32.mrf.mxu1 }
 0x34b   : > { %v4351_v57 = vpop.f32.mrf.mxu3 }
 0x34c   : > { %v4481_v17 = vadd.f32 %v4480_v5, %v4351_v57  ;;  %7135 = vmatmul.msk.bf16.gmra.mxu0 %vm4321_vm8, %v5002_v22 }
 0x34d   : > { %7180 = vmatmul.msk.bf16.gmra.mxu1 %vm4321_vm8, %v5177_v32 }
 0x34e   : > { %v4622_v3 = vadd.f32 %v4600_v37, %v4481_v17 }
 0x34f   : > { %v4781_v18 = vpop.f32.mrf.mxu2 }
 0x350   : > { %v9619_v41 = vadd.f32 %v4781_v18, %v4621_v11  ;;  %v5368_v11 = vld [vmem:[#allocation2 + $0x34] sm:$0x3] }
 0x351   : > { %v4482_v29 = vpop.f32.mrf.mxu0  ;;  %v5379_v33 = vunpack.c.l.b16 %v5368_v11 }
 0x352   : > { %v4602_v62 = vpop.f32.mrf.mxu1 }
 0x353   : > { %v4353_v59 = vpop.f32.mrf.mxu3  ;;  %v5380_v37 = vpack.c.b16 %v5379_v33, %v5379_v33 }
 0x354   : > { %v4483_v25 = vadd.f32 %v4482_v29, %v4353_v59  ;;  %7209 = vmatmul.msk.bf16.gmra.mxu2 %vm4321_vm8, %v5284_v16  ;;  %v7535_v59 = vld [vmem:[%s9726_s8 + $0x10] sm:$0xff] }
 0x355   : > { %v5406_v17 = vshrl.u32 %v5380_v37, 16  ;;  %v5409_v32 = vshll.u32 %v5380_v37, 16  ;;  %5582 = vmatpush.bf16.msrb.mxu0 %v7535_v59 }
 0x356   : > { %v4623_v28 = vadd.f32 %v4602_v62, %v4483_v25 }
 0x357   : > { %v4784_v26 = vpop.f32.mrf.mxu2  ;;  %v5408_v51 = vrot.slane %v5406_v17, 1  ;;  %v5411_v29 = vrot.slane %v5409_v32, 2 }
 0x358   : > { %v9623_v61 = vadd.f32 %v4784_v26, %v4622_v3  ;;  %7234 = vmatmul.msk.bf16.vlgmr.msra.gmra.mxu3 %vm4321_vm8, %v9396_v30 }
 0x359   : > { %v4485_v8 = vpop.f32.mrf.mxu0  ;;  %v5412_v25 = vor.u32 %v5411_v29, %v5408_v51 }
 0x35a   : > { %v4605_v14 = vpop.f32.mrf.mxu1 }
 0x35b   : > { %v4356_v40 = vpop.f32.mrf.mxu3 }
 0x35c   : > { %v4486_v13 = vadd.f32 %v4485_v8, %v4356_v40  ;;  %v7534_v40 = vld [vmem:[%s9726_s8 + $0x8] sm:$0xff] }
 0x35d   : > { %5583 = vmatpush.bf16.msrb.mxu0 %v7534_v40 }
 0x35e   : > { %v4624_v35 = vadd.f32 %v4605_v14, %v4486_v13 }
 0x35f   : > { %v4786_v38 = vpop.f32.mrf.mxu2 }
 0x360   : > { %v4807_v1 = vadd.f32 %v4786_v38, %v4623_v28 }
 0x361   : > { %v4487_v10 = vpop.f32.mrf.mxu0 }
 0x362   : > { %v4607_v39 = vpop.f32.mrf.mxu1 }
 0x363   : > { %v4358_v60 = vpop.f32.mrf.mxu3 }
 0x364   : > { %v4488_v52 = vadd.f32 %v4487_v10, %v4358_v60 }
 0x366   : > { %v4625_v42 = vadd.f32 %v4607_v39, %v4488_v52 }
 0x367   : > { %v4789_v53 = vpop.f32.mrf.mxu2 }
 0x368   : > { %v4808_v23 = vadd.f32 %v4789_v53, %v4624_v35  ;;  %7235 = vmatmul.msk.bf16.gmra.mxu3 %vm4321_vm8, %v9472_v47 }
 0x369   : > { %v4490_v50 = vpop.f32.mrf.mxu0 }
 0x36a   : > { %v4610_v49 = vpop.f32.mrf.mxu1 }
 0x36b   : > { %v4361_v30 = vpop.f32.mrf.mxu3 }
 0x36c   : > { %v4491_v45 = vadd.f32 %v4490_v50, %v4361_v30 }
 0x36e   : > { %v4626_v54 = vadd.f32 %v4610_v49, %v4491_v45 }
 0x36f   : > { %v4791_v7 = vpop.f32.mrf.mxu2 }
 0x370   : > { %v4809_v19 = vadd.f32 %v4791_v7, %v4625_v42 }
 0x371   : > { %v4492_v21 = vpop.f32.mrf.mxu0 }
 0x372   : > { %v4612_v58 = vpop.f32.mrf.mxu1 }
 0x373   : > { %v4363_v55 = vpop.f32.mrf.mxu3 }
 0x374   : > { %v4493_v56 = vadd.f32 %v4492_v21, %v4363_v55 }
 0x376   : > { %v4627_v15 = vadd.f32 %v4612_v58, %v4493_v56 }
 0x377   : > { %v4794_v36 = vpop.f32.mrf.mxu2 }
 0x378   : > { %v4810_v43 = vadd.f32 %v4794_v36, %v4626_v54  ;;  %7236 = vmatmul.msk.bf16.gmra.mxu3 %vm4321_vm8, %v9532_v48 }
 0x379   : > { %v4495_v63 = vpop.f32.mrf.mxu0 }
 0x37a   : > { %v4615_v4 = vpop.f32.mrf.mxu1 }
 0x37b   : > { %v4366_v47 = vpop.f32.mrf.mxu3 }
 0x37c   : > { %v4496_v44 = vadd.f32 %v4495_v63, %v4366_v47  ;;  %v9664_v47 = vld [vmem:[%s9725_s7] ss:$0 sm:$0xff] }
 0x37e   : > { %v4628_v12 = vadd.f32 %v4615_v4, %v4496_v44 }
 0x37f   : > { %v4796_v34 = vpop.f32.mrf.mxu2 }
 0x380   : > { %v4811_v9 = vadd.f32 %v4796_v34, %v4627_v15 }
 0x381   : > { %v4497_v46 = vpop.f32.mrf.mxu0 }
 0x382   : > { %v4617_v0 = vpop.f32.mrf.mxu1 }
 0x383   : > { %v4368_v27 = vpop.f32.mrf.mxu3 }
 0x384   : > { %v4498_v24 = vadd.f32 %v4497_v46, %v4368_v27 }
 0x386   : > { %v4629_v5 = vadd.f32 %v4617_v0, %v4498_v24 }
 0x387   : > { %v4799_v48 = vpop.f32.mrf.mxu2 }
 0x388   : > { %v4812_v57 = vadd.f32 %v4799_v48, %v4628_v12  ;;  %7237 = vmatmul.msk.bf16.gmra.mxu3 %vm4321_vm8, %v9550_v20  ;;  %v5413_v20 = vsel %vm2088_vm3, %v9546_v6, %v5412_v25  ;;  %v7533_v6 = vld [vmem:[%s9726_s8] sm:$0xff] }
 0x389   : > { %5584 = vmatpush.bf16.msrb.mxu0 %v7533_v6 }
 0x38a   : > { %v5226_v60 = vpop.f32.mrf.mxu1 }
 0x38b   : > { %v4876_v22 = vpop.f32.mrf.mxu3 }
 0x38c   : > { %v4901_v3 = vadd.f32 %v4876_v22, %v9609_v2 }
 0x38f   : > { %v4801_v18 = vpop.f32.mrf.mxu2 }
 0x390   : > { %v4813_v62 = vadd.f32 %v4801_v18, %v4629_v5 }
 0x392   : > { %v5228_v49 = vpop.f32.mrf.mxu1 }
 0x393   : > { %v4878_v16 = vpop.f32.mrf.mxu3 }
 0x394   : > { %v4902_v28 = vadd.f32 %v4878_v16, %v9619_v41 }
 0x397   : > { %v5333_v42 = vpop.f32.mrf.mxu2 }
 0x398   : > { %7238 = vmatmul.msk.bf16.gmra.mxu3 %vm4321_vm8, %v5413_v20 }
 0x39a   : > { %v5231_v21 = vpop.f32.mrf.mxu1 }
 0x39b   : > { %v4881_v26 = vpop.f32.mrf.mxu3 }
 0x39c   : > { %v4903_v2 = vadd.f32 %v4881_v26, %v9623_v61  ;;  %v5051_v61 = vpop.f32.mrf.mxu0 }
 0x39f   : > { %v5335_v30 = vpop.f32.mrf.mxu2 }
 0x3a2   : > { %v5233_v12 = vpop.f32.mrf.mxu1 }
 0x3a3   : > { %v4883_v8 = vpop.f32.mrf.mxu3 }
 0x3a4   : > { %v4904_v14 = vadd.f32 %v4883_v8, %v4807_v1  ;;  %v5053_v53 = vpop.f32.mrf.mxu0 }
 0x3a5   : > { %v5077_v56 = vadd.f32 %v5053_v53, %v4902_v28 }
 0x3a7   : > { %v5338_v58 = vpop.f32.mrf.mxu2  ;;  %v5252_v63 = vadd.f32 %v5228_v49, %v5077_v56 }
 0x3a9   : > { %v5359_v44 = vadd.f32 %v5335_v30, %v5252_v63 }
 0x3aa   : > { %v5236_v22 = vpop.f32.mrf.mxu1 }
 0x3ab   : > { %v4886_v13 = vpop.f32.mrf.mxu3 }
 0x3ac   : > { %v4905_v35 = vadd.f32 %v4886_v13, %v4808_v23  ;;  %v5056_v7 = vpop.f32.mrf.mxu0 }
 0x3ad   : > { %v5078_v27 = vadd.f32 %v5056_v7, %v4903_v2 }
 0x3af   : > { %v5340_v31 = vpop.f32.mrf.mxu2 }
 0x3b2   : > { %v5238_v25 = vpop.f32.mrf.mxu1 }
 0x3b3   : > { %v4888_v38 = vpop.f32.mrf.mxu3 }
 0x3b4   : > { %v9648_v10 = vadd.f32 %v4888_v38, %v4809_v19  ;;  %v5076_v19 = vadd.f32 %v5051_v61, %v4901_v3 }
 0x3b6   : > { %v5251_v15 = vadd.f32 %v5226_v60, %v5076_v19 }
 0x3b7   : > { %v5343_v17 = vpop.f32.mrf.mxu2 }
 0x3b8   : > { %v5358_v36 = vadd.f32 %v5333_v42, %v5251_v15 }
 0x3ba   : > { %v5241_v61 = vpop.f32.mrf.mxu1 }
 0x3bb   : > { %v4891_v41 = vpop.f32.mrf.mxu3 }
 0x3bc   : > { %v9653_v39 = vadd.f32 %v4891_v41, %v4810_v43  ;;  %v5058_v43 = vpop.f32.mrf.mxu0 }
 0x3bd   : > { %v5079_v37 = vadd.f32 %v5058_v43, %v4904_v14 }
 0x3bf   : > { %v5254_v3 = vadd.f32 %v5233_v12, %v5079_v37  ;;  %v5345_v20 = vpop.f32.mrf.mxu2 }
 0x3c1   : > { %v5361_v51 = vadd.f32 %v5340_v31, %v5254_v3 }
 0x3c3   : > { %v4893_v1 = vpop.f32.mrf.mxu3 }
 0x3c4   : > { %v9655_v52 = vadd.f32 %v4893_v1, %v4811_v9  ;;  %v5061_v0 = vpop.f32.mrf.mxu0 }
 0x3c5   : > { %v5080_v26 = vadd.f32 %v5061_v0, %v4905_v35 }
 0x3c7   : > { %v5255_v38 = vadd.f32 %v5236_v22, %v5080_v26  ;;  %v5348_v42 = vpop.f32.mrf.mxu2 }
 0x3c9   : > { %v5362_v41 = vadd.f32 %v5343_v17, %v5255_v38 }
 0x3cb   : > { %v4896_v50 = vpop.f32.mrf.mxu3 }
 0x3cc   : > { %v9657_v23 = vadd.f32 %v4896_v50, %v4812_v57  ;;  %v5253_v57 = vadd.f32 %v5231_v21, %v5078_v27  ;;  %v5063_v29 = vpop.f32.mrf.mxu0  ;;  %v5243_v21 = vpop.f32.mrf.mxu1 }
 0x3cd   : > { %v5081_v13 = vadd.f32 %v5063_v29, %v9648_v10 }
 0x3ce   : > { %v5360_v32 = vadd.f32 %v5338_v58, %v5253_v57 }
 0x3cf   : > { %v5256_v1 = vadd.f32 %v5238_v25, %v5081_v13 }
 0x3d1   : > { %v5363_v53 = vadd.f32 %v5345_v20, %v5256_v1 }
 0x3d3   : > { %v4898_v45 = vpop.f32.mrf.mxu3 }
 0x3d4   : > { %v9659_v54 = vadd.f32 %v4898_v45, %v4813_v62  ;;  %v5066_v6 = vpop.f32.mrf.mxu0 }
 0x3d5   : > { %v5082_v7 = vadd.f32 %v5066_v6, %v9653_v39 }
 0x3db   : > { %v5462_v55 = vpop.f32.mrf.mxu3 }
 0x3dc   : > { %v5487_v4 = vadd.f32 %v5462_v55, %v5358_v36  ;;  %v5068_v45 = vpop.f32.mrf.mxu0  ;;  %v5350_v55 = vpop.f32.mrf.mxu2  ;;  %v5257_v36 = vadd.f32 %v5241_v61, %v5082_v7 }
 0x3dd   : > { %v5083_v15 = vadd.f32 %v5068_v45, %v9655_v52 }
 0x3de   : > { %v5501_v9 = vadd.f32 %v9664_v47, %v5487_v4  ;;  %v5364_v43 = vadd.f32 %v5348_v42, %v5257_v36 }
 0x3df   : > { %v5258_v63 = vadd.f32 %v5243_v21, %v5083_v15 }
 0x3e0   : > { %v5511_v33 = vmax.f32 %v5501_v9, 0.0 }
 0x3e1   : > { %v5365_v12 = vadd.f32 %v5350_v55, %v5258_v63 }
 0x3e3   : > { %v5464_v34 = vpop.f32.mrf.mxu3 }
 0x3e4   : > { %v5488_v11 = vadd.f32 %v5464_v34, %v5359_v44  ;;  %v5071_v44 = vpop.f32.mrf.mxu0 }
 0x3e5   : > { %v5084_v34 = vadd.f32 %v5071_v44, %v9657_v23 }
 0x3e6   : > { %v5502_v46 = vadd.f32 %v9664_v47, %v5488_v11  ;;  %v5246_v11 = vpop.f32.mrf.mxu1 }
 0x3e8   : > { %v5512_v24 = vmax.f32 %v5502_v46, 0.0  ;;  %v5353_v46 = vpop.f32.mrf.mxu2 }
 0x3ea   : > { %v5521_v5 = vpack.c.bf16 %v5512_v24, %v5511_v33  ;;  %v5259_v33 = vadd.f32 %v5246_v11, %v5084_v34 }
 0x3eb   : > { %v5467_v48 = vpop.f32.mrf.mxu3 }
 0x3ec   : > { %7255 = vmatmul.msk.bf16.vlgmr.msrb.gmra.mxu0 %vm4321_vm8, %v5521_v5  ;;  %v5489_v18 = vadd.f32 %v5467_v48, %v5360_v32  ;;  %v5366_v0 = vadd.f32 %v5353_v46, %v5259_v33  ;;  %v5073_v48 = vpop.f32.mrf.mxu0 }
 0x3ed   : > { %v5085_v57 = vadd.f32 %v5073_v48, %v9659_v54  ;;  %v7625_v54 = vld [vmem:[%s9727_s9] ss:$0 sm:$0xff] }
 0x3ee   : > { %v5503_v59 = vadd.f32 %v9664_v47, %v5489_v18  ;;  %v5248_v17 = vpop.f32.mrf.mxu1 }
 0x3ef   : > { %v5260_v3 = vadd.f32 %v5248_v17, %v5085_v57 }
 0x3f0   : > { %v5513_v2 = vmax.f32 %v5503_v59, 0.0  ;;  %v5355_v32 = vpop.f32.mrf.mxu2 }
 0x3f1   : > { %v5367_v18 = vadd.f32 %v5355_v32, %v5260_v3 }
 0x3f3   : > { %v5469_v62 = vpop.f32.mrf.mxu3 }
 0x3f4   : > { %v5490_v16 = vadd.f32 %v5469_v62, %v5361_v51 }
 0x3f6   : > { %v5504_v28 = vadd.f32 %v9664_v47, %v5490_v16 }
 0x3f8   : > { %v5514_v8 = vmax.f32 %v5504_v28, 0.0 }
 0x3fa   : > { %v5522_v14 = vpack.c.bf16 %v5514_v8, %v5513_v2 }
 0x3fb   : > { %v5472_v40 = vpop.f32.mrf.mxu3 }
 0x3fc   : > { %7256 = vmatmul.msk.bf16.gmra.mxu0 %vm4321_vm8, %v5522_v14  ;;  %v5491_v60 = vadd.f32 %v5472_v40, %v5362_v41 }
 0x3fe   : > { %v5505_v49 = vadd.f32 %v9664_v47, %v5491_v60 }
 0x400   : > { %v5515_v10 = vmax.f32 %v5505_v49, 0.0 }
 0x403   : > { %v5474_v50 = vpop.f32.mrf.mxu3 }
 0x404   : > { %v5492_v35 = vadd.f32 %v5474_v50, %v5363_v53 }
 0x406   : > { %v5506_v30 = vadd.f32 %v9664_v47, %v5492_v35 }
 0x408   : > { %v5516_v19 = vmax.f32 %v5506_v30, 0.0 }
 0x40a   : > { %v5523_v58 = vpack.c.bf16 %v5516_v19, %v5515_v10 }
 0x40b   : > { %v5477_v56 = vpop.f32.mrf.mxu3 }
 0x40c   : > { %7257 = vmatmul.msk.bf16.gmra.mxu0 %vm4321_vm8, %v5523_v58  ;;  %v5493_v4 = vadd.f32 %v5477_v56, %v5364_v43 }
 0x40e   : > { %v5507_v39 = vadd.f32 %v9664_v47, %v5493_v4 }
 0x410   : > { %v5517_v52 = vmax.f32 %v5507_v39, 0.0 }
 0x413   : > { %v5479_v31 = vpop.f32.mrf.mxu3 }
 0x414   : > { %v5494_v9 = vadd.f32 %v5479_v31, %v5365_v12 }
 0x416   : > { %v5508_v27 = vadd.f32 %v9664_v47, %v5494_v9 }
 0x418   : > { %v5518_v24 = vmax.f32 %v5508_v27, 0.0 }
 0x41a   : > { %v5524_v5 = vpack.c.bf16 %v5518_v24, %v5517_v52 }
 0x41b   : > { %v5482_v37 = vpop.f32.mrf.mxu3 }
 0x41c   : > { %v5495_v22 = vadd.f32 %v5482_v37, %v5366_v0  ;;  %7258 = vmatmul.msk.bf16.gmra.mxu0 %vm4321_vm8, %v5524_v5 }
 0x41e   : > { %v5509_v23 = vadd.f32 %v9664_v47, %v5495_v22 }
 0x420   : > { %v5519_v59 = vmax.f32 %v5509_v23, 0.0 }
 0x423   : > { %v5484_v51 = vpop.f32.mrf.mxu3 }
 0x424   : > { %v5496_v29 = vadd.f32 %v5484_v51, %v5367_v18 }
 0x426   : > { %v5510_v62 = vadd.f32 %v9664_v47, %v5496_v29 }
 0x428   : > { %v5520_v16 = vmax.f32 %v5510_v62, 0.0 }
 0x42a   : > { %v5525_v25 = vpack.c.bf16 %v5520_v16, %v5519_v59 }
 0x42c   : > { %7259 = vmatmul.msk.bf16.gmra.mxu0 %vm4321_vm8, %v5525_v25 }
 0x469   : > { %v5586_v47 = vpop.f32.mrf.mxu0 }
 0x46a   : > { %v5587_v28 = vadd.f32 %v7625_v54, %v5586_v47 }
 0x46c   : > { %5612 = vst.msk [vmem:[%s9693_s26] sm:$0xff] %vm5611_vm10, %v5587_v28 }
 0x471   : > { %v5588_v20 = vpop.f32.mrf.mxu0 }
 0x472   : > { %v5589_v26 = vadd.f32 %v7625_v54, %v5588_v20 }
 0x474   : > { %5613 = vst.msk [vmem:[%s9693_s26 + $0x8] sm:$0xff] %vm5611_vm10, %v5589_v26 }
 0x479   : > { %v5591_v2 = vpop.f32.mrf.mxu0 }
 0x47a   : > { %v5592_v8 = vadd.f32 %v7625_v54, %v5591_v2 }
 0x47c   : > { %5614 = vst.msk [vmem:[%s9693_s26 + $0x10] sm:$0xff] %vm5611_vm10, %v5592_v8 }
 0x481   : > { %v5593_v14 = vpop.f32.mrf.mxu0 }
 0x482   : > { %v5594_v40 = vadd.f32 %v7625_v54, %v5593_v14 }
 0x484   : > { %5615 = vst.msk [vmem:[%s9693_s26 + $0x18] sm:$0xff] %vm5611_vm10, %v5594_v40 }
 0x489   : > { %v5596_v13 = vpop.f32.mrf.mxu0 }
 0x48a   : > { %v5597_v38 = vadd.f32 %v7625_v54, %v5596_v13 }
 0x48c   : > { %5616 = vst.msk [vmem:[%s9693_s26 + $0x20] sm:$0xff] %vm5611_vm10, %v5597_v38 }
 0x491   : > { %v5598_v6 = vpop.f32.mrf.mxu0 }
 0x492   : > { %v5599_v41 = vadd.f32 %v7625_v54, %v5598_v6 }
 0x494   : > { %5617 = vst.msk [vmem:[%s9693_s26 + $0x28] sm:$0xff] %vm5611_vm10, %v5599_v41 }
 0x499   : > { %v5601_v61 = vpop.f32.mrf.mxu0 }
 0x49a   : > { %v5602_v1 = vadd.f32 %v7625_v54, %v5601_v61 }
 0x49c   : > { %5618 = vst.msk [vmem:[%s9693_s26 + $0x30] sm:$0xff] %vm5611_vm10, %v5602_v1 }
 0x4a1   : > { %v5603_v60 = vpop.f32.mrf.mxu0 }
 0x4a2   : > { %v5604_v42 = vadd.f32 %v7625_v54, %v5603_v60 }
 0x4a4   : > { %5619 = vst.msk [vmem:[%s9693_s26 + $0x38] sm:$0xff] %vm5611_vm10, %v5604_v42 }
 0x4a9   : > { %v5606_v53 = vpop.f32.mrf.mxu0 }
 0x4aa   : > { %v5607_v50 = vadd.f32 %v7625_v54, %v5606_v53 }
 0x4ac   : > { %5620 = vst.msk [vmem:[%s9693_s26 + $0x40] sm:$0xff] %vm5611_vm10, %v5607_v50 }
 0x4b1   : > { %v5608_v49 = vpop.f32.mrf.mxu0 }
 0x4b2   : > { %v5609_v35 = vadd.f32 %v7625_v54, %v5608_v49 }
 0x4b4   : > { %5621 = vst.msk [vmem:[%s9693_s26 + $0x48] sm:$0xff] %vm5611_vm10, %v5609_v35 }
 0x4b5 PF: > { %s20_s13 = sadd.s32 1, %s7639_s13  }
 0x4b6   : > { %p17_p4 = scmp.ge.s32.totalorder %s20_s13, 4  }
 0x4b8   :  { %19 = sbr.rel (!%p17_p4) target bundleno = 1 (0x1), region = 117 }

</bundles_post_ra>
